<compile_context>
chip_gen: v7x
topology: tpu7x:2x2x1
jax: 0.10.0
libtpu: 0.0.40
codegen_flags: <defaults>
</compile_context>

<pallas_src>
import functools
import math

import jax
import jax.numpy as jnp
from jax.experimental import pallas as pl
from jax.experimental.pallas import tpu as pltpu


_EPS = 1e-5           # PyTorch BatchNorm2d default
_NEG_SLOPE = 0.01     # PyTorch / MONAI LeakyReLU default
_VMEM_LIMIT = 32 * 1024 * 1024   # explicit scoped-VMEM limit, safe on v5e/v6e/v7x


# --------------------------------------------------------------------------
# Small helpers
# --------------------------------------------------------------------------
def _choose_tm(m, target=256):
    """Largest tile <= target that divides M and respects sublane tiling."""
    if m <= target or m % 8 !=  0:
        return m
    tm = target
    while tm >= 8:
        if m % tm == 0:
            return tm
        tm //= 2
    return m


def _apply_act(y, act):
    if act == "leakyrelu":
        return jnp.where(y >= 0.0, y, _NEG_SLOPE * y)
    if act == "relu":
        return jnp.maximum(y, 0.0)
    return y


def _pad_contraction(x, w, min_k=8):
    """Zero-pad tiny contraction dims (K<8). Numerically identical."""
    k = x.shape[1]
    if k < min_k:
        x = jnp.pad(x, ((0, 0), (0, min_k - k)))
        w = jnp.pad(w, ((0, min_k - k), (0, 0)))
    return x, w


# --------------------------------------------------------------------------
# Pallas kernels
# --------------------------------------------------------------------------
def _gemm_bias_stats_kernel(x_ref, w_ref, b_ref, y_ref, s_ref, q_ref):
    # y = x @ w + b  (bf16 MXU operands, f32 accumulation), plus accumulation
    # of per-channel sum / sum-of-squares for training-mode BatchNorm.
    y = jnp.dot(x_ref[...].astype(jnp.bfloat16), w_ref[...],
                preferred_element_type=jnp.float32) + b_ref[...]
    y_ref[...] = y

    @pl.when(pl.program_id(0) == 0)
    def _():
        s_ref[...] = jnp.zeros_like(s_ref)
        q_ref[...] = jnp.zeros_like(q_ref)

    s_ref[...] += jnp.sum(y, axis=0, keepdims=True)
    q_ref[...] += jnp.sum(y * y, axis=0, keepdims=True)


def _gemm_bias_act_kernel(x_ref, w_ref, b_ref, o_ref, *, act):
    y = jnp.dot(x_ref[...].astype(jnp.bfloat16), w_ref[...],
                preferred_element_type=jnp.float32) + b_ref[...]
    o_ref[...] = _apply_act(y, act)


def _affine_act_kernel(y_ref, a_ref, c_ref, o_ref, *, act):
    # BatchNorm folded to a per-channel affine (scale/shift precomputed) + act.
    o_ref[...] = _apply_act(y_ref[...] * a_ref[...] + c_ref[...], act)


def _heads_kernel(x_ref, wm_ref, bm_ref, ws_ref, bs_ref, n_ref,
                  mean_ref, logsig_ref, samp_ref):
    # Fused z_mu / w_mu / z_log_sigma / w_log_sigma 1x1 convs + reparam:
    #   sampled = mean + exp(0.5 * log_sigma) * noise
    xb = x_ref[...].astype(jnp.bfloat16)
    means = jnp.dot(xb, wm_ref[...], preferred_element_type=jnp.float32) + bm_ref[...]
    logsig = jnp.dot(xb, ws_ref[...], preferred_element_type=jnp.float32) + bs_ref[...]
    mean_ref[...] = means
    logsig_ref[...] = logsig
    samp_ref[...] = means + jnp.exp(0.5 * logsig) * n_ref[...]


def _zwc_pc_kernel(h_ref, wmu_ref, bmu_ref, wls_ref, n_ref, z_ref,
                   mu_ref, ls_ref, samp_ref, pc_ref, *, dim_c, log_pi):
    # Fused z_wc_mu conv + z_wc_log_sigma conv (+0.1 folded in) + reparam
    # (scale 1.0) + pc logit/softmax.  NOTE: exactly like the PyTorch source,
    # the *sampled* value is used where a log-sigma appears in the pc logit
    # (the original code rebinds z_wc_log_sigmas to the sample).
    hb = h_ref[...].astype(jnp.bfloat16)
    mu = jnp.dot(hb, wmu_ref[...], preferred_element_type=jnp.float32) + bmu_ref[...]
    ls = jnp.dot(hb, wls_ref[...], preferred_element_type=jnp.float32) + 0.1
    samp = mu + jnp.exp(ls) * n_ref[...]
    mu_ref[...] = mu
    ls_ref[...] = ls
    samp_ref[...] = samp

    zt = jnp.tile(z_ref[...], (1, dim_c))            # in-register tile of z
    logit = -0.5 * (zt - mu) ** 2 * jnp.exp(samp) - samp + log_pi
    logit = logit - jnp.max(logit, axis=-1, keepdims=True)
    e = jnp.exp(logit)
    pc_ref[...] = e / jnp.sum(e, axis=-1, keepdims=True)


# --------------------------------------------------------------------------
# Pallas-call wrappers
# --------------------------------------------------------------------------
def gemm_bias_stats(x, w, b):
    """y = x @ w + b plus per-channel sum / sumsq of y (for BatchNorm)."""
    x, w = _pad_contraction(x, w.astype(jnp.bfloat16))
    m, k = x.shape
    n = w.shape[1]
    tm = _choose_tm(m)
    y, ssum, ssq = pl.pallas_call(
        _gemm_bias_stats_kernel,
        out_shape=(jax.ShapeDtypeStruct((m, n), jnp.float32),
                   jax.ShapeDtypeStruct((1, n), jnp.float32),
                   jax.ShapeDtypeStruct((1, n), jnp.float32)),
        grid=(m // tm,),
        in_specs=[pl.BlockSpec((tm, k), lambda i: (i, 0)),
                  pl.BlockSpec((k, n), lambda i: (0, 0)),
                  pl.BlockSpec((1, n), lambda i: (0, 0))],
        out_specs=(pl.BlockSpec((tm, n), lambda i: (i, 0)),
                   pl.BlockSpec((1, n), lambda i: (0, 0)),
                   pl.BlockSpec((1, n), lambda i: (0, 0))),
        compiler_params=pltpu.CompilerParams(
            dimension_semantics=("arbitrary",), vmem_limit_bytes=_VMEM_LIMIT),
    )(x, w, b.reshape(1, n).astype(jnp.float32))
    return y, ssum[0], ssq[0]


def gemm_bias_act(x, w, b, act="none"):
    x, w = _pad_contraction(x, w.astype(jnp.bfloat16))
    m, k = x.shape
    n = w.shape[1]
    tm = _choose_tm(m)
    kern = functools.partial(_gemm_bias_act_kernel, act=act)
    return pl.pallas_call(
        kern,
        out_shape=jax.ShapeDtypeStruct((m, n), jnp.float32),
        grid=(m // tm,),
        in_specs=[pl.BlockSpec((tm, k), lambda i: (i, 0)),
                  pl.BlockSpec((k, n), lambda i: (0, 0)),
                  pl.BlockSpec((1, n), lambda i: (0, 0))],
        out_specs=pl.BlockSpec((tm, n), lambda i: (i, 0)),
        compiler_params=pltpu.CompilerParams(
            dimension_semantics=("parallel",), vmem_limit_bytes=_VMEM_LIMIT),
    )(x, w, b.reshape(1, n).astype(jnp.float32))


def affine_act(y, scale, shift, act):
    m, c = y.shape
    tm = _choose_tm(m)
    kern = functools.partial(_affine_act_kernel, act=act)
    return pl.pallas_call(
        kern,
        out_shape=jax.ShapeDtypeStruct((m, c), jnp.float32),
        grid=(m // tm,),
        in_specs=[pl.BlockSpec((tm, c), lambda i: (i, 0)),
                  pl.BlockSpec((1, c), lambda i: (0, 0)),
                  pl.BlockSpec((1, c), lambda i: (0, 0))],
        out_specs=pl.BlockSpec((tm, c), lambda i: (i, 0)),
        compiler_params=pltpu.CompilerParams(
            dimension_semantics=("parallel",), vmem_limit_bytes=_VMEM_LIMIT),
    )(y, scale.reshape(1, c), shift.reshape(1, c))


def heads_fused(x_mc, wm, bm, ws, bs, noise):
    """Fused z/w mean+log_sigma 1x1 convs + reparameterization."""
    m, k = x_mc.shape
    ke = max(k, 8)
    x = jnp.pad(x_mc, ((0, 0), (0, ke - k))) if ke != k else x_mc
    wm = jnp.pad(wm, ((0, ke - k), (0, 0))).astype(jnp.bfloat16)
    ws = jnp.pad(ws, ((0, ke - k), (0, 0))).astype(jnp.bfloat16)
    nh = wm.shape[1]
    tm = _choose_tm(m)
    return pl.pallas_call(
        _heads_kernel,
        out_shape=tuple(jax.ShapeDtypeStruct((m, nh), jnp.float32) for _ in range(3)),
        grid=(m // tm,),
        in_specs=[pl.BlockSpec((tm, ke), lambda i: (i, 0)),
                  pl.BlockSpec((ke, nh), lambda i: (0, 0)),
                  pl.BlockSpec((1, nh), lambda i: (0, 0)),
                  pl.BlockSpec((ke, nh), lambda i: (0, 0)),
                  pl.BlockSpec((1, nh), lambda i: (0, 0)),
                  pl.BlockSpec((tm, nh), lambda i: (i, 0))],
        out_specs=tuple(pl.BlockSpec((tm, nh), lambda i: (i, 0)) for _ in range(3)),
        compiler_params=pltpu.CompilerParams(
            dimension_semantics=("parallel",), vmem_limit_bytes=_VMEM_LIMIT),
    )(x, wm, bm.reshape(1, nh), ws, bs.reshape(1, nh), noise)


def zwc_pc_fused(h_mc, wmu, bmu, wls, noise, z_mc, dim_c):
    """Fused z_wc mean/log_sigma convs + reparam + pc softmax."""
    m, k = h_mc.shape
    n = wmu.shape[1]
    dz = z_mc.shape[1]
    tm = _choose_tm(m)
    kern = functools.partial(_zwc_pc_kernel, dim_c=dim_c, log_pi=math.log(math.pi))
    return pl.pallas_call(
        kern,
        out_shape=tuple(jax.ShapeDtypeStruct((m, n), jnp.float32) for _ in range(4)),
        grid=(m // tm,),
        in_specs=[pl.BlockSpec((tm, k), lambda i: (i, 0)),
                  pl.BlockSpec((k, n), lambda i: (0, 0)),
                  pl.BlockSpec((1, n), lambda i: (0, 0)),
                  pl.BlockSpec((k, n), lambda i: (0, 0)),
                  pl.BlockSpec((tm, n), lambda i: (i, 0)),
                  pl.BlockSpec((tm, dz), lambda i: (i, 0))],
        out_specs=tuple(pl.BlockSpec((tm, n), lambda i: (i, 0)) for _ in range(4)),
        compiler_params=pltpu.CompilerParams(
            dimension_semantics=("parallel",), vmem_limit_bytes=_VMEM_LIMIT),
    )(h_mc, wmu.astype(jnp.bfloat16), bmu.reshape(1, n),
      wls.astype(jnp.bfloat16), noise, z_mc)


# --------------------------------------------------------------------------
# NHWC conv glue (strided-slice im2col, no transposes) + BN folding
# --------------------------------------------------------------------------
def conv_weight_matrix(w, transposed):
    """PyTorch conv/convtranspose weight -> (K*K*Cin, Cout) GEMM matrix
    matching the NHWC im2col (ki, kj, cin) feature ordering."""
    if transposed:
        # (Cin, Cout, K, K) -> equivalent forward-conv weight (Cout, Cin, K, K)
        w = jnp.flip(w, axis=(2, 3)).transpose(1, 0, 2, 3)
    cout, cin, k, _ = w.shape
    return w.transpose(2, 3, 1, 0).reshape(k * k * cin, cout), k


def im2col_nhwc(x, k, stride, padding):
    n, h, w, c = x.shape
    xp = jnp.pad(x, ((0, 0), (padding, padding), (padding, padding), (0, 0)))
    ho = (h + 2 * padding - k) // stride + 1
    wo = (w + 2 * padding - k) // stride + 1
    taps = []
    for i in range(k):
        for j in range(k):
            taps.append(xp[:, i:i + stride * (ho - 1) + 1:stride,
                              j:j + stride * (wo - 1) + 1:stride, :])
    patches = jnp.stack(taps, axis=3).astype(jnp.bfloat16)   # (N,Ho,Wo,K*K,C)
    return patches.reshape(n * ho * wo, k * k * c), ho, wo


def zero_dilate_nhwc(x, stride, k, padding, output_padding):
    n, h, w, c = x.shape
    hd, wd = (h - 1) * stride + 1, (w - 1) * stride + 1
    xd = jnp.zeros((n, hd, wd, c), x.dtype).at[:, ::stride, ::stride, :].set(x)
    lo = k - 1 - padding
    hi = k - 1 - padding + output_padding
    return jnp.pad(xd, ((0, 0), (lo, hi), (lo, hi), (0, 0)))


def bn_scale_shift(ssum, ssq, m_rows, gamma, beta):
    # Training-mode BatchNorm: batch statistics, biased variance, eps=1e-5.
    mean = ssum / m_rows
    var = jnp.maximum(ssq / m_rows - mean * mean, 0.0)
    scale = gamma * jax.lax.rsqrt(var + _EPS)
    shift = beta - mean * scale
    return scale, shift


def conv_bn_act(x_nhwc, layer, act="leakyrelu"):
    stride = layer["stride"]
    wm, k = conv_weight_matrix(layer["w"], layer["transposed"])
    if layer["transposed"]:
        xd = zero_dilate_nhwc(x_nhwc, stride, k, padding=2,
                              output_padding=stride - 1)
        patches, ho, wo = im2col_nhwc(xd, k, stride=1, padding=0)
    else:
        patches, ho, wo = im2col_nhwc(x_nhwc, k, stride=stride, padding=2)
    y, ssum, ssq = gemm_bias_stats(patches, wm, layer["b"])
    scale, shift = bn_scale_shift(ssum, ssq, y.shape[0],
                                  layer["gamma"], layer["beta"])
    out = affine_act(y, scale, shift, act)
    return out.reshape(x_nhwc.shape[0], ho, wo, -1)


# --------------------------------------------------------------------------
# Parameter construction (deterministic, matching module __init__ shapes)
# --------------------------------------------------------------------------
def build_params(key, in_channels, out_channels, channels, strides,
                 dim_c, dim_z, dim_w):
    keys = iter(jax.random.split(key, 128))

    def conv_p(cout, cin, k, zero=False, bias=True, transposed=False):
        shape = (cin, cout, k, k) if transposed else (cout, cin, k, k)
        if zero:  # weights_init: zero weight and bias
            return jnp.zeros(shape, jnp.float32), jnp.zeros((cout,), jnp.float32)
        fan_in = cin * k * k
        lim = 1.0 / math.sqrt(fan_in)
        w = jax.random.uniform(next(keys), shape, jnp.float32, -lim, lim)
        b = (jax.random.uniform(next(keys), (cout,), jnp.float32, -lim, lim)
             if bias else jnp.zeros((cout,), jnp.float32))
        return w, b

    def bn_p(c):
        return jnp.ones((c,), jnp.float32), jnp.zeros((c,), jnp.float32)

    params = {}

    # ---- encoder: down convs then transposed up convs (kernel 5, BN, LeakyReLU)
    enc = []
    layer_c = in_channels
    for c, s in zip(channels, strides):
        w, b = conv_p(c, layer_c, 5)
        g, be = bn_p(c)
        enc.append(dict(w=w, b=b, gamma=g, beta=be, stride=s, transposed=False))
        layer_c = c
    dec_ch = list(channels[::-1]) + [channels[0]]
    dec_st = list(strides[::-1])
    for c, s in zip(dec_ch, dec_st):  # zip truncates, as in the PyTorch code
        w, b = conv_p(c, layer_c, 5, transposed=True)
        g, be = bn_p(c)
        enc.append(dict(w=w, b=b, gamma=g, beta=be, stride=s, transposed=True))
        layer_c = c
    params["encode"] = enc
    encoded_channels = layer_c

    params["z_mu"] = conv_p(dim_z, encoded_channels, 1)
    params["z_log_sigma"] = conv_p(dim_z, encoded_channels, 1, zero=True)
    params["w_mu"] = conv_p(dim_w, encoded_channels, 1)
    params["w_log_sigma"] = conv_p(dim_w, encoded_channels, 1, zero=True)

    w, b = conv_p(64, dim_w, 1)
    g, be = bn_p(64)
    params["z_wc"] = dict(w=w, b=b, gamma=g, beta=be)
    params["z_wc_mu"] = conv_p(dim_z * dim_c, 64, 1)
    params["z_wc_log_sigma"] = conv_p(dim_z * dim_c, 64, 1, zero=True, bias=False)

    # ---- decoder
    dec = []
    layer_c = dim_z
    for c, s in zip(channels, strides):
        w, b = conv_p(c, layer_c, 5)
        g, be = bn_p(c)
        dec.append(dict(w=w, b=b, gamma=g, beta=be, stride=s, transposed=False))
        layer_c = c
    dec_ch2 = list(channels[-2::-1]) + [channels[0]]
    for c, s in zip(dec_ch2, dec_st):
        w, b = conv_p(c, layer_c, 5, transposed=True)
        g, be = bn_p(c)
        dec.append(dict(w=w, b=b, gamma=g, beta=be, stride=s, transposed=True))
        layer_c = c
    params["decode"] = dec
    params["decode_final"] = conv_p(out_channels, layer_c, 1)
    return params


# --------------------------------------------------------------------------
# Forward pass (mirrors GaussianMixtureVariationalAutoEncoder2.forward)
# --------------------------------------------------------------------------
def gmvae_forward(params, x_nchw, scanner, noise_key, dim_c):
    del scanner  # unused by the PyTorch forward as well
    n = x_nchw.shape[0]
    x = jnp.transpose(x_nchw, (0, 2, 3, 1))          # NCHW -> NHWC once

    # ---- encoder
    h = x
    for lyr in params["encode"]:
        h = conv_bn_act(h, lyr, act="leakyrelu")
    z_enc = h
    _, hh, wh, cenc = z_enc.shape
    m_rows = n * hh * wh
    z_enc_mc = z_enc.reshape(m_rows, cenc)

    dim_z = params["z_mu"][0].shape[0]
    dim_w = params["w_mu"][0].shape[0]
    dzc = params["z_wc_mu"][0].shape[0]

    def to_nchw(a_mc):
        return a_mc.reshape(n, hh, wh, -1).transpose(0, 3, 1, 2)

    out = {}

    # ---- fused q(z|x) / q(w|x) heads + reparameterization
    wm = jnp.concatenate([params["z_mu"][0].reshape(dim_z, cenc).T,
                          params["w_mu"][0].reshape(dim_w, cenc).T], axis=1)
    bm = jnp.concatenate([params["z_mu"][1], params["w_mu"][1]])
    ws = jnp.concatenate([params["z_log_sigma"][0].reshape(dim_z, cenc).T,
                          params["w_log_sigma"][0].reshape(dim_w, cenc).T], axis=1)
    bs = jnp.concatenate([params["z_log_sigma"][1], params["w_log_sigma"][1]])
    noise_zw = jax.random.normal(jax.random.fold_in(noise_key, 1),
                                 (m_rows, dim_z + dim_w), jnp.float32)
    means, logsigs, sampled = heads_fused(z_enc_mc, wm, bm, ws, bs, noise_zw)

    z_sampled_mc = sampled[:, :dim_z]
    w_sampled_mc = sampled[:, dim_z:]
    out["z_mean"] = to_nchw(means[:, :dim_z])
    out["z_log_sigma"] = to_nchw(logsigs[:, :dim_z])
    out["z_sampled"] = to_nchw(z_sampled_mc)
    out["w_mean"] = to_nchw(means[:, dim_z:])
    out["w_log_sigma"] = to_nchw(logsigs[:, dim_z:])
    out["w_sampled"] = to_nchw(w_sampled_mc)

    # ---- p(z|w,c) head: 1x1 conv (dim_w -> 64) + BatchNorm + ReLU
    zwc = params["z_wc"]
    y, ssum, ssq = gemm_bias_stats(w_sampled_mc,
                                   zwc["w"].reshape(64, dim_w).T, zwc["b"])
    scale, shift = bn_scale_shift(ssum, ssq, m_rows, zwc["gamma"], zwc["beta"])
    h_mc = affine_act(y, scale, shift, "relu")

    # ---- fused z_wc mean/log_sigma convs + reparam + pc softmax
    wmu = params["z_wc_mu"][0].reshape(dzc, 64).T
    bmu = params["z_wc_mu"][1]
    wls = params["z_wc_log_sigma"][0].reshape(dzc, 64).T
    noise_zwc = jax.random.normal(jax.random.fold_in(noise_key, 2),
                                  (m_rows, dzc), jnp.float32)
    zwc_mu, zwc_ls, zwc_samp, pc = zwc_pc_fused(
        h_mc, wmu, bmu, wls, noise_zwc, z_sampled_mc, dim_c)
    out["z_wc_mean"] = to_nchw(zwc_mu)
    out["z_wc_log_sigma"] = to_nchw(zwc_ls)
    out["z_wc_sampled"] = to_nchw(zwc_samp)
    out["pc"] = to_nchw(pc)

    # ---- decoder on z_sampled, final 1x1 conv_only projection
    hdec = z_sampled_mc.reshape(n, hh, wh, dim_z)
    for lyr in params["decode"]:
        hdec = conv_bn_act(hdec, lyr, act="leakyrelu")
    nd, hd, wd, cd = hdec.shape
    wfin, bfin = params["decode_final"]
    xm = gemm_bias_act(hdec.reshape(nd * hd * wd, cd),
                       wfin.reshape(wfin.shape[0], cd).T, bfin, act="none")
    out["x_mean"] = xm.reshape(nd, hd, wd, -1).transpose(0, 3, 1, 2)
    return out


# --------------------------------------------------------------------------
if __name__ == "__main__":
    key = jax.random.PRNGKey(0)
    k_param, k_data, k_noise = jax.random.split(key, 3)

    # Small config consistent with the module constructor:
    # dimensions=2, in_channels=1, out_channels=1, channels=(4,8), strides=(2,2)
    cfg = dict(in_channels=1, out_channels=1, channels=(4, 8), strides=(2, 2),
               dim_c=4, dim_z=8, dim_w=1)

    params = build_params(k_param, **cfg)

    x = jax.random.normal(k_data, (2, 1, 16, 16), jnp.float32)   # NCHW
    scanner = jnp.zeros((2,), jnp.float32)                       # unused

    # jit with params / static config closed over (strides stay Python ints).
    fwd = jax.jit(lambda xx, kk: gmvae_forward(params, xx, scanner, kk,
                                               cfg["dim_c"]))
    outputs = jax.block_until_ready(fwd(x, k_noise))

    # Sanity checks on shapes / softmax normalization.
    assert outputs["z_mean"].shape == (2, cfg["dim_z"], 16, 16)
    assert outputs["z_sampled"].shape == (2, cfg["dim_z"], 16, 16)
    assert outputs["w_mean"].shape == (2, cfg["dim_w"], 16, 16)
    assert outputs["z_wc_mean"].shape == (2, cfg["dim_z"] * cfg["dim_c"], 16, 16)
    assert outputs["x_mean"].shape == (2, cfg["out_channels"], 16, 16)
    assert outputs["pc"].shape == (2, cfg["dim_z"] * cfg["dim_c"], 16, 16)
    assert bool(jnp.allclose(outputs["pc"].sum(axis=1), 1.0, atol=1e-4))

    print("KERNEL_OK")
</pallas_src>

<mosaic_0001>
module attributes {stable_mosaic.version = 11 : i64} {
  func.func @_gemm_bias_stats_kernel(%arg0: i32, %arg1: memref<128x25xbf16, #tpu.memory_space<vmem>>, %arg2: memref<25x4xbf16, #tpu.memory_space<vmem>>, %arg3: memref<1x4xf32, #tpu.memory_space<vmem>>, %arg4: memref<128x4xf32, #tpu.memory_space<vmem>>, %arg5: memref<1x4xf32, #tpu.memory_space<vmem>>, %arg6: memref<1x4xf32, #tpu.memory_space<vmem>>) attributes {dimension_semantics = [#tpu.dimension_semantics<arbitrary>], iteration_bounds = array<i64: 1>, scalar_prefetch = 0 : i64, scratch_operands = 0 : i64, tpu.core_type = #tpu.core_type<tc>, window_params = [{transform_indices = @transform_0, window_bounds = array<i64: 128, 25>}, {pipeline_mode = #tpu.pipeline_mode<synchronous>, transform_indices = @transform_1, window_bounds = array<i64: 25, 4>}, {pipeline_mode = #tpu.pipeline_mode<synchronous>, transform_indices = @transform_2, window_bounds = array<i64: 1, 4>}, {transform_indices = @transform_3, window_bounds = array<i64: 128, 4>}, {pipeline_mode = #tpu.pipeline_mode<synchronous>, transform_indices = @transform_4, window_bounds = array<i64: 1, 4>}, {pipeline_mode = #tpu.pipeline_mode<synchronous>, transform_indices = @transform_5, window_bounds = array<i64: 1, 4>}]} {
    %c0 = arith.constant 0 : index
    %c0_0 = arith.constant 0 : index
    %0 = vector.load %arg1[%c0, %c0_0] : memref<128x25xbf16, #tpu.memory_space<vmem>>, vector<128x25xbf16>
    %c0_1 = arith.constant 0 : index
    %c0_2 = arith.constant 0 : index
    %1 = vector.load %arg2[%c0_1, %c0_2] : memref<25x4xbf16, #tpu.memory_space<vmem>>, vector<25x4xbf16>
    %cst = arith.constant dense<0.000000e+00> : vector<128x4xf32>
    %2 = tpu.matmul %0, %1, %cst {dimension_numbers = #tpu.dot_dimension_numbers<[1], [0], [0], [1], [0, 0, 1, 1], [], []>} : vector<128x25xbf16>, vector<25x4xbf16>, vector<128x4xf32> -> vector<128x4xf32>
    %c0_3 = arith.constant 0 : index
    %c0_4 = arith.constant 0 : index
    %3 = vector.load %arg3[%c0_3, %c0_4] : memref<1x4xf32, #tpu.memory_space<vmem>>, vector<1x4xf32>
    %4 = vector.broadcast %3 : vector<1x4xf32> to vector<128x4xf32>
    %5 = arith.addf %2, %4 : vector<128x4xf32>
    %c0_5 = arith.constant 0 : index
    %c0_6 = arith.constant 0 : index
    %6 = vector.load %arg4[%c0_5, %c0_6] : memref<128x4xf32, #tpu.memory_space<vmem>>, vector<128x4xf32>
    tpu.vector_store %arg4[%c0_5, %c0_6], %5 {strides = array<i32>} : memref<128x4xf32, #tpu.memory_space<vmem>>, vector<128x4xf32>,
    %c0_i32 = arith.constant 0 : i32
    %7 = arith.cmpi eq, %arg0, %c0_i32 : i32
    %8 = arith.extui %7 : i1 to i32
    %c0_i32_7 = arith.constant 0 : i32
    %9 = arith.cmpi ne, %8, %c0_i32_7 : i32
    scf.if %9 {
      %cst_18 = arith.constant 0.000000e+00 : f32
      %21 = vector.broadcast %cst_18 : f32 to vector<1x4xf32>
      %c0_19 = arith.constant 0 : index
      %c0_20 = arith.constant 0 : index
      %22 = vector.load %arg5[%c0_19, %c0_20] : memref<1x4xf32, #tpu.memory_space<vmem>>, vector<1x4xf32>
      tpu.vector_store %arg5[%c0_19, %c0_20], %21 {strides = array<i32>} : memref<1x4xf32, #tpu.memory_space<vmem>>, vector<1x4xf32>,
      %cst_21 = arith.constant 0.000000e+00 : f32
      %23 = vector.broadcast %cst_21 : f32 to vector<1x4xf32>
      %c0_22 = arith.constant 0 : index
      %c0_23 = arith.constant 0 : index
      %24 = vector.load %arg6[%c0_22, %c0_23] : memref<1x4xf32, #tpu.memory_space<vmem>>, vector<1x4xf32>
      tpu.vector_store %arg6[%c0_22, %c0_23], %23 {strides = array<i32>} : memref<1x4xf32, #tpu.memory_space<vmem>>, vector<1x4xf32>,
    } else {
    }
    %c0_8 = arith.constant 0 : index
    %c0_9 = arith.constant 0 : index
    %10 = vector.load %arg5[%c0_8, %c0_9] : memref<1x4xf32, #tpu.memory_space<vmem>>, vector<1x4xf32>
    %cst_10 = arith.constant dense<0.000000e+00> : vector<4xf32>
    %11 = vector.multi_reduction <add>, %5, %cst_10 [0] : vector<128x4xf32> to vector<4xf32>
    %12 = vector.shape_cast %11 : vector<4xf32> to vector<1x4xf32>
    %13 = arith.addf %10, %12 : vector<1x4xf32>
    %c0_11 = arith.constant 0 : index
    %c0_12 = arith.constant 0 : index
    %14 = vector.load %arg5[%c0_11, %c0_12] : memref<1x4xf32, #tpu.memory_space<vmem>>, vector<1x4xf32>
    tpu.vector_store %arg5[%c0_11, %c0_12], %13 {strides = array<i32>} : memref<1x4xf32, #tpu.memory_space<vmem>>, vector<1x4xf32>,
    %c0_13 = arith.constant 0 : index
    %c0_14 = arith.constant 0 : index
    %15 = vector.load %arg6[%c0_13, %c0_14] : memref<1x4xf32, #tpu.memory_space<vmem>>, vector<1x4xf32>
    %16 = arith.mulf %5, %5 : vector<128x4xf32>
    %cst_15 = arith.constant dense<0.000000e+00> : vector<4xf32>
    %17 = vector.multi_reduction <add>, %16, %cst_15 [0] : vector<128x4xf32> to vector<4xf32>
    %18 = vector.shape_cast %17 : vector<4xf32> to vector<1x4xf32>
    %19 = arith.addf %15, %18 : vector<1x4xf32>
    %c0_16 = arith.constant 0 : index
    %c0_17 = arith.constant 0 : index
    %20 = vector.load %arg6[%c0_16, %c0_17] : memref<1x4xf32, #tpu.memory_space<vmem>>, vector<1x4xf32>
    tpu.vector_store %arg6[%c0_16, %c0_17], %19 {strides = array<i32>} : memref<1x4xf32, #tpu.memory_space<vmem>>, vector<1x4xf32>,
    return
  }
  func.func @transform_0(%arg0: i32) -> (i32, i32) {
    %c0_i32 = arith.constant 0 : i32
    %c0_i32_0 = arith.constant 0 : i32
    return %arg0, %c0_i32 : i32, i32
  }
  func.func @transform_1(%arg0: i32) -> (i32, i32) {
    %c0_i32 = arith.constant 0 : i32
    %c0_i32_0 = arith.constant 0 : i32
    %c0_i32_1 = arith.constant 0 : i32
    return %c0_i32, %c0_i32_0 : i32, i32
  }
  func.func @transform_2(%arg0: i32) -> (i32, i32) {
    %c0_i32 = arith.constant 0 : i32
    %c0_i32_0 = arith.constant 0 : i32
    %c0_i32_1 = arith.constant 0 : i32
    return %c0_i32, %c0_i32_0 : i32, i32
  }
  func.func @transform_3(%arg0: i32) -> (i32, i32) {
    %c0_i32 = arith.constant 0 : i32
    %c0_i32_0 = arith.constant 0 : i32
    return %arg0, %c0_i32 : i32, i32
  }
  func.func @transform_4(%arg0: i32) -> (i32, i32) {
    %c0_i32 = arith.constant 0 : i32
    %c0_i32_0 = arith.constant 0 : i32
    %c0_i32_1 = arith.constant 0 : i32
    return %c0_i32, %c0_i32_0 : i32, i32
  }
  func.func @transform_5(%arg0: i32) -> (i32, i32) {
    %c0_i32 = arith.constant 0 : i32
    %c0_i32_0 = arith.constant 0 : i32
    %c0_i32_1 = arith.constant 0 : i32
    return %c0_i32, %c0_i32_0 : i32, i32
  }
}

module attributes {stable_mosaic.version = 11 : i64} {
  func.func @_affine_act_kernel(%arg0: i32, %arg1: memref<128x4xf32, #tpu.memory_space<vmem>>, %arg2: memref<1x4xf32, #tpu.memory_space<vmem>>, %arg3: memref<1x4xf32, #tpu.memory_space<vmem>>, %arg4: memref<128x4xf32, #tpu.memory_space<vmem>>) attributes {dimension_semantics = [#tpu.dimension_semantics<parallel>], iteration_bounds = array<i64: 1>, scalar_prefetch = 0 : i64, scratch_operands = 0 : i64, tpu.core_type = #tpu.core_type<tc>, window_params = [{transform_indices = @transform_0, window_bounds = array<i64: 128, 4>}, {pipeline_mode = #tpu.pipeline_mode<synchronous>, transform_indices = @transform_1, window_bounds = array<i64: 1, 4>}, {pipeline_mode = #tpu.pipeline_mode<synchronous>, transform_indices = @transform_2, window_bounds = array<i64: 1, 4>}, {transform_indices = @transform_3, window_bounds = array<i64: 128, 4>}]} {
    %c0 = arith.constant 0 : index
    %c0_0 = arith.constant 0 : index
    %0 = vector.load %arg1[%c0, %c0_0] : memref<128x4xf32, #tpu.memory_space<vmem>>, vector<128x4xf32>
    %c0_1 = arith.constant 0 : index
    %c0_2 = arith.constant 0 : index
    %1 = vector.load %arg2[%c0_1, %c0_2] : memref<1x4xf32, #tpu.memory_space<vmem>>, vector<1x4xf32>
    %2 = vector.broadcast %1 : vector<1x4xf32> to vector<128x4xf32>
    %3 = arith.mulf %0, %2 : vector<128x4xf32>
    %c0_3 = arith.constant 0 : index
    %c0_4 = arith.constant 0 : index
    %4 = vector.load %arg3[%c0_3, %c0_4] : memref<1x4xf32, #tpu.memory_space<vmem>>, vector<1x4xf32>
    %5 = vector.broadcast %4 : vector<1x4xf32> to vector<128x4xf32>
    %6 = arith.addf %3, %5 : vector<128x4xf32>
    %cst = arith.constant 0.000000e+00 : f32
    %7 = vector.broadcast %cst : f32 to vector<128x4xf32>
    %8 = arith.cmpf oge, %6, %7 : vector<128x4xf32>
    %cst_5 = arith.constant 0.00999999977 : f32
    %9 = vector.broadcast %cst_5 : f32 to vector<128x4xf32>
    %10 = arith.mulf %9, %6 : vector<128x4xf32>
    %11 = arith.select %8, %6, %10 : vector<128x4xi1>, vector<128x4xf32>
    %c0_6 = arith.constant 0 : index
    %c0_7 = arith.constant 0 : index
    %12 = vector.load %arg4[%c0_6, %c0_7] : memref<128x4xf32, #tpu.memory_space<vmem>>, vector<128x4xf32>
    tpu.vector_store %arg4[%c0_6, %c0_7], %11 {strides = array<i32>} : memref<128x4xf32, #tpu.memory_space<vmem>>, vector<128x4xf32>,
    return
  }
  func.func @transform_0(%arg0: i32) -> (i32, i32) {
    %c0_i32 = arith.constant 0 : i32
    %c0_i32_0 = arith.constant 0 : i32
    return %arg0, %c0_i32 : i32, i32
  }
  func.func @transform_1(%arg0: i32) -> (i32, i32) {
    %c0_i32 = arith.constant 0 : i32
    %c0_i32_0 = arith.constant 0 : i32
    %c0_i32_1 = arith.constant 0 : i32
    return %c0_i32, %c0_i32_0 : i32, i32
  }
  func.func @transform_2(%arg0: i32) -> (i32, i32) {
    %c0_i32 = arith.constant 0 : i32
    %c0_i32_0 = arith.constant 0 : i32
    %c0_i32_1 = arith.constant 0 : i32
    return %c0_i32, %c0_i32_0 : i32, i32
  }
  func.func @transform_3(%arg0: i32) -> (i32, i32) {
    %c0_i32 = arith.constant 0 : i32
    %c0_i32_0 = arith.constant 0 : i32
    return %arg0, %c0_i32 : i32, i32
  }
}

module attributes {stable_mosaic.version = 11 : i64} {
  func.func @_gemm_bias_stats_kernel(%arg0: i32, %arg1: memref<32x100xbf16, #tpu.memory_space<vmem>>, %arg2: memref<100x8xbf16, #tpu.memory_space<vmem>>, %arg3: memref<1x8xf32, #tpu.memory_space<vmem>>, %arg4: memref<32x8xf32, #tpu.memory_space<vmem>>, %arg5: memref<1x8xf32, #tpu.memory_space<vmem>>, %arg6: memref<1x8xf32, #tpu.memory_space<vmem>>) attributes {dimension_semantics = [#tpu.dimension_semantics<arbitrary>], iteration_bounds = array<i64: 1>, scalar_prefetch = 0 : i64, scratch_operands = 0 : i64, tpu.core_type = #tpu.core_type<tc>, window_params = [{transform_indices = @transform_0, window_bounds = array<i64: 32, 100>}, {pipeline_mode = #tpu.pipeline_mode<synchronous>, transform_indices = @transform_1, window_bounds = array<i64: 100, 8>}, {pipeline_mode = #tpu.pipeline_mode<synchronous>, transform_indices = @transform_2, window_bounds = array<i64: 1, 8>}, {transform_indices = @transform_3, window_bounds = array<i64: 32, 8>}, {pipeline_mode = #tpu.pipeline_mode<synchronous>, transform_indices = @transform_4, window_bounds = array<i64: 1, 8>}, {pipeline_mode = #tpu.pipeline_mode<synchronous>, transform_indices = @transform_5, window_bounds = array<i64: 1, 8>}]} {
    %c0 = arith.constant 0 : index
    %c0_0 = arith.constant 0 : index
    %0 = vector.load %arg1[%c0, %c0_0] : memref<32x100xbf16, #tpu.memory_space<vmem>>, vector<32x100xbf16>
    %c0_1 = arith.constant 0 : index
    %c0_2 = arith.constant 0 : index
    %1 = vector.load %arg2[%c0_1, %c0_2] : memref<100x8xbf16, #tpu.memory_space<vmem>>, vector<100x8xbf16>
    %cst = arith.constant dense<0.000000e+00> : vector<32x8xf32>
    %2 = tpu.matmul %0, %1, %cst {dimension_numbers = #tpu.dot_dimension_numbers<[1], [0], [0], [1], [0, 0, 1, 1], [], []>} : vector<32x100xbf16>, vector<100x8xbf16>, vector<32x8xf32> -> vector<32x8xf32>
    %c0_3 = arith.constant 0 : index
    %c0_4 = arith.constant 0 : index
    %3 = vector.load %arg3[%c0_3, %c0_4] : memref<1x8xf32, #tpu.memory_space<vmem>>, vector<1x8xf32>
    %4 = vector.broadcast %3 : vector<1x8xf32> to vector<32x8xf32>
    %5 = arith.addf %2, %4 : vector<32x8xf32>
    %c0_5 = arith.constant 0 : index
    %c0_6 = arith.constant 0 : index
    %6 = vector.load %arg4[%c0_5, %c0_6] : memref<32x8xf32, #tpu.memory_space<vmem>>, vector<32x8xf32>
    tpu.vector_store %arg4[%c0_5, %c0_6], %5 {strides = array<i32>} : memref<32x8xf32, #tpu.memory_space<vmem>>, vector<32x8xf32>,
    %c0_i32 = arith.constant 0 : i32
    %7 = arith.cmpi eq, %arg0, %c0_i32 : i32
    %8 = arith.extui %7 : i1 to i32
    %c0_i32_7 = arith.constant 0 : i32
    %9 = arith.cmpi ne, %8, %c0_i32_7 : i32
    scf.if %9 {
      %cst_18 = arith.constant 0.000000e+00 : f32
      %21 = vector.broadcast %cst_18 : f32 to vector<1x8xf32>
      %c0_19 = arith.constant 0 : index
      %c0_20 = arith.constant 0 : index
      %22 = vector.load %arg5[%c0_19, %c0_20] : memref<1x8xf32, #tpu.memory_space<vmem>>, vector<1x8xf32>
      tpu.vector_store %arg5[%c0_19, %c0_20], %21 {strides = array<i32>} : memref<1x8xf32, #tpu.memory_space<vmem>>, vector<1x8xf32>,
      %cst_21 = arith.constant 0.000000e+00 : f32
      %23 = vector.broadcast %cst_21 : f32 to vector<1x8xf32>
      %c0_22 = arith.constant 0 : index
      %c0_23 = arith.constant 0 : index
      %24 = vector.load %arg6[%c0_22, %c0_23] : memref<1x8xf32, #tpu.memory_space<vmem>>, vector<1x8xf32>
      tpu.vector_store %arg6[%c0_22, %c0_23], %23 {strides = array<i32>} : memref<1x8xf32, #tpu.memory_space<vmem>>, vector<1x8xf32>,
    } else {
    }
    %c0_8 = arith.constant 0 : index
    %c0_9 = arith.constant 0 : index
    %10 = vector.load %arg5[%c0_8, %c0_9] : memref<1x8xf32, #tpu.memory_space<vmem>>, vector<1x8xf32>
    %cst_10 = arith.constant dense<0.000000e+00> : vector<8xf32>
    %11 = vector.multi_reduction <add>, %5, %cst_10 [0] : vector<32x8xf32> to vector<8xf32>
    %12 = vector.shape_cast %11 : vector<8xf32> to vector<1x8xf32>
    %13 = arith.addf %10, %12 : vector<1x8xf32>
    %c0_11 = arith.constant 0 : index
    %c0_12 = arith.constant 0 : index
    %14 = vector.load %arg5[%c0_11, %c0_12] : memref<1x8xf32, #tpu.memory_space<vmem>>, vector<1x8xf32>
    tpu.vector_store %arg5[%c0_11, %c0_12], %13 {strides = array<i32>} : memref<1x8xf32, #tpu.memory_space<vmem>>, vector<1x8xf32>,
    %c0_13 = arith.constant 0 : index
    %c0_14 = arith.constant 0 : index
    %15 = vector.load %arg6[%c0_13, %c0_14] : memref<1x8xf32, #tpu.memory_space<vmem>>, vector<1x8xf32>
    %16 = arith.mulf %5, %5 : vector<32x8xf32>
    %cst_15 = arith.constant dense<0.000000e+00> : vector<8xf32>
    %17 = vector.multi_reduction <add>, %16, %cst_15 [0] : vector<32x8xf32> to vector<8xf32>
    %18 = vector.shape_cast %17 : vector<8xf32> to vector<1x8xf32>
    %19 = arith.addf %15, %18 : vector<1x8xf32>
    %c0_16 = arith.constant 0 : index
    %c0_17 = arith.constant 0 : index
    %20 = vector.load %arg6[%c0_16, %c0_17] : memref<1x8xf32, #tpu.memory_space<vmem>>, vector<1x8xf32>
    tpu.vector_store %arg6[%c0_16, %c0_17], %19 {strides = array<i32>} : memref<1x8xf32, #tpu.memory_space<vmem>>, vector<1x8xf32>,
    return
  }
  func.func @transform_0(%arg0: i32) -> (i32, i32) {
    %c0_i32 = arith.constant 0 : i32
    %c0_i32_0 = arith.constant 0 : i32
    return %arg0, %c0_i32 : i32, i32
  }
  func.func @transform_1(%arg0: i32) -> (i32, i32) {
    %c0_i32 = arith.constant 0 : i32
    %c0_i32_0 = arith.constant 0 : i32
    %c0_i32_1 = arith.constant 0 : i32
    return %c0_i32, %c0_i32_0 : i32, i32
  }
  func.func @transform_2(%arg0: i32) -> (i32, i32) {
    %c0_i32 = arith.constant 0 : i32
    %c0_i32_0 = arith.constant 0 : i32
    %c0_i32_1 = arith.constant 0 : i32
    return %c0_i32, %c0_i32_0 : i32, i32
  }
  func.func @transform_3(%arg0: i32) -> (i32, i32) {
    %c0_i32 = arith.constant 0 : i32
    %c0_i32_0 = arith.constant 0 : i32
    return %arg0, %c0_i32 : i32, i32
  }
  func.func @transform_4(%arg0: i32) -> (i32, i32) {
    %c0_i32 = arith.constant 0 : i32
    %c0_i32_0 = arith.constant 0 : i32
    %c0_i32_1 = arith.constant 0 : i32
    return %c0_i32, %c0_i32_0 : i32, i32
  }
  func.func @transform_5(%arg0: i32) -> (i32, i32) {
    %c0_i32 = arith.constant 0 : i32
    %c0_i32_0 = arith.constant 0 : i32
    %c0_i32_1 = arith.constant 0 : i32
    return %c0_i32, %c0_i32_0 : i32, i32
  }
}

module attributes {stable_mosaic.version = 11 : i64} {
  func.func @_affine_act_kernel(%arg0: i32, %arg1: memref<32x8xf32, #tpu.memory_space<vmem>>, %arg2: memref<1x8xf32, #tpu.memory_space<vmem>>, %arg3: memref<1x8xf32, #tpu.memory_space<vmem>>, %arg4: memref<32x8xf32, #tpu.memory_space<vmem>>) attributes {dimension_semantics = [#tpu.dimension_semantics<parallel>], iteration_bounds = array<i64: 1>, scalar_prefetch = 0 : i64, scratch_operands = 0 : i64, tpu.core_type = #tpu.core_type<tc>, window_params = [{transform_indices = @transform_0, window_bounds = array<i64: 32, 8>}, {pipeline_mode = #tpu.pipeline_mode<synchronous>, transform_indices = @transform_1, window_bounds = array<i64: 1, 8>}, {pipeline_mode = #tpu.pipeline_mode<synchronous>, transform_indices = @transform_2, window_bounds = array<i64: 1, 8>}, {transform_indices = @transform_3, window_bounds = array<i64: 32, 8>}]} {
    %c0 = arith.constant 0 : index
    %c0_0 = arith.constant 0 : index
    %0 = vector.load %arg1[%c0, %c0_0] : memref<32x8xf32, #tpu.memory_space<vmem>>, vector<32x8xf32>
    %c0_1 = arith.constant 0 : index
    %c0_2 = arith.constant 0 : index
    %1 = vector.load %arg2[%c0_1, %c0_2] : memref<1x8xf32, #tpu.memory_space<vmem>>, vector<1x8xf32>
    %2 = vector.broadcast %1 : vector<1x8xf32> to vector<32x8xf32>
    %3 = arith.mulf %0, %2 : vector<32x8xf32>
    %c0_3 = arith.constant 0 : index
    %c0_4 = arith.constant 0 : index
    %4 = vector.load %arg3[%c0_3, %c0_4] : memref<1x8xf32, #tpu.memory_space<vmem>>, vector<1x8xf32>
    %5 = vector.broadcast %4 : vector<1x8xf32> to vector<32x8xf32>
    %6 = arith.addf %3, %5 : vector<32x8xf32>
    %cst = arith.constant 0.000000e+00 : f32
    %7 = vector.broadcast %cst : f32 to vector<32x8xf32>
    %8 = arith.cmpf oge, %6, %7 : vector<32x8xf32>
    %cst_5 = arith.constant 0.00999999977 : f32
    %9 = vector.broadcast %cst_5 : f32 to vector<32x8xf32>
    %10 = arith.mulf %9, %6 : vector<32x8xf32>
    %11 = arith.select %8, %6, %10 : vector<32x8xi1>, vector<32x8xf32>
    %c0_6 = arith.constant 0 : index
    %c0_7 = arith.constant 0 : index
    %12 = vector.load %arg4[%c0_6, %c0_7] : memref<32x8xf32, #tpu.memory_space<vmem>>, vector<32x8xf32>
    tpu.vector_store %arg4[%c0_6, %c0_7], %11 {strides = array<i32>} : memref<32x8xf32, #tpu.memory_space<vmem>>, vector<32x8xf32>,
    return
  }
  func.func @transform_0(%arg0: i32) -> (i32, i32) {
    %c0_i32 = arith.constant 0 : i32
    %c0_i32_0 = arith.constant 0 : i32
    return %arg0, %c0_i32 : i32, i32
  }
  func.func @transform_1(%arg0: i32) -> (i32, i32) {
    %c0_i32 = arith.constant 0 : i32
    %c0_i32_0 = arith.constant 0 : i32
    %c0_i32_1 = arith.constant 0 : i32
    return %c0_i32, %c0_i32_0 : i32, i32
  }
  func.func @transform_2(%arg0: i32) -> (i32, i32) {
    %c0_i32 = arith.constant 0 : i32
    %c0_i32_0 = arith.constant 0 : i32
    %c0_i32_1 = arith.constant 0 : i32
    return %c0_i32, %c0_i32_0 : i32, i32
  }
  func.func @transform_3(%arg0: i32) -> (i32, i32) {
    %c0_i32 = arith.constant 0 : i32
    %c0_i32_0 = arith.constant 0 : i32
    return %arg0, %c0_i32 : i32, i32
  }
}

module attributes {stable_mosaic.version = 11 : i64} {
  func.func @_gemm_bias_stats_kernel(%arg0: i32, %arg1: memref<128x200xbf16, #tpu.memory_space<vmem>>, %arg2: memref<200x8xbf16, #tpu.memory_space<vmem>>, %arg3: memref<1x8xf32, #tpu.memory_space<vmem>>, %arg4: memref<128x8xf32, #tpu.memory_space<vmem>>, %arg5: memref<1x8xf32, #tpu.memory_space<vmem>>, %arg6: memref<1x8xf32, #tpu.memory_space<vmem>>) attributes {dimension_semantics = [#tpu.dimension_semantics<arbitrary>], iteration_bounds = array<i64: 1>, scalar_prefetch = 0 : i64, scratch_operands = 0 : i64, tpu.core_type = #tpu.core_type<tc>, window_params = [{transform_indices = @transform_0, window_bounds = array<i64: 128, 200>}, {pipeline_mode = #tpu.pipeline_mode<synchronous>, transform_indices = @transform_1, window_bounds = array<i64: 200, 8>}, {pipeline_mode = #tpu.pipeline_mode<synchronous>, transform_indices = @transform_2, window_bounds = array<i64: 1, 8>}, {transform_indices = @transform_3, window_bounds = array<i64: 128, 8>}, {pipeline_mode = #tpu.pipeline_mode<synchronous>, transform_indices = @transform_4, window_bounds = array<i64: 1, 8>}, {pipeline_mode = #tpu.pipeline_mode<synchronous>, transform_indices = @transform_5, window_bounds = array<i64: 1, 8>}]} {
    %c0 = arith.constant 0 : index
    %c0_0 = arith.constant 0 : index
    %0 = vector.load %arg1[%c0, %c0_0] : memref<128x200xbf16, #tpu.memory_space<vmem>>, vector<128x200xbf16>
    %c0_1 = arith.constant 0 : index
    %c0_2 = arith.constant 0 : index
    %1 = vector.load %arg2[%c0_1, %c0_2] : memref<200x8xbf16, #tpu.memory_space<vmem>>, vector<200x8xbf16>
    %cst = arith.constant dense<0.000000e+00> : vector<128x8xf32>
    %2 = tpu.matmul %0, %1, %cst {dimension_numbers = #tpu.dot_dimension_numbers<[1], [0], [0], [1], [0, 0, 1, 1], [], []>} : vector<128x200xbf16>, vector<200x8xbf16>, vector<128x8xf32> -> vector<128x8xf32>
    %c0_3 = arith.constant 0 : index
    %c0_4 = arith.constant 0 : index
    %3 = vector.load %arg3[%c0_3, %c0_4] : memref<1x8xf32, #tpu.memory_space<vmem>>, vector<1x8xf32>
    %4 = vector.broadcast %3 : vector<1x8xf32> to vector<128x8xf32>
    %5 = arith.addf %2, %4 : vector<128x8xf32>
    %c0_5 = arith.constant 0 : index
    %c0_6 = arith.constant 0 : index
    %6 = vector.load %arg4[%c0_5, %c0_6] : memref<128x8xf32, #tpu.memory_space<vmem>>, vector<128x8xf32>
    tpu.vector_store %arg4[%c0_5, %c0_6], %5 {strides = array<i32>} : memref<128x8xf32, #tpu.memory_space<vmem>>, vector<128x8xf32>,
    %c0_i32 = arith.constant 0 : i32
    %7 = arith.cmpi eq, %arg0, %c0_i32 : i32
    %8 = arith.extui %7 : i1 to i32
    %c0_i32_7 = arith.constant 0 : i32
    %9 = arith.cmpi ne, %8, %c0_i32_7 : i32
    scf.if %9 {
      %cst_18 = arith.constant 0.000000e+00 : f32
      %21 = vector.broadcast %cst_18 : f32 to vector<1x8xf32>
      %c0_19 = arith.constant 0 : index
      %c0_20 = arith.constant 0 : index
      %22 = vector.load %arg5[%c0_19, %c0_20] : memref<1x8xf32, #tpu.memory_space<vmem>>, vector<1x8xf32>
      tpu.vector_store %arg5[%c0_19, %c0_20], %21 {strides = array<i32>} : memref<1x8xf32, #tpu.memory_space<vmem>>, vector<1x8xf32>,
      %cst_21 = arith.constant 0.000000e+00 : f32
      %23 = vector.broadcast %cst_21 : f32 to vector<1x8xf32>
      %c0_22 = arith.constant 0 : index
      %c0_23 = arith.constant 0 : index
      %24 = vector.load %arg6[%c0_22, %c0_23] : memref<1x8xf32, #tpu.memory_space<vmem>>, vector<1x8xf32>
      tpu.vector_store %arg6[%c0_22, %c0_23], %23 {strides = array<i32>} : memref<1x8xf32, #tpu.memory_space<vmem>>, vector<1x8xf32>,
    } else {
    }
    %c0_8 = arith.constant 0 : index
    %c0_9 = arith.constant 0 : index
    %10 = vector.load %arg5[%c0_8, %c0_9] : memref<1x8xf32, #tpu.memory_space<vmem>>, vector<1x8xf32>
    %cst_10 = arith.constant dense<0.000000e+00> : vector<8xf32>
    %11 = vector.multi_reduction <add>, %5, %cst_10 [0] : vector<128x8xf32> to vector<8xf32>
    %12 = vector.shape_cast %11 : vector<8xf32> to vector<1x8xf32>
    %13 = arith.addf %10, %12 : vector<1x8xf32>
    %c0_11 = arith.constant 0 : index
    %c0_12 = arith.constant 0 : index
    %14 = vector.load %arg5[%c0_11, %c0_12] : memref<1x8xf32, #tpu.memory_space<vmem>>, vector<1x8xf32>
    tpu.vector_store %arg5[%c0_11, %c0_12], %13 {strides = array<i32>} : memref<1x8xf32, #tpu.memory_space<vmem>>, vector<1x8xf32>,
    %c0_13 = arith.constant 0 : index
    %c0_14 = arith.constant 0 : index
    %15 = vector.load %arg6[%c0_13, %c0_14] : memref<1x8xf32, #tpu.memory_space<vmem>>, vector<1x8xf32>
    %16 = arith.mulf %5, %5 : vector<128x8xf32>
    %cst_15 = arith.constant dense<0.000000e+00> : vector<8xf32>
    %17 = vector.multi_reduction <add>, %16, %cst_15 [0] : vector<128x8xf32> to vector<8xf32>
    %18 = vector.shape_cast %17 : vector<8xf32> to vector<1x8xf32>
    %19 = arith.addf %15, %18 : vector<1x8xf32>
    %c0_16 = arith.constant 0 : index
    %c0_17 = arith.constant 0 : index
    %20 = vector.load %arg6[%c0_16, %c0_17] : memref<1x8xf32, #tpu.memory_space<vmem>>, vector<1x8xf32>
    tpu.vector_store %arg6[%c0_16, %c0_17], %19 {strides = array<i32>} : memref<1x8xf32, #tpu.memory_space<vmem>>, vector<1x8xf32>,
    return
  }
  func.func @transform_0(%arg0: i32) -> (i32, i32) {
    %c0_i32 = arith.constant 0 : i32
    %c0_i32_0 = arith.constant 0 : i32
    return %arg0, %c0_i32 : i32, i32
  }
  func.func @transform_1(%arg0: i32) -> (i32, i32) {
    %c0_i32 = arith.constant 0 : i32
    %c0_i32_0 = arith.constant 0 : i32
    %c0_i32_1 = arith.constant 0 : i32
    return %c0_i32, %c0_i32_0 : i32, i32
  }
  func.func @transform_2(%arg0: i32) -> (i32, i32) {
    %c0_i32 = arith.constant 0 : i32
    %c0_i32_0 = arith.constant 0 : i32
    %c0_i32_1 = arith.constant 0 : i32
    return %c0_i32, %c0_i32_0 : i32, i32
  }
  func.func @transform_3(%arg0: i32) -> (i32, i32) {
    %c0_i32 = arith.constant 0 : i32
    %c0_i32_0 = arith.constant 0 : i32
    return %arg0, %c0_i32 : i32, i32
  }
  func.func @transform_4(%arg0: i32) -> (i32, i32) {
    %c0_i32 = arith.constant 0 : i32
    %c0_i32_0 = arith.constant 0 : i32
    %c0_i32_1 = arith.constant 0 : i32
    return %c0_i32, %c0_i32_0 : i32, i32
  }
  func.func @transform_5(%arg0: i32) -> (i32, i32) {
    %c0_i32 = arith.constant 0 : i32
    %c0_i32_0 = arith.constant 0 : i32
    %c0_i32_1 = arith.constant 0 : i32
    return %c0_i32, %c0_i32_0 : i32, i32
  }
}

module attributes {stable_mosaic.version = 11 : i64} {
  func.func @_affine_act_kernel(%arg0: i32, %arg1: memref<128x8xf32, #tpu.memory_space<vmem>>, %arg2: memref<1x8xf32, #tpu.memory_space<vmem>>, %arg3: memref<1x8xf32, #tpu.memory_space<vmem>>, %arg4: memref<128x8xf32, #tpu.memory_space<vmem>>) attributes {dimension_semantics = [#tpu.dimension_semantics<parallel>], iteration_bounds = array<i64: 1>, scalar_prefetch = 0 : i64, scratch_operands = 0 : i64, tpu.core_type = #tpu.core_type<tc>, window_params = [{transform_indices = @transform_0, window_bounds = array<i64: 128, 8>}, {pipeline_mode = #tpu.pipeline_mode<synchronous>, transform_indices = @transform_1, window_bounds = array<i64: 1, 8>}, {pipeline_mode = #tpu.pipeline_mode<synchronous>, transform_indices = @transform_2, window_bounds = array<i64: 1, 8>}, {transform_indices = @transform_3, window_bounds = array<i64: 128, 8>}]} {
    %c0 = arith.constant 0 : index
    %c0_0 = arith.constant 0 : index
    %0 = vector.load %arg1[%c0, %c0_0] : memref<128x8xf32, #tpu.memory_space<vmem>>, vector<128x8xf32>
    %c0_1 = arith.constant 0 : index
    %c0_2 = arith.constant 0 : index
    %1 = vector.load %arg2[%c0_1, %c0_2] : memref<1x8xf32, #tpu.memory_space<vmem>>, vector<1x8xf32>
    %2 = vector.broadcast %1 : vector<1x8xf32> to vector<128x8xf32>
    %3 = arith.mulf %0, %2 : vector<128x8xf32>
    %c0_3 = arith.constant 0 : index
    %c0_4 = arith.constant 0 : index
    %4 = vector.load %arg3[%c0_3, %c0_4] : memref<1x8xf32, #tpu.memory_space<vmem>>, vector<1x8xf32>
    %5 = vector.broadcast %4 : vector<1x8xf32> to vector<128x8xf32>
    %6 = arith.addf %3, %5 : vector<128x8xf32>
    %cst = arith.constant 0.000000e+00 : f32
    %7 = vector.broadcast %cst : f32 to vector<128x8xf32>
    %8 = arith.cmpf oge, %6, %7 : vector<128x8xf32>
    %cst_5 = arith.constant 0.00999999977 : f32
    %9 = vector.broadcast %cst_5 : f32 to vector<128x8xf32>
    %10 = arith.mulf %9, %6 : vector<128x8xf32>
    %11 = arith.select %8, %6, %10 : vector<128x8xi1>, vector<128x8xf32>
    %c0_6 = arith.constant 0 : index
    %c0_7 = arith.constant 0 : index
    %12 = vector.load %arg4[%c0_6, %c0_7] : memref<128x8xf32, #tpu.memory_space<vmem>>, vector<128x8xf32>
    tpu.vector_store %arg4[%c0_6, %c0_7], %11 {strides = array<i32>} : memref<128x8xf32, #tpu.memory_space<vmem>>, vector<128x8xf32>,
    return
  }
  func.func @transform_0(%arg0: i32) -> (i32, i32) {
    %c0_i32 = arith.constant 0 : i32
    %c0_i32_0 = arith.constant 0 : i32
    return %arg0, %c0_i32 : i32, i32
  }
  func.func @transform_1(%arg0: i32) -> (i32, i32) {
    %c0_i32 = arith.constant 0 : i32
    %c0_i32_0 = arith.constant 0 : i32
    %c0_i32_1 = arith.constant 0 : i32
    return %c0_i32, %c0_i32_0 : i32, i32
  }
  func.func @transform_2(%arg0: i32) -> (i32, i32) {
    %c0_i32 = arith.constant 0 : i32
    %c0_i32_0 = arith.constant 0 : i32
    %c0_i32_1 = arith.constant 0 : i32
    return %c0_i32, %c0_i32_0 : i32, i32
  }
  func.func @transform_3(%arg0: i32) -> (i32, i32) {
    %c0_i32 = arith.constant 0 : i32
    %c0_i32_0 = arith.constant 0 : i32
    return %arg0, %c0_i32 : i32, i32
  }
}

module attributes {stable_mosaic.version = 11 : i64} {
  func.func @_gemm_bias_stats_kernel(%arg0: i32, %arg1: memref<256x200xbf16, #tpu.memory_space<vmem>>, %arg2: memref<200x4xbf16, #tpu.memory_space<vmem>>, %arg3: memref<1x4xf32, #tpu.memory_space<vmem>>, %arg4: memref<256x4xf32, #tpu.memory_space<vmem>>, %arg5: memref<1x4xf32, #tpu.memory_space<vmem>>, %arg6: memref<1x4xf32, #tpu.memory_space<vmem>>) attributes {dimension_semantics = [#tpu.dimension_semantics<arbitrary>], iteration_bounds = array<i64: 2>, scalar_prefetch = 0 : i64, scratch_operands = 0 : i64, tpu.core_type = #tpu.core_type<tc>, window_params = [{transform_indices = @transform_0, window_bounds = array<i64: 256, 200>}, {pipeline_mode = #tpu.pipeline_mode<synchronous>, transform_indices = @transform_1, window_bounds = array<i64: 200, 4>}, {pipeline_mode = #tpu.pipeline_mode<synchronous>, transform_indices = @transform_2, window_bounds = array<i64: 1, 4>}, {transform_indices = @transform_3, window_bounds = array<i64: 256, 4>}, {pipeline_mode = #tpu.pipeline_mode<synchronous>, transform_indices = @transform_4, window_bounds = array<i64: 1, 4>}, {pipeline_mode = #tpu.pipeline_mode<synchronous>, transform_indices = @transform_5, window_bounds = array<i64: 1, 4>}]} {
    %c0 = arith.constant 0 : index
    %c0_0 = arith.constant 0 : index
    %0 = vector.load %arg1[%c0, %c0_0] : memref<256x200xbf16, #tpu.memory_space<vmem>>, vector<256x200xbf16>
    %c0_1 = arith.constant 0 : index
    %c0_2 = arith.constant 0 : index
    %1 = vector.load %arg2[%c0_1, %c0_2] : memref<200x4xbf16, #tpu.memory_space<vmem>>, vector<200x4xbf16>
    %cst = arith.constant dense<0.000000e+00> : vector<256x4xf32>
    %2 = tpu.matmul %0, %1, %cst {dimension_numbers = #tpu.dot_dimension_numbers<[1], [0], [0], [1], [0, 0, 1, 1], [], []>} : vector<256x200xbf16>, vector<200x4xbf16>, vector<256x4xf32> -> vector<256x4xf32>
    %c0_3 = arith.constant 0 : index
    %c0_4 = arith.constant 0 : index
    %3 = vector.load %arg3[%c0_3, %c0_4] : memref<1x4xf32, #tpu.memory_space<vmem>>, vector<1x4xf32>
    %4 = vector.broadcast %3 : vector<1x4xf32> to vector<256x4xf32>
    %5 = arith.addf %2, %4 : vector<256x4xf32>
    %c0_5 = arith.constant 0 : index
    %c0_6 = arith.constant 0 : index
    %6 = vector.load %arg4[%c0_5, %c0_6] : memref<256x4xf32, #tpu.memory_space<vmem>>, vector<256x4xf32>
    tpu.vector_store %arg4[%c0_5, %c0_6], %5 {strides = array<i32>} : memref<256x4xf32, #tpu.memory_space<vmem>>, vector<256x4xf32>,
    %c0_i32 = arith.constant 0 : i32
    %7 = arith.cmpi eq, %arg0, %c0_i32 : i32
    %8 = arith.extui %7 : i1 to i32
    %c0_i32_7 = arith.constant 0 : i32
    %9 = arith.cmpi ne, %8, %c0_i32_7 : i32
    scf.if %9 {
      %cst_18 = arith.constant 0.000000e+00 : f32
      %21 = vector.broadcast %cst_18 : f32 to vector<1x4xf32>
      %c0_19 = arith.constant 0 : index
      %c0_20 = arith.constant 0 : index
      %22 = vector.load %arg5[%c0_19, %c0_20] : memref<1x4xf32, #tpu.memory_space<vmem>>, vector<1x4xf32>
      tpu.vector_store %arg5[%c0_19, %c0_20], %21 {strides = array<i32>} : memref<1x4xf32, #tpu.memory_space<vmem>>, vector<1x4xf32>,
      %cst_21 = arith.constant 0.000000e+00 : f32
      %23 = vector.broadcast %cst_21 : f32 to vector<1x4xf32>
      %c0_22 = arith.constant 0 : index
      %c0_23 = arith.constant 0 : index
      %24 = vector.load %arg6[%c0_22, %c0_23] : memref<1x4xf32, #tpu.memory_space<vmem>>, vector<1x4xf32>
      tpu.vector_store %arg6[%c0_22, %c0_23], %23 {strides = array<i32>} : memref<1x4xf32, #tpu.memory_space<vmem>>, vector<1x4xf32>,
    } else {
    }
    %c0_8 = arith.constant 0 : index
    %c0_9 = arith.constant 0 : index
    %10 = vector.load %arg5[%c0_8, %c0_9] : memref<1x4xf32, #tpu.memory_space<vmem>>, vector<1x4xf32>
    %cst_10 = arith.constant dense<0.000000e+00> : vector<4xf32>
    %11 = vector.multi_reduction <add>, %5, %cst_10 [0] : vector<256x4xf32> to vector<4xf32>
    %12 = vector.shape_cast %11 : vector<4xf32> to vector<1x4xf32>
    %13 = arith.addf %10, %12 : vector<1x4xf32>
    %c0_11 = arith.constant 0 : index
    %c0_12 = arith.constant 0 : index
    %14 = vector.load %arg5[%c0_11, %c0_12] : memref<1x4xf32, #tpu.memory_space<vmem>>, vector<1x4xf32>
    tpu.vector_store %arg5[%c0_11, %c0_12], %13 {strides = array<i32>} : memref<1x4xf32, #tpu.memory_space<vmem>>, vector<1x4xf32>,
    %c0_13 = arith.constant 0 : index
    %c0_14 = arith.constant 0 : index
    %15 = vector.load %arg6[%c0_13, %c0_14] : memref<1x4xf32, #tpu.memory_space<vmem>>, vector<1x4xf32>
    %16 = arith.mulf %5, %5 : vector<256x4xf32>
    %cst_15 = arith.constant dense<0.000000e+00> : vector<4xf32>
    %17 = vector.multi_reduction <add>, %16, %cst_15 [0] : vector<256x4xf32> to vector<4xf32>
    %18 = vector.shape_cast %17 : vector<4xf32> to vector<1x4xf32>
    %19 = arith.addf %15, %18 : vector<1x4xf32>
    %c0_16 = arith.constant 0 : index
    %c0_17 = arith.constant 0 : index
    %20 = vector.load %arg6[%c0_16, %c0_17] : memref<1x4xf32, #tpu.memory_space<vmem>>, vector<1x4xf32>
    tpu.vector_store %arg6[%c0_16, %c0_17], %19 {strides = array<i32>} : memref<1x4xf32, #tpu.memory_space<vmem>>, vector<1x4xf32>,
    return
  }
  func.func @transform_0(%arg0: i32) -> (i32, i32) {
    %c0_i32 = arith.constant 0 : i32
    %c0_i32_0 = arith.constant 0 : i32
    return %arg0, %c0_i32 : i32, i32
  }
  func.func @transform_1(%arg0: i32) -> (i32, i32) {
    %c0_i32 = arith.constant 0 : i32
    %c0_i32_0 = arith.constant 0 : i32
    %c0_i32_1 = arith.constant 0 : i32
    return %c0_i32, %c0_i32_0 : i32, i32
  }
  func.func @transform_2(%arg0: i32) -> (i32, i32) {
    %c0_i32 = arith.constant 0 : i32
    %c0_i32_0 = arith.constant 0 : i32
    %c0_i32_1 = arith.constant 0 : i32
    return %c0_i32, %c0_i32_0 : i32, i32
  }
  func.func @transform_3(%arg0: i32) -> (i32, i32) {
    %c0_i32 = arith.constant 0 : i32
    %c0_i32_0 = arith.constant 0 : i32
    return %arg0, %c0_i32 : i32, i32
  }
  func.func @transform_4(%arg0: i32) -> (i32, i32) {
    %c0_i32 = arith.constant 0 : i32
    %c0_i32_0 = arith.constant 0 : i32
    %c0_i32_1 = arith.constant 0 : i32
    return %c0_i32, %c0_i32_0 : i32, i32
  }
  func.func @transform_5(%arg0: i32) -> (i32, i32) {
    %c0_i32 = arith.constant 0 : i32
    %c0_i32_0 = arith.constant 0 : i32
    %c0_i32_1 = arith.constant 0 : i32
    return %c0_i32, %c0_i32_0 : i32, i32
  }
}

module attributes {stable_mosaic.version = 11 : i64} {
  func.func @_affine_act_kernel(%arg0: i32, %arg1: memref<256x4xf32, #tpu.memory_space<vmem>>, %arg2: memref<1x4xf32, #tpu.memory_space<vmem>>, %arg3: memref<1x4xf32, #tpu.memory_space<vmem>>, %arg4: memref<256x4xf32, #tpu.memory_space<vmem>>) attributes {dimension_semantics = [#tpu.dimension_semantics<parallel>], iteration_bounds = array<i64: 2>, scalar_prefetch = 0 : i64, scratch_operands = 0 : i64, tpu.core_type = #tpu.core_type<tc>, window_params = [{transform_indices = @transform_0, window_bounds = array<i64: 256, 4>}, {pipeline_mode = #tpu.pipeline_mode<synchronous>, transform_indices = @transform_1, window_bounds = array<i64: 1, 4>}, {pipeline_mode = #tpu.pipeline_mode<synchronous>, transform_indices = @transform_2, window_bounds = array<i64: 1, 4>}, {transform_indices = @transform_3, window_bounds = array<i64: 256, 4>}]} {
    %c0 = arith.constant 0 : index
    %c0_0 = arith.constant 0 : index
    %0 = vector.load %arg1[%c0, %c0_0] : memref<256x4xf32, #tpu.memory_space<vmem>>, vector<256x4xf32>
    %c0_1 = arith.constant 0 : index
    %c0_2 = arith.constant 0 : index
    %1 = vector.load %arg2[%c0_1, %c0_2] : memref<1x4xf32, #tpu.memory_space<vmem>>, vector<1x4xf32>
    %2 = vector.broadcast %1 : vector<1x4xf32> to vector<256x4xf32>
    %3 = arith.mulf %0, %2 : vector<256x4xf32>
    %c0_3 = arith.constant 0 : index
    %c0_4 = arith.constant 0 : index
    %4 = vector.load %arg3[%c0_3, %c0_4] : memref<1x4xf32, #tpu.memory_space<vmem>>, vector<1x4xf32>
    %5 = vector.broadcast %4 : vector<1x4xf32> to vector<256x4xf32>
    %6 = arith.addf %3, %5 : vector<256x4xf32>
    %cst = arith.constant 0.000000e+00 : f32
    %7 = vector.broadcast %cst : f32 to vector<256x4xf32>
    %8 = arith.cmpf oge, %6, %7 : vector<256x4xf32>
    %cst_5 = arith.constant 0.00999999977 : f32
    %9 = vector.broadcast %cst_5 : f32 to vector<256x4xf32>
    %10 = arith.mulf %9, %6 : vector<256x4xf32>
    %11 = arith.select %8, %6, %10 : vector<256x4xi1>, vector<256x4xf32>
    %c0_6 = arith.constant 0 : index
    %c0_7 = arith.constant 0 : index
    %12 = vector.load %arg4[%c0_6, %c0_7] : memref<256x4xf32, #tpu.memory_space<vmem>>, vector<256x4xf32>
    tpu.vector_store %arg4[%c0_6, %c0_7], %11 {strides = array<i32>} : memref<256x4xf32, #tpu.memory_space<vmem>>, vector<256x4xf32>,
    return
  }
  func.func @transform_0(%arg0: i32) -> (i32, i32) {
    %c0_i32 = arith.constant 0 : i32
    %c0_i32_0 = arith.constant 0 : i32
    return %arg0, %c0_i32 : i32, i32
  }
  func.func @transform_1(%arg0: i32) -> (i32, i32) {
    %c0_i32 = arith.constant 0 : i32
    %c0_i32_0 = arith.constant 0 : i32
    %c0_i32_1 = arith.constant 0 : i32
    return %c0_i32, %c0_i32_0 : i32, i32
  }
  func.func @transform_2(%arg0: i32) -> (i32, i32) {
    %c0_i32 = arith.constant 0 : i32
    %c0_i32_0 = arith.constant 0 : i32
    %c0_i32_1 = arith.constant 0 : i32
    return %c0_i32, %c0_i32_0 : i32, i32
  }
  func.func @transform_3(%arg0: i32) -> (i32, i32) {
    %c0_i32 = arith.constant 0 : i32
    %c0_i32_0 = arith.constant 0 : i32
    return %arg0, %c0_i32 : i32, i32
  }
}

module attributes {stable_mosaic.version = 11 : i64} {
  func.func @_heads_kernel(%arg0: i32, %arg1: memref<256x8xf32, #tpu.memory_space<vmem>>, %arg2: memref<8x9xbf16, #tpu.memory_space<vmem>>, %arg3: memref<1x9xf32, #tpu.memory_space<vmem>>, %arg4: memref<8x9xbf16, #tpu.memory_space<vmem>>, %arg5: memref<1x9xf32, #tpu.memory_space<vmem>>, %arg6: memref<256x9xf32, #tpu.memory_space<vmem>>, %arg7: memref<256x9xf32, #tpu.memory_space<vmem>>, %arg8: memref<256x9xf32, #tpu.memory_space<vmem>>, %arg9: memref<256x9xf32, #tpu.memory_space<vmem>>) attributes {dimension_semantics = [#tpu.dimension_semantics<parallel>], iteration_bounds = array<i64: 2>, scalar_prefetch = 0 : i64, scratch_operands = 0 : i64, tpu.core_type = #tpu.core_type<tc>, window_params = [{transform_indices = @transform_0, window_bounds = array<i64: 256, 8>}, {pipeline_mode = #tpu.pipeline_mode<synchronous>, transform_indices = @transform_1, window_bounds = array<i64: 8, 9>}, {pipeline_mode = #tpu.pipeline_mode<synchronous>, transform_indices = @transform_2, window_bounds = array<i64: 1, 9>}, {pipeline_mode = #tpu.pipeline_mode<synchronous>, transform_indices = @transform_3, window_bounds = array<i64: 8, 9>}, {pipeline_mode = #tpu.pipeline_mode<synchronous>, transform_indices = @transform_4, window_bounds = array<i64: 1, 9>}, {transform_indices = @transform_5, window_bounds = array<i64: 256, 9>}, {transform_indices = @transform_6, window_bounds = array<i64: 256, 9>}, {transform_indices = @transform_7, window_bounds = array<i64: 256, 9>}, {transform_indices = @transform_8, window_bounds = array<i64: 256, 9>}]} {
    %c0 = arith.constant 0 : index
    %c0_0 = arith.constant 0 : index
    %0 = vector.load %arg1[%c0, %c0_0] : memref<256x8xf32, #tpu.memory_space<vmem>>, vector<256x8xf32>
    %1 = arith.truncf %0 : vector<256x8xf32> to vector<256x8xbf16>
    %c0_1 = arith.constant 0 : index
    %c0_2 = arith.constant 0 : index
    %2 = vector.load %arg2[%c0_1, %c0_2] : memref<8x9xbf16, #tpu.memory_space<vmem>>, vector<8x9xbf16>
    %cst = arith.constant dense<0.000000e+00> : vector<256x9xf32>
    %3 = tpu.matmul %1, %2, %cst {dimension_numbers = #tpu.dot_dimension_numbers<[1], [0], [0], [1], [0, 0, 1, 1], [], []>} : vector<256x8xbf16>, vector<8x9xbf16>, vector<256x9xf32> -> vector<256x9xf32>
    %c0_3 = arith.constant 0 : index
    %c0_4 = arith.constant 0 : index
    %4 = vector.load %arg3[%c0_3, %c0_4] : memref<1x9xf32, #tpu.memory_space<vmem>>, vector<1x9xf32>
    %5 = vector.broadcast %4 : vector<1x9xf32> to vector<256x9xf32>
    %6 = arith.addf %3, %5 : vector<256x9xf32>
    %c0_5 = arith.constant 0 : index
    %c0_6 = arith.constant 0 : index
    %7 = vector.load %arg4[%c0_5, %c0_6] : memref<8x9xbf16, #tpu.memory_space<vmem>>, vector<8x9xbf16>
    %cst_7 = arith.constant dense<0.000000e+00> : vector<256x9xf32>
    %8 = tpu.matmul %1, %7, %cst_7 {dimension_numbers = #tpu.dot_dimension_numbers<[1], [0], [0], [1], [0, 0, 1, 1], [], []>} : vector<256x8xbf16>, vector<8x9xbf16>, vector<256x9xf32> -> vector<256x9xf32>
    %c0_8 = arith.constant 0 : index
    %c0_9 = arith.constant 0 : index
    %9 = vector.load %arg5[%c0_8, %c0_9] : memref<1x9xf32, #tpu.memory_space<vmem>>, vector<1x9xf32>
    %10 = vector.broadcast %9 : vector<1x9xf32> to vector<256x9xf32>
    %11 = arith.addf %8, %10 : vector<256x9xf32>
    %c0_10 = arith.constant 0 : index
    %c0_11 = arith.constant 0 : index
    %12 = vector.load %arg7[%c0_10, %c0_11] : memref<256x9xf32, #tpu.memory_space<vmem>>, vector<256x9xf32>
    tpu.vector_store %arg7[%c0_10, %c0_11], %6 {strides = array<i32>} : memref<256x9xf32, #tpu.memory_space<vmem>>, vector<256x9xf32>,
    %c0_12 = arith.constant 0 : index
    %c0_13 = arith.constant 0 : index
    %13 = vector.load %arg8[%c0_12, %c0_13] : memref<256x9xf32, #tpu.memory_space<vmem>>, vector<256x9xf32>
    tpu.vector_store %arg8[%c0_12, %c0_13], %11 {strides = array<i32>} : memref<256x9xf32, #tpu.memory_space<vmem>>, vector<256x9xf32>,
    %cst_14 = arith.constant 5.000000e-01 : f32
    %14 = vector.broadcast %cst_14 : f32 to vector<256x9xf32>
    %15 = arith.mulf %14, %11 : vector<256x9xf32>
    %16 = math.exp %15 : vector<256x9xf32>
    %c0_15 = arith.constant 0 : index
    %c0_16 = arith.constant 0 : index
    %17 = vector.load %arg6[%c0_15, %c0_16] : memref<256x9xf32, #tpu.memory_space<vmem>>, vector<256x9xf32>
    %18 = arith.mulf %16, %17 : vector<256x9xf32>
    %19 = arith.addf %6, %18 : vector<256x9xf32>
    %c0_17 = arith.constant 0 : index
    %c0_18 = arith.constant 0 : index
    %20 = vector.load %arg9[%c0_17, %c0_18] : memref<256x9xf32, #tpu.memory_space<vmem>>, vector<256x9xf32>
    tpu.vector_store %arg9[%c0_17, %c0_18], %19 {strides = array<i32>} : memref<256x9xf32, #tpu.memory_space<vmem>>, vector<256x9xf32>,
    return
  }
  func.func @transform_0(%arg0: i32) -> (i32, i32) {
    %c0_i32 = arith.constant 0 : i32
    %c0_i32_0 = arith.constant 0 : i32
    return %arg0, %c0_i32 : i32, i32
  }
  func.func @transform_1(%arg0: i32) -> (i32, i32) {
    %c0_i32 = arith.constant 0 : i32
    %c0_i32_0 = arith.constant 0 : i32
    %c0_i32_1 = arith.constant 0 : i32
    return %c0_i32, %c0_i32_0 : i32, i32
  }
  func.func @transform_2(%arg0: i32) -> (i32, i32) {
    %c0_i32 = arith.constant 0 : i32
    %c0_i32_0 = arith.constant 0 : i32
    %c0_i32_1 = arith.constant 0 : i32
    return %c0_i32, %c0_i32_0 : i32, i32
  }
  func.func @transform_3(%arg0: i32) -> (i32, i32) {
    %c0_i32 = arith.constant 0 : i32
    %c0_i32_0 = arith.constant 0 : i32
    %c0_i32_1 = arith.constant 0 : i32
    return %c0_i32, %c0_i32_0 : i32, i32
  }
  func.func @transform_4(%arg0: i32) -> (i32, i32) {
    %c0_i32 = arith.constant 0 : i32
    %c0_i32_0 = arith.constant 0 : i32
    %c0_i32_1 = arith.constant 0 : i32
    return %c0_i32, %c0_i32_0 : i32, i32
  }
  func.func @transform_5(%arg0: i32) -> (i32, i32) {
    %c0_i32 = arith.constant 0 : i32
    %c0_i32_0 = arith.constant 0 : i32
    return %arg0, %c0_i32 : i32, i32
  }
  func.func @transform_6(%arg0: i32) -> (i32, i32) {
    %c0_i32 = arith.constant 0 : i32
    %c0_i32_0 = arith.constant 0 : i32
    return %arg0, %c0_i32 : i32, i32
  }
  func.func @transform_7(%arg0: i32) -> (i32, i32) {
    %c0_i32 = arith.constant 0 : i32
    %c0_i32_0 = arith.constant 0 : i32
    return %arg0, %c0_i32 : i32, i32
  }
  func.func @transform_8(%arg0: i32) -> (i32, i32) {
    %c0_i32 = arith.constant 0 : i32
    %c0_i32_0 = arith.constant 0 : i32
    return %arg0, %c0_i32 : i32, i32
  }
}

module attributes {stable_mosaic.version = 11 : i64} {
  func.func @_gemm_bias_stats_kernel(%arg0: i32, %arg1: memref<128x200xbf16, #tpu.memory_space<vmem>>, %arg2: memref<200x4xbf16, #tpu.memory_space<vmem>>, %arg3: memref<1x4xf32, #tpu.memory_space<vmem>>, %arg4: memref<128x4xf32, #tpu.memory_space<vmem>>, %arg5: memref<1x4xf32, #tpu.memory_space<vmem>>, %arg6: memref<1x4xf32, #tpu.memory_space<vmem>>) attributes {dimension_semantics = [#tpu.dimension_semantics<arbitrary>], iteration_bounds = array<i64: 1>, scalar_prefetch = 0 : i64, scratch_operands = 0 : i64, tpu.core_type = #tpu.core_type<tc>, window_params = [{transform_indices = @transform_0, window_bounds = array<i64: 128, 200>}, {pipeline_mode = #tpu.pipeline_mode<synchronous>, transform_indices = @transform_1, window_bounds = array<i64: 200, 4>}, {pipeline_mode = #tpu.pipeline_mode<synchronous>, transform_indices = @transform_2, window_bounds = array<i64: 1, 4>}, {transform_indices = @transform_3, window_bounds = array<i64: 128, 4>}, {pipeline_mode = #tpu.pipeline_mode<synchronous>, transform_indices = @transform_4, window_bounds = array<i64: 1, 4>}, {pipeline_mode = #tpu.pipeline_mode<synchronous>, transform_indices = @transform_5, window_bounds = array<i64: 1, 4>}]} {
    %c0 = arith.constant 0 : index
    %c0_0 = arith.constant 0 : index
    %0 = vector.load %arg1[%c0, %c0_0] : memref<128x200xbf16, #tpu.memory_space<vmem>>, vector<128x200xbf16>
    %c0_1 = arith.constant 0 : index
    %c0_2 = arith.constant 0 : index
    %1 = vector.load %arg2[%c0_1, %c0_2] : memref<200x4xbf16, #tpu.memory_space<vmem>>, vector<200x4xbf16>
    %cst = arith.constant dense<0.000000e+00> : vector<128x4xf32>
    %2 = tpu.matmul %0, %1, %cst {dimension_numbers = #tpu.dot_dimension_numbers<[1], [0], [0], [1], [0, 0, 1, 1], [], []>} : vector<128x200xbf16>, vector<200x4xbf16>, vector<128x4xf32> -> vector<128x4xf32>
    %c0_3 = arith.constant 0 : index
    %c0_4 = arith.constant 0 : index
    %3 = vector.load %arg3[%c0_3, %c0_4] : memref<1x4xf32, #tpu.memory_space<vmem>>, vector<1x4xf32>
    %4 = vector.broadcast %3 : vector<1x4xf32> to vector<128x4xf32>
    %5 = arith.addf %2, %4 : vector<128x4xf32>
    %c0_5 = arith.constant 0 : index
    %c0_6 = arith.constant 0 : index
    %6 = vector.load %arg4[%c0_5, %c0_6] : memref<128x4xf32, #tpu.memory_space<vmem>>, vector<128x4xf32>
    tpu.vector_store %arg4[%c0_5, %c0_6], %5 {strides = array<i32>} : memref<128x4xf32, #tpu.memory_space<vmem>>, vector<128x4xf32>,
    %c0_i32 = arith.constant 0 : i32
    %7 = arith.cmpi eq, %arg0, %c0_i32 : i32
    %8 = arith.extui %7 : i1 to i32
    %c0_i32_7 = arith.constant 0 : i32
    %9 = arith.cmpi ne, %8, %c0_i32_7 : i32
    scf.if %9 {
      %cst_18 = arith.constant 0.000000e+00 : f32
      %21 = vector.broadcast %cst_18 : f32 to vector<1x4xf32>
      %c0_19 = arith.constant 0 : index
      %c0_20 = arith.constant 0 : index
      %22 = vector.load %arg5[%c0_19, %c0_20] : memref<1x4xf32, #tpu.memory_space<vmem>>, vector<1x4xf32>
      tpu.vector_store %arg5[%c0_19, %c0_20], %21 {strides = array<i32>} : memref<1x4xf32, #tpu.memory_space<vmem>>, vector<1x4xf32>,
      %cst_21 = arith.constant 0.000000e+00 : f32
      %23 = vector.broadcast %cst_21 : f32 to vector<1x4xf32>
      %c0_22 = arith.constant 0 : index
      %c0_23 = arith.constant 0 : index
      %24 = vector.load %arg6[%c0_22, %c0_23] : memref<1x4xf32, #tpu.memory_space<vmem>>, vector<1x4xf32>
      tpu.vector_store %arg6[%c0_22, %c0_23], %23 {strides = array<i32>} : memref<1x4xf32, #tpu.memory_space<vmem>>, vector<1x4xf32>,
    } else {
    }
    %c0_8 = arith.constant 0 : index
    %c0_9 = arith.constant 0 : index
    %10 = vector.load %arg5[%c0_8, %c0_9] : memref<1x4xf32, #tpu.memory_space<vmem>>, vector<1x4xf32>
    %cst_10 = arith.constant dense<0.000000e+00> : vector<4xf32>
    %11 = vector.multi_reduction <add>, %5, %cst_10 [0] : vector<128x4xf32> to vector<4xf32>
    %12 = vector.shape_cast %11 : vector<4xf32> to vector<1x4xf32>
    %13 = arith.addf %10, %12 : vector<1x4xf32>
    %c0_11 = arith.constant 0 : index
    %c0_12 = arith.constant 0 : index
    %14 = vector.load %arg5[%c0_11, %c0_12] : memref<1x4xf32, #tpu.memory_space<vmem>>, vector<1x4xf32>
    tpu.vector_store %arg5[%c0_11, %c0_12], %13 {strides = array<i32>} : memref<1x4xf32, #tpu.memory_space<vmem>>, vector<1x4xf32>,
    %c0_13 = arith.constant 0 : index
    %c0_14 = arith.constant 0 : index
    %15 = vector.load %arg6[%c0_13, %c0_14] : memref<1x4xf32, #tpu.memory_space<vmem>>, vector<1x4xf32>
    %16 = arith.mulf %5, %5 : vector<128x4xf32>
    %cst_15 = arith.constant dense<0.000000e+00> : vector<4xf32>
    %17 = vector.multi_reduction <add>, %16, %cst_15 [0] : vector<128x4xf32> to vector<4xf32>
    %18 = vector.shape_cast %17 : vector<4xf32> to vector<1x4xf32>
    %19 = arith.addf %15, %18 : vector<1x4xf32>
    %c0_16 = arith.constant 0 : index
    %c0_17 = arith.constant 0 : index
    %20 = vector.load %arg6[%c0_16, %c0_17] : memref<1x4xf32, #tpu.memory_space<vmem>>, vector<1x4xf32>
    tpu.vector_store %arg6[%c0_16, %c0_17], %19 {strides = array<i32>} : memref<1x4xf32, #tpu.memory_space<vmem>>, vector<1x4xf32>,
    return
  }
  func.func @transform_0(%arg0: i32) -> (i32, i32) {
    %c0_i32 = arith.constant 0 : i32
    %c0_i32_0 = arith.constant 0 : i32
    return %arg0, %c0_i32 : i32, i32
  }
  func.func @transform_1(%arg0: i32) -> (i32, i32) {
    %c0_i32 = arith.constant 0 : i32
    %c0_i32_0 = arith.constant 0 : i32
    %c0_i32_1 = arith.constant 0 : i32
    return %c0_i32, %c0_i32_0 : i32, i32
  }
  func.func @transform_2(%arg0: i32) -> (i32, i32) {
    %c0_i32 = arith.constant 0 : i32
    %c0_i32_0 = arith.constant 0 : i32
    %c0_i32_1 = arith.constant 0 : i32
    return %c0_i32, %c0_i32_0 : i32, i32
  }
  func.func @transform_3(%arg0: i32) -> (i32, i32) {
    %c0_i32 = arith.constant 0 : i32
    %c0_i32_0 = arith.constant 0 : i32
    return %arg0, %c0_i32 : i32, i32
  }
  func.func @transform_4(%arg0: i32) -> (i32, i32) {
    %c0_i32 = arith.constant 0 : i32
    %c0_i32_0 = arith.constant 0 : i32
    %c0_i32_1 = arith.constant 0 : i32
    return %c0_i32, %c0_i32_0 : i32, i32
  }
  func.func @transform_5(%arg0: i32) -> (i32, i32) {
    %c0_i32 = arith.constant 0 : i32
    %c0_i32_0 = arith.constant 0 : i32
    %c0_i32_1 = arith.constant 0 : i32
    return %c0_i32, %c0_i32_0 : i32, i32
  }
}

module attributes {stable_mosaic.version = 11 : i64} {
  func.func @_gemm_bias_stats_kernel(%arg0: i32, %arg1: memref<32x100xbf16, #tpu.memory_space<vmem>>, %arg2: memref<100x8xbf16, #tpu.memory_space<vmem>>, %arg3: memref<1x8xf32, #tpu.memory_space<vmem>>, %arg4: memref<32x8xf32, #tpu.memory_space<vmem>>, %arg5: memref<1x8xf32, #tpu.memory_space<vmem>>, %arg6: memref<1x8xf32, #tpu.memory_space<vmem>>) attributes {dimension_semantics = [#tpu.dimension_semantics<arbitrary>], iteration_bounds = array<i64: 1>, scalar_prefetch = 0 : i64, scratch_operands = 0 : i64, tpu.core_type = #tpu.core_type<tc>, window_params = [{transform_indices = @transform_0, window_bounds = array<i64: 32, 100>}, {pipeline_mode = #tpu.pipeline_mode<synchronous>, transform_indices = @transform_1, window_bounds = array<i64: 100, 8>}, {pipeline_mode = #tpu.pipeline_mode<synchronous>, transform_indices = @transform_2, window_bounds = array<i64: 1, 8>}, {transform_indices = @transform_3, window_bounds = array<i64: 32, 8>}, {pipeline_mode = #tpu.pipeline_mode<synchronous>, transform_indices = @transform_4, window_bounds = array<i64: 1, 8>}, {pipeline_mode = #tpu.pipeline_mode<synchronous>, transform_indices = @transform_5, window_bounds = array<i64: 1, 8>}]} {
    %c0 = arith.constant 0 : index
    %c0_0 = arith.constant 0 : index
    %0 = vector.load %arg1[%c0, %c0_0] : memref<32x100xbf16, #tpu.memory_space<vmem>>, vector<32x100xbf16>
    %c0_1 = arith.constant 0 : index
    %c0_2 = arith.constant 0 : index
    %1 = vector.load %arg2[%c0_1, %c0_2] : memref<100x8xbf16, #tpu.memory_space<vmem>>, vector<100x8xbf16>
    %cst = arith.constant dense<0.000000e+00> : vector<32x8xf32>
    %2 = tpu.matmul %0, %1, %cst {dimension_numbers = #tpu.dot_dimension_numbers<[1], [0], [0], [1], [0, 0, 1, 1], [], []>} : vector<32x100xbf16>, vector<100x8xbf16>, vector<32x8xf32> -> vector<32x8xf32>
    %c0_3 = arith.constant 0 : index
    %c0_4 = arith.constant 0 : index
    %3 = vector.load %arg3[%c0_3, %c0_4] : memref<1x8xf32, #tpu.memory_space<vmem>>, vector<1x8xf32>
    %4 = vector.broadcast %3 : vector<1x8xf32> to vector<32x8xf32>
    %5 = arith.addf %2, %4 : vector<32x8xf32>
    %c0_5 = arith.constant 0 : index
    %c0_6 = arith.constant 0 : index
    %6 = vector.load %arg4[%c0_5, %c0_6] : memref<32x8xf32, #tpu.memory_space<vmem>>, vector<32x8xf32>
    tpu.vector_store %arg4[%c0_5, %c0_6], %5 {strides = array<i32>} : memref<32x8xf32, #tpu.memory_space<vmem>>, vector<32x8xf32>,
    %c0_i32 = arith.constant 0 : i32
    %7 = arith.cmpi eq, %arg0, %c0_i32 : i32
    %8 = arith.extui %7 : i1 to i32
    %c0_i32_7 = arith.constant 0 : i32
    %9 = arith.cmpi ne, %8, %c0_i32_7 : i32
    scf.if %9 {
      %cst_18 = arith.constant 0.000000e+00 : f32
      %21 = vector.broadcast %cst_18 : f32 to vector<1x8xf32>
      %c0_19 = arith.constant 0 : index
      %c0_20 = arith.constant 0 : index
      %22 = vector.load %arg5[%c0_19, %c0_20] : memref<1x8xf32, #tpu.memory_space<vmem>>, vector<1x8xf32>
      tpu.vector_store %arg5[%c0_19, %c0_20], %21 {strides = array<i32>} : memref<1x8xf32, #tpu.memory_space<vmem>>, vector<1x8xf32>,
      %cst_21 = arith.constant 0.000000e+00 : f32
      %23 = vector.broadcast %cst_21 : f32 to vector<1x8xf32>
      %c0_22 = arith.constant 0 : index
      %c0_23 = arith.constant 0 : index
      %24 = vector.load %arg6[%c0_22, %c0_23] : memref<1x8xf32, #tpu.memory_space<vmem>>, vector<1x8xf32>
      tpu.vector_store %arg6[%c0_22, %c0_23], %23 {strides = array<i32>} : memref<1x8xf32, #tpu.memory_space<vmem>>, vector<1x8xf32>,
    } else {
    }
    %c0_8 = arith.constant 0 : index
    %c0_9 = arith.constant 0 : index
    %10 = vector.load %arg5[%c0_8, %c0_9] : memref<1x8xf32, #tpu.memory_space<vmem>>, vector<1x8xf32>
    %cst_10 = arith.constant dense<0.000000e+00> : vector<8xf32>
    %11 = vector.multi_reduction <add>, %5, %cst_10 [0] : vector<32x8xf32> to vector<8xf32>
    %12 = vector.shape_cast %11 : vector<8xf32> to vector<1x8xf32>
    %13 = arith.addf %10, %12 : vector<1x8xf32>
    %c0_11 = arith.constant 0 : index
    %c0_12 = arith.constant 0 : index
    %14 = vector.load %arg5[%c0_11, %c0_12] : memref<1x8xf32, #tpu.memory_space<vmem>>, vector<1x8xf32>
    tpu.vector_store %arg5[%c0_11, %c0_12], %13 {strides = array<i32>} : memref<1x8xf32, #tpu.memory_space<vmem>>, vector<1x8xf32>,
    %c0_13 = arith.constant 0 : index
    %c0_14 = arith.constant 0 : index
    %15 = vector.load %arg6[%c0_13, %c0_14] : memref<1x8xf32, #tpu.memory_space<vmem>>, vector<1x8xf32>
    %16 = arith.mulf %5, %5 : vector<32x8xf32>
    %cst_15 = arith.constant dense<0.000000e+00> : vector<8xf32>
    %17 = vector.multi_reduction <add>, %16, %cst_15 [0] : vector<32x8xf32> to vector<8xf32>
    %18 = vector.shape_cast %17 : vector<8xf32> to vector<1x8xf32>
    %19 = arith.addf %15, %18 : vector<1x8xf32>
    %c0_16 = arith.constant 0 : index
    %c0_17 = arith.constant 0 : index
    %20 = vector.load %arg6[%c0_16, %c0_17] : memref<1x8xf32, #tpu.memory_space<vmem>>, vector<1x8xf32>
    tpu.vector_store %arg6[%c0_16, %c0_17], %19 {strides = array<i32>} : memref<1x8xf32, #tpu.memory_space<vmem>>, vector<1x8xf32>,
    return
  }
  func.func @transform_0(%arg0: i32) -> (i32, i32) {
    %c0_i32 = arith.constant 0 : i32
    %c0_i32_0 = arith.constant 0 : i32
    return %arg0, %c0_i32 : i32, i32
  }
  func.func @transform_1(%arg0: i32) -> (i32, i32) {
    %c0_i32 = arith.constant 0 : i32
    %c0_i32_0 = arith.constant 0 : i32
    %c0_i32_1 = arith.constant 0 : i32
    return %c0_i32, %c0_i32_0 : i32, i32
  }
  func.func @transform_2(%arg0: i32) -> (i32, i32) {
    %c0_i32 = arith.constant 0 : i32
    %c0_i32_0 = arith.constant 0 : i32
    %c0_i32_1 = arith.constant 0 : i32
    return %c0_i32, %c0_i32_0 : i32, i32
  }
  func.func @transform_3(%arg0: i32) -> (i32, i32) {
    %c0_i32 = arith.constant 0 : i32
    %c0_i32_0 = arith.constant 0 : i32
    return %arg0, %c0_i32 : i32, i32
  }
  func.func @transform_4(%arg0: i32) -> (i32, i32) {
    %c0_i32 = arith.constant 0 : i32
    %c0_i32_0 = arith.constant 0 : i32
    %c0_i32_1 = arith.constant 0 : i32
    return %c0_i32, %c0_i32_0 : i32, i32
  }
  func.func @transform_5(%arg0: i32) -> (i32, i32) {
    %c0_i32 = arith.constant 0 : i32
    %c0_i32_0 = arith.constant 0 : i32
    %c0_i32_1 = arith.constant 0 : i32
    return %c0_i32, %c0_i32_0 : i32, i32
  }
}

module attributes {stable_mosaic.version = 11 : i64} {
  func.func @_gemm_bias_stats_kernel(%arg0: i32, %arg1: memref<256x100xbf16, #tpu.memory_space<vmem>>, %arg2: memref<100x4xbf16, #tpu.memory_space<vmem>>, %arg3: memref<1x4xf32, #tpu.memory_space<vmem>>, %arg4: memref<256x4xf32, #tpu.memory_space<vmem>>, %arg5: memref<1x4xf32, #tpu.memory_space<vmem>>, %arg6: memref<1x4xf32, #tpu.memory_space<vmem>>) attributes {dimension_semantics = [#tpu.dimension_semantics<arbitrary>], iteration_bounds = array<i64: 2>, scalar_prefetch = 0 : i64, scratch_operands = 0 : i64, tpu.core_type = #tpu.core_type<tc>, window_params = [{transform_indices = @transform_0, window_bounds = array<i64: 256, 100>}, {pipeline_mode = #tpu.pipeline_mode<synchronous>, transform_indices = @transform_1, window_bounds = array<i64: 100, 4>}, {pipeline_mode = #tpu.pipeline_mode<synchronous>, transform_indices = @transform_2, window_bounds = array<i64: 1, 4>}, {transform_indices = @transform_3, window_bounds = array<i64: 256, 4>}, {pipeline_mode = #tpu.pipeline_mode<synchronous>, transform_indices = @transform_4, window_bounds = array<i64: 1, 4>}, {pipeline_mode = #tpu.pipeline_mode<synchronous>, transform_indices = @transform_5, window_bounds = array<i64: 1, 4>}]} {
    %c0 = arith.constant 0 : index
    %c0_0 = arith.constant 0 : index
    %0 = vector.load %arg1[%c0, %c0_0] : memref<256x100xbf16, #tpu.memory_space<vmem>>, vector<256x100xbf16>
    %c0_1 = arith.constant 0 : index
    %c0_2 = arith.constant 0 : index
    %1 = vector.load %arg2[%c0_1, %c0_2] : memref<100x4xbf16, #tpu.memory_space<vmem>>, vector<100x4xbf16>
    %cst = arith.constant dense<0.000000e+00> : vector<256x4xf32>
    %2 = tpu.matmul %0, %1, %cst {dimension_numbers = #tpu.dot_dimension_numbers<[1], [0], [0], [1], [0, 0, 1, 1], [], []>} : vector<256x100xbf16>, vector<100x4xbf16>, vector<256x4xf32> -> vector<256x4xf32>
    %c0_3 = arith.constant 0 : index
    %c0_4 = arith.constant 0 : index
    %3 = vector.load %arg3[%c0_3, %c0_4] : memref<1x4xf32, #tpu.memory_space<vmem>>, vector<1x4xf32>
    %4 = vector.broadcast %3 : vector<1x4xf32> to vector<256x4xf32>
    %5 = arith.addf %2, %4 : vector<256x4xf32>
    %c0_5 = arith.constant 0 : index
    %c0_6 = arith.constant 0 : index
    %6 = vector.load %arg4[%c0_5, %c0_6] : memref<256x4xf32, #tpu.memory_space<vmem>>, vector<256x4xf32>
    tpu.vector_store %arg4[%c0_5, %c0_6], %5 {strides = array<i32>} : memref<256x4xf32, #tpu.memory_space<vmem>>, vector<256x4xf32>,
    %c0_i32 = arith.constant 0 : i32
    %7 = arith.cmpi eq, %arg0, %c0_i32 : i32
    %8 = arith.extui %7 : i1 to i32
    %c0_i32_7 = arith.constant 0 : i32
    %9 = arith.cmpi ne, %8, %c0_i32_7 : i32
    scf.if %9 {
      %cst_18 = arith.constant 0.000000e+00 : f32
      %21 = vector.broadcast %cst_18 : f32 to vector<1x4xf32>
      %c0_19 = arith.constant 0 : index
      %c0_20 = arith.constant 0 : index
      %22 = vector.load %arg5[%c0_19, %c0_20] : memref<1x4xf32, #tpu.memory_space<vmem>>, vector<1x4xf32>
      tpu.vector_store %arg5[%c0_19, %c0_20], %21 {strides = array<i32>} : memref<1x4xf32, #tpu.memory_space<vmem>>, vector<1x4xf32>,
      %cst_21 = arith.constant 0.000000e+00 : f32
      %23 = vector.broadcast %cst_21 : f32 to vector<1x4xf32>
      %c0_22 = arith.constant 0 : index
      %c0_23 = arith.constant 0 : index
      %24 = vector.load %arg6[%c0_22, %c0_23] : memref<1x4xf32, #tpu.memory_space<vmem>>, vector<1x4xf32>
      tpu.vector_store %arg6[%c0_22, %c0_23], %23 {strides = array<i32>} : memref<1x4xf32, #tpu.memory_space<vmem>>, vector<1x4xf32>,
    } else {
    }
    %c0_8 = arith.constant 0 : index
    %c0_9 = arith.constant 0 : index
    %10 = vector.load %arg5[%c0_8, %c0_9] : memref<1x4xf32, #tpu.memory_space<vmem>>, vector<1x4xf32>
    %cst_10 = arith.constant dense<0.000000e+00> : vector<4xf32>
    %11 = vector.multi_reduction <add>, %5, %cst_10 [0] : vector<256x4xf32> to vector<4xf32>
    %12 = vector.shape_cast %11 : vector<4xf32> to vector<1x4xf32>
    %13 = arith.addf %10, %12 : vector<1x4xf32>
    %c0_11 = arith.constant 0 : index
    %c0_12 = arith.constant 0 : index
    %14 = vector.load %arg5[%c0_11, %c0_12] : memref<1x4xf32, #tpu.memory_space<vmem>>, vector<1x4xf32>
    tpu.vector_store %arg5[%c0_11, %c0_12], %13 {strides = array<i32>} : memref<1x4xf32, #tpu.memory_space<vmem>>, vector<1x4xf32>,
    %c0_13 = arith.constant 0 : index
    %c0_14 = arith.constant 0 : index
    %15 = vector.load %arg6[%c0_13, %c0_14] : memref<1x4xf32, #tpu.memory_space<vmem>>, vector<1x4xf32>
    %16 = arith.mulf %5, %5 : vector<256x4xf32>
    %cst_15 = arith.constant dense<0.000000e+00> : vector<4xf32>
    %17 = vector.multi_reduction <add>, %16, %cst_15 [0] : vector<256x4xf32> to vector<4xf32>
    %18 = vector.shape_cast %17 : vector<4xf32> to vector<1x4xf32>
    %19 = arith.addf %15, %18 : vector<1x4xf32>
    %c0_16 = arith.constant 0 : index
    %c0_17 = arith.constant 0 : index
    %20 = vector.load %arg6[%c0_16, %c0_17] : memref<1x4xf32, #tpu.memory_space<vmem>>, vector<1x4xf32>
    tpu.vector_store %arg6[%c0_16, %c0_17], %19 {strides = array<i32>} : memref<1x4xf32, #tpu.memory_space<vmem>>, vector<1x4xf32>,
    return
  }
  func.func @transform_0(%arg0: i32) -> (i32, i32) {
    %c0_i32 = arith.constant 0 : i32
    %c0_i32_0 = arith.constant 0 : i32
    return %arg0, %c0_i32 : i32, i32
  }
  func.func @transform_1(%arg0: i32) -> (i32, i32) {
    %c0_i32 = arith.constant 0 : i32
    %c0_i32_0 = arith.constant 0 : i32
    %c0_i32_1 = arith.constant 0 : i32
    return %c0_i32, %c0_i32_0 : i32, i32
  }
  func.func @transform_2(%arg0: i32) -> (i32, i32) {
    %c0_i32 = arith.constant 0 : i32
    %c0_i32_0 = arith.constant 0 : i32
    %c0_i32_1 = arith.constant 0 : i32
    return %c0_i32, %c0_i32_0 : i32, i32
  }
  func.func @transform_3(%arg0: i32) -> (i32, i32) {
    %c0_i32 = arith.constant 0 : i32
    %c0_i32_0 = arith.constant 0 : i32
    return %arg0, %c0_i32 : i32, i32
  }
  func.func @transform_4(%arg0: i32) -> (i32, i32) {
    %c0_i32 = arith.constant 0 : i32
    %c0_i32_0 = arith.constant 0 : i32
    %c0_i32_1 = arith.constant 0 : i32
    return %c0_i32, %c0_i32_0 : i32, i32
  }
  func.func @transform_5(%arg0: i32) -> (i32, i32) {
    %c0_i32 = arith.constant 0 : i32
    %c0_i32_0 = arith.constant 0 : i32
    %c0_i32_1 = arith.constant 0 : i32
    return %c0_i32, %c0_i32_0 : i32, i32
  }
}

module attributes {stable_mosaic.version = 11 : i64} {
  func.func @_gemm_bias_act_kernel(%arg0: i32, %arg1: memref<256x8xf32, #tpu.memory_space<vmem>>, %arg2: memref<8x1xbf16, #tpu.memory_space<vmem>>, %arg3: memref<1x1xf32, #tpu.memory_space<vmem>>, %arg4: memref<256x1xf32, #tpu.memory_space<vmem>>) attributes {dimension_semantics = [#tpu.dimension_semantics<parallel>], iteration_bounds = array<i64: 2>, scalar_prefetch = 0 : i64, scratch_operands = 0 : i64, tpu.core_type = #tpu.core_type<tc>, window_params = [{transform_indices = @transform_0, window_bounds = array<i64: 256, 8>}, {pipeline_mode = #tpu.pipeline_mode<synchronous>, transform_indices = @transform_1, window_bounds = array<i64: 8, 1>}, {pipeline_mode = #tpu.pipeline_mode<synchronous>, transform_indices = @transform_2, window_bounds = array<i64: 1, 1>}, {transform_indices = @transform_3, window_bounds = array<i64: 256, 1>}]} {
    %c0 = arith.constant 0 : index
    %c0_0 = arith.constant 0 : index
    %0 = vector.load %arg1[%c0, %c0_0] : memref<256x8xf32, #tpu.memory_space<vmem>>, vector<256x8xf32>
    %1 = arith.truncf %0 : vector<256x8xf32> to vector<256x8xbf16>
    %c0_1 = arith.constant 0 : index
    %c0_2 = arith.constant 0 : index
    %2 = vector.load %arg2[%c0_1, %c0_2] : memref<8x1xbf16, #tpu.memory_space<vmem>>, vector<8x1xbf16>
    %cst = arith.constant dense<0.000000e+00> : vector<256x1xf32>
    %3 = tpu.matmul %1, %2, %cst {dimension_numbers = #tpu.dot_dimension_numbers<[1], [0], [0], [1], [0, 0, 1, 1], [], []>} : vector<256x8xbf16>, vector<8x1xbf16>, vector<256x1xf32> -> vector<256x1xf32>
    %c0_3 = arith.constant 0 : index
    %c0_4 = arith.constant 0 : index
    %4 = vector.load %arg3[%c0_3, %c0_4] : memref<1x1xf32, #tpu.memory_space<vmem>>, vector<1x1xf32>
    %5 = vector.broadcast %4 : vector<1x1xf32> to vector<256x1xf32>
    %6 = arith.addf %3, %5 : vector<256x1xf32>
    %c0_5 = arith.constant 0 : index
    %c0_6 = arith.constant 0 : index
    %7 = vector.load %arg4[%c0_5, %c0_6] : memref<256x1xf32, #tpu.memory_space<vmem>>, vector<256x1xf32>
    tpu.vector_store %arg4[%c0_5, %c0_6], %6 {strides = array<i32>} : memref<256x1xf32, #tpu.memory_space<vmem>>, vector<256x1xf32>,
    return
  }
  func.func @transform_0(%arg0: i32) -> (i32, i32) {
    %c0_i32 = arith.constant 0 : i32
    %c0_i32_0 = arith.constant 0 : i32
    return %arg0, %c0_i32 : i32, i32
  }
  func.func @transform_1(%arg0: i32) -> (i32, i32) {
    %c0_i32 = arith.constant 0 : i32
    %c0_i32_0 = arith.constant 0 : i32
    %c0_i32_1 = arith.constant 0 : i32
    return %c0_i32, %c0_i32_0 : i32, i32
  }
  func.func @transform_2(%arg0: i32) -> (i32, i32) {
    %c0_i32 = arith.constant 0 : i32
    %c0_i32_0 = arith.constant 0 : i32
    %c0_i32_1 = arith.constant 0 : i32
    return %c0_i32, %c0_i32_0 : i32, i32
  }
  func.func @transform_3(%arg0: i32) -> (i32, i32) {
    %c0_i32 = arith.constant 0 : i32
    %c0_i32_0 = arith.constant 0 : i32
    return %arg0, %c0_i32 : i32, i32
  }
}

module attributes {stable_mosaic.version = 11 : i64} {
  func.func @_gemm_bias_stats_kernel(%arg0: i32, %arg1: memref<256x8xf32, #tpu.memory_space<vmem>>, %arg2: memref<8x64xbf16, #tpu.memory_space<vmem>>, %arg3: memref<1x64xf32, #tpu.memory_space<vmem>>, %arg4: memref<256x64xf32, #tpu.memory_space<vmem>>, %arg5: memref<1x64xf32, #tpu.memory_space<vmem>>, %arg6: memref<1x64xf32, #tpu.memory_space<vmem>>) attributes {dimension_semantics = [#tpu.dimension_semantics<arbitrary>], iteration_bounds = array<i64: 2>, scalar_prefetch = 0 : i64, scratch_operands = 0 : i64, tpu.core_type = #tpu.core_type<tc>, window_params = [{transform_indices = @transform_0, window_bounds = array<i64: 256, 8>}, {pipeline_mode = #tpu.pipeline_mode<synchronous>, transform_indices = @transform_1, window_bounds = array<i64: 8, 64>}, {pipeline_mode = #tpu.pipeline_mode<synchronous>, transform_indices = @transform_2, window_bounds = array<i64: 1, 64>}, {transform_indices = @transform_3, window_bounds = array<i64: 256, 64>}, {pipeline_mode = #tpu.pipeline_mode<synchronous>, transform_indices = @transform_4, window_bounds = array<i64: 1, 64>}, {pipeline_mode = #tpu.pipeline_mode<synchronous>, transform_indices = @transform_5, window_bounds = array<i64: 1, 64>}]} {
    %c0 = arith.constant 0 : index
    %c0_0 = arith.constant 0 : index
    %0 = vector.load %arg1[%c0, %c0_0] : memref<256x8xf32, #tpu.memory_space<vmem>>, vector<256x8xf32>
    %1 = arith.truncf %0 : vector<256x8xf32> to vector<256x8xbf16>
    %c0_1 = arith.constant 0 : index
    %c0_2 = arith.constant 0 : index
    %2 = vector.load %arg2[%c0_1, %c0_2] : memref<8x64xbf16, #tpu.memory_space<vmem>>, vector<8x64xbf16>
    %cst = arith.constant dense<0.000000e+00> : vector<256x64xf32>
    %3 = tpu.matmul %1, %2, %cst {dimension_numbers = #tpu.dot_dimension_numbers<[1], [0], [0], [1], [0, 0, 1, 1], [], []>} : vector<256x8xbf16>, vector<8x64xbf16>, vector<256x64xf32> -> vector<256x64xf32>
    %c0_3 = arith.constant 0 : index
    %c0_4 = arith.constant 0 : index
    %4 = vector.load %arg3[%c0_3, %c0_4] : memref<1x64xf32, #tpu.memory_space<vmem>>, vector<1x64xf32>
    %5 = vector.broadcast %4 : vector<1x64xf32> to vector<256x64xf32>
    %6 = arith.addf %3, %5 : vector<256x64xf32>
    %c0_5 = arith.constant 0 : index
    %c0_6 = arith.constant 0 : index
    %7 = vector.load %arg4[%c0_5, %c0_6] : memref<256x64xf32, #tpu.memory_space<vmem>>, vector<256x64xf32>
    tpu.vector_store %arg4[%c0_5, %c0_6], %6 {strides = array<i32>} : memref<256x64xf32, #tpu.memory_space<vmem>>, vector<256x64xf32>,
    %c0_i32 = arith.constant 0 : i32
    %8 = arith.cmpi eq, %arg0, %c0_i32 : i32
    %9 = arith.extui %8 : i1 to i32
    %c0_i32_7 = arith.constant 0 : i32
    %10 = arith.cmpi ne, %9, %c0_i32_7 : i32
    scf.if %10 {
      %cst_18 = arith.constant 0.000000e+00 : f32
      %22 = vector.broadcast %cst_18 : f32 to vector<1x64xf32>
      %c0_19 = arith.constant 0 : index
      %c0_20 = arith.constant 0 : index
      %23 = vector.load %arg5[%c0_19, %c0_20] : memref<1x64xf32, #tpu.memory_space<vmem>>, vector<1x64xf32>
      tpu.vector_store %arg5[%c0_19, %c0_20], %22 {strides = array<i32>} : memref<1x64xf32, #tpu.memory_space<vmem>>, vector<1x64xf32>,
      %cst_21 = arith.constant 0.000000e+00 : f32
      %24 = vector.broadcast %cst_21 : f32 to vector<1x64xf32>
      %c0_22 = arith.constant 0 : index
      %c0_23 = arith.constant 0 : index
      %25 = vector.load %arg6[%c0_22, %c0_23] : memref<1x64xf32, #tpu.memory_space<vmem>>, vector<1x64xf32>
      tpu.vector_store %arg6[%c0_22, %c0_23], %24 {strides = array<i32>} : memref<1x64xf32, #tpu.memory_space<vmem>>, vector<1x64xf32>,
    } else {
    }
    %c0_8 = arith.constant 0 : index
    %c0_9 = arith.constant 0 : index
    %11 = vector.load %arg5[%c0_8, %c0_9] : memref<1x64xf32, #tpu.memory_space<vmem>>, vector<1x64xf32>
    %cst_10 = arith.constant dense<0.000000e+00> : vector<64xf32>
    %12 = vector.multi_reduction <add>, %6, %cst_10 [0] : vector<256x64xf32> to vector<64xf32>
    %13 = vector.shape_cast %12 : vector<64xf32> to vector<1x64xf32>
    %14 = arith.addf %11, %13 : vector<1x64xf32>
    %c0_11 = arith.constant 0 : index
    %c0_12 = arith.constant 0 : index
    %15 = vector.load %arg5[%c0_11, %c0_12] : memref<1x64xf32, #tpu.memory_space<vmem>>, vector<1x64xf32>
    tpu.vector_store %arg5[%c0_11, %c0_12], %14 {strides = array<i32>} : memref<1x64xf32, #tpu.memory_space<vmem>>, vector<1x64xf32>,
    %c0_13 = arith.constant 0 : index
    %c0_14 = arith.constant 0 : index
    %16 = vector.load %arg6[%c0_13, %c0_14] : memref<1x64xf32, #tpu.memory_space<vmem>>, vector<1x64xf32>
    %17 = arith.mulf %6, %6 : vector<256x64xf32>
    %cst_15 = arith.constant dense<0.000000e+00> : vector<64xf32>
    %18 = vector.multi_reduction <add>, %17, %cst_15 [0] : vector<256x64xf32> to vector<64xf32>
    %19 = vector.shape_cast %18 : vector<64xf32> to vector<1x64xf32>
    %20 = arith.addf %16, %19 : vector<1x64xf32>
    %c0_16 = arith.constant 0 : index
    %c0_17 = arith.constant 0 : index
    %21 = vector.load %arg6[%c0_16, %c0_17] : memref<1x64xf32, #tpu.memory_space<vmem>>, vector<1x64xf32>
    tpu.vector_store %arg6[%c0_16, %c0_17], %20 {strides = array<i32>} : memref<1x64xf32, #tpu.memory_space<vmem>>, vector<1x64xf32>,
    return
  }
  func.func @transform_0(%arg0: i32) -> (i32, i32) {
    %c0_i32 = arith.constant 0 : i32
    %c0_i32_0 = arith.constant 0 : i32
    return %arg0, %c0_i32 : i32, i32
  }
  func.func @transform_1(%arg0: i32) -> (i32, i32) {
    %c0_i32 = arith.constant 0 : i32
    %c0_i32_0 = arith.constant 0 : i32
    %c0_i32_1 = arith.constant 0 : i32
    return %c0_i32, %c0_i32_0 : i32, i32
  }
  func.func @transform_2(%arg0: i32) -> (i32, i32) {
    %c0_i32 = arith.constant 0 : i32
    %c0_i32_0 = arith.constant 0 : i32
    %c0_i32_1 = arith.constant 0 : i32
    return %c0_i32, %c0_i32_0 : i32, i32
  }
  func.func @transform_3(%arg0: i32) -> (i32, i32) {
    %c0_i32 = arith.constant 0 : i32
    %c0_i32_0 = arith.constant 0 : i32
    return %arg0, %c0_i32 : i32, i32
  }
  func.func @transform_4(%arg0: i32) -> (i32, i32) {
    %c0_i32 = arith.constant 0 : i32
    %c0_i32_0 = arith.constant 0 : i32
    %c0_i32_1 = arith.constant 0 : i32
    return %c0_i32, %c0_i32_0 : i32, i32
  }
  func.func @transform_5(%arg0: i32) -> (i32, i32) {
    %c0_i32 = arith.constant 0 : i32
    %c0_i32_0 = arith.constant 0 : i32
    %c0_i32_1 = arith.constant 0 : i32
    return %c0_i32, %c0_i32_0 : i32, i32
  }
}

module attributes {stable_mosaic.version = 11 : i64} {
  func.func @_affine_act_kernel(%arg0: i32, %arg1: memref<256x64xf32, #tpu.memory_space<vmem>>, %arg2: memref<1x64xf32, #tpu.memory_space<vmem>>, %arg3: memref<1x64xf32, #tpu.memory_space<vmem>>, %arg4: memref<256x64xf32, #tpu.memory_space<vmem>>) attributes {dimension_semantics = [#tpu.dimension_semantics<parallel>], iteration_bounds = array<i64: 2>, scalar_prefetch = 0 : i64, scratch_operands = 0 : i64, tpu.core_type = #tpu.core_type<tc>, window_params = [{transform_indices = @transform_0, window_bounds = array<i64: 256, 64>}, {pipeline_mode = #tpu.pipeline_mode<synchronous>, transform_indices = @transform_1, window_bounds = array<i64: 1, 64>}, {pipeline_mode = #tpu.pipeline_mode<synchronous>, transform_indices = @transform_2, window_bounds = array<i64: 1, 64>}, {transform_indices = @transform_3, window_bounds = array<i64: 256, 64>}]} {
    %c0 = arith.constant 0 : index
    %c0_0 = arith.constant 0 : index
    %0 = vector.load %arg1[%c0, %c0_0] : memref<256x64xf32, #tpu.memory_space<vmem>>, vector<256x64xf32>
    %c0_1 = arith.constant 0 : index
    %c0_2 = arith.constant 0 : index
    %1 = vector.load %arg2[%c0_1, %c0_2] : memref<1x64xf32, #tpu.memory_space<vmem>>, vector<1x64xf32>
    %2 = vector.broadcast %1 : vector<1x64xf32> to vector<256x64xf32>
    %3 = arith.mulf %0, %2 : vector<256x64xf32>
    %c0_3 = arith.constant 0 : index
    %c0_4 = arith.constant 0 : index
    %4 = vector.load %arg3[%c0_3, %c0_4] : memref<1x64xf32, #tpu.memory_space<vmem>>, vector<1x64xf32>
    %5 = vector.broadcast %4 : vector<1x64xf32> to vector<256x64xf32>
    %6 = arith.addf %3, %5 : vector<256x64xf32>
    %cst = arith.constant 0.000000e+00 : f32
    %7 = vector.broadcast %cst : f32 to vector<256x64xf32>
    %8 = arith.maximumf %6, %7 : vector<256x64xf32>
    %c0_5 = arith.constant 0 : index
    %c0_6 = arith.constant 0 : index
    %9 = vector.load %arg4[%c0_5, %c0_6] : memref<256x64xf32, #tpu.memory_space<vmem>>, vector<256x64xf32>
    tpu.vector_store %arg4[%c0_5, %c0_6], %8 {strides = array<i32>} : memref<256x64xf32, #tpu.memory_space<vmem>>, vector<256x64xf32>,
    return
  }
  func.func @transform_0(%arg0: i32) -> (i32, i32) {
    %c0_i32 = arith.constant 0 : i32
    %c0_i32_0 = arith.constant 0 : i32
    return %arg0, %c0_i32 : i32, i32
  }
  func.func @transform_1(%arg0: i32) -> (i32, i32) {
    %c0_i32 = arith.constant 0 : i32
    %c0_i32_0 = arith.constant 0 : i32
    %c0_i32_1 = arith.constant 0 : i32
    return %c0_i32, %c0_i32_0 : i32, i32
  }
  func.func @transform_2(%arg0: i32) -> (i32, i32) {
    %c0_i32 = arith.constant 0 : i32
    %c0_i32_0 = arith.constant 0 : i32
    %c0_i32_1 = arith.constant 0 : i32
    return %c0_i32, %c0_i32_0 : i32, i32
  }
  func.func @transform_3(%arg0: i32) -> (i32, i32) {
    %c0_i32 = arith.constant 0 : i32
    %c0_i32_0 = arith.constant 0 : i32
    return %arg0, %c0_i32 : i32, i32
  }
}

module attributes {stable_mosaic.version = 11 : i64} {
  func.func @_zwc_pc_kernel(%arg0: i32, %arg1: memref<256x64xf32, #tpu.memory_space<vmem>>, %arg2: memref<64x32xbf16, #tpu.memory_space<vmem>>, %arg3: memref<1x32xf32, #tpu.memory_space<vmem>>, %arg4: memref<64x32xbf16, #tpu.memory_space<vmem>>, %arg5: memref<256x32xf32, #tpu.memory_space<vmem>>, %arg6: memref<256x8xf32, #tpu.memory_space<vmem>>, %arg7: memref<256x32xf32, #tpu.memory_space<vmem>>, %arg8: memref<256x32xf32, #tpu.memory_space<vmem>>, %arg9: memref<256x32xf32, #tpu.memory_space<vmem>>, %arg10: memref<256x32xf32, #tpu.memory_space<vmem>>) attributes {dimension_semantics = [#tpu.dimension_semantics<parallel>], iteration_bounds = array<i64: 2>, scalar_prefetch = 0 : i64, scratch_operands = 0 : i64, tpu.core_type = #tpu.core_type<tc>, window_params = [{transform_indices = @transform_0, window_bounds = array<i64: 256, 64>}, {pipeline_mode = #tpu.pipeline_mode<synchronous>, transform_indices = @transform_1, window_bounds = array<i64: 64, 32>}, {pipeline_mode = #tpu.pipeline_mode<synchronous>, transform_indices = @transform_2, window_bounds = array<i64: 1, 32>}, {pipeline_mode = #tpu.pipeline_mode<synchronous>, transform_indices = @transform_3, window_bounds = array<i64: 64, 32>}, {transform_indices = @transform_4, window_bounds = array<i64: 256, 32>}, {transform_indices = @transform_5, window_bounds = array<i64: 256, 8>}, {transform_indices = @transform_6, window_bounds = array<i64: 256, 32>}, {transform_indices = @transform_7, window_bounds = array<i64: 256, 32>}, {transform_indices = @transform_8, window_bounds = array<i64: 256, 32>}, {transform_indices = @transform_9, window_bounds = array<i64: 256, 32>}]} {
    %c0 = arith.constant 0 : index
    %c0_0 = arith.constant 0 : index
    %0 = vector.load %arg1[%c0, %c0_0] : memref<256x64xf32, #tpu.memory_space<vmem>>, vector<256x64xf32>
    %1 = arith.truncf %0 : vector<256x64xf32> to vector<256x64xbf16>
    %c0_1 = arith.constant 0 : index
    %c0_2 = arith.constant 0 : index
    %2 = vector.load %arg2[%c0_1, %c0_2] : memref<64x32xbf16, #tpu.memory_space<vmem>>, vector<64x32xbf16>
    %cst = arith.constant dense<0.000000e+00> : vector<256x32xf32>
    %3 = tpu.matmul %1, %2, %cst {dimension_numbers = #tpu.dot_dimension_numbers<[1], [0], [0], [1], [0, 0, 1, 1], [], []>} : vector<256x64xbf16>, vector<64x32xbf16>, vector<256x32xf32> -> vector<256x32xf32>
    %c0_3 = arith.constant 0 : index
    %c0_4 = arith.constant 0 : index
    %4 = vector.load %arg3[%c0_3, %c0_4] : memref<1x32xf32, #tpu.memory_space<vmem>>, vector<1x32xf32>
    %5 = vector.broadcast %4 : vector<1x32xf32> to vector<256x32xf32>
    %6 = arith.addf %3, %5 : vector<256x32xf32>
    %c0_5 = arith.constant 0 : index
    %c0_6 = arith.constant 0 : index
    %7 = vector.load %arg4[%c0_5, %c0_6] : memref<64x32xbf16, #tpu.memory_space<vmem>>, vector<64x32xbf16>
    %cst_7 = arith.constant dense<0.000000e+00> : vector<256x32xf32>
    %8 = tpu.matmul %1, %7, %cst_7 {dimension_numbers = #tpu.dot_dimension_numbers<[1], [0], [0], [1], [0, 0, 1, 1], [], []>} : vector<256x64xbf16>, vector<64x32xbf16>, vector<256x32xf32> -> vector<256x32xf32>
    %cst_8 = arith.constant 1.000000e-01 : f32
    %9 = vector.broadcast %cst_8 : f32 to vector<256x32xf32>
    %10 = arith.addf %8, %9 : vector<256x32xf32>
    %11 = math.exp %10 : vector<256x32xf32>
    %c0_9 = arith.constant 0 : index
    %c0_10 = arith.constant 0 : index
    %12 = vector.load %arg5[%c0_9, %c0_10] : memref<256x32xf32, #tpu.memory_space<vmem>>, vector<256x32xf32>
    %13 = arith.mulf %11, %12 : vector<256x32xf32>
    %14 = arith.addf %6, %13 : vector<256x32xf32>
    %c0_11 = arith.constant 0 : index
    %c0_12 = arith.constant 0 : index
    %15 = vector.load %arg7[%c0_11, %c0_12] : memref<256x32xf32, #tpu.memory_space<vmem>>, vector<256x32xf32>
    tpu.vector_store %arg7[%c0_11, %c0_12], %6 {strides = array<i32>} : memref<256x32xf32, #tpu.memory_space<vmem>>, vector<256x32xf32>,
    %c0_13 = arith.constant 0 : index
    %c0_14 = arith.constant 0 : index
    %16 = vector.load %arg8[%c0_13, %c0_14] : memref<256x32xf32, #tpu.memory_space<vmem>>, vector<256x32xf32>
    tpu.vector_store %arg8[%c0_13, %c0_14], %10 {strides = array<i32>} : memref<256x32xf32, #tpu.memory_space<vmem>>, vector<256x32xf32>,
    %c0_15 = arith.constant 0 : index
    %c0_16 = arith.constant 0 : index
    %17 = vector.load %arg9[%c0_15, %c0_16] : memref<256x32xf32, #tpu.memory_space<vmem>>, vector<256x32xf32>
    tpu.vector_store %arg9[%c0_15, %c0_16], %14 {strides = array<i32>} : memref<256x32xf32, #tpu.memory_space<vmem>>, vector<256x32xf32>,
    %c0_17 = arith.constant 0 : index
    %c0_18 = arith.constant 0 : index
    %18 = vector.load %arg6[%c0_17, %c0_18] : memref<256x8xf32, #tpu.memory_space<vmem>>, vector<256x8xf32>
    %19 = tpu.concatenate %18, %18, %18, %18 in 1 : vector<256x8xf32>, vector<256x8xf32>, vector<256x8xf32>, vector<256x8xf32> -> vector<256x32xf32>
    %20 = arith.subf %19, %6 : vector<256x32xf32>
    %21 = arith.mulf %20, %20 : vector<256x32xf32>
    %cst_19 = arith.constant -5.000000e-01 : f32
    %22 = vector.broadcast %cst_19 : f32 to vector<256x32xf32>
    %23 = arith.mulf %22, %21 : vector<256x32xf32>
    %24 = math.exp %14 : vector<256x32xf32>
    %25 = arith.mulf %23, %24 : vector<256x32xf32>
    %26 = arith.subf %25, %14 : vector<256x32xf32>
    %cst_20 = arith.constant 1.14472985 : f32
    %27 = vector.broadcast %cst_20 : f32 to vector<256x32xf32>
    %28 = arith.addf %26, %27 : vector<256x32xf32>
    %cst_21 = arith.constant dense<0xFF800000> : vector<256xf32>
    %29 = vector.multi_reduction <maximumf>, %28, %cst_21 [1] : vector<256x32xf32> to vector<256xf32>
    %30 = vector.shape_cast %29 : vector<256xf32> to vector<256x1xf32>
    %31 = vector.broadcast %30 : vector<256x1xf32> to vector<256x32xf32>
    %32 = arith.subf %28, %31 : vector<256x32xf32>
    %33 = math.exp %32 : vector<256x32xf32>
    %cst_22 = arith.constant dense<0.000000e+00> : vector<256xf32>
    %34 = vector.multi_reduction <add>, %33, %cst_22 [1] : vector<256x32xf32> to vector<256xf32>
    %35 = vector.shape_cast %34 : vector<256xf32> to vector<256x1xf32>
    %36 = vector.broadcast %35 : vector<256x1xf32> to vector<256x32xf32>
    %37 = arith.divf %33, %36 : vector<256x32xf32>
    %c0_23 = arith.constant 0 : index
    %c0_24 = arith.constant 0 : index
    %38 = vector.load %arg10[%c0_23, %c0_24] : memref<256x32xf32, #tpu.memory_space<vmem>>, vector<256x32xf32>
    tpu.vector_store %arg10[%c0_23, %c0_24], %37 {strides = array<i32>} : memref<256x32xf32, #tpu.memory_space<vmem>>, vector<256x32xf32>,
    return
  }
  func.func @transform_0(%arg0: i32) -> (i32, i32) {
    %c0_i32 = arith.constant 0 : i32
    %c0_i32_0 = arith.constant 0 : i32
    return %arg0, %c0_i32 : i32, i32
  }
  func.func @transform_1(%arg0: i32) -> (i32, i32) {
    %c0_i32 = arith.constant 0 : i32
    %c0_i32_0 = arith.constant 0 : i32
    %c0_i32_1 = arith.constant 0 : i32
    return %c0_i32, %c0_i32_0 : i32, i32
  }
  func.func @transform_2(%arg0: i32) -> (i32, i32) {
    %c0_i32 = arith.constant 0 : i32
    %c0_i32_0 = arith.constant 0 : i32
    %c0_i32_1 = arith.constant 0 : i32
    return %c0_i32, %c0_i32_0 : i32, i32
  }
  func.func @transform_3(%arg0: i32) -> (i32, i32) {
    %c0_i32 = arith.constant 0 : i32
    %c0_i32_0 = arith.constant 0 : i32
    %c0_i32_1 = arith.constant 0 : i32
    return %c0_i32, %c0_i32_0 : i32, i32
  }
  func.func @transform_4(%arg0: i32) -> (i32, i32) {
    %c0_i32 = arith.constant 0 : i32
    %c0_i32_0 = arith.constant 0 : i32
    return %arg0, %c0_i32 : i32, i32
  }
  func.func @transform_5(%arg0: i32) -> (i32, i32) {
    %c0_i32 = arith.constant 0 : i32
    %c0_i32_0 = arith.constant 0 : i32
    return %arg0, %c0_i32 : i32, i32
  }
  func.func @transform_6(%arg0: i32) -> (i32, i32) {
    %c0_i32 = arith.constant 0 : i32
    %c0_i32_0 = arith.constant 0 : i32
    return %arg0, %c0_i32 : i32, i32
  }
  func.func @transform_7(%arg0: i32) -> (i32, i32) {
    %c0_i32 = arith.constant 0 : i32
    %c0_i32_0 = arith.constant 0 : i32
    return %arg0, %c0_i32 : i32, i32
  }
  func.func @transform_8(%arg0: i32) -> (i32, i32) {
    %c0_i32 = arith.constant 0 : i32
    %c0_i32_0 = arith.constant 0 : i32
    return %arg0, %c0_i32 : i32, i32
  }
  func.func @transform_9(%arg0: i32) -> (i32, i32) {
    %c0_i32 = arith.constant 0 : i32
    %c0_i32_0 = arith.constant 0 : i32
    return %arg0, %c0_i32 : i32, i32
  }
}

</mosaic_0001>

<bundles_post_ra>
// kernel: _lambda_.22
= control target key start
LH: loop header
LB: loop body
LE: loop exit
PB: predicated region body
PF: predicated region fallthrough
CT: control target
= control target key end

     0   :  { %vm124_vm0 = vcmask 31744   ;;  %s322_s0 = inlined_call_operand.vmem [shape: f32[128,4], index: 0, kind: input, shape index: {}]   ;;  %s323_s1 = inlined_call_operand.vmem [shape: f32[1,4], index: 1, kind: input, shape index: {}]   ;;  %s324_s2 = inlined_call_operand.vmem [shape: f32[1,4], index: 2, kind: input, shape index: {}]   ;;  %s325_s3 = inlined_call_operand.vmem [shape: f32[128,4], index: 3, kind: output, shape index: {}]  }
   0x1   :  { %v14_v0 = vld [vmem:[%s322_s0] sm:$0xff]  ;;  %v15_v4 = vld [vmem:[%s322_s0 + $0x8] sm:$0xff]  ;;  %v16_v5 = vld [vmem:[%s322_s0 + $0x10] sm:$0xff] }
   0x2   :  { %v173_v1 = vld [vmem:[%s323_s1] ss:$0 sm:$0xff]  ;;  %v17_v6 = vld [vmem:[%s322_s0 + $0x18] sm:$0xff]  ;;  %v19_v11 = vld [vmem:[%s322_s0 + $0x28] sm:$0xff] }
   0x3   :  { %v178_v2 = vld [vmem:[%s324_s2] ss:$0 sm:$0xff]  ;;  %v37_v3 = vmul.f32 %v173_v1, %v14_v0  ;;  %v38_v7 = vmul.f32 %v173_v1, %v15_v4  ;;  %v39_v8 = vmul.f32 %v173_v1, %v16_v5  ;;  %v40_v9 = vmul.f32 %v173_v1, %v17_v6  ;;  %v20_v12 = vld [vmem:[%s322_s0 + $0x30] sm:$0xff]  ;;  %v21_v17 = vld [vmem:[%s322_s0 + $0x38] sm:$0xff] }
   0x4   :  { %v18_v10 = vld [vmem:[%s322_s0 + $0x20] sm:$0xff]  ;;  %v42_v15 = vmul.f32 %v173_v1, %v19_v11  ;;  %v43_v16 = vmul.f32 %v173_v1, %v20_v12  ;;  %v44_v21 = vmul.f32 %v173_v1, %v21_v17  ;;  %v23_v30 = vld [vmem:[%s322_s0 + $0x48] sm:$0xff]  ;;  %v24_v31 = vld [vmem:[%s322_s0 + $0x50] sm:$0xff] }
   0x5   :  { %v60_v13 = vadd.f32 %v178_v2, %v37_v3  ;;  %v41_v14 = vmul.f32 %v173_v1, %v18_v10  ;;  %v61_v18 = vadd.f32 %v178_v2, %v38_v7  ;;  %v62_v19 = vadd.f32 %v178_v2, %v39_v8  ;;  %v22_v25 = vld [vmem:[%s322_s0 + $0x40] sm:$0xff]  ;;  %v25_v43 = vld [vmem:[%s322_s0 + $0x58] sm:$0xff]  ;;  %v27_v45 = vld [vmem:[%s322_s0 + $0x68] sm:$0xff] }
   0x6   :  { %v63_v20 = vadd.f32 %v178_v2, %v40_v9  ;;  %v65_v24 = vadd.f32 %v178_v2, %v42_v15  ;;  %v66_v37 = vadd.f32 %v178_v2, %v43_v16  ;;  %v67_v38 = vadd.f32 %v178_v2, %v44_v21  ;;  %v26_v44 = vld [vmem:[%s322_s0 + $0x60] sm:$0xff]  ;;  %v28_v56 = vld [vmem:[%s322_s0 + $0x70] sm:$0xff]  ;;  %v29_v4 = vld [vmem:[%s322_s0 + $0x78] sm:$0xff] }
   0x7   :  { %vm76_vm1 = vcmp.ge.f32.partialorder %v60_v13, 0.0  ;;  %v92_v22 = vmul.f32 0.01, %v60_v13  ;;  %v64_v23 = vadd.f32 %v178_v2, %v41_v14  ;;  %vm77_vm2 = vcmp.ge.f32.partialorder %v61_v18, 0.0 }
   0x8   :  { %v93_v26 = vmul.f32 0.01, %v61_v18  ;;  %vm78_vm3 = vcmp.ge.f32.partialorder %v62_v19, 0.0  ;;  %v94_v27 = vmul.f32 0.01, %v62_v19  ;;  %vm79_vm4 = vcmp.ge.f32.partialorder %v63_v20, 0.0 }
   0x9   :  { %v108_v28 = vsel %vm76_vm1, %v60_v13, %v92_v22  ;;  %v95_v29 = vmul.f32 0.01, %v63_v20  ;;  %vm80_vm5 = vcmp.ge.f32.partialorder %v64_v23, 0.0  ;;  %v96_v34 = vmul.f32 0.01, %v64_v23 }
   0xa   :  { %125 = vst.msk [vmem:[%s325_s3] sm:$0xff] %vm124_vm0, %v108_v28  ;;  %v109_v32 = vsel %vm77_vm2, %v61_v18, %v93_v26  ;;  %v110_v33 = vsel %vm78_vm3, %v62_v19, %v94_v27  ;;  %vm81_vm6 = vcmp.ge.f32.partialorder %v65_v24, 0.0  ;;  %v97_v36 = vmul.f32 0.01, %v65_v24 }
   0xb   :  { %126 = vst.msk [vmem:[%s325_s3 + $0x8] sm:$0xff] %vm124_vm0, %v109_v32  ;;  %127 = vst.msk [vmem:[%s325_s3 + $0x10] sm:$0xff] %vm124_vm0, %v110_v33  ;;  %v111_v35 = vsel %vm79_vm4, %v63_v20, %v95_v29  ;;  %v112_v39 = vsel %vm80_vm5, %v64_v23, %v96_v34  ;;  %v45_v40 = vmul.f32 %v173_v1, %v22_v25  ;;  %vm82_vm7 = vcmp.ge.f32.partialorder %v66_v37, 0.0 }
   0xc   :  { %128 = vst.msk [vmem:[%s325_s3 + $0x18] sm:$0xff] %vm124_vm0, %v111_v35  ;;  %v46_v41 = vmul.f32 %v173_v1, %v23_v30  ;;  %v47_v42 = vmul.f32 %v173_v1, %v24_v31  ;;  %129 = vst.msk [vmem:[%s325_s3 + $0x20] sm:$0xff] %vm124_vm0, %v112_v39  ;;  %v113_v46 = vsel %vm81_vm6, %v65_v24, %v97_v36  ;;  %v98_v47 = vmul.f32 0.01, %v66_v37 }
   0xd   :  { %vm83_vm8 = vcmp.ge.f32.partialorder %v67_v38, 0.0  ;;  %130 = vst.msk [vmem:[%s325_s3 + $0x28] sm:$0xff] %vm124_vm0, %v113_v46  ;;  %v99_v48 = vmul.f32 0.01, %v67_v38  ;;  %v68_v49 = vadd.f32 %v178_v2, %v45_v40  ;;  %v48_v53 = vmul.f32 %v173_v1, %v25_v43 }
   0xe   :  { %v69_v50 = vadd.f32 %v178_v2, %v46_v41  ;;  %v70_v51 = vadd.f32 %v178_v2, %v47_v42  ;;  %v114_v52 = vsel %vm82_vm7, %v66_v37, %v98_v47  ;;  %v49_v54 = vmul.f32 %v173_v1, %v26_v44 }
   0xf   :  { %v50_v55 = vmul.f32 %v173_v1, %v27_v45  ;;  %131 = vst.msk [vmem:[%s325_s3 + $0x30] sm:$0xff] %vm124_vm0, %v114_v52  ;;  %v115_v57 = vsel %vm83_vm8, %v67_v38, %v99_v48  ;;  %vm84_vm9 = vcmp.ge.f32.partialorder %v68_v49, 0.0  ;;  %v100_v58 = vmul.f32 0.01, %v68_v49 }
  0x10   :  { %vm85_vm10 = vcmp.ge.f32.partialorder %v69_v50, 0.0  ;;  %132 = vst.msk [vmem:[%s325_s3 + $0x38] sm:$0xff] %vm124_vm0, %v115_v57  ;;  %v101_v59 = vmul.f32 0.01, %v69_v50  ;;  %vm86_vm11 = vcmp.ge.f32.partialorder %v70_v51, 0.0  ;;  %v71_v61 = vadd.f32 %v178_v2, %v48_v53 }
  0x11   :  { %v102_v60 = vmul.f32 0.01, %v70_v51  ;;  %v116_v62 = vsel %vm84_vm9, %v68_v49, %v100_v58  ;;  %v72_v63 = vadd.f32 %v178_v2, %v49_v54  ;;  %v73_v0 = vadd.f32 %v178_v2, %v50_v55 }
  0x12   :  { %v51_v3 = vmul.f32 %v173_v1, %v28_v56  ;;  %133 = vst.msk [vmem:[%s325_s3 + $0x40] sm:$0xff] %vm124_vm0, %v116_v62  ;;  %v117_v5 = vsel %vm85_vm10, %v69_v50, %v101_v59  ;;  %vm87_vm12 = vcmp.ge.f32.partialorder %v71_v61, 0.0  ;;  %v103_v7 = vmul.f32 0.01, %v71_v61 }
  0x13   :  { %v118_v6 = vsel %vm86_vm11, %v70_v51, %v102_v60  ;;  %134 = vst.msk [vmem:[%s325_s3 + $0x48] sm:$0xff] %vm124_vm0, %v117_v5  ;;  %vm88_vm13 = vcmp.ge.f32.partialorder %v72_v63, 0.0  ;;  %v104_v8 = vmul.f32 0.01, %v72_v63  ;;  %vm89_vm14 = vcmp.ge.f32.partialorder %v73_v0, 0.0 }
  0x14   :  { %135 = vst.msk [vmem:[%s325_s3 + $0x50] sm:$0xff] %vm124_vm0, %v118_v6  ;;  %v105_v9 = vmul.f32 0.01, %v73_v0  ;;  %v119_v10 = vsel %vm87_vm12, %v71_v61, %v103_v7  ;;  %v74_v11 = vadd.f32 %v178_v2, %v51_v3  ;;  %v52_v12 = vmul.f32 %v173_v1, %v29_v4 }
  0x15   :  { %136 = vst.msk [vmem:[%s325_s3 + $0x58] sm:$0xff] %vm124_vm0, %v119_v10  ;;  %v120_v13 = vsel %vm88_vm13, %v72_v63, %v104_v8 }
  0x16   :  { %v121_v14 = vsel %vm89_vm14, %v73_v0, %v105_v9  ;;  %137 = vst.msk [vmem:[%s325_s3 + $0x60] sm:$0xff] %vm124_vm0, %v120_v13  ;;  %vm90_vm15 = vcmp.ge.f32.partialorder %v74_v11, 0.0  ;;  %v106_v15 = vmul.f32 0.01, %v74_v11  ;;  %v75_v1 = vadd.f32 %v178_v2, %v52_v12 }
  0x17   :  { %138 = vst.msk [vmem:[%s325_s3 + $0x68] sm:$0xff] %vm124_vm0, %v121_v14 }
  0x18   :  { %v122_v16 = vsel %vm90_vm15, %v74_v11, %v106_v15  ;;  %vm91_vm1 = vcmp.ge.f32.partialorder %v75_v1, 0.0  ;;  %v107_v17 = vmul.f32 0.01, %v75_v1 }
  0x19   :  { %139 = vst.msk [vmem:[%s325_s3 + $0x70] sm:$0xff] %vm124_vm0, %v122_v16 }
  0x1a   :  { %v123_v18 = vsel %vm91_vm1, %v75_v1, %v107_v17 }
  0x1b   :  { %140 = vst.msk [vmem:[%s325_s3 + $0x78] sm:$0xff] %vm124_vm0, %v123_v18 }

// kernel: _lambda_.21
= control target key start
LH: loop header
LB: loop body
LE: loop exit
PB: predicated region body
PF: predicated region fallthrough
CT: control target
= control target key end

     0   :  { %11 = vsyncpa [#allocation3], 0  ;;  %s749_s0 = inlined_call_operand.vmem [shape: bf16[128,25], index: 0, kind: input, shape index: {}]   ;;  %s750_s1 = inlined_call_operand.hbm [shape: bf16[25,4], index: 1, kind: input, shape index: {}]   ;;  %s751_s2 = inlined_call_operand.hbm [shape: f32[1,4], index: 2, kind: input, shape index: {}]   ;;  %s752_s3 = inlined_call_operand.vmem [shape: f32[128,4], index: 3, kind: output, shape index: {0}]   ;;  %s753_s4 = inlined_call_operand.vmem [shape: f32[1,4], index: 4, kind: output, shape index: {1}]   ;;  %s754_s5 = inlined_call_operand.vmem [shape: f32[1,4], index: 5, kind: output, shape index: {2}]  }
   0x1   :  { %12 = vsyncpa [#allocation5], 0  ;;  %s503_s18 = smov [#allocation2]   ;;  %s455_s22 = scalar_lea.hbm %s750_s1, 256 }
   0x2   :  { %s20_s19 = sshll.u32 %s503_s18, 4  ;;  %p456_p0 = scmp.ne.s32.totalorder %s750_s1, %s455_s22  ;;  %s21_s19 = int_to_ptr.vmem [resolvable:$true] %s20_s19 }
   0x3   :  { %p459_p1 = scmp.lt.u32.totalorder %s455_s22, %s750_s1 }
   0x5   :  { %p461_p2 = pnand %p459_p1, %p456_p0 }
   0x7   :  { %464 = shalt.err (!%p461_p2)
}
   0x8   :  { %s465_s27 = scalar_lea.vmem %s21_s19, 256  ;;  %p470_p4 = scmp.lt.s32.totalorder %s21_s19, %s21_s19 }
   0x9   :  { %p466_p3 = scmp.ne.s32.totalorder %s21_s19, %s465_s27  ;;  %p471_p5 = scmp.lt.s32.totalorder %s465_s27, %s465_s27 }
   0xb   :  { %p472_p6 = por %p471_p5, %p470_p4 }
   0xd   :  { %p473_p7 = pnand %p472_p6, %p466_p3 }
   0xf   :  { %476 = shalt.err (!%p473_p7)
}
  0x10   :  { %s504_s28 = smov 64   ;;  %s505_s29 = smov 4  }
  0x11   :  { %26 = dma.hbm_to_vmem [thread:$0]  %s750_s1, 256, %s21_s19, [#allocation3], %s504_s28, %s504_s28, %s505_s29  }
  0x12   :  { %s506_s7 = smov [#allocation4]   ;;  %s477_s11 = scalar_lea.hbm %s751_s2, 16 }
  0x13   :  { %s33_s8 = sshll.u32 %s506_s7, 4  ;;  %p478_p8 = scmp.ne.s32.totalorder %s751_s2, %s477_s11  ;;  %s34_s8 = int_to_ptr.vmem [resolvable:$true] %s33_s8 }
  0x14   :  { %p481_p9 = scmp.lt.u32.totalorder %s477_s11, %s751_s2 }
  0x16   :  { %p483_p10 = pnand %p481_p9, %p478_p8 }
  0x18   :  { %486 = shalt.err (!%p483_p10)
}
  0x19   :  { %s487_s16 = scalar_lea.vmem %s34_s8, 16  ;;  %s491_s1 = scalar_lea.vmem %s34_s8, 32 }
  0x1a   :  { %p488_p11 = scmp.ne.s32.totalorder %s34_s8, %s487_s16  ;;  %p492_p12 = scmp.lt.s32.totalorder %s34_s8, %s34_s8 }
  0x1b   :  { %p493_p13 = scmp.lt.s32.totalorder %s491_s1, %s487_s16 }
  0x1d   :  { %p494_p0 = por %p493_p13, %p492_p12 }
  0x1f   :  { %p495_p1 = pnand %p494_p0, %p488_p11 }
  0x21   :  { %498 = shalt.err (!%p495_p1)
}
  0x22   :  { %36 = dma.hbm_to_vmem [thread:$0]  %s751_s2, 16, %s34_s8, [#allocation5]  }
  0x23   :  { %499 = dma.done.wait [#allocation3], 256  }
  0x24   :  { %500 = vsyncadd [#allocation3], 4294967040 }
  0x25   :  { %501 = dma.done.wait [#allocation5], 16  }
  0x26   :  { %502 = vsyncadd [#allocation5], 4294967280  ;;  %vm147_vm0 = vcmask 1043456   ;;  %vm148_vm1 = vcmask 1044480   ;;  %v507_v0 = vmov 65535   ;;  %vm122_vm2 = vcmask 203776  }
  0x27   :  { %v149_v1 = vsel %vm147_vm0, 4294967295, %v507_v0  ;;  %v445_v2 = vld [vmem:[#allocation2] sm:$0xff]   ;;  %v446_v4 = vld [vmem:[#allocation2 + $0x8] sm:$0x1f]   ;;  %v449_v8 = vld [vmem:[%s749_s0 + $0x10] sm:$0xff]   ;;  %vm272_vm3 = vcmask 24576  }
  0x28   :  { %v150_v3 = vsel %vm148_vm1, %v149_v1, 0  ;;  %415 = vmatprep.subr.bf16.mxu0 %v445_v2  ;;  %v447_v5 = vld [vmem:[%s749_s0] sm:$0xff]   ;;  %435 = vmatprep.subr.bf16.mxu1 %v445_v2  ;;  %v448_v7 = vld [vmem:[%s749_s0 + $0x8] sm:$0xff]   ;;  %v453_v11 = vld [vmem:[%s749_s0 + $0x30] sm:$0xff]   ;;  %v508_v14 = vmov 0.0   ;;  %vm251_vm4 = vcmask 31744  }
  0x29   :  { %416 = vmatpush3.bf16.msra.mxu0 %v445_v2  ;;  %v152_v6 = vand.u32 %v446_v4, %v150_v3  ;;  %437 = vmatpush3.bf16.msra.mxu1 %v445_v2  ;;  %v451_v9 = vld [vmem:[%s749_s0 + $0x20] sm:$0xff]   ;;  %v452_v10 = vld [vmem:[%s749_s0 + $0x28] sm:$0xff]   ;;  %v450_v12 = vld [vmem:[%s749_s0 + $0x18] sm:$0xff]   ;;  %273 = vst.msk [vmem:[%s753_s4] sm:$0x1] %vm272_vm3, %v508_v14 }
  0x2a   :  { %419 = vmatprep.mubr.msk.bf16.mxu0 %vm122_vm2, %v447_v5  ;;  %427 = vmatprep.mubr.msk.bf16.mxu1 %vm122_vm2, %v451_v9  ;;  %v454_v13 = vld [vmem:[%s749_s0 + $0x38] sm:$0xff]   ;;  %274 = vst.msk [vmem:[%s754_s5] sm:$0x1] %vm272_vm3, %v508_v14  ;;  %v603_v15 = vld [vmem:[#allocation4] ss:$0 sm:$0xff] }
  0x2b   :  { %417 = vmatprep.subr.bf16.mxu0 %v152_v6  ;;  %436 = vmatprep.subr.bf16.mxu1 %v152_v6 }
  0x2d   :  { %418 = vmatpush3.bf16.msra.mxu0 %v152_v6  ;;  %438 = vmatpush3.bf16.msra.mxu1 %v152_v6 }
  0x30   :  { %420 = vmatmul.mubr.msk.bf16.vlgmr.msra.gmra.mrb[0].mxu0 %vm122_vm2, %v448_v7  ;;  %428 = vmatmul.mubr.msk.bf16.vlgmr.msra.gmra.mrb[0].mxu1 %vm122_vm2, %v452_v10 }
  0x31   :  { %423 = vmatprep.mubr.msk.bf16.mxu0 %vm122_vm2, %v449_v8  ;;  %431 = vmatprep.mubr.msk.bf16.mxu1 %vm122_vm2, %v453_v11 }
  0x38   :  { %424 = vmatmul.mubr.msk.bf16.gmra.mrb[4].mxu0 %vm122_vm2, %v450_v12  ;;  %432 = vmatmul.mubr.msk.bf16.gmra.mrb[4].mxu1 %vm122_vm2, %v454_v13 }
 0x103   :  { %v421_v16 = vpop.f32.mrb[0].mxu0  ;;  %v429_v17 = vpop.f32.mrb[0].mxu1 }
 0x104   :  { %v197_v18 = vadd.f32 %v421_v16, %v603_v15  ;;  %v188_v19 = vpop.f32.mrb[1].mxu0  ;;  %v607_v20 = vadd.f32 %v429_v17, %v603_v15  ;;  %v220_v21 = vpop.f32.mrb[1].mxu1 }
 0x105   :  { %v189_v22 = vadd.f32 %v603_v15, %v188_v19  ;;  %v422_v23 = vpop.f32.mrb[2].mxu0  ;;  %v611_v24 = vadd.f32 %v603_v15, %v220_v21  ;;  %v430_v25 = vpop.f32.mrb[2].mxu1 }
 0x106   :  { %254 = vst.msk [vmem:[%s752_s3 + $0x10] sm:$0xff] %vm251_vm4, %v197_v18  ;;  %v200_v26 = vadd.f32 %v422_v23, %v603_v15  ;;  %v191_v27 = vpop.f32.mrb[3].mxu0  ;;  %262 = vst.msk [vmem:[%s752_s3 + $0x50] sm:$0xff] %vm251_vm4, %v607_v20  ;;  %v223_v28 = vpop.f32.mrb[3].mxu1  ;;  %v319_v31 = vmul.f32 %v197_v18, %v197_v18  ;;  %v644_v37 = vadd.f32 %v430_v25, %v603_v15  ;;  %v279_v38 = vsel %vm251_vm4, %v197_v18, 0.0 }
 0x107   :  { %252 = vst.msk [vmem:[%s752_s3] sm:$0xff] %vm251_vm4, %v189_v22  ;;  %v317_v29 = vmul.f32 %v189_v22, %v189_v22  ;;  %v192_v30 = vadd.f32 %v603_v15, %v191_v27  ;;  %260 = vst.msk [vmem:[%s752_s3 + $0x40] sm:$0xff] %vm251_vm4, %v611_v24  ;;  %v276_v32 = vsel %vm251_vm4, %v189_v22, 0.0  ;;  %v224_v42 = vadd.f32 %v603_v15, %v223_v28 }
 0x108   :  { %255 = vst.msk [vmem:[%s752_s3 + $0x18] sm:$0xff] %vm251_vm4, %v200_v26  ;;  %v320_v35 = vmul.f32 %v200_v26, %v200_v26  ;;  %263 = vst.msk [vmem:[%s752_s3 + $0x58] sm:$0xff] %vm251_vm4, %v644_v37  ;;  %v336_v49 = vsel %vm251_vm4, %v319_v31, 0.0  ;;  %v281_v50 = vsel %vm251_vm4, %v200_v26, 0.0  ;;  %v325_v3 = vmul.f32 %v611_v24, %v611_v24 }
 0x109   :  { %253 = vst.msk [vmem:[%s752_s3 + $0x8] sm:$0xff] %vm251_vm4, %v192_v30  ;;  %v277_v33 = vsel %vm251_vm4, %v192_v30, 0.0  ;;  %v318_v34 = vmul.f32 %v192_v30, %v192_v30  ;;  %v333_v39 = vsel %vm251_vm4, %v317_v29, 0.0  ;;  %261 = vst.msk [vmem:[%s752_s3 + $0x48] sm:$0xff] %vm251_vm4, %v224_v42  ;;  %v291_v19 = vsel %vm251_vm4, %v611_v24, 0.0 }
 0x10a   :  { %v278_v36 = vadd.f32 %v277_v33, %v276_v32  ;;  %v338_v54 = vsel %vm251_vm4, %v320_v35, 0.0  ;;  %v348_v25 = vsel %vm251_vm4, %v325_v3, 0.0  ;;  %v326_v26 = vmul.f32 %v224_v42, %v224_v42 }
 0x10b   :  { %v334_v40 = vsel %vm251_vm4, %v318_v34, 0.0  ;;  %v425_v41 = vpop.f32.mrb[4].mxu0  ;;  %v433_v43 = vpop.f32.mrb[4].mxu1  ;;  %v293_v28 = vsel %vm251_vm4, %v224_v42, 0.0  ;;  %v327_v29 = vmul.f32 %v607_v20, %v607_v20  ;;  %v295_v31 = vsel %vm251_vm4, %v607_v20, 0.0 }
 0x10c   :  { %v280_v44 = vadd.f32 %v279_v38, %v278_v36  ;;  %v335_v45 = vadd.f32 %v334_v40, %v333_v39  ;;  %v213_v46 = vadd.f32 %v425_v41, %v603_v15  ;;  %v204_v47 = vpop.f32.mrb[5].mxu0  ;;  %v236_v48 = vpop.f32.mrb[5].mxu1  ;;  %v245_v9 = vadd.f32 %v433_v43, %v603_v15 }
 0x10d   :  { %v205_v51 = vadd.f32 %v603_v15, %v204_v47  ;;  %v426_v52 = vpop.f32.mrb[6].mxu0  ;;  %v434_v53 = vpop.f32.mrb[6].mxu1  ;;  %v237_v10 = vadd.f32 %v603_v15, %v236_v48  ;;  %v328_v33 = vmul.f32 %v644_v37, %v644_v37  ;;  %v350_v35 = vsel %vm251_vm4, %v326_v26, 0.0 }
 0x10e   :  { %v337_v55 = vadd.f32 %v336_v49, %v335_v45  ;;  %258 = vst.msk [vmem:[%s752_s3 + $0x30] sm:$0xff] %vm251_vm4, %v213_v46  ;;  %v282_v56 = vadd.f32 %v281_v50, %v280_v44  ;;  %v207_v57 = vpop.f32.mrb[7].mxu0  ;;  %v239_v58 = vpop.f32.mrb[7].mxu1  ;;  %v216_v61 = vadd.f32 %v426_v52, %v603_v15  ;;  %v323_v4 = vmul.f32 %v213_v46, %v213_v46 }
 0x10f   :  { %256 = vst.msk [vmem:[%s752_s3 + $0x20] sm:$0xff] %vm251_vm4, %v205_v51  ;;  %v283_v59 = vsel %vm251_vm4, %v205_v51, 0.0  ;;  %v321_v60 = vmul.f32 %v205_v51, %v205_v51  ;;  %v208_v62 = vadd.f32 %v603_v15, %v207_v57  ;;  %v287_v8 = vsel %vm251_vm4, %v213_v46, 0.0  ;;  %266 = vst.msk [vmem:[%s752_s3 + $0x70] sm:$0xff] %vm251_vm4, %v245_v9 }
 0x110   :  { %v284_v63 = vadd.f32 %v283_v59, %v282_v56  ;;  %v339_v0 = vadd.f32 %v338_v54, %v337_v55  ;;  %259 = vst.msk [vmem:[%s752_s3 + $0x38] sm:$0xff] %vm251_vm4, %v216_v61  ;;  %v248_v11 = vadd.f32 %v434_v53, %v603_v15  ;;  %v324_v12 = vmul.f32 %v216_v61, %v216_v61 }
 0x111   :  { %v340_v1 = vsel %vm251_vm4, %v321_v60, 0.0  ;;  %257 = vst.msk [vmem:[%s752_s3 + $0x28] sm:$0xff] %vm251_vm4, %v208_v62  ;;  %v285_v2 = vsel %vm251_vm4, %v208_v62, 0.0  ;;  %v322_v7 = vmul.f32 %v208_v62, %v208_v62  ;;  %v240_v16 = vadd.f32 %v603_v15, %v239_v58  ;;  %264 = vst.msk [vmem:[%s752_s3 + $0x60] sm:$0xff] %vm251_vm4, %v237_v10 }
 0x112   :  { %v341_v5 = vadd.f32 %v340_v1, %v339_v0  ;;  %v286_v6 = vadd.f32 %v285_v2, %v284_v63  ;;  %v289_v17 = vsel %vm251_vm4, %v216_v61, 0.0  ;;  %267 = vst.msk [vmem:[%s752_s3 + $0x78] sm:$0xff] %vm251_vm4, %v248_v11  ;;  %v344_v15 = vsel %vm251_vm4, %v323_v4, 0.0 }
 0x113   :  { %v342_v14 = vsel %vm251_vm4, %v322_v7, 0.0  ;;  %265 = vst.msk [vmem:[%s752_s3 + $0x68] sm:$0xff] %vm251_vm4, %v240_v16  ;;  %v346_v23 = vsel %vm251_vm4, %v324_v12, 0.0  ;;  %v329_v36 = vmul.f32 %v237_v10, %v237_v10  ;;  %v297_v38 = vsel %vm251_vm4, %v644_v37, 0.0 }
 0x114   :  { %v288_v13 = vadd.f32 %v287_v8, %v286_v6  ;;  %v343_v18 = vadd.f32 %v342_v14, %v341_v5  ;;  %v299_v40 = vsel %vm251_vm4, %v237_v10, 0.0  ;;  %v352_v41 = vsel %vm251_vm4, %v327_v29, 0.0  ;;  %v275_v6 = vld [vmem:[%s753_s4] sm:$0x1] }
 0x115   :  { %v354_v20 = vsel %vm251_vm4, %v328_v33, 0.0  ;;  %v356_v45 = vsel %vm251_vm4, %v329_v36, 0.0  ;;  %v330_v46 = vmul.f32 %v240_v16, %v240_v16  ;;  %v301_v48 = vsel %vm251_vm4, %v240_v16, 0.0 }
 0x116   :  { %v290_v21 = vadd.f32 %v289_v17, %v288_v13  ;;  %v345_v22 = vadd.f32 %v344_v15, %v343_v18  ;;  %v331_v49 = vmul.f32 %v245_v9, %v245_v9  ;;  %v303_v37 = vsel %vm251_vm4, %v245_v9, 0.0 }
 0x117   :  { %v332_v52 = vmul.f32 %v248_v11, %v248_v11  ;;  %v358_v54 = vsel %vm251_vm4, %v330_v46, 0.0  ;;  %v305_v55 = vsel %vm251_vm4, %v248_v11, 0.0  ;;  %v316_v11 = vld [vmem:[%s754_s5] sm:$0x1] }
 0x118   :  { %v292_v24 = vadd.f32 %v291_v19, %v290_v21  ;;  %v347_v27 = vadd.f32 %v346_v23, %v345_v22  ;;  %v360_v57 = vsel %vm251_vm4, %v331_v49, 0.0 }
 0x119   :  { %v362_v60 = vsel %vm251_vm4, %v332_v52, 0.0 }
 0x11a   :  { %v294_v30 = vadd.f32 %v293_v28, %v292_v24  ;;  %v349_v32 = vadd.f32 %v348_v25, %v347_v27 }
 0x11c   :  { %v296_v34 = vadd.f32 %v295_v31, %v294_v30  ;;  %v351_v39 = vadd.f32 %v350_v35, %v349_v32 }
 0x11e   :  { %v298_v42 = vadd.f32 %v297_v38, %v296_v34  ;;  %v353_v43 = vadd.f32 %v352_v41, %v351_v39 }
 0x120   :  { %v300_v44 = vadd.f32 %v299_v40, %v298_v42  ;;  %v355_v47 = vadd.f32 %v354_v20, %v353_v43 }
 0x122   :  { %v302_v50 = vadd.f32 %v301_v48, %v300_v44  ;;  %v357_v51 = vadd.f32 %v356_v45, %v355_v47 }
 0x124   :  { %v304_v53 = vadd.f32 %v303_v37, %v302_v50  ;;  %v359_v56 = vadd.f32 %v358_v54, %v357_v51 }
 0x126   :  { %v306_v58 = vadd.f32 %v305_v55, %v304_v53  ;;  %v361_v59 = vadd.f32 %v360_v57, %v359_v56 }
 0x128   :  { %v307_v61 = vrot.slane %v306_v58, 4  ;;  %v363_v62 = vadd.f32 %v362_v60, %v361_v59 }
 0x12a   :  { %v308_v63 = vadd.f32 %v307_v61, %v306_v58  ;;  %v364_v0 = vrot.slane %v363_v62, 4 }
 0x12c   :  { %v309_v1 = vrot.slane %v308_v63, 2  ;;  %v365_v2 = vadd.f32 %v364_v0, %v363_v62 }
 0x12e   :  { %v310_v3 = vadd.f32 %v309_v1, %v308_v63  ;;  %v366_v4 = vrot.slane %v365_v2, 2 }
 0x130   :  { %v311_v5 = vrot.slane %v310_v3, 1  ;;  %v367_v7 = vadd.f32 %v366_v4, %v365_v2 }
 0x132   :  { %v312_v8 = vadd.f32 %v311_v5, %v310_v3  ;;  %v368_v9 = vrot.slane %v367_v7, 1 }
 0x134   :  { %v313_v10 = vadd.f32 %v312_v8, %v275_v6  ;;  %v369_v12 = vadd.f32 %v368_v9, %v367_v7 }
 0x136   :  { %315 = vst.msk [vmem:[%s753_s4] sm:$0x1] %vm272_vm3, %v313_v10  ;;  %v370_v13 = vadd.f32 %v369_v12, %v316_v11 }
 0x138   :  { %371 = vst.msk [vmem:[%s754_s5] sm:$0x1] %vm272_vm3, %v370_v13 }
 0x139   :  { %384 = vsyncpa [#allocation3], 1 }
 0x13a   :  { %385 = vsyncpa [#allocation5], 1 }

// kernel: _lambda_.23
= control target key start
LH: loop header
LB: loop body
LE: loop exit
PB: predicated region body
PF: predicated region fallthrough
CT: control target
= control target key end

     0   :  { %11 = vsyncpa [#allocation3], 0  ;;  %s455_s0 = inlined_call_operand.vmem [shape: bf16[32,100], index: 0, kind: input, shape index: {}]   ;;  %s456_s1 = inlined_call_operand.hbm [shape: bf16[100,8], index: 1, kind: input, shape index: {}]   ;;  %s457_s2 = inlined_call_operand.hbm [shape: f32[1,8], index: 2, kind: input, shape index: {}]   ;;  %s458_s3 = inlined_call_operand.vmem [shape: f32[32,8], index: 3, kind: output, shape index: {0}]   ;;  %s459_s4 = inlined_call_operand.vmem [shape: f32[1,8], index: 4, kind: output, shape index: {1}]   ;;  %s460_s5 = inlined_call_operand.vmem [shape: f32[1,8], index: 5, kind: output, shape index: {2}]  }
   0x1   :  { %12 = vsyncpa [#allocation5], 0  ;;  %s342_s18 = smov [#allocation2]   ;;  %s294_s22 = scalar_lea.hbm %s456_s1, 832 }
   0x2   :  { %s20_s19 = sshll.u32 %s342_s18, 4  ;;  %p295_p0 = scmp.ne.s32.totalorder %s456_s1, %s294_s22  ;;  %s21_s19 = int_to_ptr.vmem [resolvable:$true] %s20_s19 }
   0x3   :  { %p298_p1 = scmp.lt.u32.totalorder %s294_s22, %s456_s1 }
   0x5   :  { %p300_p2 = pnand %p298_p1, %p295_p0 }
   0x7   :  { %303 = shalt.err (!%p300_p2)
}
   0x8   :  { %s304_s27 = scalar_lea.vmem %s21_s19, 832  ;;  %p309_p4 = scmp.lt.s32.totalorder %s21_s19, %s21_s19 }
   0x9   :  { %p305_p3 = scmp.ne.s32.totalorder %s21_s19, %s304_s27  ;;  %p310_p5 = scmp.lt.s32.totalorder %s304_s27, %s304_s27 }
   0xb   :  { %p311_p6 = por %p310_p5, %p309_p4 }
   0xd   :  { %p312_p7 = pnand %p311_p6, %p305_p3 }
   0xf   :  { %315 = shalt.err (!%p312_p7)
}
  0x10   :  { %s343_s28 = smov 64   ;;  %s344_s29 = smov 4  }
  0x11   :  { %26 = dma.hbm_to_vmem [thread:$0]  %s456_s1, 832, %s21_s19, [#allocation3], %s343_s28, %s343_s28, %s344_s29  }
  0x12   :  { %s345_s7 = smov [#allocation4]   ;;  %s316_s11 = scalar_lea.hbm %s457_s2, 16 }
  0x13   :  { %s33_s8 = sshll.u32 %s345_s7, 4  ;;  %p317_p8 = scmp.ne.s32.totalorder %s457_s2, %s316_s11  ;;  %s34_s8 = int_to_ptr.vmem [resolvable:$true] %s33_s8 }
  0x14   :  { %p320_p9 = scmp.lt.u32.totalorder %s316_s11, %s457_s2 }
  0x16   :  { %p322_p10 = pnand %p320_p9, %p317_p8 }
  0x18   :  { %325 = shalt.err (!%p322_p10)
}
  0x19   :  { %s326_s16 = scalar_lea.vmem %s34_s8, 16  ;;  %s330_s1 = scalar_lea.vmem %s34_s8, 32 }
  0x1a   :  { %p327_p11 = scmp.ne.s32.totalorder %s34_s8, %s326_s16  ;;  %p331_p12 = scmp.lt.s32.totalorder %s34_s8, %s34_s8 }
  0x1b   :  { %p332_p13 = scmp.lt.s32.totalorder %s330_s1, %s326_s16 }
  0x1d   :  { %p333_p0 = por %p332_p13, %p331_p12 }
  0x1f   :  { %p334_p1 = pnand %p333_p0, %p327_p11 }
  0x21   :  { %337 = shalt.err (!%p334_p1)
}
  0x22   :  { %36 = dma.hbm_to_vmem [thread:$0]  %s457_s2, 16, %s34_s8, [#allocation5]  }
  0x23   :  { %338 = dma.done.wait [#allocation3], 832  }
  0x24   :  { %339 = vsyncadd [#allocation3], 4294966464 }
  0x25   :  { %340 = dma.done.wait [#allocation5], 16  }
  0x26   :  { %341 = vsyncadd [#allocation5], 4294967280  ;;  %v285_v0 = vld [vmem:[#allocation2] sm:$0xff]   ;;  %v286_v1 = vld [vmem:[#allocation2 + $0x8] sm:$0xff]   ;;  %vm117_vm0 = vcmask 818176   ;;  %vm124_vm1 = vcmask 1041408  }
  0x27   :  { %261 = vmatprep.subr.bf16.mxu0 %v285_v0  ;;  %v287_v2 = vld [vmem:[#allocation2 + $0x10] sm:$0xff]   ;;  %v292_v3 = vld [vmem:[%s455_s0] sm:$0xff]   ;;  %v288_v4 = vld [vmem:[#allocation2 + $0x18] sm:$0xff]   ;;  %vm186_vm2 = vcmask 57344   ;;  %v346_v10 = vmov 0.0   ;;  %vm177_vm3 = vcmask 64512  }
  0x28   :  { %262 = vmatpush3.bf16.msra.mxu0 %v285_v0  ;;  %275 = vmatprep.mubr.msk.bf16.mxu0 %vm117_vm0, %v292_v3  ;;  %v289_v5 = vld [vmem:[#allocation2 + $0x20] sm:$0xff]   ;;  %v290_v6 = vld [vmem:[#allocation2 + $0x28] sm:$0xff]   ;;  %v291_v7 = vld [vmem:[#allocation2 + $0x30] ss:$0 sps:$4 sm:$0x33]  }
  0x29   :  { %263 = vmatprep.subr.bf16.mxu0 %v286_v1  ;;  %v126_v8 = vsel %vm124_vm1, %v291_v7, 0  ;;  %v293_v9 = vld [vmem:[%s455_s0 + $0x8] sm:$0xff]   ;;  %187 = vst.msk [vmem:[%s459_s4] sm:$0x1] %vm186_vm2, %v346_v10  ;;  %188 = vst.msk [vmem:[%s460_s5] sm:$0x1] %vm186_vm2, %v346_v10 }
  0x2a   :  { %v240_v11 = vld [vmem:[#allocation4] ss:$0 sm:$0xff] }
  0x2c   :  { %264 = vmatpush3.bf16.msra.mxu0 %v286_v1 }
  0x2d   :  { %265 = vmatprep.subr.bf16.mxu0 %v287_v2 }
  0x30   :  { %266 = vmatpush3.bf16.msra.mxu0 %v287_v2  ;;  %v189_v47 = vld [vmem:[%s459_s4] sm:$0x1] }
  0x31   :  { %267 = vmatprep.subr.bf16.mxu0 %v288_v4  ;;  %v206_v50 = vld [vmem:[%s460_s5] sm:$0x1] }
  0x34   :  { %268 = vmatpush3.bf16.msra.mxu0 %v288_v4 }
  0x35   :  { %269 = vmatprep.subr.bf16.mxu0 %v289_v5 }
  0x38   :  { %270 = vmatpush3.bf16.msra.mxu0 %v289_v5 }
  0x39   :  { %271 = vmatprep.subr.bf16.mxu0 %v290_v6 }
  0x3c   :  { %272 = vmatpush3.bf16.msra.mxu0 %v290_v6 }
  0x3d   :  { %279 = vmatprep.subr.msk.bf16.mxu0 %vm124_vm1, %v291_v7 }
  0x40   :  { %274 = vmatpush3.bf16.msra.mxu0 %v126_v8 }
  0x43   :  { %276 = vmatmul.mubr.msk.bf16.vlgmr.msra.gmra.mrb[0].mxu0 %vm117_vm0, %v293_v9 }
 0x116   :  { %v277_v12 = vpop.f32.mrb[0].mxu0 }
 0x117   :  { %v171_v13 = vadd.f32 %v277_v12, %v240_v11  ;;  %v162_v14 = vpop.f32.mrb[1].mxu0 }
 0x118   :  { %v163_v15 = vadd.f32 %v240_v11, %v162_v14  ;;  %v278_v16 = vpop.f32.mrb[2].mxu0 }
 0x119   :  { %180 = vst.msk [vmem:[%s458_s3 + $0x10] sm:$0xff] %vm177_vm3, %v171_v13  ;;  %v174_v17 = vadd.f32 %v278_v16, %v240_v11  ;;  %v165_v18 = vpop.f32.mrb[3].mxu0  ;;  %v209_v21 = vmul.f32 %v171_v13, %v171_v13  ;;  %v193_v26 = vsel %vm177_vm3, %v171_v13, 0.0 }
 0x11a   :  { %178 = vst.msk [vmem:[%s458_s3] sm:$0xff] %vm177_vm3, %v163_v15  ;;  %v207_v19 = vmul.f32 %v163_v15, %v163_v15  ;;  %v166_v20 = vadd.f32 %v240_v11, %v165_v18  ;;  %v190_v22 = vsel %vm177_vm3, %v163_v15, 0.0 }
 0x11b   :  { %181 = vst.msk [vmem:[%s458_s3 + $0x18] sm:$0xff] %vm177_vm3, %v174_v17  ;;  %v210_v28 = vmul.f32 %v174_v17, %v174_v17  ;;  %v214_v32 = vsel %vm177_vm3, %v209_v21, 0.0  ;;  %v195_v33 = vsel %vm177_vm3, %v174_v17, 0.0 }
 0x11c   :  { %179 = vst.msk [vmem:[%s458_s3 + $0x8] sm:$0xff] %vm177_vm3, %v166_v20  ;;  %v191_v23 = vsel %vm177_vm3, %v166_v20, 0.0  ;;  %v208_v24 = vmul.f32 %v166_v20, %v166_v20  ;;  %v211_v27 = vsel %vm177_vm3, %v207_v19, 0.0 }
 0x11d   :  { %v192_v25 = vadd.f32 %v191_v23, %v190_v22  ;;  %v216_v36 = vsel %vm177_vm3, %v210_v28, 0.0 }
 0x11e   :  { %v212_v29 = vsel %vm177_vm3, %v208_v24, 0.0 }
 0x11f   :  { %v194_v30 = vadd.f32 %v193_v26, %v192_v25  ;;  %v213_v31 = vadd.f32 %v212_v29, %v211_v27 }
 0x121   :  { %v196_v34 = vadd.f32 %v195_v33, %v194_v30  ;;  %v215_v35 = vadd.f32 %v214_v32, %v213_v31 }
 0x123   :  { %v197_v37 = vrot.slane %v196_v34, 4  ;;  %v217_v38 = vadd.f32 %v216_v36, %v215_v35 }
 0x125   :  { %v198_v39 = vadd.f32 %v197_v37, %v196_v34  ;;  %v218_v40 = vrot.slane %v217_v38, 4 }
 0x127   :  { %v199_v41 = vrot.slane %v198_v39, 2  ;;  %v219_v42 = vadd.f32 %v218_v40, %v217_v38 }
 0x129   :  { %v200_v43 = vadd.f32 %v199_v41, %v198_v39  ;;  %v220_v44 = vrot.slane %v219_v42, 2 }
 0x12b   :  { %v201_v45 = vrot.slane %v200_v43, 1  ;;  %v221_v46 = vadd.f32 %v220_v44, %v219_v42 }
 0x12d   :  { %v202_v48 = vadd.f32 %v201_v45, %v200_v43  ;;  %v222_v49 = vrot.slane %v221_v46, 1 }
 0x12f   :  { %v203_v51 = vadd.f32 %v202_v48, %v189_v47  ;;  %v223_v52 = vadd.f32 %v222_v49, %v221_v46 }
 0x131   :  { %205 = vst.msk [vmem:[%s459_s4] sm:$0x1] %vm186_vm2, %v203_v51  ;;  %v224_v53 = vadd.f32 %v223_v52, %v206_v50 }
 0x133   :  { %225 = vst.msk [vmem:[%s460_s5] sm:$0x1] %vm186_vm2, %v224_v53 }
 0x134   :  { %238 = vsyncpa [#allocation3], 1 }
 0x135   :  { %239 = vsyncpa [#allocation5], 1 }

// kernel: _lambda_.24
= control target key start
LH: loop header
LB: loop body
LE: loop exit
PB: predicated region body
PF: predicated region fallthrough
CT: control target
= control target key end

     0   :  { %vm52_vm1 = vcmask 64512   ;;  %s113_s0 = inlined_call_operand.vmem [shape: f32[32,8], index: 0, kind: input, shape index: {}]   ;;  %s114_s1 = inlined_call_operand.vmem [shape: f32[1,8], index: 1, kind: input, shape index: {}]   ;;  %s115_s2 = inlined_call_operand.vmem [shape: f32[1,8], index: 2, kind: input, shape index: {}]   ;;  %s116_s3 = inlined_call_operand.vmem [shape: f32[32,8], index: 3, kind: output, shape index: {}]  }
   0x1   :  { %v14_v0 = vld [vmem:[%s113_s0] sm:$0xff]  ;;  %v15_v4 = vld [vmem:[%s113_s0 + $0x8] sm:$0xff]  ;;  %v16_v5 = vld [vmem:[%s113_s0 + $0x10] sm:$0xff] }
   0x2   :  { %v61_v1 = vld [vmem:[%s114_s1] ss:$0 sm:$0xff]  ;;  %v17_v6 = vld [vmem:[%s113_s0 + $0x18] sm:$0xff] }
   0x3   :  { %v62_v2 = vld [vmem:[%s115_s2] ss:$0 sm:$0xff]  ;;  %v25_v3 = vmul.f32 %v61_v1, %v14_v0  ;;  %v26_v7 = vmul.f32 %v61_v1, %v15_v4  ;;  %v27_v8 = vmul.f32 %v61_v1, %v16_v5  ;;  %v28_v9 = vmul.f32 %v61_v1, %v17_v6 }
   0x5   :  { %v36_v10 = vadd.f32 %v62_v2, %v25_v3  ;;  %v37_v11 = vadd.f32 %v62_v2, %v26_v7  ;;  %v38_v12 = vadd.f32 %v62_v2, %v27_v8  ;;  %v39_v13 = vadd.f32 %v62_v2, %v28_v9 }
   0x7   :  { %vm40_vm0 = vcmp.ge.f32.partialorder %v36_v10, 0.0  ;;  %v44_v14 = vmul.f32 0.01, %v36_v10  ;;  %vm41_vm2 = vcmp.ge.f32.partialorder %v37_v11, 0.0  ;;  %v45_v15 = vmul.f32 0.01, %v37_v11 }
   0x8   :  { %vm42_vm3 = vcmp.ge.f32.partialorder %v38_v12, 0.0  ;;  %v46_v16 = vmul.f32 0.01, %v38_v12  ;;  %vm43_vm4 = vcmp.ge.f32.partialorder %v39_v13, 0.0  ;;  %v47_v18 = vmul.f32 0.01, %v39_v13 }
   0x9   :  { %v48_v17 = vsel %vm40_vm0, %v36_v10, %v44_v14  ;;  %v49_v19 = vsel %vm41_vm2, %v37_v11, %v45_v15 }
   0xa   :  { %53 = vst.msk [vmem:[%s116_s3] sm:$0xff] %vm52_vm1, %v48_v17  ;;  %v50_v20 = vsel %vm42_vm3, %v38_v12, %v46_v16  ;;  %54 = vst.msk [vmem:[%s116_s3 + $0x8] sm:$0xff] %vm52_vm1, %v49_v19  ;;  %v51_v21 = vsel %vm43_vm4, %v39_v13, %v47_v18 }
   0xb   :  { %55 = vst.msk [vmem:[%s116_s3 + $0x10] sm:$0xff] %vm52_vm1, %v50_v20  ;;  %56 = vst.msk [vmem:[%s116_s3 + $0x18] sm:$0xff] %vm52_vm1, %v51_v21 }

// kernel: _lambda_.26
= control target key start
LH: loop header
LB: loop body
LE: loop exit
PB: predicated region body
PF: predicated region fallthrough
CT: control target
= control target key end

     0   :  { %vm124_vm0 = vcmask 64512   ;;  %s322_s0 = inlined_call_operand.vmem [shape: f32[128,8], index: 0, kind: input, shape index: {}]   ;;  %s323_s1 = inlined_call_operand.vmem [shape: f32[1,8], index: 1, kind: input, shape index: {}]   ;;  %s324_s2 = inlined_call_operand.vmem [shape: f32[1,8], index: 2, kind: input, shape index: {}]   ;;  %s325_s3 = inlined_call_operand.vmem [shape: f32[128,8], index: 3, kind: output, shape index: {}]  }
   0x1   :  { %v14_v0 = vld [vmem:[%s322_s0] sm:$0xff]  ;;  %v15_v4 = vld [vmem:[%s322_s0 + $0x8] sm:$0xff]  ;;  %v16_v5 = vld [vmem:[%s322_s0 + $0x10] sm:$0xff] }
   0x2   :  { %v173_v1 = vld [vmem:[%s323_s1] ss:$0 sm:$0xff]  ;;  %v17_v6 = vld [vmem:[%s322_s0 + $0x18] sm:$0xff]  ;;  %v19_v11 = vld [vmem:[%s322_s0 + $0x28] sm:$0xff] }
   0x3   :  { %v178_v2 = vld [vmem:[%s324_s2] ss:$0 sm:$0xff]  ;;  %v37_v3 = vmul.f32 %v173_v1, %v14_v0  ;;  %v38_v7 = vmul.f32 %v173_v1, %v15_v4  ;;  %v39_v8 = vmul.f32 %v173_v1, %v16_v5  ;;  %v40_v9 = vmul.f32 %v173_v1, %v17_v6  ;;  %v20_v12 = vld [vmem:[%s322_s0 + $0x30] sm:$0xff]  ;;  %v21_v17 = vld [vmem:[%s322_s0 + $0x38] sm:$0xff] }
   0x4   :  { %v18_v10 = vld [vmem:[%s322_s0 + $0x20] sm:$0xff]  ;;  %v42_v15 = vmul.f32 %v173_v1, %v19_v11  ;;  %v43_v16 = vmul.f32 %v173_v1, %v20_v12  ;;  %v44_v21 = vmul.f32 %v173_v1, %v21_v17  ;;  %v23_v30 = vld [vmem:[%s322_s0 + $0x48] sm:$0xff]  ;;  %v24_v31 = vld [vmem:[%s322_s0 + $0x50] sm:$0xff] }
   0x5   :  { %v60_v13 = vadd.f32 %v178_v2, %v37_v3  ;;  %v41_v14 = vmul.f32 %v173_v1, %v18_v10  ;;  %v61_v18 = vadd.f32 %v178_v2, %v38_v7  ;;  %v62_v19 = vadd.f32 %v178_v2, %v39_v8  ;;  %v22_v25 = vld [vmem:[%s322_s0 + $0x40] sm:$0xff]  ;;  %v25_v43 = vld [vmem:[%s322_s0 + $0x58] sm:$0xff]  ;;  %v27_v45 = vld [vmem:[%s322_s0 + $0x68] sm:$0xff] }
   0x6   :  { %v63_v20 = vadd.f32 %v178_v2, %v40_v9  ;;  %v65_v24 = vadd.f32 %v178_v2, %v42_v15  ;;  %v66_v37 = vadd.f32 %v178_v2, %v43_v16  ;;  %v67_v38 = vadd.f32 %v178_v2, %v44_v21  ;;  %v26_v44 = vld [vmem:[%s322_s0 + $0x60] sm:$0xff]  ;;  %v28_v56 = vld [vmem:[%s322_s0 + $0x70] sm:$0xff]  ;;  %v29_v4 = vld [vmem:[%s322_s0 + $0x78] sm:$0xff] }
   0x7   :  { %vm76_vm1 = vcmp.ge.f32.partialorder %v60_v13, 0.0  ;;  %v92_v22 = vmul.f32 0.01, %v60_v13  ;;  %v64_v23 = vadd.f32 %v178_v2, %v41_v14  ;;  %vm77_vm2 = vcmp.ge.f32.partialorder %v61_v18, 0.0 }
   0x8   :  { %v93_v26 = vmul.f32 0.01, %v61_v18  ;;  %vm78_vm3 = vcmp.ge.f32.partialorder %v62_v19, 0.0  ;;  %v94_v27 = vmul.f32 0.01, %v62_v19  ;;  %vm79_vm4 = vcmp.ge.f32.partialorder %v63_v20, 0.0 }
   0x9   :  { %v108_v28 = vsel %vm76_vm1, %v60_v13, %v92_v22  ;;  %v95_v29 = vmul.f32 0.01, %v63_v20  ;;  %vm80_vm5 = vcmp.ge.f32.partialorder %v64_v23, 0.0  ;;  %v96_v34 = vmul.f32 0.01, %v64_v23 }
   0xa   :  { %125 = vst.msk [vmem:[%s325_s3] sm:$0xff] %vm124_vm0, %v108_v28  ;;  %v109_v32 = vsel %vm77_vm2, %v61_v18, %v93_v26  ;;  %v110_v33 = vsel %vm78_vm3, %v62_v19, %v94_v27  ;;  %vm81_vm6 = vcmp.ge.f32.partialorder %v65_v24, 0.0  ;;  %v97_v36 = vmul.f32 0.01, %v65_v24 }
   0xb   :  { %126 = vst.msk [vmem:[%s325_s3 + $0x8] sm:$0xff] %vm124_vm0, %v109_v32  ;;  %127 = vst.msk [vmem:[%s325_s3 + $0x10] sm:$0xff] %vm124_vm0, %v110_v33  ;;  %v111_v35 = vsel %vm79_vm4, %v63_v20, %v95_v29  ;;  %v112_v39 = vsel %vm80_vm5, %v64_v23, %v96_v34  ;;  %v45_v40 = vmul.f32 %v173_v1, %v22_v25  ;;  %vm82_vm7 = vcmp.ge.f32.partialorder %v66_v37, 0.0 }
   0xc   :  { %128 = vst.msk [vmem:[%s325_s3 + $0x18] sm:$0xff] %vm124_vm0, %v111_v35  ;;  %v46_v41 = vmul.f32 %v173_v1, %v23_v30  ;;  %v47_v42 = vmul.f32 %v173_v1, %v24_v31  ;;  %129 = vst.msk [vmem:[%s325_s3 + $0x20] sm:$0xff] %vm124_vm0, %v112_v39  ;;  %v113_v46 = vsel %vm81_vm6, %v65_v24, %v97_v36  ;;  %v98_v47 = vmul.f32 0.01, %v66_v37 }
   0xd   :  { %vm83_vm8 = vcmp.ge.f32.partialorder %v67_v38, 0.0  ;;  %130 = vst.msk [vmem:[%s325_s3 + $0x28] sm:$0xff] %vm124_vm0, %v113_v46  ;;  %v99_v48 = vmul.f32 0.01, %v67_v38  ;;  %v68_v49 = vadd.f32 %v178_v2, %v45_v40  ;;  %v48_v53 = vmul.f32 %v173_v1, %v25_v43 }
   0xe   :  { %v69_v50 = vadd.f32 %v178_v2, %v46_v41  ;;  %v70_v51 = vadd.f32 %v178_v2, %v47_v42  ;;  %v114_v52 = vsel %vm82_vm7, %v66_v37, %v98_v47  ;;  %v49_v54 = vmul.f32 %v173_v1, %v26_v44 }
   0xf   :  { %v50_v55 = vmul.f32 %v173_v1, %v27_v45  ;;  %131 = vst.msk [vmem:[%s325_s3 + $0x30] sm:$0xff] %vm124_vm0, %v114_v52  ;;  %v115_v57 = vsel %vm83_vm8, %v67_v38, %v99_v48  ;;  %vm84_vm9 = vcmp.ge.f32.partialorder %v68_v49, 0.0  ;;  %v100_v58 = vmul.f32 0.01, %v68_v49 }
  0x10   :  { %vm85_vm10 = vcmp.ge.f32.partialorder %v69_v50, 0.0  ;;  %132 = vst.msk [vmem:[%s325_s3 + $0x38] sm:$0xff] %vm124_vm0, %v115_v57  ;;  %v101_v59 = vmul.f32 0.01, %v69_v50  ;;  %vm86_vm11 = vcmp.ge.f32.partialorder %v70_v51, 0.0  ;;  %v71_v61 = vadd.f32 %v178_v2, %v48_v53 }
  0x11   :  { %v102_v60 = vmul.f32 0.01, %v70_v51  ;;  %v116_v62 = vsel %vm84_vm9, %v68_v49, %v100_v58  ;;  %v72_v63 = vadd.f32 %v178_v2, %v49_v54  ;;  %v73_v0 = vadd.f32 %v178_v2, %v50_v55 }
  0x12   :  { %v51_v3 = vmul.f32 %v173_v1, %v28_v56  ;;  %133 = vst.msk [vmem:[%s325_s3 + $0x40] sm:$0xff] %vm124_vm0, %v116_v62  ;;  %v117_v5 = vsel %vm85_vm10, %v69_v50, %v101_v59  ;;  %vm87_vm12 = vcmp.ge.f32.partialorder %v71_v61, 0.0  ;;  %v103_v7 = vmul.f32 0.01, %v71_v61 }
  0x13   :  { %v118_v6 = vsel %vm86_vm11, %v70_v51, %v102_v60  ;;  %134 = vst.msk [vmem:[%s325_s3 + $0x48] sm:$0xff] %vm124_vm0, %v117_v5  ;;  %vm88_vm13 = vcmp.ge.f32.partialorder %v72_v63, 0.0  ;;  %v104_v8 = vmul.f32 0.01, %v72_v63  ;;  %vm89_vm14 = vcmp.ge.f32.partialorder %v73_v0, 0.0 }
  0x14   :  { %135 = vst.msk [vmem:[%s325_s3 + $0x50] sm:$0xff] %vm124_vm0, %v118_v6  ;;  %v105_v9 = vmul.f32 0.01, %v73_v0  ;;  %v119_v10 = vsel %vm87_vm12, %v71_v61, %v103_v7  ;;  %v74_v11 = vadd.f32 %v178_v2, %v51_v3  ;;  %v52_v12 = vmul.f32 %v173_v1, %v29_v4 }
  0x15   :  { %136 = vst.msk [vmem:[%s325_s3 + $0x58] sm:$0xff] %vm124_vm0, %v119_v10  ;;  %v120_v13 = vsel %vm88_vm13, %v72_v63, %v104_v8 }
  0x16   :  { %v121_v14 = vsel %vm89_vm14, %v73_v0, %v105_v9  ;;  %137 = vst.msk [vmem:[%s325_s3 + $0x60] sm:$0xff] %vm124_vm0, %v120_v13  ;;  %vm90_vm15 = vcmp.ge.f32.partialorder %v74_v11, 0.0  ;;  %v106_v15 = vmul.f32 0.01, %v74_v11  ;;  %v75_v1 = vadd.f32 %v178_v2, %v52_v12 }
  0x17   :  { %138 = vst.msk [vmem:[%s325_s3 + $0x68] sm:$0xff] %vm124_vm0, %v121_v14 }
  0x18   :  { %v122_v16 = vsel %vm90_vm15, %v74_v11, %v106_v15  ;;  %vm91_vm1 = vcmp.ge.f32.partialorder %v75_v1, 0.0  ;;  %v107_v17 = vmul.f32 0.01, %v75_v1 }
  0x19   :  { %139 = vst.msk [vmem:[%s325_s3 + $0x70] sm:$0xff] %vm124_vm0, %v122_v16 }
  0x1a   :  { %v123_v18 = vsel %vm91_vm1, %v75_v1, %v107_v17 }
  0x1b   :  { %140 = vst.msk [vmem:[%s325_s3 + $0x78] sm:$0xff] %vm124_vm0, %v123_v18 }

// kernel: _lambda_.25
= control target key start
LH: loop header
LB: loop body
LE: loop exit
PB: predicated region body
PF: predicated region fallthrough
CT: control target
= control target key end

     0   :  { %v575_v0 = vmov 0   ;;  %vm213_vm0 = vcmask 588800   ;;  %vm238_vm1 = vcmask 1043456   ;;  %vm360_vm2 = vcmask 57344   ;;  %s897_s1 = inlined_call_operand.vmem [shape: bf16[200,8], index: 1, kind: input, shape index: {}]   ;;  %s898_s0 = inlined_call_operand.vmem [shape: bf16[128,200], index: 0, kind: input, shape index: {}]   ;;  %s899_s4 = inlined_call_operand.vmem [shape: f32[1,8], index: 4, kind: output, shape index: {1}]   ;;  %s900_s5 = inlined_call_operand.vmem [shape: f32[1,8], index: 5, kind: output, shape index: {2}]   ;;  %s901_s2 = inlined_call_operand.vmem [shape: f32[1,8], index: 2, kind: input, shape index: {}]   ;;  %s902_s3 = inlined_call_operand.vmem [shape: f32[128,8], index: 3, kind: output, shape index: {0}]  }
   0x1   :  { %242 = vmatprep.subr.bf16.mxu0 %v575_v0  ;;  %v538_v1 = vld [vmem:[%s897_s1] sm:$0xff]   ;;  %510 = vmatprep.subr.bf16.mxu1 %v575_v0  ;;  %v539_v2 = vld [vmem:[%s897_s1 + $0x8] sm:$0xff]   ;;  %v540_v3 = vld [vmem:[%s897_s1 + $0x10] sm:$0xff]   ;;  %v576_v31 = vmov 0.0   ;;  %vm339_vm3 = vcmask 64512  }
   0x2   :  { %243 = vmatpush1.bf16.msra.mxu0 %v538_v1  ;;  %523 = vmatpush1.bf16.msra.mxu1 %v538_v1  ;;  %v541_v4 = vld [vmem:[%s897_s1 + $0x18] sm:$0xff]   ;;  %v553_v5 = vld [vmem:[%s898_s0 + $0x4] ss:$8 sps:$4 sm:$0xff]   ;;  %v544_v9 = vld [vmem:[%s897_s1 + $0x30] sm:$0xff]   ;;  %361 = vst.msk [vmem:[%s899_s4] sm:$0x1] %vm360_vm2, %v576_v31 }
   0x3   :  { %244 = vmatprep.subr.bf16.mxu0 %v575_v0  ;;  %511 = vmatprep.subr.bf16.mxu1 %v575_v0  ;;  %v542_v6 = vld [vmem:[%s897_s1 + $0x20] sm:$0xff]   ;;  %v543_v8 = vld [vmem:[%s897_s1 + $0x28] sm:$0xff]   ;;  %v545_v10 = vld [vmem:[%s897_s1 + $0x38] sm:$0xff]   ;;  %362 = vst.msk [vmem:[%s900_s5] sm:$0x1] %vm360_vm2, %v576_v31 }
   0x4   :  { %502 = vmatprep.mubr.msk.bf16.mxu0 %vm213_vm0, %v553_v5  ;;  %v559_v7 = vld [vmem:[%s898_s0 + $0x44] ss:$8 sps:$4 sm:$0xff]   ;;  %v548_v13 = vld [vmem:[%s897_s1 + $0x50] sm:$0xff]   ;;  %v549_v14 = vld [vmem:[%s897_s1 + $0x58] sm:$0xff]  }
   0x5   :  { %506 = vmatprep.mubr.msk.bf16.mxu1 %vm213_vm0, %v559_v7  ;;  %v546_v11 = vld [vmem:[%s897_s1 + $0x40] sm:$0xff]   ;;  %v547_v12 = vld [vmem:[%s897_s1 + $0x48] sm:$0xff]   ;;  %v554_v19 = vld [vmem:[%s898_s0 + $0x14] ss:$8 sps:$4 sm:$0xff]  }
   0x6   :  { %245 = vmatpush1.bf16.msra.mxu0 %v539_v2  ;;  %524 = vmatpush1.bf16.msra.mxu1 %v539_v2  ;;  %v550_v15 = vld [vmem:[%s897_s1 + $0x60] ss:$0 sps:$4 sm:$0xff]   ;;  %v563_v20 = vld [vmem:[%s898_s0 + $0x54] ss:$8 sps:$4 sm:$0xff]   ;;  %v556_v21 = vld [vmem:[%s898_s0 + $0x10] ss:$8 sps:$4 sm:$0xff]  }
   0x7   :  { %246 = vmatprep.subr.bf16.mxu0 %v575_v0  ;;  %512 = vmatprep.subr.bf16.mxu1 %v575_v0  ;;  %v240_v16 = vsel %vm238_vm1, %v550_v15, 0  ;;  %v551_v17 = vld [vmem:[%s898_s0] ss:$8 sps:$4 sm:$0xff]   ;;  %v565_v22 = vld [vmem:[%s898_s0 + $0x50] ss:$8 sps:$4 sm:$0xff]  }
   0x8   :  { %v557_v18 = vld [vmem:[%s898_s0 + $0x40] ss:$8 sps:$4 sm:$0xff]   ;;  %v560_v23 = vld [vmem:[%s898_s0 + $0x24] ss:$8 sps:$4 sm:$0xff]   ;;  %v566_v27 = vld [vmem:[%s898_s0 + $0x34] ss:$8 sps:$4 sm:$0xff]  }
   0x9   :  { %v569_v24 = vld [vmem:[%s898_s0 + $0x64] ss:$8 sps:$4 sm:$0xff]   ;;  %v562_v25 = vld [vmem:[%s898_s0 + $0x20] ss:$8 sps:$4 sm:$0xff]   ;;  %v572_v28 = vld [vmem:[%s898_s0 + $0x74] ss:$8 sps:$4 sm:$0xff]  }
   0xa   :  { %247 = vmatpush1.bf16.msra.mxu0 %v540_v3  ;;  %525 = vmatpush1.bf16.msra.mxu1 %v540_v3  ;;  %v571_v26 = vld [vmem:[%s898_s0 + $0x60] ss:$8 sps:$4 sm:$0xff]   ;;  %v568_v29 = vld [vmem:[%s898_s0 + $0x30] ss:$8 sps:$4 sm:$0xff]  }
   0xb   :  { %248 = vmatprep.subr.bf16.mxu0 %v575_v0  ;;  %513 = vmatprep.subr.bf16.mxu1 %v575_v0  ;;  %v574_v30 = vld [vmem:[%s898_s0 + $0x70] ss:$8 sps:$4 sm:$0xff]   ;;  %v739_v32 = vld [vmem:[%s901_s2] ss:$0 sm:$0xff] }
   0xe   :  { %249 = vmatpush1.bf16.msra.mxu0 %v541_v4  ;;  %526 = vmatpush1.bf16.msra.mxu1 %v541_v4 }
   0xf   :  { %250 = vmatprep.subr.bf16.mxu0 %v575_v0  ;;  %514 = vmatprep.subr.bf16.mxu1 %v575_v0 }
  0x12   :  { %251 = vmatpush1.bf16.msra.mxu0 %v542_v6  ;;  %527 = vmatpush1.bf16.msra.mxu1 %v542_v6 }
  0x13   :  { %252 = vmatprep.subr.bf16.mxu0 %v575_v0  ;;  %515 = vmatprep.subr.bf16.mxu1 %v575_v0 }
  0x16   :  { %253 = vmatpush1.bf16.msra.mxu0 %v543_v8  ;;  %528 = vmatpush1.bf16.msra.mxu1 %v543_v8 }
  0x17   :  { %254 = vmatprep.subr.bf16.mxu0 %v575_v0  ;;  %516 = vmatprep.subr.bf16.mxu1 %v575_v0 }
  0x1a   :  { %255 = vmatpush1.bf16.msra.mxu0 %v544_v9  ;;  %529 = vmatpush1.bf16.msra.mxu1 %v544_v9 }
  0x1b   :  { %256 = vmatprep.subr.bf16.mxu0 %v575_v0  ;;  %517 = vmatprep.subr.bf16.mxu1 %v575_v0 }
  0x1e   :  { %257 = vmatpush1.bf16.msra.mxu0 %v545_v10  ;;  %530 = vmatpush1.bf16.msra.mxu1 %v545_v10 }
  0x1f   :  { %258 = vmatprep.subr.bf16.mxu0 %v575_v0  ;;  %518 = vmatprep.subr.bf16.mxu1 %v575_v0 }
  0x22   :  { %259 = vmatpush1.bf16.msra.mxu0 %v546_v11  ;;  %531 = vmatpush1.bf16.msra.mxu1 %v546_v11 }
  0x23   :  { %260 = vmatprep.subr.bf16.mxu0 %v575_v0  ;;  %519 = vmatprep.subr.bf16.mxu1 %v575_v0 }
  0x26   :  { %261 = vmatpush1.bf16.msra.mxu0 %v547_v12  ;;  %532 = vmatpush1.bf16.msra.mxu1 %v547_v12 }
  0x27   :  { %262 = vmatprep.subr.bf16.mxu0 %v575_v0  ;;  %520 = vmatprep.subr.bf16.mxu1 %v575_v0 }
  0x2a   :  { %263 = vmatpush1.bf16.msra.mxu0 %v548_v13  ;;  %533 = vmatpush1.bf16.msra.mxu1 %v548_v13 }
  0x2b   :  { %264 = vmatprep.subr.bf16.mxu0 %v575_v0  ;;  %521 = vmatprep.subr.bf16.mxu1 %v575_v0 }
  0x2e   :  { %265 = vmatpush1.bf16.msra.mxu0 %v549_v14  ;;  %534 = vmatpush1.bf16.msra.mxu1 %v549_v14 }
  0x2f   :  { %266 = vmatprep.subr.bf16.mxu0 %v575_v0  ;;  %522 = vmatprep.subr.bf16.mxu1 %v575_v0 }
  0x32   :  { %267 = vmatpush1.bf16.msra.mxu0 %v240_v16  ;;  %535 = vmatpush1.bf16.msra.mxu1 %v240_v16 }
  0x35   :  { %275 = vmatmul.mubr.bf16.vlgmr.msra.gmra.mrb[0].mxu0 %v551_v17  ;;  %307 = vmatmul.mubr.bf16.vlgmr.msra.gmra.mrb[0].mxu1 %v557_v18 }
  0x36   :  { %503 = vmatprep.mubr.msk.bf16.mxu0 %vm213_vm0, %v554_v19  ;;  %507 = vmatprep.mubr.msk.bf16.mxu1 %vm213_vm0, %v563_v20 }
  0x3d   :  { %283 = vmatmul.mubr.bf16.gmra.mrb[4].mxu0 %v556_v21  ;;  %315 = vmatmul.mubr.bf16.gmra.mrb[4].mxu1 %v565_v22 }
  0x3e   :  { %504 = vmatprep.mubr.msk.bf16.mxu0 %vm213_vm0, %v560_v23  ;;  %508 = vmatprep.mubr.msk.bf16.mxu1 %vm213_vm0, %v569_v24 }
  0x45   :  { %291 = vmatmul.mubr.bf16.gmra.mrb[8].mxu0 %v562_v25  ;;  %323 = vmatmul.mubr.bf16.gmra.mrb[8].mxu1 %v571_v26 }
  0x46   :  { %505 = vmatprep.mubr.msk.bf16.mxu0 %vm213_vm0, %v566_v27  ;;  %509 = vmatprep.mubr.msk.bf16.mxu1 %vm213_vm0, %v572_v28 }
  0x4d   :  { %299 = vmatmul.mubr.bf16.gmra.mrb[12].mxu0 %v568_v29  ;;  %331 = vmatmul.mubr.bf16.gmra.mrb[12].mxu1 %v574_v30 }
 0x108   :  { %v276_v33 = vpop.f32.mrb[0].mxu0  ;;  %v308_v34 = vpop.f32.mrb[0].mxu1 }
 0x109   :  { %v277_v35 = vadd.f32 %v739_v32, %v276_v33  ;;  %v278_v36 = vpop.f32.mrb[1].mxu0  ;;  %v743_v37 = vadd.f32 %v739_v32, %v308_v34  ;;  %v310_v38 = vpop.f32.mrb[1].mxu1 }
 0x10a   :  { %v279_v39 = vpop.f32.mrb[2].mxu0  ;;  %v311_v40 = vpop.f32.mrb[2].mxu1 }
 0x10b   :  { %340 = vst.msk [vmem:[%s902_s3] sm:$0xff] %vm339_vm3, %v277_v35  ;;  %v405_v41 = vmul.f32 %v277_v35, %v277_v35  ;;  %v280_v42 = vadd.f32 %v739_v32, %v279_v39  ;;  %v281_v43 = vpop.f32.mrb[3].mxu0  ;;  %348 = vst.msk [vmem:[%s902_s3 + $0x40] sm:$0xff] %vm339_vm3, %v743_v37  ;;  %v313_v44 = vpop.f32.mrb[3].mxu1  ;;  %v756_v45 = vadd.f32 %v739_v32, %v311_v40  ;;  %v364_v46 = vsel %vm339_vm3, %v277_v35, 0.0 }
 0x10d   :  { %341 = vst.msk [vmem:[%s902_s3 + $0x8] sm:$0xff] %vm339_vm3, %v280_v42  ;;  %v365_v47 = vsel %vm339_vm3, %v280_v42, 0.0  ;;  %v406_v48 = vmul.f32 %v280_v42, %v280_v42  ;;  %349 = vst.msk [vmem:[%s902_s3 + $0x48] sm:$0xff] %vm339_vm3, %v756_v45  ;;  %v421_v50 = vsel %vm339_vm3, %v405_v41, 0.0 }
 0x10e   :  { %v366_v49 = vadd.f32 %v365_v47, %v364_v46 }
 0x10f   :  { %v422_v51 = vsel %vm339_vm3, %v406_v48, 0.0 }
 0x110   :  { %v423_v52 = vadd.f32 %v422_v51, %v421_v50  ;;  %v284_v53 = vpop.f32.mrb[4].mxu0  ;;  %v316_v54 = vpop.f32.mrb[4].mxu1  ;;  %v413_v51 = vmul.f32 %v743_v37, %v743_v37 }
 0x111   :  { %v285_v55 = vadd.f32 %v739_v32, %v284_v53  ;;  %v286_v56 = vpop.f32.mrb[5].mxu0  ;;  %v773_v57 = vadd.f32 %v739_v32, %v316_v54  ;;  %v318_v58 = vpop.f32.mrb[5].mxu1 }
 0x112   :  { %v287_v59 = vpop.f32.mrb[6].mxu0  ;;  %v319_v60 = vpop.f32.mrb[6].mxu1  ;;  %v414_v58 = vmul.f32 %v756_v45, %v756_v45 }
 0x113   :  { %342 = vst.msk [vmem:[%s902_s3 + $0x10] sm:$0xff] %vm339_vm3, %v285_v55  ;;  %v367_v61 = vsel %vm339_vm3, %v285_v55, 0.0  ;;  %v407_v62 = vmul.f32 %v285_v55, %v285_v55  ;;  %v288_v63 = vadd.f32 %v739_v32, %v287_v59  ;;  %v289_v0 = vpop.f32.mrb[7].mxu0  ;;  %350 = vst.msk [vmem:[%s902_s3 + $0x50] sm:$0xff] %vm339_vm3, %v773_v57  ;;  %v321_v1 = vpop.f32.mrb[7].mxu1  ;;  %v787_v3 = vadd.f32 %v739_v32, %v319_v60 }
 0x114   :  { %v368_v2 = vadd.f32 %v367_v61, %v366_v49  ;;  %v415_v0 = vmul.f32 %v773_v57, %v773_v57 }
 0x115   :  { %v424_v4 = vsel %vm339_vm3, %v407_v62, 0.0  ;;  %343 = vst.msk [vmem:[%s902_s3 + $0x18] sm:$0xff] %vm339_vm3, %v288_v63  ;;  %v369_v5 = vsel %vm339_vm3, %v288_v63, 0.0  ;;  %v408_v6 = vmul.f32 %v288_v63, %v288_v63  ;;  %351 = vst.msk [vmem:[%s902_s3 + $0x58] sm:$0xff] %vm339_vm3, %v787_v3  ;;  %v436_v62 = vsel %vm339_vm3, %v413_v51, 0.0 }
 0x116   :  { %v425_v7 = vadd.f32 %v424_v4, %v423_v52  ;;  %v370_v8 = vadd.f32 %v369_v5, %v368_v2  ;;  %v381_v63 = vsel %vm339_vm3, %v756_v45, 0.0  ;;  %v438_v4 = vsel %vm339_vm3, %v414_v58, 0.0 }
 0x117   :  { %v426_v9 = vsel %vm339_vm3, %v408_v6, 0.0  ;;  %v416_v5 = vmul.f32 %v787_v3, %v787_v3  ;;  %v385_v45 = vsel %vm339_vm3, %v787_v3, 0.0 }
 0x118   :  { %v427_v10 = vadd.f32 %v426_v9, %v425_v7  ;;  %v292_v11 = vpop.f32.mrb[8].mxu0  ;;  %v324_v12 = vpop.f32.mrb[8].mxu1 }
 0x119   :  { %v293_v13 = vadd.f32 %v739_v32, %v292_v11  ;;  %v294_v14 = vpop.f32.mrb[9].mxu0  ;;  %v803_v15 = vadd.f32 %v739_v32, %v324_v12  ;;  %v326_v16 = vpop.f32.mrb[9].mxu1  ;;  %v442_v12 = vsel %vm339_vm3, %v416_v5, 0.0 }
 0x11a   :  { %v295_v17 = vpop.f32.mrb[10].mxu0  ;;  %v327_v18 = vpop.f32.mrb[10].mxu1 }
 0x11b   :  { %344 = vst.msk [vmem:[%s902_s3 + $0x20] sm:$0xff] %vm339_vm3, %v293_v13  ;;  %v371_v19 = vsel %vm339_vm3, %v293_v13, 0.0  ;;  %v409_v20 = vmul.f32 %v293_v13, %v293_v13  ;;  %v296_v21 = vadd.f32 %v739_v32, %v295_v17  ;;  %v297_v22 = vpop.f32.mrb[11].mxu0  ;;  %352 = vst.msk [vmem:[%s902_s3 + $0x60] sm:$0xff] %vm339_vm3, %v803_v15  ;;  %v329_v23 = vpop.f32.mrb[11].mxu1  ;;  %v328_v25 = vadd.f32 %v739_v32, %v327_v18 }
 0x11c   :  { %v372_v24 = vadd.f32 %v371_v19, %v370_v8  ;;  %v440_v8 = vsel %vm339_vm3, %v415_v0, 0.0  ;;  %v417_v9 = vmul.f32 %v803_v15, %v803_v15 }
 0x11d   :  { %v428_v26 = vsel %vm339_vm3, %v409_v20, 0.0  ;;  %345 = vst.msk [vmem:[%s902_s3 + $0x28] sm:$0xff] %vm339_vm3, %v296_v21  ;;  %v373_v27 = vsel %vm339_vm3, %v296_v21, 0.0  ;;  %v410_v28 = vmul.f32 %v296_v21, %v296_v21  ;;  %353 = vst.msk [vmem:[%s902_s3 + $0x68] sm:$0xff] %vm339_vm3, %v328_v25  ;;  %v418_v13 = vmul.f32 %v328_v25, %v328_v25 }
 0x11e   :  { %v429_v29 = vadd.f32 %v428_v26, %v427_v10  ;;  %v374_v30 = vadd.f32 %v373_v27, %v372_v24  ;;  %v444_v18 = vsel %vm339_vm3, %v417_v9, 0.0  ;;  %v389_v19 = vsel %vm339_vm3, %v328_v25, 0.0 }
 0x11f   :  { %v430_v31 = vsel %vm339_vm3, %v410_v28, 0.0  ;;  %v446_v22 = vsel %vm339_vm3, %v418_v13, 0.0 }
 0x120   :  { %v431_v33 = vadd.f32 %v430_v31, %v429_v29  ;;  %v300_v34 = vpop.f32.mrb[12].mxu0  ;;  %v332_v35 = vpop.f32.mrb[12].mxu1 }
 0x121   :  { %v301_v36 = vadd.f32 %v739_v32, %v300_v34  ;;  %v302_v38 = vpop.f32.mrb[13].mxu0  ;;  %v333_v39 = vadd.f32 %v739_v32, %v332_v35  ;;  %v334_v40 = vpop.f32.mrb[13].mxu1 }
 0x122   :  { %v303_v41 = vpop.f32.mrb[14].mxu0  ;;  %v335_v42 = vpop.f32.mrb[14].mxu1 }
 0x123   :  { %346 = vst.msk [vmem:[%s902_s3 + $0x30] sm:$0xff] %vm339_vm3, %v301_v36  ;;  %v375_v43 = vsel %vm339_vm3, %v301_v36, 0.0  ;;  %v411_v44 = vmul.f32 %v301_v36, %v301_v36  ;;  %v304_v46 = vadd.f32 %v739_v32, %v303_v41  ;;  %v305_v47 = vpop.f32.mrb[15].mxu0  ;;  %354 = vst.msk [vmem:[%s902_s3 + $0x70] sm:$0xff] %vm339_vm3, %v333_v39  ;;  %v337_v48 = vpop.f32.mrb[15].mxu1  ;;  %v336_v50 = vadd.f32 %v739_v32, %v335_v42 }
 0x124   :  { %v376_v49 = vadd.f32 %v375_v43, %v374_v30  ;;  %v379_v32 = vsel %vm339_vm3, %v743_v37, 0.0  ;;  %v383_v37 = vsel %vm339_vm3, %v773_v57, 0.0  ;;  %v387_v57 = vsel %vm339_vm3, %v803_v15, 0.0  ;;  %v363_v42 = vld [vmem:[%s899_s4] sm:$0x1] }
 0x125   :  { %v432_v52 = vsel %vm339_vm3, %v411_v44, 0.0  ;;  %347 = vst.msk [vmem:[%s902_s3 + $0x38] sm:$0xff] %vm339_vm3, %v304_v46  ;;  %v377_v53 = vsel %vm339_vm3, %v304_v46, 0.0  ;;  %v412_v54 = vmul.f32 %v304_v46, %v304_v46  ;;  %355 = vst.msk [vmem:[%s902_s3 + $0x78] sm:$0xff] %vm339_vm3, %v336_v50  ;;  %v419_v14 = vmul.f32 %v333_v39, %v333_v39  ;;  %v404_v46 = vld [vmem:[%s900_s5] sm:$0x1] }
 0x126   :  { %v433_v55 = vadd.f32 %v432_v52, %v431_v33  ;;  %v378_v56 = vadd.f32 %v377_v53, %v376_v49  ;;  %v391_v3 = vsel %vm339_vm3, %v333_v39, 0.0  ;;  %v420_v24 = vmul.f32 %v336_v50, %v336_v50 }
 0x127   :  { %v434_v59 = vsel %vm339_vm3, %v412_v54, 0.0  ;;  %v448_v23 = vsel %vm339_vm3, %v419_v14, 0.0  ;;  %v393_v15 = vsel %vm339_vm3, %v336_v50, 0.0 }
 0x128   :  { %v380_v60 = vadd.f32 %v379_v32, %v378_v56  ;;  %v435_v61 = vadd.f32 %v434_v59, %v433_v55  ;;  %v450_v30 = vsel %vm339_vm3, %v420_v24, 0.0 }
 0x12a   :  { %v382_v1 = vadd.f32 %v381_v63, %v380_v60  ;;  %v437_v2 = vadd.f32 %v436_v62, %v435_v61 }
 0x12c   :  { %v439_v6 = vadd.f32 %v438_v4, %v437_v2  ;;  %v384_v7 = vadd.f32 %v383_v37, %v382_v1 }
 0x12e   :  { %v386_v10 = vadd.f32 %v385_v45, %v384_v7  ;;  %v441_v11 = vadd.f32 %v440_v8, %v439_v6 }
 0x130   :  { %v388_v16 = vadd.f32 %v387_v57, %v386_v10  ;;  %v443_v17 = vadd.f32 %v442_v12, %v441_v11 }
 0x132   :  { %v445_v20 = vadd.f32 %v444_v18, %v443_v17  ;;  %v390_v21 = vadd.f32 %v389_v19, %v388_v16 }
 0x134   :  { %v447_v26 = vadd.f32 %v446_v22, %v445_v20  ;;  %v392_v27 = vadd.f32 %v391_v3, %v390_v21 }
 0x136   :  { %v449_v28 = vadd.f32 %v448_v23, %v447_v26  ;;  %v394_v29 = vadd.f32 %v393_v15, %v392_v27 }
 0x138   :  { %v395_v31 = vrot.slane %v394_v29, 4  ;;  %v451_v33 = vadd.f32 %v450_v30, %v449_v28 }
 0x13a   :  { %v396_v25 = vadd.f32 %v395_v31, %v394_v29  ;;  %v452_v34 = vrot.slane %v451_v33, 4 }
 0x13c   :  { %v397_v35 = vrot.slane %v396_v25, 2  ;;  %v453_v36 = vadd.f32 %v452_v34, %v451_v33 }
 0x13e   :  { %v398_v38 = vadd.f32 %v397_v35, %v396_v25  ;;  %v454_v39 = vrot.slane %v453_v36, 2 }
 0x140   :  { %v399_v40 = vrot.slane %v398_v38, 1  ;;  %v455_v41 = vadd.f32 %v454_v39, %v453_v36 }
 0x142   :  { %v400_v43 = vadd.f32 %v399_v40, %v398_v38  ;;  %v456_v44 = vrot.slane %v455_v41, 1 }
 0x144   :  { %v401_v47 = vadd.f32 %v400_v43, %v363_v42  ;;  %v457_v48 = vadd.f32 %v456_v44, %v455_v41 }
 0x146   :  { %403 = vst.msk [vmem:[%s899_s4] sm:$0x1] %vm360_vm2, %v401_v47  ;;  %v458_v49 = vadd.f32 %v457_v48, %v404_v46 }
 0x148   :  { %459 = vst.msk [vmem:[%s900_s5] sm:$0x1] %vm360_vm2, %v458_v49 }

// kernel: _lambda_.28
= control target key start
LH: loop header
LB: loop body
LE: loop exit
PB: predicated region body
PF: predicated region fallthrough
CT: control target
= control target key end

     0   :  { %s518_s12 = smov 0   ;;  %s712_s0 = inlined_call_operand.vmem [shape: f32[512,4], index: 0, kind: input, shape index: {}]   ;;  %s713_s1 = inlined_call_operand.vmem [shape: f32[1,4], index: 1, kind: input, shape index: {}]   ;;  %s714_s2 = inlined_call_operand.vmem [shape: f32[1,4], index: 2, kind: input, shape index: {}]   ;;  %s715_s3 = inlined_call_operand.vmem [shape: f32[512,4], index: 3, kind: output, shape index: {}]  }
   0x1 LB: > { %s469_s13 = sadd.s32 4294967295, %s496_s12   ;;  %p473_p0 = scmp.ge.s32.totalorder %s496_s12, 1  ;;  %s496_s12 = sphi %s518_s12, %s13_s12  }
   0x2   : > { %p138_p1 = scmp.lt.s32.totalorder %s496_s12, 3 }
   0x4   : > { %p139_p2 = pnand %p473_p0, %p138_p1 }
   0x5   : > { %s474_s14 = sshll.u32 (!%p139_p2), %s469_s13, 5  ;;  %v532_v0 = vld [vmem:[%s713_s1] ss:$0 sm:$0xff] (!%p139_p2)  ;;  %vm380_vm0 = vcmask (!%p139_p2), 31744  }
   0x6   : > { %142 = sbr.rel (%p139_p2) target bundleno = 62 (0x3e), region = 32  ;;  %p163_p3 = scmp.lt.s32.totalorder (!%p139_p2), %s474_s14, 63  ;;  %v542_v1 = vld [vmem:[%s714_s2] ss:$0 sm:$0xff] (!%p139_p2) }
   0xd   : > { %s717_s14 = smov (!%p163_p3, %s474_s14), 63 }
   0xe   : > { %s475_s15 = sshll.u32 %s717_s14, 3 }
   0xf   : > { %s537_s20 = scalar_lea.vmem %s712_s0, %s475_s15  ;;  %s570_s25 = scalar_lea.vmem %s715_s3, %s475_s15 }
  0x10   : > { %v174_v2 = vld [vmem:[%s537_s20] sm:$0xff]  ;;  %v175_v3 = vld [vmem:[%s537_s20 + $0x8] sm:$0xff]  ;;  %v176_v4 = vld [vmem:[%s537_s20 + $0x10] sm:$0xff] }
  0x11   : > { %v213_v5 = vmul.f32 %v532_v0, %v174_v2  ;;  %v214_v6 = vmul.f32 %v532_v0, %v175_v3  ;;  %v215_v7 = vmul.f32 %v532_v0, %v176_v4  ;;  %v177_v8 = vld [vmem:[%s537_s20 + $0x18] sm:$0xff]  ;;  %v178_v9 = vld [vmem:[%s537_s20 + $0x20] sm:$0xff]  ;;  %v179_v10 = vld [vmem:[%s537_s20 + $0x28] sm:$0xff] }
  0x12   : > { %v216_v11 = vmul.f32 %v532_v0, %v177_v8  ;;  %v217_v12 = vmul.f32 %v532_v0, %v178_v9  ;;  %v218_v13 = vmul.f32 %v532_v0, %v179_v10  ;;  %v180_v14 = vld [vmem:[%s537_s20 + $0x30] sm:$0xff]  ;;  %v181_v15 = vld [vmem:[%s537_s20 + $0x38] sm:$0xff]  ;;  %v182_v24 = vld [vmem:[%s537_s20 + $0x40] sm:$0xff] }
  0x13   : > { %v252_v16 = vadd.f32 %v542_v1, %v213_v5  ;;  %v253_v17 = vadd.f32 %v542_v1, %v214_v6  ;;  %v254_v18 = vadd.f32 %v542_v1, %v215_v7  ;;  %v219_v19 = vmul.f32 %v532_v0, %v180_v14  ;;  %v183_v32 = vld [vmem:[%s537_s20 + $0x48] sm:$0xff]  ;;  %v184_v33 = vld [vmem:[%s537_s20 + $0x50] sm:$0xff]  ;;  %v185_v34 = vld [vmem:[%s537_s20 + $0x58] sm:$0xff] }
  0x14   : > { %v255_v20 = vadd.f32 %v542_v1, %v216_v11  ;;  %v256_v21 = vadd.f32 %v542_v1, %v217_v12  ;;  %v257_v22 = vadd.f32 %v542_v1, %v218_v13  ;;  %v220_v23 = vmul.f32 %v532_v0, %v181_v15  ;;  %v186_v46 = vld [vmem:[%s537_s20 + $0x60] sm:$0xff]  ;;  %v187_v47 = vld [vmem:[%s537_s20 + $0x68] sm:$0xff]  ;;  %v188_v58 = vld [vmem:[%s537_s20 + $0x70] sm:$0xff] }
  0x15   : > { %vm284_vm1 = vcmp.ge.f32.partialorder %v252_v16, 0.0  ;;  %v316_v25 = vmul.f32 0.01, %v252_v16  ;;  %vm285_vm2 = vcmp.ge.f32.partialorder %v253_v17, 0.0  ;;  %v317_v26 = vmul.f32 0.01, %v253_v17 }
  0x16   : > { %vm286_vm3 = vcmp.ge.f32.partialorder %v254_v18, 0.0  ;;  %v318_v27 = vmul.f32 0.01, %v254_v18  ;;  %vm287_vm4 = vcmp.ge.f32.partialorder %v255_v20, 0.0  ;;  %v319_v28 = vmul.f32 0.01, %v255_v20 }
  0x17   : > { %v348_v29 = vsel %vm284_vm1, %v252_v16, %v316_v25  ;;  %v349_v30 = vsel %vm285_vm2, %v253_v17, %v317_v26  ;;  %vm288_vm5 = vcmp.ge.f32.partialorder %v256_v21, 0.0  ;;  %v320_v31 = vmul.f32 0.01, %v256_v21  ;;  %v189_v59 = vld [vmem:[%s537_s20 + $0x78] sm:$0xff]  ;;  %v190_v6 = vld [vmem:[%s537_s20 + $0x80] sm:$0xff]  ;;  %v191_v7 = vld [vmem:[%s537_s20 + $0x88] sm:$0xff] }
  0x18   : > { %381 = vst.msk [vmem:[%s570_s25] sm:$0xff] %vm380_vm0, %v348_v29  ;;  %382 = vst.msk [vmem:[%s570_s25 + $0x8] sm:$0xff] %vm380_vm0, %v349_v30  ;;  %v350_v35 = vsel %vm286_vm3, %v254_v18, %v318_v27  ;;  %v351_v36 = vsel %vm287_vm4, %v255_v20, %v319_v28  ;;  %vm289_vm6 = vcmp.ge.f32.partialorder %v257_v22, 0.0  ;;  %v321_v37 = vmul.f32 0.01, %v257_v22  ;;  %v192_v12 = vld [vmem:[%s537_s20 + $0x90] sm:$0xff] }
  0x19   : > { %383 = vst.msk [vmem:[%s570_s25 + $0x10] sm:$0xff] %vm380_vm0, %v350_v35  ;;  %384 = vst.msk [vmem:[%s570_s25 + $0x18] sm:$0xff] %vm380_vm0, %v351_v36  ;;  %v352_v38 = vsel %vm288_vm5, %v256_v21, %v320_v31  ;;  %v258_v39 = vadd.f32 %v542_v1, %v219_v19  ;;  %v259_v40 = vadd.f32 %v542_v1, %v220_v23  ;;  %v193_v13 = vld [vmem:[%s537_s20 + $0x98] sm:$0xff]  ;;  %v195_v25 = vld [vmem:[%s537_s20 + $0xa8] sm:$0xff] }
  0x1a   : > { %v221_v41 = vmul.f32 %v532_v0, %v182_v24  ;;  %385 = vst.msk [vmem:[%s570_s25 + $0x20] sm:$0xff] %vm380_vm0, %v352_v38  ;;  %v353_v42 = vsel %vm289_vm6, %v257_v22, %v321_v37  ;;  %v222_v43 = vmul.f32 %v532_v0, %v183_v32  ;;  %v223_v44 = vmul.f32 %v532_v0, %v184_v33  ;;  %v194_v24 = vld [vmem:[%s537_s20 + $0xa0] sm:$0xff]  ;;  %v196_v36 = vld [vmem:[%s537_s20 + $0xb0] sm:$0xff]  ;;  %v197_v37 = vld [vmem:[%s537_s20 + $0xb8] sm:$0xff] }
  0x1b   : > { %v224_v45 = vmul.f32 %v532_v0, %v185_v34  ;;  %386 = vst.msk [vmem:[%s570_s25 + $0x28] sm:$0xff] %vm380_vm0, %v353_v42  ;;  %vm290_vm7 = vcmp.ge.f32.partialorder %v258_v39, 0.0  ;;  %v322_v48 = vmul.f32 0.01, %v258_v39  ;;  %vm291_vm8 = vcmp.ge.f32.partialorder %v259_v40, 0.0 }
  0x1c   : > { %v323_v49 = vmul.f32 0.01, %v259_v40  ;;  %v260_v50 = vadd.f32 %v542_v1, %v221_v41  ;;  %v261_v51 = vadd.f32 %v542_v1, %v222_v43  ;;  %v262_v52 = vadd.f32 %v542_v1, %v223_v44 }
  0x1d   : > { %v263_v53 = vadd.f32 %v542_v1, %v224_v45  ;;  %v354_v54 = vsel %vm290_vm7, %v258_v39, %v322_v48  ;;  %v225_v56 = vmul.f32 %v532_v0, %v186_v46  ;;  %v226_v57 = vmul.f32 %v532_v0, %v187_v47  ;;  %v198_v46 = vld [vmem:[%s537_s20 + $0xc0] sm:$0xff]  ;;  %v199_v47 = vld [vmem:[%s537_s20 + $0xc8] sm:$0xff] }
  0x1e   : > { %v355_v55 = vsel %vm291_vm8, %v259_v40, %v323_v49  ;;  %387 = vst.msk [vmem:[%s570_s25 + $0x30] sm:$0xff] %vm380_vm0, %v354_v54  ;;  %vm292_vm9 = vcmp.ge.f32.partialorder %v260_v50, 0.0  ;;  %v324_v60 = vmul.f32 0.01, %v260_v50  ;;  %vm293_vm10 = vcmp.ge.f32.partialorder %v261_v51, 0.0 }
  0x1f   : > { %388 = vst.msk [vmem:[%s570_s25 + $0x38] sm:$0xff] %vm380_vm0, %v355_v55  ;;  %v325_v61 = vmul.f32 0.01, %v261_v51  ;;  %vm294_vm11 = vcmp.ge.f32.partialorder %v262_v52, 0.0  ;;  %v326_v62 = vmul.f32 0.01, %v262_v52  ;;  %v264_v4 = vadd.f32 %v542_v1, %v225_v56 }
  0x20   : > { %vm295_vm12 = vcmp.ge.f32.partialorder %v263_v53, 0.0  ;;  %v327_v63 = vmul.f32 0.01, %v263_v53  ;;  %v356_v2 = vsel %vm292_vm9, %v260_v50, %v324_v60  ;;  %v265_v5 = vadd.f32 %v542_v1, %v226_v57 }
  0x21   : > { %v357_v3 = vsel %vm293_vm10, %v261_v51, %v325_v61  ;;  %389 = vst.msk [vmem:[%s570_s25 + $0x40] sm:$0xff] %vm380_vm0, %v356_v2  ;;  %v358_v8 = vsel %vm294_vm11, %v262_v52, %v326_v62  ;;  %v227_v10 = vmul.f32 %v532_v0, %v188_v58  ;;  %v228_v11 = vmul.f32 %v532_v0, %v189_v59  ;;  %v200_v52 = vld [vmem:[%s537_s20 + $0xd0] sm:$0xff]  ;;  %v202_v2 = vld [vmem:[%s537_s20 + $0xe0] sm:$0xff] }
  0x22   : > { %390 = vst.msk [vmem:[%s570_s25 + $0x48] sm:$0xff] %vm380_vm0, %v357_v3  ;;  %v359_v9 = vsel %vm295_vm12, %v263_v53, %v327_v63  ;;  %391 = vst.msk [vmem:[%s570_s25 + $0x50] sm:$0xff] %vm380_vm0, %v358_v8  ;;  %vm296_vm13 = vcmp.ge.f32.partialorder %v264_v4, 0.0  ;;  %v328_v14 = vmul.f32 0.01, %v264_v4  ;;  %vm297_vm14 = vcmp.ge.f32.partialorder %v265_v5, 0.0 }
  0x23   : > { %392 = vst.msk [vmem:[%s570_s25 + $0x58] sm:$0xff] %vm380_vm0, %v359_v9  ;;  %v329_v15 = vmul.f32 0.01, %v265_v5  ;;  %v266_v16 = vadd.f32 %v542_v1, %v227_v10  ;;  %v267_v17 = vadd.f32 %v542_v1, %v228_v11  ;;  %v229_v18 = vmul.f32 %v532_v0, %v190_v6  ;;  %v201_v53 = vld [vmem:[%s537_s20 + $0xd8] sm:$0xff]  ;;  %v203_v3 = vld [vmem:[%s537_s20 + $0xe8] sm:$0xff] }
  0x24   : > { %v230_v19 = vmul.f32 %v532_v0, %v191_v7  ;;  %v360_v20 = vsel %vm296_vm13, %v264_v4, %v328_v14  ;;  %v231_v22 = vmul.f32 %v532_v0, %v192_v12  ;;  %v232_v23 = vmul.f32 %v532_v0, %v193_v13  ;;  %v204_v14 = vld [vmem:[%s537_s20 + $0xf0] sm:$0xff] }
  0x25   : > { %v361_v21 = vsel %vm297_vm14, %v265_v5, %v329_v15  ;;  %393 = vst.msk [vmem:[%s570_s25 + $0x60] sm:$0xff] %vm380_vm0, %v360_v20  ;;  %vm298_vm15 = vcmp.ge.f32.partialorder %v266_v16, 0.0  ;;  %v330_v26 = vmul.f32 0.01, %v266_v16  ;;  %vm299_vm1 = vcmp.ge.f32.partialorder %v267_v17, 0.0  ;;  %v205_v15 = vld [vmem:[%s537_s20 + $0xf8] sm:$0xff] }
  0x26   : > { %394 = vst.msk [vmem:[%s570_s25 + $0x68] sm:$0xff] %vm380_vm0, %v361_v21  ;;  %v331_v27 = vmul.f32 0.01, %v267_v17  ;;  %v268_v28 = vadd.f32 %v542_v1, %v229_v18  ;;  %v269_v29 = vadd.f32 %v542_v1, %v230_v19  ;;  %v270_v30 = vadd.f32 %v542_v1, %v231_v22 }
  0x27   : > { %v271_v31 = vadd.f32 %v542_v1, %v232_v23  ;;  %v362_v32 = vsel %vm298_vm15, %v266_v16, %v330_v26  ;;  %v233_v34 = vmul.f32 %v532_v0, %v194_v24  ;;  %v234_v35 = vmul.f32 %v532_v0, %v195_v25 }
  0x28   : > { %v363_v33 = vsel %vm299_vm1, %v267_v17, %v331_v27  ;;  %395 = vst.msk [vmem:[%s570_s25 + $0x70] sm:$0xff] %vm380_vm0, %v362_v32  ;;  %vm300_vm2 = vcmp.ge.f32.partialorder %v268_v28, 0.0  ;;  %v332_v38 = vmul.f32 0.01, %v268_v28  ;;  %vm301_vm3 = vcmp.ge.f32.partialorder %v269_v29, 0.0 }
  0x29   : > { %396 = vst.msk [vmem:[%s570_s25 + $0x78] sm:$0xff] %vm380_vm0, %v363_v33  ;;  %v333_v39 = vmul.f32 0.01, %v269_v29  ;;  %vm302_vm4 = vcmp.ge.f32.partialorder %v270_v30, 0.0  ;;  %v334_v40 = vmul.f32 0.01, %v270_v30  ;;  %v272_v44 = vadd.f32 %v542_v1, %v233_v34 }
  0x2a   : > { %vm303_vm5 = vcmp.ge.f32.partialorder %v271_v31, 0.0  ;;  %v335_v41 = vmul.f32 0.01, %v271_v31  ;;  %v364_v42 = vsel %vm300_vm2, %v268_v28, %v332_v38  ;;  %v273_v45 = vadd.f32 %v542_v1, %v234_v35 }
  0x2b   : > { %v365_v43 = vsel %vm301_vm3, %v269_v29, %v333_v39  ;;  %397 = vst.msk [vmem:[%s570_s25 + $0x80] sm:$0xff] %vm380_vm0, %v364_v42  ;;  %v366_v48 = vsel %vm302_vm4, %v270_v30, %v334_v40  ;;  %v235_v50 = vmul.f32 %v532_v0, %v196_v36  ;;  %v236_v51 = vmul.f32 %v532_v0, %v197_v37 }
  0x2c   : > { %398 = vst.msk [vmem:[%s570_s25 + $0x88] sm:$0xff] %vm380_vm0, %v365_v43  ;;  %v367_v49 = vsel %vm303_vm5, %v271_v31, %v335_v41  ;;  %399 = vst.msk [vmem:[%s570_s25 + $0x90] sm:$0xff] %vm380_vm0, %v366_v48  ;;  %vm304_vm6 = vcmp.ge.f32.partialorder %v272_v44, 0.0  ;;  %v336_v54 = vmul.f32 0.01, %v272_v44  ;;  %vm305_vm7 = vcmp.ge.f32.partialorder %v273_v45, 0.0 }
  0x2d   : > { %400 = vst.msk [vmem:[%s570_s25 + $0x98] sm:$0xff] %vm380_vm0, %v367_v49  ;;  %v337_v55 = vmul.f32 0.01, %v273_v45  ;;  %v274_v56 = vadd.f32 %v542_v1, %v235_v50  ;;  %v275_v57 = vadd.f32 %v542_v1, %v236_v51  ;;  %v237_v58 = vmul.f32 %v532_v0, %v198_v46 }
  0x2e   : > { %v238_v59 = vmul.f32 %v532_v0, %v199_v47  ;;  %v368_v60 = vsel %vm304_vm6, %v272_v44, %v336_v54  ;;  %v239_v62 = vmul.f32 %v532_v0, %v200_v52  ;;  %v240_v63 = vmul.f32 %v532_v0, %v201_v53 }
  0x2f   : > { %v369_v61 = vsel %vm305_vm7, %v273_v45, %v337_v55  ;;  %401 = vst.msk [vmem:[%s570_s25 + $0xa0] sm:$0xff] %vm380_vm0, %v368_v60  ;;  %vm306_vm8 = vcmp.ge.f32.partialorder %v274_v56, 0.0  ;;  %v338_v4 = vmul.f32 0.01, %v274_v56  ;;  %vm307_vm9 = vcmp.ge.f32.partialorder %v275_v57, 0.0 }
  0x30   : > { %402 = vst.msk [vmem:[%s570_s25 + $0xa8] sm:$0xff] %vm380_vm0, %v369_v61  ;;  %v339_v5 = vmul.f32 0.01, %v275_v57  ;;  %v276_v6 = vadd.f32 %v542_v1, %v237_v58  ;;  %v277_v7 = vadd.f32 %v542_v1, %v238_v59  ;;  %v278_v8 = vadd.f32 %v542_v1, %v239_v62 }
  0x31   : > { %v279_v9 = vadd.f32 %v542_v1, %v240_v63  ;;  %v370_v10 = vsel %vm306_vm8, %v274_v56, %v338_v4  ;;  %v241_v12 = vmul.f32 %v532_v0, %v202_v2  ;;  %v242_v13 = vmul.f32 %v532_v0, %v203_v3 }
  0x32   : > { %v371_v11 = vsel %vm307_vm9, %v275_v57, %v339_v5  ;;  %403 = vst.msk [vmem:[%s570_s25 + $0xb0] sm:$0xff] %vm380_vm0, %v370_v10  ;;  %vm308_vm10 = vcmp.ge.f32.partialorder %v276_v6, 0.0  ;;  %v340_v16 = vmul.f32 0.01, %v276_v6  ;;  %vm309_vm11 = vcmp.ge.f32.partialorder %v277_v7, 0.0 }
  0x33   : > { %404 = vst.msk [vmem:[%s570_s25 + $0xb8] sm:$0xff] %vm380_vm0, %v371_v11  ;;  %v341_v17 = vmul.f32 0.01, %v277_v7  ;;  %vm310_vm12 = vcmp.ge.f32.partialorder %v278_v8, 0.0  ;;  %v342_v18 = vmul.f32 0.01, %v278_v8  ;;  %v280_v22 = vadd.f32 %v542_v1, %v241_v12 }
  0x34   : > { %vm311_vm13 = vcmp.ge.f32.partialorder %v279_v9, 0.0  ;;  %v343_v19 = vmul.f32 0.01, %v279_v9  ;;  %v372_v20 = vsel %vm308_vm10, %v276_v6, %v340_v16  ;;  %v281_v23 = vadd.f32 %v542_v1, %v242_v13 }
  0x35   : > { %v373_v21 = vsel %vm309_vm11, %v277_v7, %v341_v17  ;;  %405 = vst.msk [vmem:[%s570_s25 + $0xc0] sm:$0xff] %vm380_vm0, %v372_v20  ;;  %v374_v24 = vsel %vm310_vm12, %v278_v8, %v342_v18  ;;  %v243_v26 = vmul.f32 %v532_v0, %v204_v14  ;;  %v244_v27 = vmul.f32 %v532_v0, %v205_v15 }
  0x36   : > { %406 = vst.msk [vmem:[%s570_s25 + $0xc8] sm:$0xff] %vm380_vm0, %v373_v21  ;;  %v375_v25 = vsel %vm311_vm13, %v279_v9, %v343_v19  ;;  %407 = vst.msk [vmem:[%s570_s25 + $0xd0] sm:$0xff] %vm380_vm0, %v374_v24  ;;  %vm312_vm14 = vcmp.ge.f32.partialorder %v280_v22, 0.0  ;;  %v344_v28 = vmul.f32 0.01, %v280_v22  ;;  %vm313_vm15 = vcmp.ge.f32.partialorder %v281_v23, 0.0 }
  0x37   : > { %408 = vst.msk [vmem:[%s570_s25 + $0xd8] sm:$0xff] %vm380_vm0, %v375_v25  ;;  %v345_v29 = vmul.f32 0.01, %v281_v23  ;;  %v282_v30 = vadd.f32 %v542_v1, %v243_v26  ;;  %v283_v31 = vadd.f32 %v542_v1, %v244_v27 }
  0x38   : > { %v376_v32 = vsel %vm312_vm14, %v280_v22, %v344_v28 }
  0x39   : > { %v377_v33 = vsel %vm313_vm15, %v281_v23, %v345_v29  ;;  %409 = vst.msk [vmem:[%s570_s25 + $0xe0] sm:$0xff] %vm380_vm0, %v376_v32  ;;  %vm314_vm1 = vcmp.ge.f32.partialorder %v282_v30, 0.0  ;;  %v346_v0 = vmul.f32 0.01, %v282_v30  ;;  %vm315_vm2 = vcmp.ge.f32.partialorder %v283_v31, 0.0 }
  0x3a   : > { %410 = vst.msk [vmem:[%s570_s25 + $0xe8] sm:$0xff] %vm380_vm0, %v377_v33  ;;  %v347_v34 = vmul.f32 0.01, %v283_v31 }
  0x3b   : > { %v378_v35 = vsel %vm314_vm1, %v282_v30, %v346_v0 }
  0x3c   : > { %v379_v36 = vsel %vm315_vm2, %v283_v31, %v347_v34  ;;  %411 = vst.msk [vmem:[%s570_s25 + $0xf0] sm:$0xff] %vm380_vm0, %v378_v35 }
  0x3d   : > { %412 = vst.msk [vmem:[%s570_s25 + $0xf8] sm:$0xff] %vm380_vm0, %v379_v36 }
  0x3e PF: > { %s13_s12 = sadd.s32 1, %s496_s12  }
  0x3f   : > { %p10_p4 = scmp.ge.s32.totalorder %s13_s12, 4  }
  0x41   :  { %12 = sbr.rel (!%p10_p4) target bundleno = 1 (0x1), region = 62 }

// kernel: _lambda_.27
= control target key start
LH: loop header
LB: loop body
LE: loop exit
PB: predicated region body
PF: predicated region fallthrough
CT: control target
= control target key end

     0   :  { %s1222_s18 = smov 0   ;;  %s1744_s0 = inlined_call_operand.vmem [shape: bf16[512,200], index: 0, kind: input, shape index: {}]   ;;  %s1745_s1 = inlined_call_operand.vmem [shape: bf16[200,4], index: 1, kind: input, shape index: {}]   ;;  %s1746_s2 = inlined_call_operand.vmem [shape: f32[1,4], index: 2, kind: input, shape index: {}]   ;;  %s1747_s3 = inlined_call_operand.vmem [shape: f32[512,4], index: 3, kind: output, shape index: {0}]   ;;  %s1748_s4 = inlined_call_operand.vmem [shape: f32[1,4], index: 4, kind: output, shape index: {1}]   ;;  %s1749_s5 = inlined_call_operand.vmem [shape: f32[1,4], index: 5, kind: output, shape index: {2}]  }
   0x1 LB: > { %s1009_s19 = sadd.s32 4294967295, %s1188_s18   ;;  %p1013_p0 = scmp.ge.s32.totalorder %s1188_s18, 1  ;;  %s1188_s18 = sphi %s1222_s18, %s16_s18  }
   0x2   : > { %p184_p1 = scmp.lt.s32.totalorder %s1188_s18, 3 }
   0x4   : > { %p185_p2 = pnand %p1013_p0, %p184_p1 }
   0x5   : > { %v1121_v0 = vld [vmem:[%s1745_s1] sm:$0xff] (!%p185_p2)   ;;  %v1190_v1 = vmov (!%p185_p2), 0   ;;  %v1122_v2 = vld [vmem:[%s1745_s1 + $0x8] sm:$0xff] (!%p185_p2)   ;;  %s1014_s24 = sshll.u32 (!%p185_p2), %s1009_s19, 5  ;;  %v1123_v3 = vld [vmem:[%s1745_s1 + $0x10] sm:$0xff] (!%p185_p2)   ;;  %vm510_vm0 = vcmask (!%p185_p2), 588800  }
   0x6   : > { %188 = sbr.rel (%p185_p2) target bundleno = 414 (0x19e), region = 32  ;;  %563 = vmatprep.subr.bf16.mxu0 (!%p185_p2), %v1190_v1  ;;  %1085 = vmatprep.subr.bf16.mxu1 (!%p185_p2), %v1190_v1  ;;  %p214_p3 = scmp.lt.s32.totalorder (!%p185_p2), %s1014_s24, 63  ;;  %v1124_v4 = vld [vmem:[%s1745_s1 + $0x18] sm:$0xff] (!%p185_p2)   ;;  %v1125_v6 = vld [vmem:[%s1745_s1 + $0x20] sm:$0xff] (!%p185_p2)   ;;  %v1126_v8 = vld [vmem:[%s1745_s1 + $0x28] sm:$0xff] (!%p185_p2)   ;;  %vm559_vm1 = vcmask (!%p185_p2), 1043456  }
   0x7   : > { %564 = vmatpush1.bf16.msra.mxu0 (!%p185_p2), %v1121_v0  ;;  %1098 = vmatpush1.bf16.msra.mxu1 (!%p185_p2), %v1121_v0  ;;  %v1127_v9 = vld [vmem:[%s1745_s1 + $0x30] sm:$0xff] (!%p185_p2)   ;;  %v1128_v10 = vld [vmem:[%s1745_s1 + $0x38] sm:$0xff] (!%p185_p2)   ;;  %v1129_v11 = vld [vmem:[%s1745_s1 + $0x40] sm:$0xff] (!%p185_p2)   ;;  %vm724_vm2 = vcmask (!%p185_p2), 31744   ;;  %p1081_p4 = scmp.ne.s32.totalorder (!%p185_p2), %s1009_s19, 0 }
   0x8   : > { %565 = vmatprep.subr.bf16.mxu0 (!%p185_p2), %v1190_v1  ;;  %1086 = vmatprep.subr.bf16.mxu1 (!%p185_p2), %v1190_v1  ;;  %v1130_v12 = vld [vmem:[%s1745_s1 + $0x48] sm:$0xff] (!%p185_p2)   ;;  %v1131_v13 = vld [vmem:[%s1745_s1 + $0x50] sm:$0xff] (!%p185_p2)   ;;  %v1132_v14 = vld [vmem:[%s1745_s1 + $0x58] sm:$0xff] (!%p185_p2)  }
   0x9   : > { %v1133_v15 = vld [vmem:[%s1745_s1 + $0x60] ss:$0 sps:$4 sm:$0xff] (!%p185_p2)  }
   0xa   : > { %v561_v16 = vsel (!%p185_p2), %vm559_vm1, %v1133_v15, 0  ;;  %v1358_v47 = vld [vmem:[%s1746_s2] ss:$0 sm:$0xff] (!%p185_p2) }
   0xb   : > { %566 = vmatpush1.bf16.msra.mxu0 (!%p185_p2), %v1122_v2  ;;  %1099 = vmatpush1.bf16.msra.mxu1 (!%p185_p2), %v1122_v2 }
   0xc   : > { %567 = vmatprep.subr.bf16.mxu0 (!%p185_p2), %v1190_v1  ;;  %1087 = vmatprep.subr.bf16.mxu1 (!%p185_p2), %v1190_v1 }
   0xd   : > { %s1751_s24 = smov (!%p214_p3, %s1014_s24), 63  ;;  %vm761_vm3 = vcmask (!%p1081_p4), 24576  }
   0xe   : > { %s1084_s27 = sshll.u32 %s1751_s24, 3 }
   0xf   : > { %568 = vmatpush1.bf16.msra.mxu0 %v1123_v3  ;;  %1100 = vmatpush1.bf16.msra.mxu1 %v1123_v3  ;;  %s1258_s7 = scalar_lea.vmem %s1744_s0, %s1084_s27  ;;  %s1365_s10 = scalar_lea.vmem %s1747_s3, %s1084_s27 }
  0x10   : > { %569 = vmatprep.subr.bf16.mxu0 %v1190_v1  ;;  %1088 = vmatprep.subr.bf16.mxu1 %v1190_v1  ;;  %v1136_v5 = vld [vmem:[%s1258_s7 + $0x4] ss:$8 sps:$4 sm:$0xff]   ;;  %v1134_v17 = vld [vmem:[%s1258_s7] ss:$8 sps:$4 sm:$0xff]   ;;  %v1140_v19 = vld [vmem:[%s1258_s7 + $0x14] ss:$8 sps:$4 sm:$0xff]  }
  0x11   : > { %v1139_v7 = vld [vmem:[%s1258_s7 + $0x84] ss:$8 sps:$4 sm:$0xff]   ;;  %1065 = vmatprep.mubr.msk.bf16.mxu0 %vm510_vm0, %v1136_v5  ;;  %v1137_v18 = vld [vmem:[%s1258_s7 + $0x80] ss:$8 sps:$4 sm:$0xff]   ;;  %v1142_v20 = vld [vmem:[%s1258_s7 + $0x94] ss:$8 sps:$4 sm:$0xff]  }
  0x12   : > { %1073 = vmatprep.mubr.msk.bf16.mxu1 %vm510_vm0, %v1139_v7  ;;  %v1144_v21 = vld [vmem:[%s1258_s7 + $0x10] ss:$8 sps:$4 sm:$0xff]   ;;  %v1146_v23 = vld [vmem:[%s1258_s7 + $0x24] ss:$8 sps:$4 sm:$0xff]   ;;  %v1150_v25 = vld [vmem:[%s1258_s7 + $0x20] ss:$8 sps:$4 sm:$0xff]  }
  0x13   : > { %570 = vmatpush1.bf16.msra.mxu0 %v1124_v4  ;;  %1101 = vmatpush1.bf16.msra.mxu1 %v1124_v4  ;;  %v1145_v22 = vld [vmem:[%s1258_s7 + $0x90] ss:$8 sps:$4 sm:$0xff]   ;;  %v1148_v24 = vld [vmem:[%s1258_s7 + $0xa4] ss:$8 sps:$4 sm:$0xff]   ;;  %v1151_v26 = vld [vmem:[%s1258_s7 + $0xa0] ss:$8 sps:$4 sm:$0xff]  }
  0x14   : > { %571 = vmatprep.subr.bf16.mxu0 %v1190_v1  ;;  %1089 = vmatprep.subr.bf16.mxu1 %v1190_v1  ;;  %v1152_v27 = vld [vmem:[%s1258_s7 + $0x34] ss:$8 sps:$4 sm:$0xff]   ;;  %v1156_v29 = vld [vmem:[%s1258_s7 + $0x30] ss:$8 sps:$4 sm:$0xff]   ;;  %v1158_v31 = vld [vmem:[%s1258_s7 + $0x44] ss:$8 sps:$4 sm:$0xff]  }
  0x15   : > { %v1154_v28 = vld [vmem:[%s1258_s7 + $0xb4] ss:$8 sps:$4 sm:$0xff]   ;;  %v1157_v30 = vld [vmem:[%s1258_s7 + $0xb0] ss:$8 sps:$4 sm:$0xff]   ;;  %v1160_v32 = vld [vmem:[%s1258_s7 + $0xc4] ss:$8 sps:$4 sm:$0xff]  }
  0x16   : > { %v1162_v33 = vld [vmem:[%s1258_s7 + $0x40] ss:$8 sps:$4 sm:$0xff]   ;;  %v1164_v35 = vld [vmem:[%s1258_s7 + $0x54] ss:$8 sps:$4 sm:$0xff]   ;;  %v1168_v37 = vld [vmem:[%s1258_s7 + $0x50] ss:$8 sps:$4 sm:$0xff]  }
  0x17   : > { %572 = vmatpush1.bf16.msra.mxu0 %v1125_v6  ;;  %1102 = vmatpush1.bf16.msra.mxu1 %v1125_v6  ;;  %v1163_v34 = vld [vmem:[%s1258_s7 + $0xc0] ss:$8 sps:$4 sm:$0xff]   ;;  %v1166_v36 = vld [vmem:[%s1258_s7 + $0xd4] ss:$8 sps:$4 sm:$0xff]   ;;  %v1169_v38 = vld [vmem:[%s1258_s7 + $0xd0] ss:$8 sps:$4 sm:$0xff]  }
  0x18   : > { %573 = vmatprep.subr.bf16.mxu0 %v1190_v1  ;;  %1090 = vmatprep.subr.bf16.mxu1 %v1190_v1  ;;  %v1170_v39 = vld [vmem:[%s1258_s7 + $0x64] ss:$8 sps:$4 sm:$0xff]   ;;  %v1174_v41 = vld [vmem:[%s1258_s7 + $0x60] ss:$8 sps:$4 sm:$0xff]   ;;  %v1176_v43 = vld [vmem:[%s1258_s7 + $0x74] ss:$8 sps:$4 sm:$0xff]  }
  0x19   : > { %v1172_v40 = vld [vmem:[%s1258_s7 + $0xe4] ss:$8 sps:$4 sm:$0xff]   ;;  %v1175_v42 = vld [vmem:[%s1258_s7 + $0xe0] ss:$8 sps:$4 sm:$0xff]   ;;  %v1178_v44 = vld [vmem:[%s1258_s7 + $0xf4] ss:$8 sps:$4 sm:$0xff]  }
  0x1a   : > { %v1180_v45 = vld [vmem:[%s1258_s7 + $0x70] ss:$8 sps:$4 sm:$0xff]  }
  0x1b   : > { %574 = vmatpush1.bf16.msra.mxu0 %v1126_v8  ;;  %1103 = vmatpush1.bf16.msra.mxu1 %v1126_v8  ;;  %v1181_v46 = vld [vmem:[%s1258_s7 + $0xf0] ss:$8 sps:$4 sm:$0xff]  }
  0x1c   : > { %575 = vmatprep.subr.bf16.mxu0 %v1190_v1  ;;  %1091 = vmatprep.subr.bf16.mxu1 %v1190_v1 }
  0x1f   : > { %576 = vmatpush1.bf16.msra.mxu0 %v1127_v9  ;;  %1104 = vmatpush1.bf16.msra.mxu1 %v1127_v9 }
  0x20   : > { %577 = vmatprep.subr.bf16.mxu0 %v1190_v1  ;;  %1092 = vmatprep.subr.bf16.mxu1 %v1190_v1 }
  0x23   : > { %578 = vmatpush1.bf16.msra.mxu0 %v1128_v10  ;;  %1105 = vmatpush1.bf16.msra.mxu1 %v1128_v10 }
  0x24   : > { %579 = vmatprep.subr.bf16.mxu0 %v1190_v1  ;;  %1093 = vmatprep.subr.bf16.mxu1 %v1190_v1 }
  0x27   : > { %580 = vmatpush1.bf16.msra.mxu0 %v1129_v11  ;;  %1106 = vmatpush1.bf16.msra.mxu1 %v1129_v11 }
  0x28   : > { %581 = vmatprep.subr.bf16.mxu0 %v1190_v1  ;;  %1094 = vmatprep.subr.bf16.mxu1 %v1190_v1 }
  0x2b   : > { %582 = vmatpush1.bf16.msra.mxu0 %v1130_v12  ;;  %1107 = vmatpush1.bf16.msra.mxu1 %v1130_v12 }
  0x2c   : > { %583 = vmatprep.subr.bf16.mxu0 %v1190_v1  ;;  %1095 = vmatprep.subr.bf16.mxu1 %v1190_v1 }
  0x2f   : > { %584 = vmatpush1.bf16.msra.mxu0 %v1131_v13  ;;  %1108 = vmatpush1.bf16.msra.mxu1 %v1131_v13 }
  0x30   : > { %585 = vmatprep.subr.bf16.mxu0 %v1190_v1  ;;  %1096 = vmatprep.subr.bf16.mxu1 %v1190_v1 }
  0x33   : > { %586 = vmatpush1.bf16.msra.mxu0 %v1132_v14  ;;  %1109 = vmatpush1.bf16.msra.mxu1 %v1132_v14 }
  0x34   : > { %587 = vmatprep.subr.bf16.mxu0 %v1190_v1  ;;  %1097 = vmatprep.subr.bf16.mxu1 %v1190_v1 }
  0x37   : > { %588 = vmatpush1.bf16.msra.mxu0 %v561_v16  ;;  %1110 = vmatpush1.bf16.msra.mxu1 %v561_v16 }
  0x3a   : > { %596 = vmatmul.mubr.bf16.vlgmr.msra.gmra.mrb[0].mxu0 %v1134_v17  ;;  %660 = vmatmul.mubr.bf16.vlgmr.msra.gmra.mrb[0].mxu1 %v1137_v18 }
  0x3b   : > { %1066 = vmatprep.mubr.msk.bf16.mxu0 %vm510_vm0, %v1140_v19  ;;  %1074 = vmatprep.mubr.msk.bf16.mxu1 %vm510_vm0, %v1142_v20 }
  0x42   : > { %604 = vmatmul.mubr.bf16.gmra.mrb[4].mxu0 %v1144_v21  ;;  %668 = vmatmul.mubr.bf16.gmra.mrb[4].mxu1 %v1145_v22 }
  0x43   : > { %1067 = vmatprep.mubr.msk.bf16.mxu0 %vm510_vm0, %v1146_v23  ;;  %1075 = vmatprep.mubr.msk.bf16.mxu1 %vm510_vm0, %v1148_v24 }
  0x4a   : > { %612 = vmatmul.mubr.bf16.gmra.mrb[8].mxu0 %v1150_v25  ;;  %676 = vmatmul.mubr.bf16.gmra.mrb[8].mxu1 %v1151_v26 }
  0x4b   : > { %1068 = vmatprep.mubr.msk.bf16.mxu0 %vm510_vm0, %v1152_v27  ;;  %1076 = vmatprep.mubr.msk.bf16.mxu1 %vm510_vm0, %v1154_v28 }
  0x52   : > { %620 = vmatmul.mubr.bf16.gmra.mrb[12].mxu0 %v1156_v29  ;;  %684 = vmatmul.mubr.bf16.gmra.mrb[12].mxu1 %v1157_v30 }
  0x53   : > { %1069 = vmatprep.mubr.msk.bf16.mxu0 %vm510_vm0, %v1158_v31  ;;  %1077 = vmatprep.mubr.msk.bf16.mxu1 %vm510_vm0, %v1160_v32 }
  0x5a   : > { %628 = vmatmul.mubr.bf16.gmra.mrb[16].mxu0 %v1162_v33  ;;  %692 = vmatmul.mubr.bf16.gmra.mrb[16].mxu1 %v1163_v34 }
  0x5b   : > { %1070 = vmatprep.mubr.msk.bf16.mxu0 %vm510_vm0, %v1164_v35  ;;  %1078 = vmatprep.mubr.msk.bf16.mxu1 %vm510_vm0, %v1166_v36 }
  0x62   : > { %636 = vmatmul.mubr.bf16.gmra.mrb[20].mxu0 %v1168_v37  ;;  %700 = vmatmul.mubr.bf16.gmra.mrb[20].mxu1 %v1169_v38 }
  0x63   : > { %1071 = vmatprep.mubr.msk.bf16.mxu0 %vm510_vm0, %v1170_v39  ;;  %1079 = vmatprep.mubr.msk.bf16.mxu1 %vm510_vm0, %v1172_v40 }
  0x6a   : > { %644 = vmatmul.mubr.bf16.gmra.mrb[24].mxu0 %v1174_v41  ;;  %708 = vmatmul.mubr.bf16.gmra.mrb[24].mxu1 %v1175_v42 }
  0x6b   : > { %1072 = vmatprep.mubr.msk.bf16.mxu0 %vm510_vm0, %v1176_v43  ;;  %1080 = vmatprep.mubr.msk.bf16.mxu1 %vm510_vm0, %v1178_v44 }
  0x72   : > { %652 = vmatmul.mubr.bf16.gmra.mrb[28].mxu0 %v1180_v45  ;;  %716 = vmatmul.mubr.bf16.gmra.mrb[28].mxu1 %v1181_v46 }
 0x10d   : > { %v597_v48 = vpop.f32.mrb[0].mxu0  ;;  %v661_v49 = vpop.f32.mrb[0].mxu1 }
 0x10e   : > { %v1368_v50 = vadd.f32 %v1358_v47, %v597_v48  ;;  %v1371_v51 = vadd.f32 %v1358_v47, %v661_v49  ;;  %v599_v52 = vpop.f32.mrb[1].mxu0  ;;  %v663_v53 = vpop.f32.mrb[1].mxu1 }
 0x10f   : > { %v600_v54 = vpop.f32.mrb[2].mxu0  ;;  %v664_v55 = vpop.f32.mrb[2].mxu1 }
 0x110   : > { %725 = vst.msk [vmem:[%s1365_s10] sm:$0xff] %vm724_vm2, %v1368_v50  ;;  %741 = vst.msk [vmem:[%s1365_s10 + $0x80] sm:$0xff] %vm724_vm2, %v1371_v51  ;;  %v1380_v56 = vadd.f32 %v1358_v47, %v600_v54  ;;  %v1383_v57 = vadd.f32 %v1358_v47, %v664_v55  ;;  %v602_v58 = vpop.f32.mrb[3].mxu0  ;;  %v666_v59 = vpop.f32.mrb[3].mxu1 }
 0x112   : > { %726 = vst.msk [vmem:[%s1365_s10 + $0x8] sm:$0xff] %vm724_vm2, %v1380_v56  ;;  %742 = vst.msk [vmem:[%s1365_s10 + $0x88] sm:$0xff] %vm724_vm2, %v1383_v57 }
 0x115   : > { %v605_v60 = vpop.f32.mrb[4].mxu0  ;;  %v669_v61 = vpop.f32.mrb[4].mxu1 }
 0x116   : > { %v1392_v62 = vadd.f32 %v1358_v47, %v605_v60  ;;  %v1395_v63 = vadd.f32 %v1358_v47, %v669_v61  ;;  %v607_v0 = vpop.f32.mrb[5].mxu0  ;;  %v671_v1 = vpop.f32.mrb[5].mxu1 }
 0x117   : > { %v608_v2 = vpop.f32.mrb[6].mxu0  ;;  %v672_v3 = vpop.f32.mrb[6].mxu1 }
 0x118   : > { %727 = vst.msk [vmem:[%s1365_s10 + $0x10] sm:$0xff] %vm724_vm2, %v1392_v62  ;;  %743 = vst.msk [vmem:[%s1365_s10 + $0x90] sm:$0xff] %vm724_vm2, %v1395_v63  ;;  %v1404_v4 = vadd.f32 %v1358_v47, %v608_v2  ;;  %v1407_v5 = vadd.f32 %v1358_v47, %v672_v3  ;;  %v610_v6 = vpop.f32.mrb[7].mxu0  ;;  %v674_v7 = vpop.f32.mrb[7].mxu1 }
 0x11a   : > { %728 = vst.msk [vmem:[%s1365_s10 + $0x18] sm:$0xff] %vm724_vm2, %v1404_v4  ;;  %744 = vst.msk [vmem:[%s1365_s10 + $0x98] sm:$0xff] %vm724_vm2, %v1407_v5 }
 0x11d   : > { %v613_v8 = vpop.f32.mrb[8].mxu0  ;;  %v677_v9 = vpop.f32.mrb[8].mxu1 }
 0x11e   : > { %v1416_v10 = vadd.f32 %v1358_v47, %v613_v8  ;;  %v1419_v11 = vadd.f32 %v1358_v47, %v677_v9  ;;  %v615_v12 = vpop.f32.mrb[9].mxu0  ;;  %v679_v13 = vpop.f32.mrb[9].mxu1 }
 0x11f   : > { %v616_v14 = vpop.f32.mrb[10].mxu0  ;;  %v680_v15 = vpop.f32.mrb[10].mxu1 }
 0x120   : > { %729 = vst.msk [vmem:[%s1365_s10 + $0x20] sm:$0xff] %vm724_vm2, %v1416_v10  ;;  %745 = vst.msk [vmem:[%s1365_s10 + $0xa0] sm:$0xff] %vm724_vm2, %v1419_v11  ;;  %v1428_v16 = vadd.f32 %v1358_v47, %v616_v14  ;;  %v1431_v17 = vadd.f32 %v1358_v47, %v680_v15  ;;  %v618_v18 = vpop.f32.mrb[11].mxu0  ;;  %v682_v19 = vpop.f32.mrb[11].mxu1 }
 0x122   : > { %730 = vst.msk [vmem:[%s1365_s10 + $0x28] sm:$0xff] %vm724_vm2, %v1428_v16  ;;  %746 = vst.msk [vmem:[%s1365_s10 + $0xa8] sm:$0xff] %vm724_vm2, %v1431_v17 }
 0x125   : > { %v621_v20 = vpop.f32.mrb[12].mxu0  ;;  %v685_v21 = vpop.f32.mrb[12].mxu1 }
 0x126   : > { %v1440_v22 = vadd.f32 %v1358_v47, %v621_v20  ;;  %v1443_v23 = vadd.f32 %v1358_v47, %v685_v21  ;;  %v623_v24 = vpop.f32.mrb[13].mxu0  ;;  %v687_v25 = vpop.f32.mrb[13].mxu1 }
 0x127   : > { %v624_v26 = vpop.f32.mrb[14].mxu0  ;;  %v688_v27 = vpop.f32.mrb[14].mxu1 }
 0x128   : > { %731 = vst.msk [vmem:[%s1365_s10 + $0x30] sm:$0xff] %vm724_vm2, %v1440_v22  ;;  %747 = vst.msk [vmem:[%s1365_s10 + $0xb0] sm:$0xff] %vm724_vm2, %v1443_v23  ;;  %v1452_v28 = vadd.f32 %v1358_v47, %v624_v26  ;;  %v1455_v29 = vadd.f32 %v1358_v47, %v688_v27  ;;  %v626_v30 = vpop.f32.mrb[15].mxu0  ;;  %v690_v31 = vpop.f32.mrb[15].mxu1 }
 0x12a   : > { %732 = vst.msk [vmem:[%s1365_s10 + $0x38] sm:$0xff] %vm724_vm2, %v1452_v28  ;;  %748 = vst.msk [vmem:[%s1365_s10 + $0xb8] sm:$0xff] %vm724_vm2, %v1455_v29 }
 0x12d   : > { %v629_v32 = vpop.f32.mrb[16].mxu0  ;;  %v693_v33 = vpop.f32.mrb[16].mxu1 }
 0x12e   : > { %v1464_v34 = vadd.f32 %v1358_v47, %v629_v32  ;;  %v1467_v35 = vadd.f32 %v1358_v47, %v693_v33  ;;  %v631_v36 = vpop.f32.mrb[17].mxu0  ;;  %v695_v37 = vpop.f32.mrb[17].mxu1  ;;  %v1191_v33 = vmov (!%p1081_p4), 0.0  }
 0x12f   : > { %v632_v38 = vpop.f32.mrb[18].mxu0  ;;  %v696_v39 = vpop.f32.mrb[18].mxu1  ;;  %762 = vst.msk [vmem:[%s1748_s4] sm:$0x1] (!%p1081_p4), %vm761_vm3, %v1191_v33  ;;  %763 = vst.msk [vmem:[%s1749_s5] sm:$0x1] (!%p1081_p4), %vm761_vm3, %v1191_v33 }
 0x130   : > { %733 = vst.msk [vmem:[%s1365_s10 + $0x40] sm:$0xff] %vm724_vm2, %v1464_v34  ;;  %749 = vst.msk [vmem:[%s1365_s10 + $0xc0] sm:$0xff] %vm724_vm2, %v1467_v35  ;;  %v1476_v40 = vadd.f32 %v1358_v47, %v632_v38  ;;  %v1479_v41 = vadd.f32 %v1358_v47, %v696_v39  ;;  %v634_v42 = vpop.f32.mrb[19].mxu0  ;;  %v698_v43 = vpop.f32.mrb[19].mxu1 }
 0x132   : > { %734 = vst.msk [vmem:[%s1365_s10 + $0x48] sm:$0xff] %vm724_vm2, %v1476_v40  ;;  %750 = vst.msk [vmem:[%s1365_s10 + $0xc8] sm:$0xff] %vm724_vm2, %v1479_v41 }
 0x135   : > { %v637_v44 = vpop.f32.mrb[20].mxu0  ;;  %v701_v45 = vpop.f32.mrb[20].mxu1 }
 0x136   : > { %v1488_v46 = vadd.f32 %v1358_v47, %v637_v44  ;;  %v1491_v48 = vadd.f32 %v1358_v47, %v701_v45  ;;  %v639_v49 = vpop.f32.mrb[21].mxu0  ;;  %v703_v52 = vpop.f32.mrb[21].mxu1 }
 0x137   : > { %v640_v53 = vpop.f32.mrb[22].mxu0  ;;  %v704_v54 = vpop.f32.mrb[22].mxu1 }
 0x138   : > { %735 = vst.msk [vmem:[%s1365_s10 + $0x50] sm:$0xff] %vm724_vm2, %v1488_v46  ;;  %751 = vst.msk [vmem:[%s1365_s10 + $0xd0] sm:$0xff] %vm724_vm2, %v1491_v48  ;;  %v1500_v55 = vadd.f32 %v1358_v47, %v640_v53  ;;  %v1503_v58 = vadd.f32 %v1358_v47, %v704_v54  ;;  %v642_v59 = vpop.f32.mrb[23].mxu0  ;;  %v706_v60 = vpop.f32.mrb[23].mxu1 }
 0x13a   : > { %736 = vst.msk [vmem:[%s1365_s10 + $0x58] sm:$0xff] %vm724_vm2, %v1500_v55  ;;  %752 = vst.msk [vmem:[%s1365_s10 + $0xd8] sm:$0xff] %vm724_vm2, %v1503_v58 }
 0x13d   : > { %v645_v61 = vpop.f32.mrb[24].mxu0  ;;  %v709_v0 = vpop.f32.mrb[24].mxu1 }
 0x13e   : > { %v1512_v1 = vadd.f32 %v1358_v47, %v645_v61  ;;  %v1515_v2 = vadd.f32 %v1358_v47, %v709_v0  ;;  %v647_v3 = vpop.f32.mrb[25].mxu0  ;;  %v711_v6 = vpop.f32.mrb[25].mxu1 }
 0x13f   : > { %v648_v7 = vpop.f32.mrb[26].mxu0  ;;  %v712_v8 = vpop.f32.mrb[26].mxu1 }
 0x140   : > { %737 = vst.msk [vmem:[%s1365_s10 + $0x60] sm:$0xff] %vm724_vm2, %v1512_v1  ;;  %753 = vst.msk [vmem:[%s1365_s10 + $0xe0] sm:$0xff] %vm724_vm2, %v1515_v2  ;;  %v1524_v9 = vadd.f32 %v1358_v47, %v648_v7  ;;  %v1527_v12 = vadd.f32 %v1358_v47, %v712_v8  ;;  %v650_v13 = vpop.f32.mrb[27].mxu0  ;;  %v714_v14 = vpop.f32.mrb[27].mxu1 }
 0x142   : > { %738 = vst.msk [vmem:[%s1365_s10 + $0x68] sm:$0xff] %vm724_vm2, %v1524_v9  ;;  %754 = vst.msk [vmem:[%s1365_s10 + $0xe8] sm:$0xff] %vm724_vm2, %v1527_v12 }
 0x144   : > { %760 = sbr.rel (%p1081_p4) target bundleno = 331 (0x14b), region = 36 }
 0x145   : > { %v653_v15 = vpop.f32.mrb[28].mxu0  ;;  %v717_v18 = vpop.f32.mrb[28].mxu1 }
 0x146   : > { %v1536_v19 = vadd.f32 %v1358_v47, %v653_v15  ;;  %v1539_v20 = vadd.f32 %v1358_v47, %v717_v18  ;;  %v655_v21 = vpop.f32.mrb[29].mxu0  ;;  %v719_v24 = vpop.f32.mrb[29].mxu1 }
 0x147   : > { %v656_v25 = vpop.f32.mrb[30].mxu0  ;;  %v720_v26 = vpop.f32.mrb[30].mxu1 }
 0x148   : > { %739 = vst.msk [vmem:[%s1365_s10 + $0x70] sm:$0xff] %vm724_vm2, %v1536_v19  ;;  %755 = vst.msk [vmem:[%s1365_s10 + $0xf0] sm:$0xff] %vm724_vm2, %v1539_v20  ;;  %v1548_v27 = vadd.f32 %v1358_v47, %v656_v25  ;;  %v1551_v30 = vadd.f32 %v1358_v47, %v720_v26  ;;  %v658_v31 = vpop.f32.mrb[31].mxu0  ;;  %v722_v32 = vpop.f32.mrb[31].mxu1 }
 0x14a   : > { %740 = vst.msk [vmem:[%s1365_s10 + $0x78] sm:$0xff] %vm724_vm2, %v1548_v27  ;;  %756 = vst.msk [vmem:[%s1365_s10 + $0xf8] sm:$0xff] %vm724_vm2, %v1551_v30 }
 0x14b PF: > { %v765_v47 = vsel %vm724_vm2, %v1368_v50, 0.0  ;;  %v766_v36 = vsel %vm724_vm2, %v1380_v56, 0.0  ;;  %v768_v37 = vsel %vm724_vm2, %v1392_v62, 0.0  ;;  %v770_v39 = vsel %vm724_vm2, %v1404_v4, 0.0 }
 0x14c   : > { %v767_v38 = vadd.f32 %v766_v36, %v765_v47  ;;  %v772_v43 = vsel %vm724_vm2, %v1416_v10, 0.0  ;;  %v774_v45 = vsel %vm724_vm2, %v1428_v16, 0.0  ;;  %v776_v52 = vsel %vm724_vm2, %v1440_v22, 0.0 }
 0x14d   : > { %v778_v54 = vsel %vm724_vm2, %v1452_v28, 0.0  ;;  %v780_v60 = vsel %vm724_vm2, %v1464_v34, 0.0  ;;  %v782_v0 = vsel %vm724_vm2, %v1476_v40, 0.0  ;;  %v838_v3 = vmul.f32 %v1368_v50, %v1368_v50 }
 0x14e   : > { %v769_v42 = vadd.f32 %v768_v37, %v767_v38  ;;  %v839_v6 = vmul.f32 %v1380_v56, %v1380_v56  ;;  %v840_v8 = vmul.f32 %v1392_v62, %v1392_v62  ;;  %v784_v13 = vsel %vm724_vm2, %v1488_v46, 0.0 }
 0x14f   : > { %v841_v14 = vmul.f32 %v1404_v4, %v1404_v4  ;;  %v786_v18 = vsel %vm724_vm2, %v1500_v55, 0.0  ;;  %v842_v50 = vmul.f32 %v1416_v10, %v1416_v10  ;;  %v870_v21 = vsel %vm724_vm2, %v838_v3, 0.0 }
 0x150   : > { %v771_v44 = vadd.f32 %v770_v39, %v769_v42  ;;  %v871_v56 = vsel %vm724_vm2, %v839_v6, 0.0  ;;  %v873_v62 = vsel %vm724_vm2, %v840_v8, 0.0  ;;  %v788_v26 = vsel %vm724_vm2, %v1512_v1, 0.0 }
 0x151   : > { %v872_v25 = vadd.f32 %v871_v56, %v870_v21  ;;  %v843_v4 = vmul.f32 %v1428_v16, %v1428_v16  ;;  %v875_v31 = vsel %vm724_vm2, %v841_v14, 0.0  ;;  %v790_v10 = vsel %vm724_vm2, %v1524_v9, 0.0 }
 0x152   : > { %v773_v49 = vadd.f32 %v772_v43, %v771_v44  ;;  %v844_v47 = vmul.f32 %v1440_v22, %v1440_v22  ;;  %v877_v36 = vsel %vm724_vm2, %v842_v50, 0.0  ;;  %v792_v39 = vsel %vm724_vm2, %v1536_v19, 0.0 }
 0x153   : > { %v874_v33 = vadd.f32 %v873_v62, %v872_v25  ;;  %v845_v16 = vmul.f32 %v1452_v28, %v1452_v28  ;;  %v879_v42 = vsel %vm724_vm2, %v843_v4, 0.0  ;;  %v846_v22 = vmul.f32 %v1464_v34, %v1464_v34 }
 0x154   : > { %v775_v53 = vadd.f32 %v774_v45, %v773_v49  ;;  %v794_v45 = vsel %vm724_vm2, %v1548_v27, 0.0  ;;  %v881_v49 = vsel %vm724_vm2, %v844_v47, 0.0  ;;  %v847_v28 = vmul.f32 %v1476_v40, %v1476_v40 }
 0x155   : > { %v876_v38 = vadd.f32 %v875_v31, %v874_v33  ;;  %v848_v34 = vmul.f32 %v1488_v46, %v1488_v46  ;;  %v885_v3 = vsel %vm724_vm2, %v846_v22, 0.0  ;;  %v800_v8 = vsel %vm724_vm2, %v1395_v63, 0.0 }
 0x156   : > { %v777_v59 = vadd.f32 %v776_v52, %v775_v53  ;;  %v849_v40 = vmul.f32 %v1500_v55, %v1500_v55  ;;  %v850_v46 = vmul.f32 %v1512_v1, %v1512_v1  ;;  %v851_v55 = vmul.f32 %v1524_v9, %v1524_v9 }
 0x157   : > { %v878_v44 = vadd.f32 %v877_v36, %v876_v38  ;;  %v889_v50 = vsel %vm724_vm2, %v848_v34, 0.0  ;;  %v806_v4 = vsel %vm724_vm2, %v1431_v17, 0.0  ;;  %v852_v1 = vmul.f32 %v1536_v19, %v1536_v19 }
 0x158   : > { %v779_v61 = vadd.f32 %v778_v54, %v777_v59  ;;  %v796_v54 = vsel %vm724_vm2, %v1371_v51, 0.0  ;;  %v883_v59 = vsel %vm724_vm2, %v845_v16, 0.0  ;;  %v891_v25 = vsel %vm724_vm2, %v849_v40, 0.0 }
 0x159   : > { %v880_v53 = vadd.f32 %v879_v42, %v878_v44  ;;  %v893_v31 = vsel %vm724_vm2, %v850_v46, 0.0  ;;  %v853_v9 = vmul.f32 %v1548_v27, %v1548_v27  ;;  %v895_v47 = vsel %vm724_vm2, %v851_v55, 0.0 }
 0x15a   : > { %v781_v7 = vadd.f32 %v780_v60, %v779_v61  ;;  %v810_v38 = vsel %vm724_vm2, %v1455_v29, 0.0  ;;  %v854_v19 = vmul.f32 %v1371_v51, %v1371_v51  ;;  %v855_v27 = vmul.f32 %v1383_v57, %v1383_v57 }
 0x15b   : > { %v882_v61 = vadd.f32 %v881_v49, %v880_v53  ;;  %v899_v44 = vsel %vm724_vm2, %v853_v9, 0.0  ;;  %v814_v49 = vsel %vm724_vm2, %v1479_v41, 0.0  ;;  %v856_v51 = vmul.f32 %v1395_v63, %v1395_v63 }
 0x15c   : > { %v783_v15 = vadd.f32 %v782_v0, %v781_v7  ;;  %v798_v0 = vsel %vm724_vm2, %v1383_v57, 0.0  ;;  %v857_v57 = vmul.f32 %v1407_v5, %v1407_v5  ;;  %v858_v63 = vmul.f32 %v1419_v11, %v1419_v11 }
 0x15d   : > { %v884_v7 = vadd.f32 %v883_v59, %v882_v61  ;;  %v903_v59 = vsel %vm724_vm2, %v855_v27, 0.0  ;;  %v905_v34 = vsel %vm724_vm2, %v856_v51, 0.0  ;;  %v826_v55 = vsel %vm724_vm2, %v1551_v30, 0.0 }
 0x15e   : > { %v785_v24 = vadd.f32 %v784_v13, %v783_v15  ;;  %v887_v13 = vsel %vm724_vm2, %v847_v28, 0.0  ;;  %v816_v28 = vsel %vm724_vm2, %v1491_v48, 0.0  ;;  %vm835_vm4 = vcmask 24576  }
 0x15f   : > { %v886_v15 = vadd.f32 %v885_v3, %v884_v7  ;;  %v820_v7 = vsel %vm724_vm2, %v1515_v2, 0.0 }
 0x160   : > { %v787_v32 = vadd.f32 %v786_v18, %v785_v24  ;;  %v802_v18 = vsel %vm724_vm2, %v1407_v5, 0.0  ;;  %v804_v24 = vsel %vm724_vm2, %v1419_v11, 0.0  ;;  %v859_v5 = vmul.f32 %v1431_v17, %v1431_v17 }
 0x161   : > { %v888_v56 = vadd.f32 %v887_v13, %v886_v15  ;;  %v860_v11 = vmul.f32 %v1443_v23, %v1443_v23  ;;  %v909_v15 = vsel %vm724_vm2, %v858_v63, 0.0  ;;  %v861_v17 = vmul.f32 %v1455_v29, %v1455_v29  ;;  %v837_v63 = vld [vmem:[%s1749_s5] sm:$0x1] }
 0x162   : > { %v789_v37 = vadd.f32 %v788_v26, %v787_v32 }
 0x163   : > { %v890_v26 = vadd.f32 %v889_v50, %v888_v56  ;;  %v824_v50 = vsel %vm724_vm2, %v1539_v20, 0.0 }
 0x164   : > { %v791_v43 = vadd.f32 %v790_v10, %v789_v37  ;;  %v808_v10 = vsel %vm724_vm2, %v1443_v23, 0.0  ;;  %v862_v23 = vmul.f32 %v1467_v35, %v1467_v35 }
 0x165   : > { %v892_v33 = vadd.f32 %v891_v25, %v890_v26  ;;  %v913_v25 = vsel %vm724_vm2, %v860_v11, 0.0 }
 0x166   : > { %v793_v52 = vadd.f32 %v792_v39, %v791_v43  ;;  %v897_v39 = vsel %vm724_vm2, %v852_v1, 0.0  ;;  %v812_v43 = vsel %vm724_vm2, %v1467_v35, 0.0  ;;  %v915_v1 = vsel %vm724_vm2, %v861_v17, 0.0 }
 0x167   : > { %v894_v37 = vadd.f32 %v893_v31, %v892_v33  ;;  %v917_v33 = vsel %vm724_vm2, %v862_v23, 0.0  ;;  %v865_v35 = vmul.f32 %v1503_v58, %v1503_v58 }
 0x168   : > { %v795_v60 = vadd.f32 %v794_v45, %v793_v52  ;;  %v901_v52 = vsel %vm724_vm2, %v854_v19, 0.0 }
 0x169   : > { %v896_v42 = vadd.f32 %v895_v47, %v894_v37 }
 0x16a   : > { %v797_v6 = vadd.f32 %v796_v54, %v795_v60 }
 0x16b   : > { %v898_v22 = vadd.f32 %v897_v39, %v896_v42 }
 0x16c   : > { %v799_v14 = vadd.f32 %v798_v0, %v797_v6  ;;  %v818_v0 = vsel %vm724_vm2, %v1503_v58, 0.0  ;;  %v868_v58 = vmul.f32 %v1539_v20, %v1539_v20 }
 0x16d   : > { %v900_v54 = vadd.f32 %v899_v44, %v898_v22  ;;  %v869_v22 = vmul.f32 %v1551_v30, %v1551_v30 }
 0x16e   : > { %v801_v21 = vadd.f32 %v800_v8, %v799_v14  ;;  %v907_v8 = vsel %vm724_vm2, %v857_v57, 0.0  ;;  %v822_v14 = vsel %vm724_vm2, %v1527_v12, 0.0 }
 0x16f   : > { %v902_v61 = vadd.f32 %v901_v52, %v900_v54  ;;  %v929_v52 = vsel %vm724_vm2, %v868_v58, 0.0  ;;  %v931_v54 = vsel %vm724_vm2, %v869_v22, 0.0 }
 0x170   : > { %v803_v62 = vadd.f32 %v802_v18, %v801_v21  ;;  %v911_v21 = vsel %vm724_vm2, %v859_v5, 0.0 }
 0x171   : > { %v904_v6 = vadd.f32 %v903_v59, %v902_v61 }
 0x172   : > { %v805_v32 = vadd.f32 %v804_v24, %v803_v62 }
 0x173   : > { %v906_v13 = vadd.f32 %v905_v34, %v904_v6 }
 0x174   : > { %v807_v36 = vadd.f32 %v806_v4, %v805_v32  ;;  %v863_v4 = vmul.f32 %v1479_v41, %v1479_v41  ;;  %v864_v32 = vmul.f32 %v1491_v48, %v1491_v48  ;;  %v866_v41 = vmul.f32 %v1515_v2, %v1515_v2  ;;  %v764_v2 = vld [vmem:[%s1748_s4] sm:$0x1] }
 0x175   : > { %v908_v46 = vadd.f32 %v907_v8, %v906_v13  ;;  %v867_v48 = vmul.f32 %v1527_v12, %v1527_v12 }
 0x176   : > { %v809_v16 = vadd.f32 %v808_v10, %v807_v36  ;;  %v919_v47 = vsel %vm724_vm2, %v863_v4, 0.0  ;;  %v925_v27 = vsel %vm724_vm2, %v866_v41, 0.0 }
 0x177   : > { %v910_v24 = vadd.f32 %v909_v15, %v908_v46  ;;  %v927_v12 = vsel %vm724_vm2, %v867_v48, 0.0 }
 0x178   : > { %v811_v45 = vadd.f32 %v810_v38, %v809_v16  ;;  %v921_v38 = vsel %vm724_vm2, %v864_v32, 0.0  ;;  %v923_v16 = vsel %vm724_vm2, %v865_v35, 0.0 }
 0x179   : > { %v912_v26 = vadd.f32 %v911_v21, %v910_v24 }
 0x17a   : > { %v813_v53 = vadd.f32 %v812_v43, %v811_v45 }
 0x17b   : > { %v914_v31 = vadd.f32 %v913_v25, %v912_v26 }
 0x17c   : > { %v815_v60 = vadd.f32 %v814_v49, %v813_v53 }
 0x17d   : > { %v916_v9 = vadd.f32 %v915_v1, %v914_v31 }
 0x17e   : > { %v817_v3 = vadd.f32 %v816_v28, %v815_v60 }
 0x17f   : > { %v918_v37 = vadd.f32 %v917_v33, %v916_v9 }
 0x180   : > { %v819_v40 = vadd.f32 %v818_v0, %v817_v3 }
 0x181   : > { %v920_v39 = vadd.f32 %v919_v47, %v918_v37 }
 0x182   : > { %v821_v18 = vadd.f32 %v820_v7, %v819_v40 }
 0x183   : > { %v922_v43 = vadd.f32 %v921_v38, %v920_v39 }
 0x184   : > { %v823_v56 = vadd.f32 %v822_v14, %v821_v18 }
 0x185   : > { %v924_v45 = vadd.f32 %v923_v16, %v922_v43 }
 0x186   : > { %v825_v62 = vadd.f32 %v824_v50, %v823_v56 }
 0x187   : > { %v926_v51 = vadd.f32 %v925_v27, %v924_v45 }
 0x188   : > { %v827_v29 = vadd.f32 %v826_v55, %v825_v62 }
 0x189   : > { %v928_v20 = vadd.f32 %v927_v12, %v926_v51 }
 0x18a   : > { %v828_v10 = vrot.slane %v827_v29, 4 }
 0x18b   : > { %v930_v28 = vadd.f32 %v929_v52, %v928_v20 }
 0x18c   : > { %v829_v36 = vadd.f32 %v828_v10, %v827_v29 }
 0x18d   : > { %v932_v57 = vadd.f32 %v931_v54, %v930_v28 }
 0x18e   : > { %v830_v19 = vrot.slane %v829_v36, 2 }
 0x18f   : > { %v933_v59 = vrot.slane %v932_v57, 4 }
 0x190   : > { %v831_v42 = vadd.f32 %v830_v19, %v829_v36 }
 0x191   : > { %v934_v30 = vadd.f32 %v933_v59, %v932_v57 }
 0x192   : > { %v832_v44 = vrot.slane %v831_v42, 1 }
 0x193   : > { %v935_v60 = vrot.slane %v934_v30, 2 }
 0x194   : > { %v833_v49 = vadd.f32 %v832_v44, %v831_v42 }
 0x195   : > { %v936_v61 = vadd.f32 %v935_v60, %v934_v30 }
 0x196   : > { %v834_v53 = vadd.f32 %v833_v49, %v764_v2 }
 0x197   : > { %v937_v0 = vrot.slane %v936_v61, 1 }
 0x198   : > { %836 = vst.msk [vmem:[%s1748_s4] sm:$0x1] %vm835_vm4, %v834_v53 }
 0x199   : > { %v938_v34 = vadd.f32 %v937_v0, %v936_v61 }
 0x19b   : > { %v939_v3 = vadd.f32 %v938_v34, %v837_v63 }
 0x19d   : > { %940 = vst.msk [vmem:[%s1749_s5] sm:$0x1] %vm835_vm4, %v939_v3 }
 0x19e PF: > { %s16_s18 = sadd.s32 1, %s1188_s18  }
 0x19f   : > { %p13_p5 = scmp.ge.s32.totalorder %s16_s18, 4  }
 0x1a1   :  { %15 = sbr.rel (!%p13_p5) target bundleno = 1 (0x1), region = 82 }

// kernel: _lambda_.29
= control target key start
LH: loop header
LB: loop body
LE: loop exit
PB: predicated region body
PF: predicated region fallthrough
CT: control target
= control target key end

     0   :  { %s1506_s27 = smov 0   ;;  %s2041_s0 = inlined_call_operand.vmem [shape: f32[512,8], index: 0, kind: input, shape index: {}]   ;;  %s2042_s1 = inlined_call_operand.vmem [shape: bf16[8,9], index: 1, kind: input, shape index: {}]   ;;  %s2043_s2 = inlined_call_operand.vmem [shape: f32[1,9], index: 2, kind: input, shape index: {}]   ;;  %s2044_s3 = inlined_call_operand.vmem [shape: bf16[8,9], index: 3, kind: input, shape index: {}]   ;;  %s2045_s4 = inlined_call_operand.vmem [shape: f32[1,9], index: 4, kind: input, shape index: {}]   ;;  %s2046_s5 = inlined_call_operand.vmem [shape: f32[512,9], index: 5, kind: input, shape index: {}]   ;;  %s2047_s6 = inlined_call_operand.vmem [shape: f32[512,9], index: 6, kind: output, shape index: {0}]   ;;  %s2048_s7 = inlined_call_operand.vmem [shape: f32[512,9], index: 7, kind: output, shape index: {1}]   ;;  %s2049_s8 = inlined_call_operand.vmem [shape: f32[512,9], index: 8, kind: output, shape index: {2}]  }
   0x1 LB: > { %s1226_s28 = sadd.s32 4294967295, %s1459_s27   ;;  %p1230_p0 = scmp.ge.s32.totalorder %s1459_s27, 1  ;;  %s1459_s27 = sphi %s1506_s27, %s19_s27  }
   0x2   : > { %p279_p1 = scmp.lt.s32.totalorder %s1459_s27, 3 }
   0x4   : > { %p280_p2 = pnand %p1230_p0, %p279_p1 }
   0x5   : > { %vm464_vm0 = vcmask (!%p280_p2), 1043456   ;;  %v629_v0 = vld [vmem:[%s2044_s3] sm:$0xf] (!%p280_p2)  ;;  %s1231_s9 = sshll.u32 (!%p280_p2), %s1226_s28, 5  ;;  %vm415_vm1 = vcmask (!%p280_p2), 64512   ;;  %vm801_vm2 = vcmask (!%p280_p2), 72704  }
   0x6   : > { %283 = sbr.rel (%p280_p2) target bundleno = 314 (0x13a), region = 44  ;;  %1380 = vmatprep.subr.msk.bf16.mxu1 (!%p280_p2), %vm464_vm0, %v629_v0  ;;  %v638_v1 = vsel (!%p280_p2), %vm464_vm0, %v629_v0, 0  ;;  %p329_p3 = scmp.lt.s32.totalorder (!%p280_p2), %s1231_s9, 63  ;;  %v407_v2 = vld [vmem:[%s2042_s1] sm:$0xf] (!%p280_p2) }
   0x7   : > { %1346 = vmatpush3.bf16.msra.mxu1 (!%p280_p2), %v638_v1  ;;  %1379 = vmatprep.subr.msk.bf16.mxu0 (!%p280_p2), %vm464_vm0, %v407_v2  ;;  %v466_v3 = vsel (!%p280_p2), %vm464_vm0, %v407_v2, 0  ;;  %v1595_v52 = vld [vmem:[%s2045_s4] ss:$0 sm:$0xff] (!%p280_p2) }
   0x8   : > { %1312 = vmatpush3.bf16.msra.mxu0 (!%p280_p2), %v466_v3  ;;  %v1600_v53 = vld [vmem:[%s2043_s2] ss:$0 sm:$0xff] (!%p280_p2) }
   0xd   : > { %s2051_s9 = smov (!%p329_p3, %s1231_s9), 63 }
   0xe   : > { %s1520_s12 = sshll.u32 %s2051_s9, 3 }
   0xf   : > { %s1526_s15 = scalar_lea.vmem %s2041_s0, %s1520_s12  ;;  %s1606_s22 = scalar_lea.vmem %s2048_s7, %s1520_s12 }
  0x10   : > { %v359_v4 = vld [vmem:[%s1526_s15] sm:$0xff]  ;;  %v360_v5 = vld [vmem:[%s1526_s15 + $0x8] sm:$0xff]  ;;  %v361_v6 = vld [vmem:[%s1526_s15 + $0x10] sm:$0xff]  ;;  %s1612_s25 = scalar_lea.vmem %s2047_s6, %s1520_s12  ;;  %s1674_s29 = scalar_lea.vmem %s2046_s5, %s1520_s12 }
  0x11   : > { %v391_v7 = vpack.c.bf16 %v360_v5, %v359_v4  ;;  %v362_v8 = vld [vmem:[%s1526_s15 + $0x18] sm:$0xff]  ;;  %v363_v9 = vld [vmem:[%s1526_s15 + $0x20] sm:$0xff]  ;;  %v364_v10 = vld [vmem:[%s1526_s15 + $0x28] sm:$0xff]  ;;  %s1708_s10 = scalar_lea.vmem %s2049_s8, %s1520_s12 }
  0x12   : > { %v392_v11 = vpack.c.bf16 %v362_v8, %v361_v6  ;;  %v393_v12 = vpack.c.bf16 %v364_v10, %v363_v9  ;;  %v365_v13 = vld [vmem:[%s1526_s15 + $0x30] sm:$0xff]  ;;  %v366_v14 = vld [vmem:[%s1526_s15 + $0x38] sm:$0xff]  ;;  %v367_v15 = vld [vmem:[%s1526_s15 + $0x40] sm:$0xff] }
  0x13   : > { %1347 = vmatprep.mubr.msk.bf16.mxu1 %vm415_vm1, %v391_v7  ;;  %1313 = vmatprep.mubr.msk.bf16.mxu0 %vm415_vm1, %v391_v7  ;;  %v368_v16 = vld [vmem:[%s1526_s15 + $0x48] sm:$0xff]  ;;  %v394_v17 = vpack.c.bf16 %v366_v14, %v365_v13  ;;  %v369_v19 = vld [vmem:[%s1526_s15 + $0x50] sm:$0xff]  ;;  %v370_v20 = vld [vmem:[%s1526_s15 + $0x58] sm:$0xff] }
  0x14   : > { %1348 = vmatmul.mubr.msk.bf16.vlgmr.msra.gmra.mrb[0].mxu1 %vm415_vm1, %v392_v11  ;;  %1314 = vmatmul.mubr.msk.bf16.vlgmr.msra.gmra.mrb[0].mxu0 %vm415_vm1, %v392_v11  ;;  %v395_v18 = vpack.c.bf16 %v368_v16, %v367_v15  ;;  %v371_v21 = vld [vmem:[%s1526_s15 + $0x60] sm:$0xff]  ;;  %v372_v22 = vld [vmem:[%s1526_s15 + $0x68] sm:$0xff]  ;;  %v396_v23 = vpack.c.bf16 %v370_v20, %v369_v19  ;;  %v373_v25 = vld [vmem:[%s1526_s15 + $0x70] sm:$0xff] }
  0x15   : > { %1351 = vmatprep.mubr.msk.bf16.mxu1 %vm415_vm1, %v393_v12  ;;  %1317 = vmatprep.mubr.msk.bf16.mxu0 %vm415_vm1, %v393_v12  ;;  %v397_v24 = vpack.c.bf16 %v372_v22, %v371_v21  ;;  %v374_v26 = vld [vmem:[%s1526_s15 + $0x78] sm:$0xff]  ;;  %v375_v27 = vld [vmem:[%s1526_s15 + $0x80] sm:$0xff]  ;;  %v376_v28 = vld [vmem:[%s1526_s15 + $0x88] sm:$0xff] }
  0x16   : > { %v398_v29 = vpack.c.bf16 %v374_v26, %v373_v25  ;;  %v399_v30 = vpack.c.bf16 %v376_v28, %v375_v27  ;;  %v377_v31 = vld [vmem:[%s1526_s15 + $0x90] sm:$0xff]  ;;  %v378_v32 = vld [vmem:[%s1526_s15 + $0x98] sm:$0xff]  ;;  %v379_v33 = vld [vmem:[%s1526_s15 + $0xa0] sm:$0xff] }
  0x17   : > { %v380_v34 = vld [vmem:[%s1526_s15 + $0xa8] sm:$0xff]  ;;  %v400_v35 = vpack.c.bf16 %v378_v32, %v377_v31  ;;  %v381_v37 = vld [vmem:[%s1526_s15 + $0xb0] sm:$0xff]  ;;  %v382_v38 = vld [vmem:[%s1526_s15 + $0xb8] sm:$0xff] }
  0x18   : > { %v401_v36 = vpack.c.bf16 %v380_v34, %v379_v33  ;;  %v383_v39 = vld [vmem:[%s1526_s15 + $0xc0] sm:$0xff]  ;;  %v384_v40 = vld [vmem:[%s1526_s15 + $0xc8] sm:$0xff]  ;;  %v402_v41 = vpack.c.bf16 %v382_v38, %v381_v37  ;;  %v385_v43 = vld [vmem:[%s1526_s15 + $0xd0] sm:$0xff] }
  0x19   : > { %v403_v42 = vpack.c.bf16 %v384_v40, %v383_v39  ;;  %v386_v44 = vld [vmem:[%s1526_s15 + $0xd8] sm:$0xff]  ;;  %v387_v45 = vld [vmem:[%s1526_s15 + $0xe0] sm:$0xff]  ;;  %v388_v46 = vld [vmem:[%s1526_s15 + $0xe8] sm:$0xff] }
  0x1a   : > { %v404_v47 = vpack.c.bf16 %v386_v44, %v385_v43  ;;  %v405_v48 = vpack.c.bf16 %v388_v46, %v387_v45  ;;  %v389_v49 = vld [vmem:[%s1526_s15 + $0xf0] sm:$0xff]  ;;  %v390_v50 = vld [vmem:[%s1526_s15 + $0xf8] sm:$0xff]  ;;  %v962_v39 = vld [vmem:[%s1674_s29] sm:$0xff] }
  0x1b   : > { %v406_v51 = vpack.c.bf16 %v390_v50, %v389_v49  ;;  %v964_v37 = vld [vmem:[%s1674_s29 + $0x10] sm:$0xff]  ;;  %v965_v43 = vld [vmem:[%s1674_s29 + $0x18] sm:$0xff]  ;;  %v963_v50 = vld [vmem:[%s1674_s29 + $0x8] sm:$0xff] }
  0x1c   : > { %1352 = vmatmul.mubr.msk.bf16.gmra.mrb[4].mxu1 %vm415_vm1, %v394_v17  ;;  %1318 = vmatmul.mubr.msk.bf16.gmra.mrb[4].mxu0 %vm415_vm1, %v394_v17 }
  0x1d   : > { %1355 = vmatprep.mubr.msk.bf16.mxu1 %vm415_vm1, %v395_v18  ;;  %1321 = vmatprep.mubr.msk.bf16.mxu0 %vm415_vm1, %v395_v18 }
  0x24   : > { %1356 = vmatmul.mubr.msk.bf16.gmra.mrb[8].mxu1 %vm415_vm1, %v396_v23  ;;  %1322 = vmatmul.mubr.msk.bf16.gmra.mrb[8].mxu0 %vm415_vm1, %v396_v23 }
  0x25   : > { %1359 = vmatprep.mubr.msk.bf16.mxu1 %vm415_vm1, %v397_v24  ;;  %1325 = vmatprep.mubr.msk.bf16.mxu0 %vm415_vm1, %v397_v24 }
  0x2c   : > { %1360 = vmatmul.mubr.msk.bf16.gmra.mrb[12].mxu1 %vm415_vm1, %v398_v29  ;;  %1326 = vmatmul.mubr.msk.bf16.gmra.mrb[12].mxu0 %vm415_vm1, %v398_v29 }
  0x2d   : > { %1363 = vmatprep.mubr.msk.bf16.mxu1 %vm415_vm1, %v399_v30  ;;  %1329 = vmatprep.mubr.msk.bf16.mxu0 %vm415_vm1, %v399_v30 }
  0x34   : > { %1364 = vmatmul.mubr.msk.bf16.gmra.mrb[16].mxu1 %vm415_vm1, %v400_v35  ;;  %1330 = vmatmul.mubr.msk.bf16.gmra.mrb[16].mxu0 %vm415_vm1, %v400_v35 }
  0x35   : > { %1367 = vmatprep.mubr.msk.bf16.mxu1 %vm415_vm1, %v401_v36  ;;  %1333 = vmatprep.mubr.msk.bf16.mxu0 %vm415_vm1, %v401_v36 }
  0x3c   : > { %1368 = vmatmul.mubr.msk.bf16.gmra.mrb[20].mxu1 %vm415_vm1, %v402_v41  ;;  %1334 = vmatmul.mubr.msk.bf16.gmra.mrb[20].mxu0 %vm415_vm1, %v402_v41 }
  0x3d   : > { %1371 = vmatprep.mubr.msk.bf16.mxu1 %vm415_vm1, %v403_v42  ;;  %1337 = vmatprep.mubr.msk.bf16.mxu0 %vm415_vm1, %v403_v42 }
  0x44   : > { %1372 = vmatmul.mubr.msk.bf16.gmra.mrb[24].mxu1 %vm415_vm1, %v404_v47  ;;  %1338 = vmatmul.mubr.msk.bf16.gmra.mrb[24].mxu0 %vm415_vm1, %v404_v47 }
  0x45   : > { %1375 = vmatprep.mubr.msk.bf16.mxu1 %vm415_vm1, %v405_v48  ;;  %1341 = vmatprep.mubr.msk.bf16.mxu0 %vm415_vm1, %v405_v48 }
  0x4c   : > { %1376 = vmatmul.mubr.msk.bf16.gmra.mrb[28].mxu1 %vm415_vm1, %v406_v51  ;;  %1342 = vmatmul.mubr.msk.bf16.gmra.mrb[28].mxu0 %vm415_vm1, %v406_v51 }
  0xe7   : > { %v1349_v54 = vpop.f32.mrb[0].mxu1  ;;  %v1315_v55 = vpop.f32.mrb[0].mxu0 }
  0xe8   : > { %v683_v56 = vadd.f32 %v1349_v54, %v1595_v52  ;;  %v674_v57 = vpop.f32.mrb[1].mxu1  ;;  %v1616_v58 = vadd.f32 %v1315_v55, %v1600_v53  ;;  %v502_v59 = vpop.f32.mrb[1].mxu0 }
  0xe9   : > { %v675_v60 = vadd.f32 %v1595_v52, %v674_v57  ;;  %v1350_v61 = vpop.f32.mrb[2].mxu1  ;;  %v1620_v62 = vadd.f32 %v1600_v53, %v502_v59  ;;  %v1316_v63 = vpop.f32.mrb[2].mxu0 }
  0xea   : > { %836 = vst.msk [vmem:[%s1606_s22 + $0x10] sm:$0xff] %vm801_vm2, %v683_v56  ;;  %v868_v0 = vmul.f32 0.5, %v683_v56  ;;  %v686_v1 = vadd.f32 %v1350_v61, %v1595_v52  ;;  %v677_v2 = vpop.f32.mrb[3].mxu1  ;;  %804 = vst.msk [vmem:[%s1612_s25 + $0x10] sm:$0xff] %vm801_vm2, %v1616_v58  ;;  %v1629_v3 = vadd.f32 %v1316_v63, %v1600_v53  ;;  %v505_v4 = vpop.f32.mrb[3].mxu0 }
  0xeb   : > { %834 = vst.msk [vmem:[%s1606_s22] sm:$0xff] %vm801_vm2, %v675_v60  ;;  %v866_v5 = vmul.f32 0.5, %v675_v60  ;;  %v678_v6 = vadd.f32 %v1595_v52, %v677_v2  ;;  %802 = vst.msk [vmem:[%s1612_s25] sm:$0xff] %vm801_vm2, %v1620_v62  ;;  %v1638_v7 = vadd.f32 %v1600_v53, %v505_v4 }
  0xec   : > { %v902_v8 = vmul.f32 1.442695, %v868_v0  ;;  %837 = vst.msk [vmem:[%s1606_s22 + $0x18] sm:$0xff] %vm801_vm2, %v686_v1  ;;  %v869_v9 = vmul.f32 0.5, %v686_v1  ;;  %805 = vst.msk [vmem:[%s1612_s25 + $0x18] sm:$0xff] %vm801_vm2, %v1629_v3 }
  0xed   : > { %v898_v10 = vmul.f32 1.442695, %v866_v5  ;;  %835 = vst.msk [vmem:[%s1606_s22 + $0x8] sm:$0xff] %vm801_vm2, %v678_v6  ;;  %v867_v11 = vmul.f32 0.5, %v678_v6  ;;  %803 = vst.msk [vmem:[%s1612_s25 + $0x8] sm:$0xff] %vm801_vm2, %v1638_v7 }
  0xee   : > { %1389 = vpow2.f32 %v902_v8  ;;  %v904_v12 = vmul.f32 1.442695, %v869_v9 }
  0xef   : > { %1391 = vpow2.f32 %v898_v10  ;;  %v900_v13 = vmul.f32 1.442695, %v867_v11  ;;  %v1353_v14 = vpop.f32.mrb[4].mxu1  ;;  %v1319_v15 = vpop.f32.mrb[4].mxu0 }
  0xf0   : > { %1393 = vpow2.f32 %v904_v12  ;;  %v699_v16 = vadd.f32 %v1353_v14, %v1595_v52  ;;  %v690_v17 = vpop.f32.mrb[5].mxu1  ;;  %v1652_v18 = vadd.f32 %v1319_v15, %v1600_v53  ;;  %v518_v19 = vpop.f32.mrb[5].mxu0 }
  0xf1   : > { %1395 = vpow2.f32 %v900_v13  ;;  %v691_v20 = vadd.f32 %v1595_v52, %v690_v17  ;;  %v1354_v21 = vpop.f32.mrb[6].mxu1  ;;  %v1656_v22 = vadd.f32 %v1600_v53, %v518_v19  ;;  %v1320_v23 = vpop.f32.mrb[6].mxu0  ;;  %v968_v17 = vld [vmem:[%s1674_s29 + $0x30] sm:$0xff]  ;;  %v966_v19 = vld [vmem:[%s1674_s29 + $0x20] sm:$0xff] }
  0xf2   : > { %840 = vst.msk [vmem:[%s1606_s22 + $0x30] sm:$0xff] %vm801_vm2, %v699_v16  ;;  %v872_v24 = vmul.f32 0.5, %v699_v16  ;;  %v702_v25 = vadd.f32 %v1354_v21, %v1595_v52  ;;  %v693_v26 = vpop.f32.mrb[7].mxu1  ;;  %808 = vst.msk [vmem:[%s1612_s25 + $0x30] sm:$0xff] %vm801_vm2, %v1652_v18  ;;  %v1665_v27 = vadd.f32 %v1320_v23, %v1600_v53  ;;  %v521_v28 = vpop.f32.mrb[7].mxu0 }
  0xf3   : > { %838 = vst.msk [vmem:[%s1606_s22 + $0x20] sm:$0xff] %vm801_vm2, %v691_v20  ;;  %v870_v29 = vmul.f32 0.5, %v691_v20  ;;  %v694_v30 = vadd.f32 %v1595_v52, %v693_v26  ;;  %806 = vst.msk [vmem:[%s1612_s25 + $0x20] sm:$0xff] %vm801_vm2, %v1656_v22  ;;  %v1680_v31 = vadd.f32 %v1600_v53, %v521_v28 }
  0xf4   : > { %v910_v32 = vmul.f32 1.442695, %v872_v24  ;;  %841 = vst.msk [vmem:[%s1606_s22 + $0x38] sm:$0xff] %vm801_vm2, %v702_v25  ;;  %v873_v33 = vmul.f32 0.5, %v702_v25  ;;  %809 = vst.msk [vmem:[%s1612_s25 + $0x38] sm:$0xff] %vm801_vm2, %v1665_v27  ;;  %v969_v24 = vld [vmem:[%s1674_s29 + $0x38] sm:$0xff] }
  0xf5   : > { %v906_v34 = vmul.f32 1.442695, %v870_v29  ;;  %839 = vst.msk [vmem:[%s1606_s22 + $0x28] sm:$0xff] %vm801_vm2, %v694_v30  ;;  %v871_v35 = vmul.f32 0.5, %v694_v30  ;;  %807 = vst.msk [vmem:[%s1612_s25 + $0x28] sm:$0xff] %vm801_vm2, %v1680_v31 }
  0xf6   : > { %1397 = vpow2.f32 %v910_v32  ;;  %v912_v36 = vmul.f32 1.442695, %v873_v33  ;;  %v967_v32 = vld [vmem:[%s1674_s29 + $0x28] sm:$0xff] }
  0xf7   : > { %1399 = vpow2.f32 %v906_v34  ;;  %v908_v38 = vmul.f32 1.442695, %v871_v35  ;;  %v1357_v40 = vpop.f32.mrb[8].mxu1  ;;  %v1323_v41 = vpop.f32.mrb[8].mxu0 }
  0xf8   : > { %v1390_v42 = vpop.eup %1389  ;;  %1401 = vpow2.f32 %v912_v36  ;;  %v715_v44 = vadd.f32 %v1357_v40, %v1595_v52  ;;  %v706_v45 = vpop.f32.mrb[9].mxu1  ;;  %v1697_v46 = vadd.f32 %v1323_v41, %v1600_v53 }
  0xf9   : > { %v534_v47 = vpop.f32.mrb[9].mxu0  ;;  %v1392_v48 = vpop.eup %1391  ;;  %1403 = vpow2.f32 %v908_v38  ;;  %v996_v49 = vmul.f32 %v1390_v42, %v964_v37  ;;  %v707_v51 = vadd.f32 %v1595_v52, %v706_v45 }
  0xfa   : > { %v1358_v54 = vpop.f32.mrb[10].mxu1  ;;  %v1702_v55 = vadd.f32 %v1600_v53, %v534_v47  ;;  %v1324_v56 = vpop.f32.mrb[10].mxu0  ;;  %v994_v59 = vmul.f32 %v1392_v48, %v962_v39  ;;  %844 = vst.msk [vmem:[%s1606_s22 + $0x50] sm:$0xff] %vm801_vm2, %v715_v44  ;;  %v876_v60 = vmul.f32 0.5, %v715_v44  ;;  %812 = vst.msk [vmem:[%s1612_s25 + $0x50] sm:$0xff] %vm801_vm2, %v1697_v46 }
  0xfb   : > { %v1394_v57 = vpop.eup %1393  ;;  %v718_v61 = vadd.f32 %v1358_v54, %v1595_v52  ;;  %v709_v63 = vpop.f32.mrb[11].mxu1  ;;  %v1717_v0 = vadd.f32 %v1324_v56, %v1600_v53  ;;  %v1028_v4 = vadd.f32 %v996_v49, %v1616_v58  ;;  %842 = vst.msk [vmem:[%s1606_s22 + $0x40] sm:$0xff] %vm801_vm2, %v707_v51  ;;  %v874_v6 = vmul.f32 0.5, %v707_v51 }
  0xfc   : > { %v537_v1 = vpop.f32.mrb[11].mxu0  ;;  %v1396_v2 = vpop.eup %1395  ;;  %v997_v5 = vmul.f32 %v1394_v57, %v965_v43  ;;  %v710_v8 = vadd.f32 %v1595_v52, %v709_v63  ;;  %810 = vst.msk [vmem:[%s1612_s25 + $0x40] sm:$0xff] %vm801_vm2, %v1702_v55  ;;  %v1026_v9 = vadd.f32 %v994_v59, %v1620_v62  ;;  %v918_v10 = vmul.f32 1.442695, %v876_v60  ;;  %v972_v63 = vld [vmem:[%s1674_s29 + $0x50] sm:$0xff] }
  0xfd   : > { %v995_v11 = vmul.f32 %v1396_v2, %v963_v50  ;;  %845 = vst.msk [vmem:[%s1606_s22 + $0x58] sm:$0xff] %vm801_vm2, %v718_v61  ;;  %v877_v12 = vmul.f32 0.5, %v718_v61  ;;  %813 = vst.msk [vmem:[%s1612_s25 + $0x58] sm:$0xff] %vm801_vm2, %v1717_v0  ;;  %v914_v13 = vmul.f32 1.442695, %v874_v6  ;;  %v1738_v14 = vadd.f32 %v1600_v53, %v537_v1  ;;  %v970_v1 = vld [vmem:[%s1674_s29 + $0x40] sm:$0xff] }
  0xfe   : > { %1060 = vst.msk [vmem:[%s1708_s10 + $0x10] sm:$0xff] %vm801_vm2, %v1028_v4  ;;  %v1029_v58 = vadd.f32 %v997_v5, %v1629_v3  ;;  %843 = vst.msk [vmem:[%s1606_s22 + $0x48] sm:$0xff] %vm801_vm2, %v710_v8  ;;  %v875_v62 = vmul.f32 0.5, %v710_v8  ;;  %1405 = vpow2.f32 %v918_v10  ;;  %v973_v6 = vld [vmem:[%s1674_s29 + $0x58] sm:$0xff] }
  0xff   : > { %1058 = vst.msk [vmem:[%s1708_s10] sm:$0xff] %vm801_vm2, %v1026_v9  ;;  %v1027_v15 = vadd.f32 %v995_v11, %v1638_v7  ;;  %v920_v16 = vmul.f32 1.442695, %v877_v12  ;;  %1407 = vpow2.f32 %v914_v13  ;;  %v1361_v20 = vpop.f32.mrb[12].mxu1  ;;  %811 = vst.msk [vmem:[%s1612_s25 + $0x48] sm:$0xff] %vm801_vm2, %v1738_v14  ;;  %v1327_v21 = vpop.f32.mrb[12].mxu0 }
 0x100   : > { %1061 = vst.msk [vmem:[%s1708_s10 + $0x18] sm:$0xff] %vm801_vm2, %v1029_v58  ;;  %v916_v3 = vmul.f32 1.442695, %v875_v62  ;;  %v1398_v23 = vpop.eup %1397  ;;  %v731_v7 = vadd.f32 %v1361_v20, %v1595_v52  ;;  %v722_v25 = vpop.f32.mrb[13].mxu1  ;;  %v1755_v26 = vadd.f32 %v1327_v21, %v1600_v53  ;;  %v971_v58 = vld [vmem:[%s1674_s29 + $0x48] sm:$0xff] }
 0x101   : > { %1059 = vst.msk [vmem:[%s1708_s10 + $0x8] sm:$0xff] %vm801_vm2, %v1027_v15  ;;  %1409 = vpow2.f32 %v920_v16  ;;  %v550_v28 = vpop.f32.mrb[13].mxu0  ;;  %v1400_v29 = vpop.eup %1399  ;;  %v1000_v30 = vmul.f32 %v1398_v23, %v968_v17  ;;  %v723_v33 = vadd.f32 %v1595_v52, %v722_v25 }
 0x102   : > { %1411 = vpow2.f32 %v916_v3  ;;  %v1362_v34 = vpop.f32.mrb[14].mxu1  ;;  %v1760_v35 = vadd.f32 %v1600_v53, %v550_v28  ;;  %v1328_v36 = vpop.f32.mrb[14].mxu0  ;;  %v998_v38 = vmul.f32 %v1400_v29, %v966_v19  ;;  %848 = vst.msk [vmem:[%s1606_s22 + $0x70] sm:$0xff] %vm801_vm2, %v731_v7  ;;  %v880_v39 = vmul.f32 0.5, %v731_v7  ;;  %816 = vst.msk [vmem:[%s1612_s25 + $0x70] sm:$0xff] %vm801_vm2, %v1755_v26 }
 0x103   : > { %v1402_v37 = vpop.eup %1401  ;;  %v734_v40 = vadd.f32 %v1362_v34, %v1595_v52  ;;  %v725_v41 = vpop.f32.mrb[15].mxu1  ;;  %v1769_v42 = vadd.f32 %v1328_v36, %v1600_v53  ;;  %v1032_v45 = vadd.f32 %v1000_v30, %v1652_v18  ;;  %846 = vst.msk [vmem:[%s1606_s22 + $0x60] sm:$0xff] %vm801_vm2, %v723_v33  ;;  %v878_v48 = vmul.f32 0.5, %v723_v33 }
 0x104   : > { %v553_v43 = vpop.f32.mrb[15].mxu0  ;;  %v1404_v44 = vpop.eup %1403  ;;  %v1001_v47 = vmul.f32 %v1402_v37, %v969_v24  ;;  %v726_v49 = vadd.f32 %v1595_v52, %v725_v41  ;;  %814 = vst.msk [vmem:[%s1612_s25 + $0x60] sm:$0xff] %vm801_vm2, %v1760_v35  ;;  %v1030_v50 = vadd.f32 %v998_v38, %v1656_v22  ;;  %v926_v51 = vmul.f32 1.442695, %v880_v39  ;;  %v976_v41 = vld [vmem:[%s1674_s29 + $0x70] sm:$0xff] }
 0x105   : > { %v999_v54 = vmul.f32 %v1404_v44, %v967_v32  ;;  %849 = vst.msk [vmem:[%s1606_s22 + $0x78] sm:$0xff] %vm801_vm2, %v734_v40  ;;  %v881_v56 = vmul.f32 0.5, %v734_v40  ;;  %817 = vst.msk [vmem:[%s1612_s25 + $0x78] sm:$0xff] %vm801_vm2, %v1769_v42  ;;  %v922_v57 = vmul.f32 1.442695, %v878_v48  ;;  %v1790_v59 = vadd.f32 %v1600_v53, %v553_v43  ;;  %v974_v43 = vld [vmem:[%s1674_s29 + $0x60] sm:$0xff] }
 0x106   : > { %1064 = vst.msk [vmem:[%s1708_s10 + $0x30] sm:$0xff] %vm801_vm2, %v1032_v45  ;;  %v1033_v18 = vadd.f32 %v1001_v47, %v1665_v27  ;;  %847 = vst.msk [vmem:[%s1606_s22 + $0x68] sm:$0xff] %vm801_vm2, %v726_v49  ;;  %v879_v22 = vmul.f32 0.5, %v726_v49  ;;  %1413 = vpow2.f32 %v926_v51  ;;  %v977_v48 = vld [vmem:[%s1674_s29 + $0x78] sm:$0xff] }
 0x107   : > { %1062 = vst.msk [vmem:[%s1708_s10 + $0x20] sm:$0xff] %vm801_vm2, %v1030_v50  ;;  %v1031_v60 = vadd.f32 %v999_v54, %v1680_v31  ;;  %v928_v61 = vmul.f32 1.442695, %v881_v56  ;;  %1415 = vpow2.f32 %v922_v57  ;;  %v1365_v2 = vpop.f32.mrb[16].mxu1  ;;  %815 = vst.msk [vmem:[%s1612_s25 + $0x68] sm:$0xff] %vm801_vm2, %v1790_v59  ;;  %v1331_v4 = vpop.f32.mrb[16].mxu0 }
 0x108   : > { %1065 = vst.msk [vmem:[%s1708_s10 + $0x38] sm:$0xff] %vm801_vm2, %v1033_v18  ;;  %v924_v27 = vmul.f32 1.442695, %v879_v22  ;;  %v1406_v5 = vpop.eup %1405  ;;  %v747_v31 = vadd.f32 %v1365_v2, %v1595_v52  ;;  %v738_v8 = vpop.f32.mrb[17].mxu1  ;;  %v1807_v9 = vadd.f32 %v1331_v4, %v1600_v53  ;;  %v975_v18 = vld [vmem:[%s1674_s29 + $0x68] sm:$0xff] }
 0x109   : > { %1063 = vst.msk [vmem:[%s1708_s10 + $0x28] sm:$0xff] %vm801_vm2, %v1031_v60  ;;  %1417 = vpow2.f32 %v928_v61  ;;  %v566_v10 = vpop.f32.mrb[17].mxu0  ;;  %v1408_v11 = vpop.eup %1407  ;;  %v1004_v12 = vmul.f32 %v1406_v5, %v972_v63  ;;  %v739_v13 = vadd.f32 %v1595_v52, %v738_v8 }
 0x10a   : > { %1419 = vpow2.f32 %v924_v27  ;;  %v1366_v62 = vpop.f32.mrb[18].mxu1  ;;  %v1812_v15 = vadd.f32 %v1600_v53, %v566_v10  ;;  %v1332_v16 = vpop.f32.mrb[18].mxu0  ;;  %v1002_v3 = vmul.f32 %v1408_v11, %v970_v1  ;;  %852 = vst.msk [vmem:[%s1606_s22 + $0x90] sm:$0xff] %vm801_vm2, %v747_v31  ;;  %v884_v19 = vmul.f32 0.5, %v747_v31  ;;  %820 = vst.msk [vmem:[%s1612_s25 + $0x90] sm:$0xff] %vm801_vm2, %v1807_v9 }
 0x10b   : > { %v1410_v17 = vpop.eup %1409  ;;  %v750_v20 = vadd.f32 %v1366_v62, %v1595_v52  ;;  %v741_v21 = vpop.f32.mrb[19].mxu1  ;;  %v1821_v23 = vadd.f32 %v1332_v16, %v1600_v53  ;;  %v1036_v25 = vadd.f32 %v1004_v12, %v1697_v46  ;;  %850 = vst.msk [vmem:[%s1606_s22 + $0x80] sm:$0xff] %vm801_vm2, %v739_v13  ;;  %v882_v29 = vmul.f32 0.5, %v739_v13 }
 0x10c   : > { %v569_v24 = vpop.f32.mrb[19].mxu0  ;;  %v1412_v7 = vpop.eup %1411  ;;  %v1005_v28 = vmul.f32 %v1410_v17, %v973_v6  ;;  %v742_v30 = vadd.f32 %v1595_v52, %v741_v21  ;;  %818 = vst.msk [vmem:[%s1612_s25 + $0x80] sm:$0xff] %vm801_vm2, %v1812_v15  ;;  %v1034_v32 = vadd.f32 %v1002_v3, %v1702_v55  ;;  %v934_v33 = vmul.f32 1.442695, %v884_v19  ;;  %v980_v21 = vld [vmem:[%s1674_s29 + $0x90] sm:$0xff] }
 0x10d   : > { %v1003_v34 = vmul.f32 %v1412_v7, %v971_v58  ;;  %853 = vst.msk [vmem:[%s1606_s22 + $0x98] sm:$0xff] %vm801_vm2, %v750_v20  ;;  %v885_v36 = vmul.f32 0.5, %v750_v20  ;;  %821 = vst.msk [vmem:[%s1612_s25 + $0x98] sm:$0xff] %vm801_vm2, %v1821_v23  ;;  %v930_v37 = vmul.f32 1.442695, %v882_v29  ;;  %v1842_v38 = vadd.f32 %v1600_v53, %v569_v24  ;;  %v978_v24 = vld [vmem:[%s1674_s29 + $0x80] sm:$0xff] }
 0x10e   : > { %1068 = vst.msk [vmem:[%s1708_s10 + $0x50] sm:$0xff] %vm801_vm2, %v1036_v25  ;;  %v1037_v46 = vadd.f32 %v1005_v28, %v1717_v0  ;;  %851 = vst.msk [vmem:[%s1606_s22 + $0x88] sm:$0xff] %vm801_vm2, %v742_v30  ;;  %v883_v55 = vmul.f32 0.5, %v742_v30  ;;  %1421 = vpow2.f32 %v934_v33  ;;  %v981_v29 = vld [vmem:[%s1674_s29 + $0x98] sm:$0xff] }
 0x10f   : > { %1066 = vst.msk [vmem:[%s1708_s10 + $0x40] sm:$0xff] %vm801_vm2, %v1034_v32  ;;  %v1035_v39 = vadd.f32 %v1003_v34, %v1738_v14  ;;  %v936_v40 = vmul.f32 1.442695, %v885_v36  ;;  %1423 = vpow2.f32 %v930_v37  ;;  %v1369_v44 = vpop.f32.mrb[20].mxu1  ;;  %819 = vst.msk [vmem:[%s1612_s25 + $0x88] sm:$0xff] %vm801_vm2, %v1842_v38  ;;  %v1335_v45 = vpop.f32.mrb[20].mxu0 }
 0x110   : > { %1069 = vst.msk [vmem:[%s1708_s10 + $0x58] sm:$0xff] %vm801_vm2, %v1037_v46  ;;  %v932_v0 = vmul.f32 1.442695, %v883_v55  ;;  %v1414_v47 = vpop.eup %1413  ;;  %v763_v14 = vadd.f32 %v1369_v44, %v1595_v52  ;;  %v754_v49 = vpop.f32.mrb[21].mxu1  ;;  %v1859_v50 = vadd.f32 %v1335_v45, %v1600_v53  ;;  %v979_v46 = vld [vmem:[%s1674_s29 + $0x88] sm:$0xff] }
 0x111   : > { %1067 = vst.msk [vmem:[%s1708_s10 + $0x48] sm:$0xff] %vm801_vm2, %v1035_v39  ;;  %1425 = vpow2.f32 %v936_v40  ;;  %v582_v51 = vpop.f32.mrb[21].mxu0  ;;  %v1416_v54 = vpop.eup %1415  ;;  %v1008_v56 = vmul.f32 %v1414_v47, %v976_v41  ;;  %v755_v57 = vadd.f32 %v1595_v52, %v754_v49 }
 0x112   : > { %1427 = vpow2.f32 %v932_v0  ;;  %v1370_v22 = vpop.f32.mrb[22].mxu1  ;;  %v1864_v60 = vadd.f32 %v1600_v53, %v582_v51  ;;  %v1336_v61 = vpop.f32.mrb[22].mxu0  ;;  %v1006_v27 = vmul.f32 %v1416_v54, %v974_v43  ;;  %856 = vst.msk [vmem:[%s1606_s22 + $0xb0] sm:$0xff] %vm801_vm2, %v763_v14  ;;  %v888_v1 = vmul.f32 0.5, %v763_v14  ;;  %824 = vst.msk [vmem:[%s1612_s25 + $0xb0] sm:$0xff] %vm801_vm2, %v1859_v50 }
 0x113   : > { %v1418_v63 = vpop.eup %1417  ;;  %v766_v2 = vadd.f32 %v1370_v22, %v1595_v52  ;;  %v757_v4 = vpop.f32.mrb[23].mxu1  ;;  %v1873_v5 = vadd.f32 %v1336_v61, %v1600_v53  ;;  %v1040_v8 = vadd.f32 %v1008_v56, %v1755_v26  ;;  %854 = vst.msk [vmem:[%s1606_s22 + $0xa0] sm:$0xff] %vm801_vm2, %v755_v57  ;;  %v886_v11 = vmul.f32 0.5, %v755_v57 }
 0x114   : > { %v585_v6 = vpop.f32.mrb[23].mxu0  ;;  %v1420_v31 = vpop.eup %1419  ;;  %v1009_v10 = vmul.f32 %v1418_v63, %v977_v48  ;;  %v758_v12 = vadd.f32 %v1595_v52, %v757_v4  ;;  %822 = vst.msk [vmem:[%s1612_s25 + $0xa0] sm:$0xff] %vm801_vm2, %v1864_v60  ;;  %v1038_v58 = vadd.f32 %v1006_v27, %v1760_v35  ;;  %v942_v13 = vmul.f32 1.442695, %v888_v1  ;;  %v984_v4 = vld [vmem:[%s1674_s29 + $0xb0] sm:$0xff] }
 0x115   : > { %v1007_v62 = vmul.f32 %v1420_v31, %v975_v18  ;;  %857 = vst.msk [vmem:[%s1606_s22 + $0xb8] sm:$0xff] %vm801_vm2, %v766_v2  ;;  %v889_v16 = vmul.f32 0.5, %v766_v2  ;;  %825 = vst.msk [vmem:[%s1612_s25 + $0xb8] sm:$0xff] %vm801_vm2, %v1873_v5  ;;  %v938_v17 = vmul.f32 1.442695, %v886_v11  ;;  %v1894_v3 = vadd.f32 %v1600_v53, %v585_v6  ;;  %v982_v6 = vld [vmem:[%s1674_s29 + $0xa0] sm:$0xff] }
 0x116   : > { %1072 = vst.msk [vmem:[%s1708_s10 + $0x70] sm:$0xff] %vm801_vm2, %v1040_v8  ;;  %v1041_v26 = vadd.f32 %v1009_v10, %v1769_v42  ;;  %855 = vst.msk [vmem:[%s1606_s22 + $0xa8] sm:$0xff] %vm801_vm2, %v758_v12  ;;  %v887_v35 = vmul.f32 0.5, %v758_v12  ;;  %1429 = vpow2.f32 %v942_v13  ;;  %v985_v11 = vld [vmem:[%s1674_s29 + $0xb8] sm:$0xff] }
 0x117   : > { %1070 = vst.msk [vmem:[%s1708_s10 + $0x60] sm:$0xff] %vm801_vm2, %v1038_v58  ;;  %v1039_v19 = vadd.f32 %v1007_v62, %v1790_v59  ;;  %v944_v20 = vmul.f32 1.442695, %v889_v16  ;;  %1431 = vpow2.f32 %v938_v17  ;;  %v1373_v7 = vpop.f32.mrb[24].mxu1  ;;  %823 = vst.msk [vmem:[%s1612_s25 + $0xa8] sm:$0xff] %vm801_vm2, %v1894_v3  ;;  %v1339_v25 = vpop.f32.mrb[24].mxu0 }
 0x118   : > { %1073 = vst.msk [vmem:[%s1708_s10 + $0x78] sm:$0xff] %vm801_vm2, %v1041_v26  ;;  %v940_v42 = vmul.f32 1.442695, %v887_v35  ;;  %v1422_v28 = vpop.eup %1421  ;;  %v779_v59 = vadd.f32 %v1373_v7, %v1595_v52  ;;  %v770_v30 = vpop.f32.mrb[25].mxu1  ;;  %v1911_v32 = vadd.f32 %v1339_v25, %v1600_v53  ;;  %v983_v26 = vld [vmem:[%s1674_s29 + $0xa8] sm:$0xff] }
 0x119   : > { %1071 = vst.msk [vmem:[%s1708_s10 + $0x68] sm:$0xff] %vm801_vm2, %v1039_v19  ;;  %1433 = vpow2.f32 %v944_v20  ;;  %v598_v33 = vpop.f32.mrb[25].mxu0  ;;  %v1424_v34 = vpop.eup %1423  ;;  %v1012_v36 = vmul.f32 %v1422_v28, %v980_v21  ;;  %v771_v37 = vadd.f32 %v1595_v52, %v770_v30 }
 0x11a   : > { %1435 = vpow2.f32 %v940_v42  ;;  %v1374_v55 = vpop.f32.mrb[26].mxu1  ;;  %v1916_v39 = vadd.f32 %v1600_v53, %v598_v33  ;;  %v1340_v40 = vpop.f32.mrb[26].mxu0  ;;  %v1010_v0 = vmul.f32 %v1424_v34, %v978_v24  ;;  %860 = vst.msk [vmem:[%s1606_s22 + $0xd0] sm:$0xff] %vm801_vm2, %v779_v59  ;;  %v892_v43 = vmul.f32 0.5, %v779_v59  ;;  %828 = vst.msk [vmem:[%s1612_s25 + $0xd0] sm:$0xff] %vm801_vm2, %v1911_v32 }
 0x11b   : > { %v1426_v41 = vpop.eup %1425  ;;  %v782_v44 = vadd.f32 %v1374_v55, %v1595_v52  ;;  %v773_v45 = vpop.f32.mrb[27].mxu1  ;;  %v1925_v47 = vadd.f32 %v1340_v40, %v1600_v53  ;;  %v1044_v49 = vadd.f32 %v1012_v36, %v1807_v9  ;;  %858 = vst.msk [vmem:[%s1606_s22 + $0xc0] sm:$0xff] %vm801_vm2, %v771_v37  ;;  %v890_v54 = vmul.f32 0.5, %v771_v37 }
 0x11c   : > { %v601_v48 = vpop.f32.mrb[27].mxu0  ;;  %v1428_v14 = vpop.eup %1427  ;;  %v1013_v51 = vmul.f32 %v1426_v41, %v981_v29  ;;  %v774_v56 = vadd.f32 %v1595_v52, %v773_v45  ;;  %826 = vst.msk [vmem:[%s1612_s25 + $0xc0] sm:$0xff] %vm801_vm2, %v1916_v39  ;;  %v1042_v18 = vadd.f32 %v1010_v0, %v1812_v15  ;;  %v950_v57 = vmul.f32 1.442695, %v892_v43  ;;  %v986_v45 = vld [vmem:[%s1674_s29 + $0xc0] sm:$0xff] }
 0x11d   : > { %v1011_v22 = vmul.f32 %v1428_v14, %v979_v46  ;;  %861 = vst.msk [vmem:[%s1606_s22 + $0xd8] sm:$0xff] %vm801_vm2, %v782_v44  ;;  %v893_v61 = vmul.f32 0.5, %v782_v44  ;;  %829 = vst.msk [vmem:[%s1612_s25 + $0xd8] sm:$0xff] %vm801_vm2, %v1925_v47  ;;  %v946_v63 = vmul.f32 1.442695, %v890_v54  ;;  %v1946_v27 = vadd.f32 %v1600_v53, %v601_v48  ;;  %v988_v44 = vld [vmem:[%s1674_s29 + $0xd0] sm:$0xff] }
 0x11e   : > { %1076 = vst.msk [vmem:[%s1708_s10 + $0x90] sm:$0xff] %vm801_vm2, %v1044_v49  ;;  %v1045_v9 = vadd.f32 %v1013_v51, %v1821_v23  ;;  %859 = vst.msk [vmem:[%s1606_s22 + $0xc8] sm:$0xff] %vm801_vm2, %v774_v56  ;;  %v891_v15 = vmul.f32 0.5, %v774_v56  ;;  %1437 = vpow2.f32 %v950_v57  ;;  %v987_v49 = vld [vmem:[%s1674_s29 + $0xc8] sm:$0xff] }
 0x11f   : > { %1074 = vst.msk [vmem:[%s1708_s10 + $0x80] sm:$0xff] %vm801_vm2, %v1042_v18  ;;  %v1043_v1 = vadd.f32 %v1011_v22, %v1842_v38  ;;  %v952_v2 = vmul.f32 1.442695, %v893_v61  ;;  %1439 = vpow2.f32 %v946_v63  ;;  %v1377_v31 = vpop.f32.mrb[28].mxu1  ;;  %827 = vst.msk [vmem:[%s1612_s25 + $0xc8] sm:$0xff] %vm801_vm2, %v1946_v27  ;;  %v1343_v8 = vpop.f32.mrb[28].mxu0 }
 0x120   : > { %1077 = vst.msk [vmem:[%s1708_s10 + $0x98] sm:$0xff] %vm801_vm2, %v1045_v9  ;;  %v948_v23 = vmul.f32 1.442695, %v891_v15  ;;  %v1430_v10 = vpop.eup %1429  ;;  %v795_v38 = vadd.f32 %v1377_v31, %v1595_v52  ;;  %v786_v12 = vpop.f32.mrb[29].mxu1  ;;  %v1963_v58 = vadd.f32 %v1343_v8, %v1600_v53  ;;  %v992_v15 = vld [vmem:[%s1674_s29 + $0xf0] sm:$0xff] }
 0x121   : > { %1075 = vst.msk [vmem:[%s1708_s10 + $0x88] sm:$0xff] %vm801_vm2, %v1043_v1  ;;  %1441 = vpow2.f32 %v952_v2  ;;  %v614_v13 = vpop.f32.mrb[29].mxu0  ;;  %v1432_v62 = vpop.eup %1431  ;;  %v1016_v16 = vmul.f32 %v1430_v10, %v984_v4  ;;  %v787_v17 = vadd.f32 %v1595_v52, %v786_v12  ;;  %v990_v1 = vld [vmem:[%s1674_s29 + $0xe0] sm:$0xff] }
 0x122   : > { %1443 = vpow2.f32 %v948_v23  ;;  %v1378_v35 = vpop.f32.mrb[30].mxu1  ;;  %v1968_v19 = vadd.f32 %v1600_v53, %v614_v13  ;;  %v1344_v20 = vpop.f32.mrb[30].mxu0  ;;  %v1014_v42 = vmul.f32 %v1432_v62, %v982_v6  ;;  %864 = vst.msk [vmem:[%s1606_s22 + $0xf0] sm:$0xff] %vm801_vm2, %v795_v38  ;;  %v896_v24 = vmul.f32 0.5, %v795_v38  ;;  %832 = vst.msk [vmem:[%s1612_s25 + $0xf0] sm:$0xff] %vm801_vm2, %v1963_v58  ;;  %v991_v23 = vld [vmem:[%s1674_s29 + $0xe8] sm:$0xff] }
 0x123   : > { %v1434_v21 = vpop.eup %1433  ;;  %v798_v7 = vadd.f32 %v1378_v35, %v1595_v52  ;;  %v789_v25 = vpop.f32.mrb[31].mxu1  ;;  %v1977_v28 = vadd.f32 %v1344_v20, %v1600_v53  ;;  %v1048_v30 = vadd.f32 %v1016_v16, %v1859_v50  ;;  %862 = vst.msk [vmem:[%s1606_s22 + $0xe0] sm:$0xff] %vm801_vm2, %v787_v17  ;;  %v894_v34 = vmul.f32 0.5, %v787_v17 }
 0x124   : > { %v617_v29 = vpop.f32.mrb[31].mxu0  ;;  %v1436_v59 = vpop.eup %1435  ;;  %v1017_v33 = vmul.f32 %v1434_v21, %v985_v11  ;;  %v790_v36 = vadd.f32 %v1595_v52, %v789_v25  ;;  %830 = vst.msk [vmem:[%s1612_s25 + $0xe0] sm:$0xff] %vm801_vm2, %v1968_v19  ;;  %v1046_v46 = vadd.f32 %v1014_v42, %v1864_v60  ;;  %v958_v37 = vmul.f32 1.442695, %v896_v24 }
 0x125   : > { %v1015_v55 = vmul.f32 %v1436_v59, %v983_v26  ;;  %865 = vst.msk [vmem:[%s1606_s22 + $0xf8] sm:$0xff] %vm801_vm2, %v798_v7  ;;  %v897_v40 = vmul.f32 0.5, %v798_v7  ;;  %833 = vst.msk [vmem:[%s1612_s25 + $0xf8] sm:$0xff] %vm801_vm2, %v1977_v28  ;;  %v954_v50 = vmul.f32 1.442695, %v894_v34  ;;  %v618_v41 = vadd.f32 %v1600_v53, %v617_v29  ;;  %v989_v53 = vld [vmem:[%s1674_s29 + $0xd8] sm:$0xff] }
 0x126   : > { %1080 = vst.msk [vmem:[%s1708_s10 + $0xb0] sm:$0xff] %vm801_vm2, %v1048_v30  ;;  %v1049_v52 = vadd.f32 %v1017_v33, %v1873_v5  ;;  %863 = vst.msk [vmem:[%s1606_s22 + $0xe8] sm:$0xff] %vm801_vm2, %v790_v36  ;;  %v895_v60 = vmul.f32 0.5, %v790_v36  ;;  %1445 = vpow2.f32 %v958_v37 }
 0x127   : > { %1078 = vst.msk [vmem:[%s1708_s10 + $0xa0] sm:$0xff] %vm801_vm2, %v1046_v46  ;;  %v1047_v0 = vadd.f32 %v1015_v55, %v1894_v3  ;;  %v960_v43 = vmul.f32 1.442695, %v897_v40  ;;  %1447 = vpow2.f32 %v954_v50  ;;  %831 = vst.msk [vmem:[%s1612_s25 + $0xe8] sm:$0xff] %vm801_vm2, %v618_v41 }
 0x128   : > { %1081 = vst.msk [vmem:[%s1708_s10 + $0xb8] sm:$0xff] %vm801_vm2, %v1049_v52  ;;  %v956_v5 = vmul.f32 1.442695, %v895_v60  ;;  %v1438_v48 = vpop.eup %1437 }
 0x129   : > { %1079 = vst.msk [vmem:[%s1708_s10 + $0xa8] sm:$0xff] %vm801_vm2, %v1047_v0  ;;  %1449 = vpow2.f32 %v960_v43  ;;  %v1440_v14 = vpop.eup %1439  ;;  %v1020_v3 = vmul.f32 %v1438_v48, %v988_v44 }
 0x12a   : > { %1451 = vpow2.f32 %v956_v5  ;;  %v1018_v54 = vmul.f32 %v1440_v14, %v986_v45 }
 0x12b   : > { %v1442_v51 = vpop.eup %1441  ;;  %v1052_v18 = vadd.f32 %v1020_v3, %v1911_v32 }
 0x12c   : > { %v1444_v56 = vpop.eup %1443  ;;  %v1021_v57 = vmul.f32 %v1442_v51, %v989_v53  ;;  %v1050_v22 = vadd.f32 %v1018_v54, %v1916_v39  ;;  %v993_v39 = vld [vmem:[%s1674_s29 + $0xf8] sm:$0xff] }
 0x12d   : > { %v1019_v61 = vmul.f32 %v1444_v56, %v987_v49  ;;  %1084 = vst.msk [vmem:[%s1708_s10 + $0xd0] sm:$0xff] %vm801_vm2, %v1052_v18 }
 0x12e   : > { %v1053_v9 = vadd.f32 %v1021_v57, %v1925_v47  ;;  %1082 = vst.msk [vmem:[%s1708_s10 + $0xc0] sm:$0xff] %vm801_vm2, %v1050_v22 }
 0x12f   : > { %v1051_v63 = vadd.f32 %v1019_v61, %v1946_v27 }
 0x130   : > { %1085 = vst.msk [vmem:[%s1708_s10 + $0xd8] sm:$0xff] %vm801_vm2, %v1053_v9  ;;  %v1446_v32 = vpop.eup %1445 }
 0x131   : > { %1083 = vst.msk [vmem:[%s1708_s10 + $0xc8] sm:$0xff] %vm801_vm2, %v1051_v63  ;;  %v1448_v2 = vpop.eup %1447  ;;  %v1024_v4 = vmul.f32 %v1446_v32, %v992_v15 }
 0x132   : > { %v1022_v6 = vmul.f32 %v1448_v2, %v990_v1 }
 0x133   : > { %v1450_v47 = vpop.eup %1449  ;;  %v1056_v27 = vadd.f32 %v1024_v4, %v1963_v58 }
 0x134   : > { %v1452_v31 = vpop.eup %1451  ;;  %v1025_v8 = vmul.f32 %v1450_v47, %v993_v39  ;;  %v1054_v10 = vadd.f32 %v1022_v6, %v1968_v19 }
 0x135   : > { %v1023_v11 = vmul.f32 %v1452_v31, %v991_v23  ;;  %1088 = vst.msk [vmem:[%s1708_s10 + $0xf0] sm:$0xff] %vm801_vm2, %v1056_v27 }
 0x136   : > { %v1057_v38 = vadd.f32 %v1025_v8, %v1977_v28  ;;  %1086 = vst.msk [vmem:[%s1708_s10 + $0xe0] sm:$0xff] %vm801_vm2, %v1054_v10 }
 0x137   : > { %v1055_v12 = vadd.f32 %v1023_v11, %v618_v41 }
 0x138   : > { %1089 = vst.msk [vmem:[%s1708_s10 + $0xf8] sm:$0xff] %vm801_vm2, %v1057_v38 }
 0x139   : > { %1087 = vst.msk [vmem:[%s1708_s10 + $0xe8] sm:$0xff] %vm801_vm2, %v1055_v12 }
 0x13a PF: > { %s19_s27 = sadd.s32 1, %s1459_s27  }
 0x13b   : > { %p16_p4 = scmp.ge.s32.totalorder %s19_s27, 4  }
 0x13d   :  { %18 = sbr.rel (!%p16_p4) target bundleno = 1 (0x1), region = 101 }

// kernel: _lambda_.33
= control target key start
LH: loop header
LB: loop body
LE: loop exit
PB: predicated region body
PF: predicated region fallthrough
CT: control target
= control target key end

     0   :  { %v575_v0 = vmov 0   ;;  %vm213_vm0 = vcmask 588800   ;;  %vm238_vm1 = vcmask 1043456   ;;  %vm360_vm2 = vcmask 24576   ;;  %s897_s1 = inlined_call_operand.vmem [shape: bf16[200,4], index: 1, kind: input, shape index: {}]   ;;  %s898_s0 = inlined_call_operand.vmem [shape: bf16[128,200], index: 0, kind: input, shape index: {}]   ;;  %s899_s4 = inlined_call_operand.vmem [shape: f32[1,4], index: 4, kind: output, shape index: {1}]   ;;  %s900_s5 = inlined_call_operand.vmem [shape: f32[1,4], index: 5, kind: output, shape index: {2}]   ;;  %s901_s2 = inlined_call_operand.vmem [shape: f32[1,4], index: 2, kind: input, shape index: {}]   ;;  %s902_s3 = inlined_call_operand.vmem [shape: f32[128,4], index: 3, kind: output, shape index: {0}]  }
   0x1   :  { %242 = vmatprep.subr.bf16.mxu0 %v575_v0  ;;  %v538_v1 = vld [vmem:[%s897_s1] sm:$0xff]   ;;  %510 = vmatprep.subr.bf16.mxu1 %v575_v0  ;;  %v539_v2 = vld [vmem:[%s897_s1 + $0x8] sm:$0xff]   ;;  %v540_v3 = vld [vmem:[%s897_s1 + $0x10] sm:$0xff]   ;;  %v576_v31 = vmov 0.0   ;;  %vm339_vm3 = vcmask 31744  }
   0x2   :  { %243 = vmatpush1.bf16.msra.mxu0 %v538_v1  ;;  %523 = vmatpush1.bf16.msra.mxu1 %v538_v1  ;;  %v541_v4 = vld [vmem:[%s897_s1 + $0x18] sm:$0xff]   ;;  %v553_v5 = vld [vmem:[%s898_s0 + $0x4] ss:$8 sps:$4 sm:$0xff]   ;;  %v544_v9 = vld [vmem:[%s897_s1 + $0x30] sm:$0xff]   ;;  %361 = vst.msk [vmem:[%s899_s4] sm:$0x1] %vm360_vm2, %v576_v31 }
   0x3   :  { %244 = vmatprep.subr.bf16.mxu0 %v575_v0  ;;  %511 = vmatprep.subr.bf16.mxu1 %v575_v0  ;;  %v542_v6 = vld [vmem:[%s897_s1 + $0x20] sm:$0xff]   ;;  %v543_v8 = vld [vmem:[%s897_s1 + $0x28] sm:$0xff]   ;;  %v545_v10 = vld [vmem:[%s897_s1 + $0x38] sm:$0xff]   ;;  %362 = vst.msk [vmem:[%s900_s5] sm:$0x1] %vm360_vm2, %v576_v31 }
   0x4   :  { %502 = vmatprep.mubr.msk.bf16.mxu0 %vm213_vm0, %v553_v5  ;;  %v559_v7 = vld [vmem:[%s898_s0 + $0x44] ss:$8 sps:$4 sm:$0xff]   ;;  %v548_v13 = vld [vmem:[%s897_s1 + $0x50] sm:$0xff]   ;;  %v549_v14 = vld [vmem:[%s897_s1 + $0x58] sm:$0xff]  }
   0x5   :  { %506 = vmatprep.mubr.msk.bf16.mxu1 %vm213_vm0, %v559_v7  ;;  %v546_v11 = vld [vmem:[%s897_s1 + $0x40] sm:$0xff]   ;;  %v547_v12 = vld [vmem:[%s897_s1 + $0x48] sm:$0xff]   ;;  %v554_v19 = vld [vmem:[%s898_s0 + $0x14] ss:$8 sps:$4 sm:$0xff]  }
   0x6   :  { %245 = vmatpush1.bf16.msra.mxu0 %v539_v2  ;;  %524 = vmatpush1.bf16.msra.mxu1 %v539_v2  ;;  %v550_v15 = vld [vmem:[%s897_s1 + $0x60] ss:$0 sps:$4 sm:$0xff]   ;;  %v563_v20 = vld [vmem:[%s898_s0 + $0x54] ss:$8 sps:$4 sm:$0xff]   ;;  %v556_v21 = vld [vmem:[%s898_s0 + $0x10] ss:$8 sps:$4 sm:$0xff]  }
   0x7   :  { %246 = vmatprep.subr.bf16.mxu0 %v575_v0  ;;  %512 = vmatprep.subr.bf16.mxu1 %v575_v0  ;;  %v240_v16 = vsel %vm238_vm1, %v550_v15, 0  ;;  %v551_v17 = vld [vmem:[%s898_s0] ss:$8 sps:$4 sm:$0xff]   ;;  %v565_v22 = vld [vmem:[%s898_s0 + $0x50] ss:$8 sps:$4 sm:$0xff]  }
   0x8   :  { %v557_v18 = vld [vmem:[%s898_s0 + $0x40] ss:$8 sps:$4 sm:$0xff]   ;;  %v560_v23 = vld [vmem:[%s898_s0 + $0x24] ss:$8 sps:$4 sm:$0xff]   ;;  %v566_v27 = vld [vmem:[%s898_s0 + $0x34] ss:$8 sps:$4 sm:$0xff]  }
   0x9   :  { %v569_v24 = vld [vmem:[%s898_s0 + $0x64] ss:$8 sps:$4 sm:$0xff]   ;;  %v562_v25 = vld [vmem:[%s898_s0 + $0x20] ss:$8 sps:$4 sm:$0xff]   ;;  %v572_v28 = vld [vmem:[%s898_s0 + $0x74] ss:$8 sps:$4 sm:$0xff]  }
   0xa   :  { %247 = vmatpush1.bf16.msra.mxu0 %v540_v3  ;;  %525 = vmatpush1.bf16.msra.mxu1 %v540_v3  ;;  %v571_v26 = vld [vmem:[%s898_s0 + $0x60] ss:$8 sps:$4 sm:$0xff]   ;;  %v568_v29 = vld [vmem:[%s898_s0 + $0x30] ss:$8 sps:$4 sm:$0xff]  }
   0xb   :  { %248 = vmatprep.subr.bf16.mxu0 %v575_v0  ;;  %513 = vmatprep.subr.bf16.mxu1 %v575_v0  ;;  %v574_v30 = vld [vmem:[%s898_s0 + $0x70] ss:$8 sps:$4 sm:$0xff]   ;;  %v739_v32 = vld [vmem:[%s901_s2] ss:$0 sm:$0xff] }
   0xe   :  { %249 = vmatpush1.bf16.msra.mxu0 %v541_v4  ;;  %526 = vmatpush1.bf16.msra.mxu1 %v541_v4 }
   0xf   :  { %250 = vmatprep.subr.bf16.mxu0 %v575_v0  ;;  %514 = vmatprep.subr.bf16.mxu1 %v575_v0 }
  0x12   :  { %251 = vmatpush1.bf16.msra.mxu0 %v542_v6  ;;  %527 = vmatpush1.bf16.msra.mxu1 %v542_v6 }
  0x13   :  { %252 = vmatprep.subr.bf16.mxu0 %v575_v0  ;;  %515 = vmatprep.subr.bf16.mxu1 %v575_v0 }
  0x16   :  { %253 = vmatpush1.bf16.msra.mxu0 %v543_v8  ;;  %528 = vmatpush1.bf16.msra.mxu1 %v543_v8 }
  0x17   :  { %254 = vmatprep.subr.bf16.mxu0 %v575_v0  ;;  %516 = vmatprep.subr.bf16.mxu1 %v575_v0 }
  0x1a   :  { %255 = vmatpush1.bf16.msra.mxu0 %v544_v9  ;;  %529 = vmatpush1.bf16.msra.mxu1 %v544_v9 }
  0x1b   :  { %256 = vmatprep.subr.bf16.mxu0 %v575_v0  ;;  %517 = vmatprep.subr.bf16.mxu1 %v575_v0 }
  0x1e   :  { %257 = vmatpush1.bf16.msra.mxu0 %v545_v10  ;;  %530 = vmatpush1.bf16.msra.mxu1 %v545_v10 }
  0x1f   :  { %258 = vmatprep.subr.bf16.mxu0 %v575_v0  ;;  %518 = vmatprep.subr.bf16.mxu1 %v575_v0 }
  0x22   :  { %259 = vmatpush1.bf16.msra.mxu0 %v546_v11  ;;  %531 = vmatpush1.bf16.msra.mxu1 %v546_v11 }
  0x23   :  { %260 = vmatprep.subr.bf16.mxu0 %v575_v0  ;;  %519 = vmatprep.subr.bf16.mxu1 %v575_v0 }
  0x26   :  { %261 = vmatpush1.bf16.msra.mxu0 %v547_v12  ;;  %532 = vmatpush1.bf16.msra.mxu1 %v547_v12 }
  0x27   :  { %262 = vmatprep.subr.bf16.mxu0 %v575_v0  ;;  %520 = vmatprep.subr.bf16.mxu1 %v575_v0 }
  0x2a   :  { %263 = vmatpush1.bf16.msra.mxu0 %v548_v13  ;;  %533 = vmatpush1.bf16.msra.mxu1 %v548_v13 }
  0x2b   :  { %264 = vmatprep.subr.bf16.mxu0 %v575_v0  ;;  %521 = vmatprep.subr.bf16.mxu1 %v575_v0 }
  0x2e   :  { %265 = vmatpush1.bf16.msra.mxu0 %v549_v14  ;;  %534 = vmatpush1.bf16.msra.mxu1 %v549_v14 }
  0x2f   :  { %266 = vmatprep.subr.bf16.mxu0 %v575_v0  ;;  %522 = vmatprep.subr.bf16.mxu1 %v575_v0 }
  0x32   :  { %267 = vmatpush1.bf16.msra.mxu0 %v240_v16  ;;  %535 = vmatpush1.bf16.msra.mxu1 %v240_v16 }
  0x35   :  { %275 = vmatmul.mubr.bf16.vlgmr.msra.gmra.mrb[0].mxu0 %v551_v17  ;;  %307 = vmatmul.mubr.bf16.vlgmr.msra.gmra.mrb[0].mxu1 %v557_v18 }
  0x36   :  { %503 = vmatprep.mubr.msk.bf16.mxu0 %vm213_vm0, %v554_v19  ;;  %507 = vmatprep.mubr.msk.bf16.mxu1 %vm213_vm0, %v563_v20 }
  0x3d   :  { %283 = vmatmul.mubr.bf16.gmra.mrb[4].mxu0 %v556_v21  ;;  %315 = vmatmul.mubr.bf16.gmra.mrb[4].mxu1 %v565_v22 }
  0x3e   :  { %504 = vmatprep.mubr.msk.bf16.mxu0 %vm213_vm0, %v560_v23  ;;  %508 = vmatprep.mubr.msk.bf16.mxu1 %vm213_vm0, %v569_v24 }
  0x45   :  { %291 = vmatmul.mubr.bf16.gmra.mrb[8].mxu0 %v562_v25  ;;  %323 = vmatmul.mubr.bf16.gmra.mrb[8].mxu1 %v571_v26 }
  0x46   :  { %505 = vmatprep.mubr.msk.bf16.mxu0 %vm213_vm0, %v566_v27  ;;  %509 = vmatprep.mubr.msk.bf16.mxu1 %vm213_vm0, %v572_v28 }
  0x4d   :  { %299 = vmatmul.mubr.bf16.gmra.mrb[12].mxu0 %v568_v29  ;;  %331 = vmatmul.mubr.bf16.gmra.mrb[12].mxu1 %v574_v30 }
 0x108   :  { %v276_v33 = vpop.f32.mrb[0].mxu0  ;;  %v308_v34 = vpop.f32.mrb[0].mxu1 }
 0x109   :  { %v277_v35 = vadd.f32 %v739_v32, %v276_v33  ;;  %v278_v36 = vpop.f32.mrb[1].mxu0  ;;  %v743_v37 = vadd.f32 %v739_v32, %v308_v34  ;;  %v310_v38 = vpop.f32.mrb[1].mxu1 }
 0x10a   :  { %v279_v39 = vpop.f32.mrb[2].mxu0  ;;  %v311_v40 = vpop.f32.mrb[2].mxu1 }
 0x10b   :  { %340 = vst.msk [vmem:[%s902_s3] sm:$0xff] %vm339_vm3, %v277_v35  ;;  %v405_v41 = vmul.f32 %v277_v35, %v277_v35  ;;  %v280_v42 = vadd.f32 %v739_v32, %v279_v39  ;;  %v281_v43 = vpop.f32.mrb[3].mxu0  ;;  %348 = vst.msk [vmem:[%s902_s3 + $0x40] sm:$0xff] %vm339_vm3, %v743_v37  ;;  %v313_v44 = vpop.f32.mrb[3].mxu1  ;;  %v756_v45 = vadd.f32 %v739_v32, %v311_v40  ;;  %v364_v46 = vsel %vm339_vm3, %v277_v35, 0.0 }
 0x10d   :  { %341 = vst.msk [vmem:[%s902_s3 + $0x8] sm:$0xff] %vm339_vm3, %v280_v42  ;;  %v365_v47 = vsel %vm339_vm3, %v280_v42, 0.0  ;;  %v406_v48 = vmul.f32 %v280_v42, %v280_v42  ;;  %349 = vst.msk [vmem:[%s902_s3 + $0x48] sm:$0xff] %vm339_vm3, %v756_v45  ;;  %v421_v50 = vsel %vm339_vm3, %v405_v41, 0.0 }
 0x10e   :  { %v366_v49 = vadd.f32 %v365_v47, %v364_v46 }
 0x10f   :  { %v422_v51 = vsel %vm339_vm3, %v406_v48, 0.0 }
 0x110   :  { %v423_v52 = vadd.f32 %v422_v51, %v421_v50  ;;  %v284_v53 = vpop.f32.mrb[4].mxu0  ;;  %v316_v54 = vpop.f32.mrb[4].mxu1  ;;  %v413_v51 = vmul.f32 %v743_v37, %v743_v37 }
 0x111   :  { %v285_v55 = vadd.f32 %v739_v32, %v284_v53  ;;  %v286_v56 = vpop.f32.mrb[5].mxu0  ;;  %v773_v57 = vadd.f32 %v739_v32, %v316_v54  ;;  %v318_v58 = vpop.f32.mrb[5].mxu1 }
 0x112   :  { %v287_v59 = vpop.f32.mrb[6].mxu0  ;;  %v319_v60 = vpop.f32.mrb[6].mxu1  ;;  %v414_v58 = vmul.f32 %v756_v45, %v756_v45 }
 0x113   :  { %342 = vst.msk [vmem:[%s902_s3 + $0x10] sm:$0xff] %vm339_vm3, %v285_v55  ;;  %v367_v61 = vsel %vm339_vm3, %v285_v55, 0.0  ;;  %v407_v62 = vmul.f32 %v285_v55, %v285_v55  ;;  %v288_v63 = vadd.f32 %v739_v32, %v287_v59  ;;  %v289_v0 = vpop.f32.mrb[7].mxu0  ;;  %350 = vst.msk [vmem:[%s902_s3 + $0x50] sm:$0xff] %vm339_vm3, %v773_v57  ;;  %v321_v1 = vpop.f32.mrb[7].mxu1  ;;  %v787_v3 = vadd.f32 %v739_v32, %v319_v60 }
 0x114   :  { %v368_v2 = vadd.f32 %v367_v61, %v366_v49  ;;  %v415_v0 = vmul.f32 %v773_v57, %v773_v57 }
 0x115   :  { %v424_v4 = vsel %vm339_vm3, %v407_v62, 0.0  ;;  %343 = vst.msk [vmem:[%s902_s3 + $0x18] sm:$0xff] %vm339_vm3, %v288_v63  ;;  %v369_v5 = vsel %vm339_vm3, %v288_v63, 0.0  ;;  %v408_v6 = vmul.f32 %v288_v63, %v288_v63  ;;  %351 = vst.msk [vmem:[%s902_s3 + $0x58] sm:$0xff] %vm339_vm3, %v787_v3  ;;  %v436_v62 = vsel %vm339_vm3, %v413_v51, 0.0 }
 0x116   :  { %v425_v7 = vadd.f32 %v424_v4, %v423_v52  ;;  %v370_v8 = vadd.f32 %v369_v5, %v368_v2  ;;  %v381_v63 = vsel %vm339_vm3, %v756_v45, 0.0  ;;  %v438_v4 = vsel %vm339_vm3, %v414_v58, 0.0 }
 0x117   :  { %v426_v9 = vsel %vm339_vm3, %v408_v6, 0.0  ;;  %v416_v5 = vmul.f32 %v787_v3, %v787_v3  ;;  %v385_v45 = vsel %vm339_vm3, %v787_v3, 0.0 }
 0x118   :  { %v427_v10 = vadd.f32 %v426_v9, %v425_v7  ;;  %v292_v11 = vpop.f32.mrb[8].mxu0  ;;  %v324_v12 = vpop.f32.mrb[8].mxu1 }
 0x119   :  { %v293_v13 = vadd.f32 %v739_v32, %v292_v11  ;;  %v294_v14 = vpop.f32.mrb[9].mxu0  ;;  %v803_v15 = vadd.f32 %v739_v32, %v324_v12  ;;  %v326_v16 = vpop.f32.mrb[9].mxu1  ;;  %v442_v12 = vsel %vm339_vm3, %v416_v5, 0.0 }
 0x11a   :  { %v295_v17 = vpop.f32.mrb[10].mxu0  ;;  %v327_v18 = vpop.f32.mrb[10].mxu1 }
 0x11b   :  { %344 = vst.msk [vmem:[%s902_s3 + $0x20] sm:$0xff] %vm339_vm3, %v293_v13  ;;  %v371_v19 = vsel %vm339_vm3, %v293_v13, 0.0  ;;  %v409_v20 = vmul.f32 %v293_v13, %v293_v13  ;;  %v296_v21 = vadd.f32 %v739_v32, %v295_v17  ;;  %v297_v22 = vpop.f32.mrb[11].mxu0  ;;  %352 = vst.msk [vmem:[%s902_s3 + $0x60] sm:$0xff] %vm339_vm3, %v803_v15  ;;  %v329_v23 = vpop.f32.mrb[11].mxu1  ;;  %v328_v25 = vadd.f32 %v739_v32, %v327_v18 }
 0x11c   :  { %v372_v24 = vadd.f32 %v371_v19, %v370_v8  ;;  %v440_v8 = vsel %vm339_vm3, %v415_v0, 0.0  ;;  %v417_v9 = vmul.f32 %v803_v15, %v803_v15 }
 0x11d   :  { %v428_v26 = vsel %vm339_vm3, %v409_v20, 0.0  ;;  %345 = vst.msk [vmem:[%s902_s3 + $0x28] sm:$0xff] %vm339_vm3, %v296_v21  ;;  %v373_v27 = vsel %vm339_vm3, %v296_v21, 0.0  ;;  %v410_v28 = vmul.f32 %v296_v21, %v296_v21  ;;  %353 = vst.msk [vmem:[%s902_s3 + $0x68] sm:$0xff] %vm339_vm3, %v328_v25  ;;  %v418_v13 = vmul.f32 %v328_v25, %v328_v25 }
 0x11e   :  { %v429_v29 = vadd.f32 %v428_v26, %v427_v10  ;;  %v374_v30 = vadd.f32 %v373_v27, %v372_v24  ;;  %v444_v18 = vsel %vm339_vm3, %v417_v9, 0.0  ;;  %v389_v19 = vsel %vm339_vm3, %v328_v25, 0.0 }
 0x11f   :  { %v430_v31 = vsel %vm339_vm3, %v410_v28, 0.0  ;;  %v446_v22 = vsel %vm339_vm3, %v418_v13, 0.0 }
 0x120   :  { %v431_v33 = vadd.f32 %v430_v31, %v429_v29  ;;  %v300_v34 = vpop.f32.mrb[12].mxu0  ;;  %v332_v35 = vpop.f32.mrb[12].mxu1 }
 0x121   :  { %v301_v36 = vadd.f32 %v739_v32, %v300_v34  ;;  %v302_v38 = vpop.f32.mrb[13].mxu0  ;;  %v333_v39 = vadd.f32 %v739_v32, %v332_v35  ;;  %v334_v40 = vpop.f32.mrb[13].mxu1 }
 0x122   :  { %v303_v41 = vpop.f32.mrb[14].mxu0  ;;  %v335_v42 = vpop.f32.mrb[14].mxu1 }
 0x123   :  { %346 = vst.msk [vmem:[%s902_s3 + $0x30] sm:$0xff] %vm339_vm3, %v301_v36  ;;  %v375_v43 = vsel %vm339_vm3, %v301_v36, 0.0  ;;  %v411_v44 = vmul.f32 %v301_v36, %v301_v36  ;;  %v304_v46 = vadd.f32 %v739_v32, %v303_v41  ;;  %v305_v47 = vpop.f32.mrb[15].mxu0  ;;  %354 = vst.msk [vmem:[%s902_s3 + $0x70] sm:$0xff] %vm339_vm3, %v333_v39  ;;  %v337_v48 = vpop.f32.mrb[15].mxu1  ;;  %v336_v50 = vadd.f32 %v739_v32, %v335_v42 }
 0x124   :  { %v376_v49 = vadd.f32 %v375_v43, %v374_v30  ;;  %v379_v32 = vsel %vm339_vm3, %v743_v37, 0.0  ;;  %v383_v37 = vsel %vm339_vm3, %v773_v57, 0.0  ;;  %v387_v57 = vsel %vm339_vm3, %v803_v15, 0.0  ;;  %v363_v42 = vld [vmem:[%s899_s4] sm:$0x1] }
 0x125   :  { %v432_v52 = vsel %vm339_vm3, %v411_v44, 0.0  ;;  %347 = vst.msk [vmem:[%s902_s3 + $0x38] sm:$0xff] %vm339_vm3, %v304_v46  ;;  %v377_v53 = vsel %vm339_vm3, %v304_v46, 0.0  ;;  %v412_v54 = vmul.f32 %v304_v46, %v304_v46  ;;  %355 = vst.msk [vmem:[%s902_s3 + $0x78] sm:$0xff] %vm339_vm3, %v336_v50  ;;  %v419_v14 = vmul.f32 %v333_v39, %v333_v39  ;;  %v404_v46 = vld [vmem:[%s900_s5] sm:$0x1] }
 0x126   :  { %v433_v55 = vadd.f32 %v432_v52, %v431_v33  ;;  %v378_v56 = vadd.f32 %v377_v53, %v376_v49  ;;  %v391_v3 = vsel %vm339_vm3, %v333_v39, 0.0  ;;  %v420_v24 = vmul.f32 %v336_v50, %v336_v50 }
 0x127   :  { %v434_v59 = vsel %vm339_vm3, %v412_v54, 0.0  ;;  %v448_v23 = vsel %vm339_vm3, %v419_v14, 0.0  ;;  %v393_v15 = vsel %vm339_vm3, %v336_v50, 0.0 }
 0x128   :  { %v380_v60 = vadd.f32 %v379_v32, %v378_v56  ;;  %v435_v61 = vadd.f32 %v434_v59, %v433_v55  ;;  %v450_v30 = vsel %vm339_vm3, %v420_v24, 0.0 }
 0x12a   :  { %v382_v1 = vadd.f32 %v381_v63, %v380_v60  ;;  %v437_v2 = vadd.f32 %v436_v62, %v435_v61 }
 0x12c   :  { %v439_v6 = vadd.f32 %v438_v4, %v437_v2  ;;  %v384_v7 = vadd.f32 %v383_v37, %v382_v1 }
 0x12e   :  { %v386_v10 = vadd.f32 %v385_v45, %v384_v7  ;;  %v441_v11 = vadd.f32 %v440_v8, %v439_v6 }
 0x130   :  { %v388_v16 = vadd.f32 %v387_v57, %v386_v10  ;;  %v443_v17 = vadd.f32 %v442_v12, %v441_v11 }
 0x132   :  { %v445_v20 = vadd.f32 %v444_v18, %v443_v17  ;;  %v390_v21 = vadd.f32 %v389_v19, %v388_v16 }
 0x134   :  { %v447_v26 = vadd.f32 %v446_v22, %v445_v20  ;;  %v392_v27 = vadd.f32 %v391_v3, %v390_v21 }
 0x136   :  { %v449_v28 = vadd.f32 %v448_v23, %v447_v26  ;;  %v394_v29 = vadd.f32 %v393_v15, %v392_v27 }
 0x138   :  { %v395_v31 = vrot.slane %v394_v29, 4  ;;  %v451_v33 = vadd.f32 %v450_v30, %v449_v28 }
 0x13a   :  { %v396_v25 = vadd.f32 %v395_v31, %v394_v29  ;;  %v452_v34 = vrot.slane %v451_v33, 4 }
 0x13c   :  { %v397_v35 = vrot.slane %v396_v25, 2  ;;  %v453_v36 = vadd.f32 %v452_v34, %v451_v33 }
 0x13e   :  { %v398_v38 = vadd.f32 %v397_v35, %v396_v25  ;;  %v454_v39 = vrot.slane %v453_v36, 2 }
 0x140   :  { %v399_v40 = vrot.slane %v398_v38, 1  ;;  %v455_v41 = vadd.f32 %v454_v39, %v453_v36 }
 0x142   :  { %v400_v43 = vadd.f32 %v399_v40, %v398_v38  ;;  %v456_v44 = vrot.slane %v455_v41, 1 }
 0x144   :  { %v401_v47 = vadd.f32 %v400_v43, %v363_v42  ;;  %v457_v48 = vadd.f32 %v456_v44, %v455_v41 }
 0x146   :  { %403 = vst.msk [vmem:[%s899_s4] sm:$0x1] %vm360_vm2, %v401_v47  ;;  %v458_v49 = vadd.f32 %v457_v48, %v404_v46 }
 0x148   :  { %459 = vst.msk [vmem:[%s900_s5] sm:$0x1] %vm360_vm2, %v458_v49 }

// kernel: _lambda_.35
= control target key start
LH: loop header
LB: loop body
LE: loop exit
PB: predicated region body
PF: predicated region fallthrough
CT: control target
= control target key end

     0   :  { %vm91_vm0 = vcmask 818176   ;;  %vm98_vm1 = vcmask 1041408   ;;  %vm160_vm2 = vcmask 57344   ;;  %v262_v10 = vmov 0.0   ;;  %s371_s1 = inlined_call_operand.vmem [shape: bf16[100,8], index: 1, kind: input, shape index: {}]   ;;  %s372_s0 = inlined_call_operand.vmem [shape: bf16[32,100], index: 0, kind: input, shape index: {}]   ;;  %s373_s4 = inlined_call_operand.vmem [shape: f32[1,8], index: 4, kind: output, shape index: {1}]   ;;  %s374_s5 = inlined_call_operand.vmem [shape: f32[1,8], index: 5, kind: output, shape index: {2}]   ;;  %s375_s2 = inlined_call_operand.vmem [shape: f32[1,8], index: 2, kind: input, shape index: {}]   ;;  %s376_s3 = inlined_call_operand.vmem [shape: f32[32,8], index: 3, kind: output, shape index: {0}]  }
   0x1   :  { %v253_v0 = vld [vmem:[%s371_s1] sm:$0xff]   ;;  %v254_v1 = vld [vmem:[%s371_s1 + $0x8] sm:$0xff]   ;;  %v255_v2 = vld [vmem:[%s371_s1 + $0x10] sm:$0xff]   ;;  %161 = vst.msk [vmem:[%s373_s4] sm:$0x1] %vm160_vm2, %v262_v10  ;;  %vm151_vm3 = vcmask 64512  }
   0x2   :  { %233 = vmatprep.subr.bf16.mxu0 %v253_v0  ;;  %v260_v3 = vld [vmem:[%s372_s0] sm:$0xff]   ;;  %v256_v4 = vld [vmem:[%s371_s1 + $0x18] sm:$0xff]   ;;  %v258_v6 = vld [vmem:[%s371_s1 + $0x28] sm:$0xff]   ;;  %162 = vst.msk [vmem:[%s374_s5] sm:$0x1] %vm160_vm2, %v262_v10 }
   0x3   :  { %234 = vmatpush3.bf16.msra.mxu0 %v253_v0  ;;  %247 = vmatprep.mubr.msk.bf16.mxu0 %vm91_vm0, %v260_v3  ;;  %v257_v5 = vld [vmem:[%s371_s1 + $0x20] sm:$0xff]   ;;  %v259_v7 = vld [vmem:[%s371_s1 + $0x30] ss:$0 sps:$4 sm:$0x33]   ;;  %v261_v9 = vld [vmem:[%s372_s0 + $0x8] sm:$0xff]  }
   0x4   :  { %235 = vmatprep.subr.bf16.mxu0 %v254_v1  ;;  %v100_v8 = vsel %vm98_vm1, %v259_v7, 0  ;;  %v212_v11 = vld [vmem:[%s375_s2] ss:$0 sm:$0xff] }
   0x7   :  { %236 = vmatpush3.bf16.msra.mxu0 %v254_v1 }
   0x8   :  { %237 = vmatprep.subr.bf16.mxu0 %v255_v2  ;;  %v163_v47 = vld [vmem:[%s373_s4] sm:$0x1] }
   0x9   :  { %v180_v50 = vld [vmem:[%s374_s5] sm:$0x1] }
   0xb   :  { %238 = vmatpush3.bf16.msra.mxu0 %v255_v2 }
   0xc   :  { %239 = vmatprep.subr.bf16.mxu0 %v256_v4 }
   0xf   :  { %240 = vmatpush3.bf16.msra.mxu0 %v256_v4 }
  0x10   :  { %241 = vmatprep.subr.bf16.mxu0 %v257_v5 }
  0x13   :  { %242 = vmatpush3.bf16.msra.mxu0 %v257_v5 }
  0x14   :  { %243 = vmatprep.subr.bf16.mxu0 %v258_v6 }
  0x17   :  { %244 = vmatpush3.bf16.msra.mxu0 %v258_v6 }
  0x18   :  { %251 = vmatprep.subr.msk.bf16.mxu0 %vm98_vm1, %v259_v7 }
  0x1b   :  { %246 = vmatpush3.bf16.msra.mxu0 %v100_v8 }
  0x1e   :  { %248 = vmatmul.mubr.msk.bf16.vlgmr.msra.gmra.mrb[0].mxu0 %vm91_vm0, %v261_v9 }
  0xf1   :  { %v249_v12 = vpop.f32.mrb[0].mxu0 }
  0xf2   :  { %v145_v13 = vadd.f32 %v249_v12, %v212_v11  ;;  %v136_v14 = vpop.f32.mrb[1].mxu0 }
  0xf3   :  { %v137_v15 = vadd.f32 %v212_v11, %v136_v14  ;;  %v250_v16 = vpop.f32.mrb[2].mxu0 }
  0xf4   :  { %154 = vst.msk [vmem:[%s376_s3 + $0x10] sm:$0xff] %vm151_vm3, %v145_v13  ;;  %v148_v17 = vadd.f32 %v250_v16, %v212_v11  ;;  %v139_v18 = vpop.f32.mrb[3].mxu0  ;;  %v183_v21 = vmul.f32 %v145_v13, %v145_v13  ;;  %v167_v26 = vsel %vm151_vm3, %v145_v13, 0.0 }
  0xf5   :  { %152 = vst.msk [vmem:[%s376_s3] sm:$0xff] %vm151_vm3, %v137_v15  ;;  %v181_v19 = vmul.f32 %v137_v15, %v137_v15  ;;  %v140_v20 = vadd.f32 %v212_v11, %v139_v18  ;;  %v164_v22 = vsel %vm151_vm3, %v137_v15, 0.0 }
  0xf6   :  { %155 = vst.msk [vmem:[%s376_s3 + $0x18] sm:$0xff] %vm151_vm3, %v148_v17  ;;  %v184_v28 = vmul.f32 %v148_v17, %v148_v17  ;;  %v188_v32 = vsel %vm151_vm3, %v183_v21, 0.0  ;;  %v169_v33 = vsel %vm151_vm3, %v148_v17, 0.0 }
  0xf7   :  { %153 = vst.msk [vmem:[%s376_s3 + $0x8] sm:$0xff] %vm151_vm3, %v140_v20  ;;  %v165_v23 = vsel %vm151_vm3, %v140_v20, 0.0  ;;  %v182_v24 = vmul.f32 %v140_v20, %v140_v20  ;;  %v185_v27 = vsel %vm151_vm3, %v181_v19, 0.0 }
  0xf8   :  { %v166_v25 = vadd.f32 %v165_v23, %v164_v22  ;;  %v190_v36 = vsel %vm151_vm3, %v184_v28, 0.0 }
  0xf9   :  { %v186_v29 = vsel %vm151_vm3, %v182_v24, 0.0 }
  0xfa   :  { %v168_v30 = vadd.f32 %v167_v26, %v166_v25  ;;  %v187_v31 = vadd.f32 %v186_v29, %v185_v27 }
  0xfc   :  { %v170_v34 = vadd.f32 %v169_v33, %v168_v30  ;;  %v189_v35 = vadd.f32 %v188_v32, %v187_v31 }
  0xfe   :  { %v171_v37 = vrot.slane %v170_v34, 4  ;;  %v191_v38 = vadd.f32 %v190_v36, %v189_v35 }
 0x100   :  { %v172_v39 = vadd.f32 %v171_v37, %v170_v34  ;;  %v192_v40 = vrot.slane %v191_v38, 4 }
 0x102   :  { %v173_v41 = vrot.slane %v172_v39, 2  ;;  %v193_v42 = vadd.f32 %v192_v40, %v191_v38 }
 0x104   :  { %v174_v43 = vadd.f32 %v173_v41, %v172_v39  ;;  %v194_v44 = vrot.slane %v193_v42, 2 }
 0x106   :  { %v175_v45 = vrot.slane %v174_v43, 1  ;;  %v195_v46 = vadd.f32 %v194_v44, %v193_v42 }
 0x108   :  { %v176_v48 = vadd.f32 %v175_v45, %v174_v43  ;;  %v196_v49 = vrot.slane %v195_v46, 1 }
 0x10a   :  { %v177_v51 = vadd.f32 %v176_v48, %v163_v47  ;;  %v197_v52 = vadd.f32 %v196_v49, %v195_v46 }
 0x10c   :  { %179 = vst.msk [vmem:[%s373_s4] sm:$0x1] %vm160_vm2, %v177_v51  ;;  %v198_v53 = vadd.f32 %v197_v52, %v180_v50 }
 0x10e   :  { %199 = vst.msk [vmem:[%s374_s5] sm:$0x1] %vm160_vm2, %v198_v53 }

// kernel: _lambda_.39
= control target key start
LH: loop header
LB: loop body
LE: loop exit
PB: predicated region body
PF: predicated region fallthrough
CT: control target
= control target key end

     0   :  { %s1102_s18 = smov 0   ;;  %s1561_s0 = inlined_call_operand.vmem [shape: bf16[512,100], index: 0, kind: input, shape index: {}]   ;;  %s1562_s1 = inlined_call_operand.vmem [shape: bf16[100,4], index: 1, kind: input, shape index: {}]   ;;  %s1563_s2 = inlined_call_operand.vmem [shape: f32[1,4], index: 2, kind: input, shape index: {}]   ;;  %s1564_s3 = inlined_call_operand.vmem [shape: f32[512,4], index: 3, kind: output, shape index: {0}]   ;;  %s1565_s4 = inlined_call_operand.vmem [shape: f32[1,4], index: 4, kind: output, shape index: {1}]   ;;  %s1566_s5 = inlined_call_operand.vmem [shape: f32[1,4], index: 5, kind: output, shape index: {2}]  }
   0x1 LB: > { %s894_s19 = sadd.s32 4294967295, %s1069_s18   ;;  %p898_p0 = scmp.ge.s32.totalorder %s1069_s18, 1  ;;  %s1069_s18 = sphi %s1102_s18, %s16_s18  }
   0x2   : > { %p183_p1 = scmp.lt.s32.totalorder %s1069_s18, 3 }
   0x4   : > { %p184_p2 = pnand %p898_p0, %p183_p1 }
   0x5   : > { %v1040_v0 = vld [vmem:[%s1562_s1] sm:$0xff] (!%p184_p2)   ;;  %v1041_v1 = vld [vmem:[%s1562_s1 + $0x8] sm:$0xff] (!%p184_p2)   ;;  %s899_s24 = sshll.u32 (!%p184_p2), %s894_s19, 5  ;;  %v1042_v2 = vld [vmem:[%s1562_s1 + $0x10] sm:$0xff] (!%p184_p2)   ;;  %vm395_vm0 = vcmask (!%p184_p2), 818176   ;;  %vm444_vm1 = vcmask (!%p184_p2), 1041408  }
   0x6   : > { %187 = sbr.rel (%p184_p2) target bundleno = 359 (0x167), region = 32  ;;  %969 = vmatprep.subr.bf16.mxu0 (!%p184_p2), %v1040_v0  ;;  %1015 = vmatprep.subr.bf16.mxu1 (!%p184_p2), %v1040_v0  ;;  %p212_p3 = scmp.lt.s32.totalorder (!%p184_p2), %s899_s24, 63  ;;  %v1043_v3 = vld [vmem:[%s1562_s1 + $0x18] sm:$0xff] (!%p184_p2)   ;;  %v1044_v6 = vld [vmem:[%s1562_s1 + $0x20] sm:$0xff] (!%p184_p2)   ;;  %v1045_v7 = vld [vmem:[%s1562_s1 + $0x28] sm:$0xff] (!%p184_p2)   ;;  %vm609_vm2 = vcmask (!%p184_p2), 31744  }
   0x7   : > { %970 = vmatpush3.bf16.msra.mxu0 (!%p184_p2), %v1040_v0  ;;  %1022 = vmatpush3.bf16.msra.mxu1 (!%p184_p2), %v1040_v0  ;;  %v1046_v8 = vld [vmem:[%s1562_s1 + $0x30] ss:$0 sps:$4 sm:$0x33] (!%p184_p2)   ;;  %v1177_v24 = vld [vmem:[%s1563_s2] ss:$0 sm:$0xff] (!%p184_p2)  ;;  %p943_p4 = scmp.ne.s32.totalorder (!%p184_p2), %s894_s19, 0 }
   0x8   : > { %971 = vmatprep.subr.bf16.mxu0 (!%p184_p2), %v1041_v1  ;;  %1016 = vmatprep.subr.bf16.mxu1 (!%p184_p2), %v1041_v1  ;;  %v446_v9 = vsel (!%p184_p2), %vm444_vm1, %v1046_v8, 0 }
   0xb   : > { %972 = vmatpush3.bf16.msra.mxu0 (!%p184_p2), %v1041_v1  ;;  %1023 = vmatpush3.bf16.msra.mxu1 (!%p184_p2), %v1041_v1 }
   0xc   : > { %973 = vmatprep.subr.bf16.mxu0 (!%p184_p2), %v1042_v2  ;;  %1017 = vmatprep.subr.bf16.mxu1 (!%p184_p2), %v1042_v2 }
   0xd   : > { %s1568_s24 = smov (!%p212_p3, %s899_s24), 63  ;;  %vm646_vm3 = vcmask (!%p943_p4), 24576  }
   0xe   : > { %s900_s27 = sshll.u32 %s1568_s24, 2  ;;  %s902_s14 = sshll.u32 %s1568_s24, 3 }
   0xf   : > { %s1130_s7 = scalar_lea.vmem %s1561_s0, %s900_s27  ;;  %974 = vmatpush3.bf16.msra.mxu0 %v1042_v2  ;;  %1024 = vmatpush3.bf16.msra.mxu1 %v1042_v2  ;;  %s1182_s21 = scalar_lea.vmem %s1564_s3, %s902_s14 }
  0x10   : > { %v1047_v4 = vld [vmem:[%s1130_s7] sm:$0xff]   ;;  %975 = vmatprep.subr.bf16.mxu0 %v1043_v3  ;;  %1018 = vmatprep.subr.bf16.mxu1 %v1043_v3  ;;  %v1049_v10 = vld [vmem:[%s1130_s7 + $0x8] sm:$0xff]   ;;  %v1051_v12 = vld [vmem:[%s1130_s7 + $0x10] sm:$0xff]  }
  0x11   : > { %v1048_v5 = vld [vmem:[%s1130_s7 + $0x40] sm:$0xff]   ;;  %983 = vmatprep.mubr.msk.bf16.mxu0 %vm395_vm0, %v1047_v4  ;;  %v1050_v11 = vld [vmem:[%s1130_s7 + $0x48] sm:$0xff]   ;;  %v1052_v13 = vld [vmem:[%s1130_s7 + $0x50] sm:$0xff]  }
  0x12   : > { %999 = vmatprep.mubr.msk.bf16.mxu1 %vm395_vm0, %v1048_v5  ;;  %v1053_v14 = vld [vmem:[%s1130_s7 + $0x18] sm:$0xff]   ;;  %v1055_v16 = vld [vmem:[%s1130_s7 + $0x20] sm:$0xff]   ;;  %v1057_v18 = vld [vmem:[%s1130_s7 + $0x28] sm:$0xff]  }
  0x13   : > { %976 = vmatpush3.bf16.msra.mxu0 %v1043_v3  ;;  %1025 = vmatpush3.bf16.msra.mxu1 %v1043_v3  ;;  %v1054_v15 = vld [vmem:[%s1130_s7 + $0x58] sm:$0xff]   ;;  %v1056_v17 = vld [vmem:[%s1130_s7 + $0x60] sm:$0xff]   ;;  %v1058_v19 = vld [vmem:[%s1130_s7 + $0x68] sm:$0xff]  }
  0x14   : > { %977 = vmatprep.subr.bf16.mxu0 %v1044_v6  ;;  %1019 = vmatprep.subr.bf16.mxu1 %v1044_v6  ;;  %v1059_v20 = vld [vmem:[%s1130_s7 + $0x30] sm:$0xff]   ;;  %v1061_v22 = vld [vmem:[%s1130_s7 + $0x38] sm:$0xff]  }
  0x15   : > { %v1060_v21 = vld [vmem:[%s1130_s7 + $0x70] sm:$0xff]   ;;  %v1062_v23 = vld [vmem:[%s1130_s7 + $0x78] sm:$0xff]  }
  0x17   : > { %978 = vmatpush3.bf16.msra.mxu0 %v1044_v6  ;;  %1026 = vmatpush3.bf16.msra.mxu1 %v1044_v6 }
  0x18   : > { %979 = vmatprep.subr.bf16.mxu0 %v1045_v7  ;;  %1020 = vmatprep.subr.bf16.mxu1 %v1045_v7 }
  0x1b   : > { %980 = vmatpush3.bf16.msra.mxu0 %v1045_v7  ;;  %1027 = vmatpush3.bf16.msra.mxu1 %v1045_v7 }
  0x1c   : > { %1029 = vmatprep.subr.msk.bf16.mxu0 %vm444_vm1, %v1046_v8  ;;  %1030 = vmatprep.subr.msk.bf16.mxu1 %vm444_vm1, %v1046_v8 }
  0x1f   : > { %982 = vmatpush3.bf16.msra.mxu0 %v446_v9  ;;  %1028 = vmatpush3.bf16.msra.mxu1 %v446_v9 }
  0x22   : > { %984 = vmatmul.mubr.msk.bf16.vlgmr.msra.gmra.mrb[0].mxu0 %vm395_vm0, %v1049_v10  ;;  %1000 = vmatmul.mubr.msk.bf16.vlgmr.msra.gmra.mrb[0].mxu1 %vm395_vm0, %v1050_v11 }
  0x23   : > { %987 = vmatprep.mubr.msk.bf16.mxu0 %vm395_vm0, %v1051_v12  ;;  %1003 = vmatprep.mubr.msk.bf16.mxu1 %vm395_vm0, %v1052_v13 }
  0x2a   : > { %988 = vmatmul.mubr.msk.bf16.gmra.mrb[4].mxu0 %vm395_vm0, %v1053_v14  ;;  %1004 = vmatmul.mubr.msk.bf16.gmra.mrb[4].mxu1 %vm395_vm0, %v1054_v15 }
  0x2b   : > { %991 = vmatprep.mubr.msk.bf16.mxu0 %vm395_vm0, %v1055_v16  ;;  %1007 = vmatprep.mubr.msk.bf16.mxu1 %vm395_vm0, %v1056_v17 }
  0x32   : > { %992 = vmatmul.mubr.msk.bf16.gmra.mrb[8].mxu0 %vm395_vm0, %v1057_v18  ;;  %1008 = vmatmul.mubr.msk.bf16.gmra.mrb[8].mxu1 %vm395_vm0, %v1058_v19 }
  0x33   : > { %995 = vmatprep.mubr.msk.bf16.mxu0 %vm395_vm0, %v1059_v20  ;;  %1011 = vmatprep.mubr.msk.bf16.mxu1 %vm395_vm0, %v1060_v21 }
  0x3a   : > { %996 = vmatmul.mubr.msk.bf16.gmra.mrb[12].mxu0 %vm395_vm0, %v1061_v22  ;;  %1012 = vmatmul.mubr.msk.bf16.gmra.mrb[12].mxu1 %vm395_vm0, %v1062_v23 }
  0xf5   : > { %v985_v25 = vpop.f32.mrb[0].mxu0  ;;  %v1001_v26 = vpop.f32.mrb[0].mxu1 }
  0xf6   : > { %v1185_v27 = vadd.f32 %v985_v25, %v1177_v24  ;;  %v1188_v28 = vadd.f32 %v1001_v26, %v1177_v24  ;;  %v482_v29 = vpop.f32.mrb[1].mxu0  ;;  %v546_v30 = vpop.f32.mrb[1].mxu1  ;;  %v1071_v26 = vmov (!%p943_p4), 0.0  }
  0xf7   : > { %v1191_v31 = vadd.f32 %v1177_v24, %v482_v29  ;;  %v1194_v32 = vadd.f32 %v1177_v24, %v546_v30  ;;  %v986_v33 = vpop.f32.mrb[2].mxu0  ;;  %v1002_v34 = vpop.f32.mrb[2].mxu1  ;;  %647 = vst.msk [vmem:[%s1565_s4] sm:$0x1] (!%p943_p4), %vm646_vm3, %v1071_v26  ;;  %648 = vst.msk [vmem:[%s1566_s5] sm:$0x1] (!%p943_p4), %vm646_vm3, %v1071_v26 }
  0xf8   : > { %612 = vst.msk [vmem:[%s1182_s21 + $0x10] sm:$0xff] %vm609_vm2, %v1185_v27  ;;  %628 = vst.msk [vmem:[%s1182_s21 + $0x90] sm:$0xff] %vm609_vm2, %v1188_v28  ;;  %v1203_v35 = vadd.f32 %v986_v33, %v1177_v24  ;;  %v1206_v36 = vadd.f32 %v1002_v34, %v1177_v24  ;;  %v485_v37 = vpop.f32.mrb[3].mxu0  ;;  %v549_v38 = vpop.f32.mrb[3].mxu1 }
  0xf9   : > { %610 = vst.msk [vmem:[%s1182_s21] sm:$0xff] %vm609_vm2, %v1191_v31  ;;  %626 = vst.msk [vmem:[%s1182_s21 + $0x80] sm:$0xff] %vm609_vm2, %v1194_v32  ;;  %v1215_v39 = vadd.f32 %v1177_v24, %v485_v37  ;;  %v1218_v40 = vadd.f32 %v1177_v24, %v549_v38 }
  0xfa   : > { %613 = vst.msk [vmem:[%s1182_s21 + $0x18] sm:$0xff] %vm609_vm2, %v1203_v35  ;;  %629 = vst.msk [vmem:[%s1182_s21 + $0x98] sm:$0xff] %vm609_vm2, %v1206_v36 }
  0xfb   : > { %611 = vst.msk [vmem:[%s1182_s21 + $0x8] sm:$0xff] %vm609_vm2, %v1215_v39  ;;  %627 = vst.msk [vmem:[%s1182_s21 + $0x88] sm:$0xff] %vm609_vm2, %v1218_v40 }
  0xfd   : > { %v989_v41 = vpop.f32.mrb[4].mxu0  ;;  %v1005_v42 = vpop.f32.mrb[4].mxu1 }
  0xfe   : > { %v1233_v43 = vadd.f32 %v989_v41, %v1177_v24  ;;  %v1236_v44 = vadd.f32 %v1005_v42, %v1177_v24  ;;  %v498_v45 = vpop.f32.mrb[5].mxu0  ;;  %v562_v46 = vpop.f32.mrb[5].mxu1 }
  0xff   : > { %v1239_v47 = vadd.f32 %v1177_v24, %v498_v45  ;;  %v1242_v48 = vadd.f32 %v1177_v24, %v562_v46  ;;  %v990_v49 = vpop.f32.mrb[6].mxu0  ;;  %v1006_v50 = vpop.f32.mrb[6].mxu1 }
 0x100   : > { %616 = vst.msk [vmem:[%s1182_s21 + $0x30] sm:$0xff] %vm609_vm2, %v1233_v43  ;;  %632 = vst.msk [vmem:[%s1182_s21 + $0xb0] sm:$0xff] %vm609_vm2, %v1236_v44  ;;  %v1251_v51 = vadd.f32 %v990_v49, %v1177_v24  ;;  %v1254_v52 = vadd.f32 %v1006_v50, %v1177_v24  ;;  %v501_v53 = vpop.f32.mrb[7].mxu0  ;;  %v565_v54 = vpop.f32.mrb[7].mxu1 }
 0x101   : > { %614 = vst.msk [vmem:[%s1182_s21 + $0x20] sm:$0xff] %vm609_vm2, %v1239_v47  ;;  %630 = vst.msk [vmem:[%s1182_s21 + $0xa0] sm:$0xff] %vm609_vm2, %v1242_v48  ;;  %v1263_v55 = vadd.f32 %v1177_v24, %v501_v53  ;;  %v1266_v56 = vadd.f32 %v1177_v24, %v565_v54 }
 0x102   : > { %617 = vst.msk [vmem:[%s1182_s21 + $0x38] sm:$0xff] %vm609_vm2, %v1251_v51  ;;  %633 = vst.msk [vmem:[%s1182_s21 + $0xb8] sm:$0xff] %vm609_vm2, %v1254_v52 }
 0x103   : > { %615 = vst.msk [vmem:[%s1182_s21 + $0x28] sm:$0xff] %vm609_vm2, %v1263_v55  ;;  %631 = vst.msk [vmem:[%s1182_s21 + $0xa8] sm:$0xff] %vm609_vm2, %v1266_v56 }
 0x105   : > { %v993_v57 = vpop.f32.mrb[8].mxu0  ;;  %v1009_v58 = vpop.f32.mrb[8].mxu1 }
 0x106   : > { %v1281_v59 = vadd.f32 %v993_v57, %v1177_v24  ;;  %v1284_v60 = vadd.f32 %v1009_v58, %v1177_v24  ;;  %v514_v61 = vpop.f32.mrb[9].mxu0  ;;  %v578_v62 = vpop.f32.mrb[9].mxu1 }
 0x107   : > { %v1287_v63 = vadd.f32 %v1177_v24, %v514_v61  ;;  %v1290_v0 = vadd.f32 %v1177_v24, %v578_v62  ;;  %v994_v1 = vpop.f32.mrb[10].mxu0  ;;  %v1010_v2 = vpop.f32.mrb[10].mxu1 }
 0x108   : > { %620 = vst.msk [vmem:[%s1182_s21 + $0x50] sm:$0xff] %vm609_vm2, %v1281_v59  ;;  %636 = vst.msk [vmem:[%s1182_s21 + $0xd0] sm:$0xff] %vm609_vm2, %v1284_v60  ;;  %v1299_v3 = vadd.f32 %v994_v1, %v1177_v24  ;;  %v1302_v4 = vadd.f32 %v1010_v2, %v1177_v24  ;;  %v517_v5 = vpop.f32.mrb[11].mxu0  ;;  %v581_v6 = vpop.f32.mrb[11].mxu1 }
 0x109   : > { %618 = vst.msk [vmem:[%s1182_s21 + $0x40] sm:$0xff] %vm609_vm2, %v1287_v63  ;;  %634 = vst.msk [vmem:[%s1182_s21 + $0xc0] sm:$0xff] %vm609_vm2, %v1290_v0  ;;  %v1311_v7 = vadd.f32 %v1177_v24, %v517_v5  ;;  %v1314_v8 = vadd.f32 %v1177_v24, %v581_v6 }
 0x10a   : > { %621 = vst.msk [vmem:[%s1182_s21 + $0x58] sm:$0xff] %vm609_vm2, %v1299_v3  ;;  %637 = vst.msk [vmem:[%s1182_s21 + $0xd8] sm:$0xff] %vm609_vm2, %v1302_v4 }
 0x10b   : > { %619 = vst.msk [vmem:[%s1182_s21 + $0x48] sm:$0xff] %vm609_vm2, %v1311_v7  ;;  %635 = vst.msk [vmem:[%s1182_s21 + $0xc8] sm:$0xff] %vm609_vm2, %v1314_v8 }
 0x10d   : > { %v997_v9 = vpop.f32.mrb[12].mxu0  ;;  %v1013_v10 = vpop.f32.mrb[12].mxu1  ;;  %645 = sbr.rel (%p943_p4) target bundleno = 276 (0x114), region = 36 }
 0x10e   : > { %v1329_v11 = vadd.f32 %v997_v9, %v1177_v24  ;;  %v1332_v12 = vadd.f32 %v1013_v10, %v1177_v24  ;;  %v530_v13 = vpop.f32.mrb[13].mxu0  ;;  %v594_v14 = vpop.f32.mrb[13].mxu1 }
 0x10f   : > { %v1335_v15 = vadd.f32 %v1177_v24, %v530_v13  ;;  %v1338_v16 = vadd.f32 %v1177_v24, %v594_v14  ;;  %v998_v17 = vpop.f32.mrb[14].mxu0  ;;  %v1014_v18 = vpop.f32.mrb[14].mxu1 }
 0x110   : > { %624 = vst.msk [vmem:[%s1182_s21 + $0x70] sm:$0xff] %vm609_vm2, %v1329_v11  ;;  %640 = vst.msk [vmem:[%s1182_s21 + $0xf0] sm:$0xff] %vm609_vm2, %v1332_v12  ;;  %v1347_v19 = vadd.f32 %v998_v17, %v1177_v24  ;;  %v1350_v20 = vadd.f32 %v1014_v18, %v1177_v24  ;;  %v533_v21 = vpop.f32.mrb[15].mxu0  ;;  %v597_v22 = vpop.f32.mrb[15].mxu1 }
 0x111   : > { %622 = vst.msk [vmem:[%s1182_s21 + $0x60] sm:$0xff] %vm609_vm2, %v1335_v15  ;;  %638 = vst.msk [vmem:[%s1182_s21 + $0xe0] sm:$0xff] %vm609_vm2, %v1338_v16  ;;  %v1359_v23 = vadd.f32 %v1177_v24, %v533_v21  ;;  %v1362_v25 = vadd.f32 %v1177_v24, %v597_v22 }
 0x112   : > { %625 = vst.msk [vmem:[%s1182_s21 + $0x78] sm:$0xff] %vm609_vm2, %v1347_v19  ;;  %641 = vst.msk [vmem:[%s1182_s21 + $0xf8] sm:$0xff] %vm609_vm2, %v1350_v20 }
 0x113   : > { %623 = vst.msk [vmem:[%s1182_s21 + $0x68] sm:$0xff] %vm609_vm2, %v1359_v23  ;;  %639 = vst.msk [vmem:[%s1182_s21 + $0xe8] sm:$0xff] %vm609_vm2, %v1362_v25 }
 0x114 PF: > { %v650_v24 = vsel %vm609_vm2, %v1191_v31, 0.0  ;;  %v651_v29 = vsel %vm609_vm2, %v1215_v39, 0.0  ;;  %v653_v30 = vsel %vm609_vm2, %v1185_v27, 0.0  ;;  %v655_v34 = vsel %vm609_vm2, %v1203_v35, 0.0 }
 0x115   : > { %v652_v33 = vadd.f32 %v651_v29, %v650_v24  ;;  %v657_v38 = vsel %vm609_vm2, %v1239_v47, 0.0  ;;  %v659_v42 = vsel %vm609_vm2, %v1263_v55, 0.0  ;;  %v661_v46 = vsel %vm609_vm2, %v1233_v43, 0.0 }
 0x116   : > { %v663_v50 = vsel %vm609_vm2, %v1251_v51, 0.0  ;;  %v665_v54 = vsel %vm609_vm2, %v1287_v63, 0.0  ;;  %v667_v58 = vsel %vm609_vm2, %v1311_v7, 0.0  ;;  %v723_v61 = vmul.f32 %v1191_v31, %v1191_v31 }
 0x117   : > { %v654_v37 = vadd.f32 %v653_v30, %v652_v33  ;;  %v724_v62 = vmul.f32 %v1215_v39, %v1215_v39  ;;  %v725_v2 = vmul.f32 %v1185_v27, %v1185_v27  ;;  %v669_v5 = vsel %vm609_vm2, %v1281_v59, 0.0 }
 0x118   : > { %v726_v6 = vmul.f32 %v1203_v35, %v1203_v35  ;;  %v671_v10 = vsel %vm609_vm2, %v1299_v3, 0.0  ;;  %v727_v31 = vmul.f32 %v1239_v47, %v1239_v47  ;;  %v755_v13 = vsel %vm609_vm2, %v723_v61, 0.0 }
 0x119   : > { %v656_v41 = vadd.f32 %v655_v34, %v654_v37  ;;  %v756_v39 = vsel %vm609_vm2, %v724_v62, 0.0  ;;  %v758_v27 = vsel %vm609_vm2, %v725_v2, 0.0  ;;  %v673_v18 = vsel %vm609_vm2, %v1335_v15, 0.0 }
 0x11a   : > { %v757_v17 = vadd.f32 %v756_v39, %v755_v13  ;;  %v728_v35 = vmul.f32 %v1263_v55, %v1263_v55  ;;  %v760_v21 = vsel %vm609_vm2, %v726_v6, 0.0  ;;  %v675_v47 = vsel %vm609_vm2, %v1359_v23, 0.0 }
 0x11b   : > { %v658_v45 = vadd.f32 %v657_v38, %v656_v41  ;;  %v729_v24 = vmul.f32 %v1233_v43, %v1233_v43  ;;  %v762_v29 = vsel %vm609_vm2, %v727_v31, 0.0  ;;  %v677_v34 = vsel %vm609_vm2, %v1329_v11, 0.0 }
 0x11c   : > { %v759_v26 = vadd.f32 %v758_v27, %v757_v17  ;;  %v730_v55 = vmul.f32 %v1251_v51, %v1251_v51  ;;  %v764_v37 = vsel %vm609_vm2, %v728_v35, 0.0  ;;  %v731_v43 = vmul.f32 %v1287_v63, %v1287_v63 }
 0x11d   : > { %v660_v49 = vadd.f32 %v659_v42, %v658_v45  ;;  %v679_v42 = vsel %vm609_vm2, %v1347_v19, 0.0  ;;  %v766_v45 = vsel %vm609_vm2, %v729_v24, 0.0  ;;  %v732_v51 = vmul.f32 %v1311_v7, %v1311_v7 }
 0x11e   : > { %v761_v33 = vadd.f32 %v760_v21, %v759_v26  ;;  %v733_v63 = vmul.f32 %v1281_v59, %v1281_v59  ;;  %v770_v61 = vsel %vm609_vm2, %v731_v43, 0.0  ;;  %v685_v2 = vsel %vm609_vm2, %v1188_v28, 0.0 }
 0x11f   : > { %v662_v53 = vadd.f32 %v661_v46, %v660_v49  ;;  %v734_v7 = vmul.f32 %v1299_v3, %v1299_v3  ;;  %v735_v59 = vmul.f32 %v1335_v15, %v1335_v15  ;;  %v736_v3 = vmul.f32 %v1359_v23, %v1359_v23 }
 0x120   : > { %v763_v41 = vadd.f32 %v762_v29, %v761_v33  ;;  %v774_v31 = vsel %vm609_vm2, %v733_v63, 0.0  ;;  %v691_v35 = vsel %vm609_vm2, %v1266_v56, 0.0  ;;  %v737_v15 = vmul.f32 %v1329_v11, %v1329_v11 }
 0x121   : > { %v664_v57 = vadd.f32 %v663_v50, %v662_v53  ;;  %v681_v50 = vsel %vm609_vm2, %v1194_v32, 0.0  ;;  %v768_v53 = vsel %vm609_vm2, %v730_v55, 0.0  ;;  %v776_v17 = vsel %vm609_vm2, %v734_v7, 0.0 }
 0x122   : > { %v765_v49 = vadd.f32 %v764_v37, %v763_v41  ;;  %v778_v21 = vsel %vm609_vm2, %v735_v59, 0.0  ;;  %v738_v23 = vmul.f32 %v1347_v19, %v1347_v19  ;;  %v780_v24 = vsel %vm609_vm2, %v736_v3, 0.0 }
 0x123   : > { %v666_v1 = vadd.f32 %v665_v54, %v664_v57  ;;  %v695_v33 = vsel %vm609_vm2, %v1254_v52, 0.0  ;;  %v739_v11 = vmul.f32 %v1194_v32, %v1194_v32  ;;  %v740_v19 = vmul.f32 %v1218_v40, %v1218_v40 }
 0x124   : > { %v767_v57 = vadd.f32 %v766_v45, %v765_v49  ;;  %v784_v41 = vsel %vm609_vm2, %v738_v23, 0.0  ;;  %v699_v45 = vsel %vm609_vm2, %v1314_v8, 0.0  ;;  %v741_v32 = vmul.f32 %v1188_v28, %v1188_v28 }
 0x125   : > { %v668_v9 = vadd.f32 %v667_v58, %v666_v1  ;;  %v683_v58 = vsel %vm609_vm2, %v1218_v40, 0.0  ;;  %v742_v40 = vmul.f32 %v1206_v36, %v1206_v36  ;;  %v743_v28 = vmul.f32 %v1242_v48, %v1242_v48 }
 0x126   : > { %v769_v1 = vadd.f32 %v768_v53, %v767_v57  ;;  %v788_v53 = vsel %vm609_vm2, %v740_v19, 0.0  ;;  %v790_v63 = vsel %vm609_vm2, %v741_v32, 0.0  ;;  %v711_v3 = vsel %vm609_vm2, %v1350_v20, 0.0 }
 0x127   : > { %v670_v14 = vadd.f32 %v669_v5, %v668_v9  ;;  %v772_v5 = vsel %vm609_vm2, %v732_v51, 0.0  ;;  %v701_v51 = vsel %vm609_vm2, %v1284_v60, 0.0  ;;  %vm720_vm4 = vcmask 24576  }
 0x128   : > { %v771_v9 = vadd.f32 %v770_v61, %v769_v1  ;;  %v705_v1 = vsel %vm609_vm2, %v1338_v16, 0.0 }
 0x129   : > { %v672_v22 = vadd.f32 %v671_v10, %v670_v14  ;;  %v687_v10 = vsel %vm609_vm2, %v1206_v36, 0.0  ;;  %v689_v14 = vsel %vm609_vm2, %v1242_v48, 0.0  ;;  %v744_v36 = vmul.f32 %v1266_v56, %v1266_v56 }
 0x12a   : > { %v773_v39 = vadd.f32 %v772_v5, %v771_v9  ;;  %v745_v48 = vmul.f32 %v1236_v44, %v1236_v44  ;;  %v794_v9 = vsel %vm609_vm2, %v743_v28, 0.0  ;;  %v746_v56 = vmul.f32 %v1254_v52, %v1254_v52  ;;  %v722_v28 = vld [vmem:[%s1566_s5] sm:$0x1] }
 0x12b   : > { %v674_v30 = vadd.f32 %v673_v18, %v672_v22 }
 0x12c   : > { %v775_v18 = vadd.f32 %v774_v31, %v773_v39  ;;  %v709_v31 = vsel %vm609_vm2, %v1332_v12, 0.0 }
 0x12d   : > { %v676_v38 = vadd.f32 %v675_v47, %v674_v30  ;;  %v693_v47 = vsel %vm609_vm2, %v1236_v44, 0.0  ;;  %v747_v44 = vmul.f32 %v1290_v0, %v1290_v0 }
 0x12e   : > { %v777_v26 = vadd.f32 %v776_v17, %v775_v18  ;;  %v798_v17 = vsel %vm609_vm2, %v745_v48, 0.0 }
 0x12f   : > { %v678_v46 = vadd.f32 %v677_v34, %v676_v38  ;;  %v782_v34 = vsel %vm609_vm2, %v737_v15, 0.0  ;;  %v697_v38 = vsel %vm609_vm2, %v1290_v0, 0.0  ;;  %v800_v15 = vsel %vm609_vm2, %v746_v56, 0.0 }
 0x130   : > { %v779_v30 = vadd.f32 %v778_v21, %v777_v26  ;;  %v802_v26 = vsel %vm609_vm2, %v747_v44, 0.0  ;;  %v750_v0 = vmul.f32 %v1302_v4, %v1302_v4 }
 0x131   : > { %v680_v54 = vadd.f32 %v679_v42, %v678_v46  ;;  %v786_v46 = vsel %vm609_vm2, %v739_v11, 0.0 }
 0x132   : > { %v781_v37 = vadd.f32 %v780_v24, %v779_v30 }
 0x133   : > { %v682_v62 = vadd.f32 %v681_v50, %v680_v54 }
 0x134   : > { %v783_v43 = vadd.f32 %v782_v34, %v781_v37 }
 0x135   : > { %v684_v6 = vadd.f32 %v683_v58, %v682_v62  ;;  %v703_v58 = vsel %vm609_vm2, %v1302_v4, 0.0  ;;  %v753_v4 = vmul.f32 %v1332_v12, %v1332_v12 }
 0x136   : > { %v785_v50 = vadd.f32 %v784_v41, %v783_v43  ;;  %v754_v43 = vmul.f32 %v1350_v20, %v1350_v20 }
 0x137   : > { %v686_v13 = vadd.f32 %v685_v2, %v684_v6  ;;  %v792_v2 = vsel %vm609_vm2, %v742_v40, 0.0  ;;  %v707_v6 = vsel %vm609_vm2, %v1362_v25, 0.0 }
 0x138   : > { %v787_v57 = vadd.f32 %v786_v46, %v785_v50  ;;  %v814_v46 = vsel %vm609_vm2, %v753_v4, 0.0  ;;  %v816_v50 = vsel %vm609_vm2, %v754_v43, 0.0 }
 0x139   : > { %v688_v27 = vadd.f32 %v687_v10, %v686_v13  ;;  %v796_v13 = vsel %vm609_vm2, %v744_v36, 0.0 }
 0x13a   : > { %v789_v62 = vadd.f32 %v788_v53, %v787_v57 }
 0x13b   : > { %v690_v22 = vadd.f32 %v689_v14, %v688_v27 }
 0x13c   : > { %v791_v5 = vadd.f32 %v790_v63, %v789_v62 }
 0x13d   : > { %v692_v29 = vadd.f32 %v691_v35, %v690_v22  ;;  %v748_v35 = vmul.f32 %v1314_v8, %v1314_v8  ;;  %v749_v22 = vmul.f32 %v1284_v60, %v1284_v60  ;;  %v751_v8 = vmul.f32 %v1338_v16, %v1338_v16  ;;  %v649_v16 = vld [vmem:[%s1565_s4] sm:$0x1] }
 0x13e   : > { %v793_v59 = vadd.f32 %v792_v2, %v791_v5  ;;  %v752_v60 = vmul.f32 %v1362_v25, %v1362_v25 }
 0x13f   : > { %v694_v55 = vadd.f32 %v693_v47, %v692_v29  ;;  %v804_v24 = vsel %vm609_vm2, %v748_v35, 0.0  ;;  %v810_v19 = vsel %vm609_vm2, %v751_v8, 0.0 }
 0x140   : > { %v795_v14 = vadd.f32 %v794_v9, %v793_v59  ;;  %v812_v25 = vsel %vm609_vm2, %v752_v60, 0.0 }
 0x141   : > { %v696_v42 = vadd.f32 %v695_v33, %v694_v55  ;;  %v806_v33 = vsel %vm609_vm2, %v749_v22, 0.0  ;;  %v808_v55 = vsel %vm609_vm2, %v750_v0, 0.0 }
 0x142   : > { %v797_v18 = vadd.f32 %v796_v13, %v795_v14 }
 0x143   : > { %v698_v49 = vadd.f32 %v697_v38, %v696_v42 }
 0x144   : > { %v799_v21 = vadd.f32 %v798_v17, %v797_v18 }
 0x145   : > { %v700_v54 = vadd.f32 %v699_v45, %v698_v49 }
 0x146   : > { %v801_v23 = vadd.f32 %v800_v15, %v799_v21 }
 0x147   : > { %v702_v61 = vadd.f32 %v701_v51, %v700_v54 }
 0x148   : > { %v803_v30 = vadd.f32 %v802_v26, %v801_v23 }
 0x149   : > { %v704_v7 = vadd.f32 %v703_v58, %v702_v61 }
 0x14a   : > { %v805_v34 = vadd.f32 %v804_v24, %v803_v30 }
 0x14b   : > { %v706_v10 = vadd.f32 %v705_v1, %v704_v7 }
 0x14c   : > { %v807_v38 = vadd.f32 %v806_v33, %v805_v34 }
 0x14d   : > { %v708_v39 = vadd.f32 %v707_v6, %v706_v10 }
 0x14e   : > { %v809_v42 = vadd.f32 %v808_v55, %v807_v38 }
 0x14f   : > { %v710_v27 = vadd.f32 %v709_v31, %v708_v39 }
 0x150   : > { %v811_v32 = vadd.f32 %v810_v19, %v809_v42 }
 0x151   : > { %v712_v52 = vadd.f32 %v711_v3, %v710_v27 }
 0x152   : > { %v813_v12 = vadd.f32 %v812_v25, %v811_v32 }
 0x153   : > { %v713_v47 = vrot.slane %v712_v52, 4 }
 0x154   : > { %v815_v51 = vadd.f32 %v814_v46, %v813_v12 }
 0x155   : > { %v714_v29 = vadd.f32 %v713_v47, %v712_v52 }
 0x156   : > { %v817_v40 = vadd.f32 %v816_v50, %v815_v51 }
 0x157   : > { %v715_v11 = vrot.slane %v714_v29, 2 }
 0x158   : > { %v818_v53 = vrot.slane %v817_v40, 4 }
 0x159   : > { %v716_v37 = vadd.f32 %v715_v11, %v714_v29 }
 0x15a   : > { %v819_v20 = vadd.f32 %v818_v53, %v817_v40 }
 0x15b   : > { %v717_v41 = vrot.slane %v716_v37, 1 }
 0x15c   : > { %v820_v54 = vrot.slane %v819_v20, 2 }
 0x15d   : > { %v718_v45 = vadd.f32 %v717_v41, %v716_v37 }
 0x15e   : > { %v821_v57 = vadd.f32 %v820_v54, %v819_v20 }
 0x15f   : > { %v719_v49 = vadd.f32 %v718_v45, %v649_v16 }
 0x160   : > { %v822_v58 = vrot.slane %v821_v57, 1 }
 0x161   : > { %721 = vst.msk [vmem:[%s1565_s4] sm:$0x1] %vm720_vm4, %v719_v49 }
 0x162   : > { %v823_v63 = vadd.f32 %v822_v58, %v821_v57 }
 0x164   : > { %v824_v61 = vadd.f32 %v823_v63, %v722_v28 }
 0x166   : > { %825 = vst.msk [vmem:[%s1566_s5] sm:$0x1] %vm720_vm4, %v824_v61 }
 0x167 PF: > { %s16_s18 = sadd.s32 1, %s1069_s18  }
 0x168   : > { %p13_p5 = scmp.ge.s32.totalorder %s16_s18, 4  }
 0x16a   :  { %15 = sbr.rel (!%p13_p5) target bundleno = 1 (0x1), region = 82 }

// kernel: _lambda_.41
= control target key start
LH: loop header
LB: loop body
LE: loop exit
PB: predicated region body
PF: predicated region fallthrough
CT: control target
= control target key end

     0   :  { %s658_s14 = smov 0   ;;  %s835_s0 = inlined_call_operand.vmem [shape: f32[512,8], index: 0, kind: input, shape index: {}]   ;;  %s836_s1 = inlined_call_operand.vmem [shape: bf16[8,1], index: 1, kind: input, shape index: {}]   ;;  %s837_s2 = inlined_call_operand.<no memory space> [shape: f32[1,1], index: 2, kind: input, shape index: {}]   ;;  %s838_s3 = inlined_call_operand.vmem [shape: f32[512,1], index: 3, kind: output, shape index: {}]  }
   0x1   :  { %v8_v0 = vstv %s837_s2 }
   0x2   :  { %9 = vst [vmem:[#allocation2] sm:$0x1] %v8_v0 }
   0x3 LB: > { %s536_s15 = sadd.s32 4294967295, %s633_s14   ;;  %p540_p0 = scmp.ge.s32.totalorder %s633_s14, 1  ;;  %s633_s14 = sphi %s658_s14, %s15_s14  }
   0x4   : > { %p140_p1 = scmp.lt.s32.totalorder %s633_s14, 3 }
   0x6   : > { %p141_p2 = pnand %p540_p0, %p140_p1 }
   0x7   : > { %v225_v1 = vld [vmem:[%s836_s1] sm:$0xf] (!%p141_p2)  ;;  %vm282_vm0 = vcmask (!%p141_p2), 1043456   ;;  %s541_s2 = sshll.u32 (!%p141_p2), %s536_s15, 5  ;;  %vm233_vm1 = vcmask (!%p141_p2), 64512   ;;  %vm447_vm2 = vcmask (!%p141_p2), 7168  }
   0x8   : > { %144 = sbr.rel (%p141_p2) target bundleno = 265 (0x109), region = 32  ;;  %617 = vmatprep.subr.msk.bf16.mxu0 (!%p141_p2), %vm282_vm0, %v225_v1  ;;  %618 = vmatprep.subr.msk.bf16.mxu1 (!%p141_p2), %vm282_vm0, %v225_v1  ;;  %v284_v2 = vsel (!%p141_p2), %vm282_vm0, %v225_v1, 0  ;;  %p165_p3 = scmp.lt.s32.totalorder (!%p141_p2), %s541_s2, 63 }
   0x9   : > { %582 = vmatpush3.bf16.msra.mxu0 (!%p141_p2), %v284_v2  ;;  %616 = vmatpush3.bf16.msra.mxu1 (!%p141_p2), %v284_v2  ;;  %v727_v51 = vld [vmem:[#allocation2] ss:$0 sm:$0xff] (!%p141_p2) }
   0xf   : > { %s840_s2 = smov (!%p165_p3, %s541_s2), 63 }
  0x10   : > { %s542_s18 = sshll.u32 %s840_s2, 3 }
  0x11   : > { %s677_s21 = scalar_lea.vmem %s835_s0, %s542_s18  ;;  %s734_s24 = scalar_lea.vmem %s838_s3, %s542_s18 }
  0x12   : > { %v177_v3 = vld [vmem:[%s677_s21] sm:$0xff]  ;;  %v178_v4 = vld [vmem:[%s677_s21 + $0x8] sm:$0xff]  ;;  %v179_v8 = vld [vmem:[%s677_s21 + $0x10] sm:$0xff] }
  0x13   : > { %v193_v5 = vld [vmem:[%s677_s21 + $0x80] sm:$0xff]  ;;  %v209_v6 = vpack.c.bf16 %v178_v4, %v177_v3  ;;  %v194_v7 = vld [vmem:[%s677_s21 + $0x88] sm:$0xff]  ;;  %v180_v9 = vld [vmem:[%s677_s21 + $0x18] sm:$0xff] }
  0x14   : > { %v217_v10 = vpack.c.bf16 %v194_v7, %v193_v5  ;;  %v210_v11 = vpack.c.bf16 %v180_v9, %v179_v8  ;;  %v195_v12 = vld [vmem:[%s677_s21 + $0x90] sm:$0xff]  ;;  %v196_v13 = vld [vmem:[%s677_s21 + $0x98] sm:$0xff]  ;;  %v181_v14 = vld [vmem:[%s677_s21 + $0x20] sm:$0xff] }
  0x15   : > { %583 = vmatprep.mubr.msk.bf16.mxu0 %vm233_vm1, %v209_v6  ;;  %v218_v15 = vpack.c.bf16 %v196_v13, %v195_v12  ;;  %v182_v16 = vld [vmem:[%s677_s21 + $0x28] sm:$0xff]  ;;  %v197_v17 = vld [vmem:[%s677_s21 + $0xa0] sm:$0xff]  ;;  %v183_v21 = vld [vmem:[%s677_s21 + $0x30] sm:$0xff] }
  0x16   : > { %v198_v18 = vld [vmem:[%s677_s21 + $0xa8] sm:$0xff]  ;;  %599 = vmatprep.mubr.msk.bf16.mxu1 %vm233_vm1, %v217_v10  ;;  %584 = vmatmul.mubr.msk.bf16.vlgmr.msra.gmra.mrb[0].mxu0 %vm233_vm1, %v210_v11  ;;  %v211_v19 = vpack.c.bf16 %v182_v16, %v181_v14  ;;  %v184_v22 = vld [vmem:[%s677_s21 + $0x38] sm:$0xff]  ;;  %v199_v23 = vld [vmem:[%s677_s21 + $0xb0] sm:$0xff] }
  0x17   : > { %v219_v20 = vpack.c.bf16 %v198_v18, %v197_v17  ;;  %600 = vmatmul.mubr.msk.bf16.vlgmr.msra.gmra.mrb[0].mxu1 %vm233_vm1, %v218_v15  ;;  %v200_v24 = vld [vmem:[%s677_s21 + $0xb8] sm:$0xff]  ;;  %v185_v25 = vld [vmem:[%s677_s21 + $0x40] sm:$0xff]  ;;  %v186_v26 = vld [vmem:[%s677_s21 + $0x48] sm:$0xff]  ;;  %v212_v29 = vpack.c.bf16 %v184_v22, %v183_v21 }
  0x18   : > { %587 = vmatprep.mubr.msk.bf16.mxu0 %vm233_vm1, %v211_v19  ;;  %v201_v27 = vld [vmem:[%s677_s21 + $0xc0] sm:$0xff]  ;;  %v202_v28 = vld [vmem:[%s677_s21 + $0xc8] sm:$0xff]  ;;  %v220_v30 = vpack.c.bf16 %v200_v24, %v199_v23  ;;  %v213_v31 = vpack.c.bf16 %v186_v26, %v185_v25  ;;  %v187_v33 = vld [vmem:[%s677_s21 + $0x50] sm:$0xff] }
  0x19   : > { %603 = vmatprep.mubr.msk.bf16.mxu1 %vm233_vm1, %v219_v20  ;;  %v221_v32 = vpack.c.bf16 %v202_v28, %v201_v27  ;;  %v188_v34 = vld [vmem:[%s677_s21 + $0x58] sm:$0xff]  ;;  %v203_v35 = vld [vmem:[%s677_s21 + $0xd0] sm:$0xff]  ;;  %v189_v37 = vld [vmem:[%s677_s21 + $0x60] sm:$0xff] }
  0x1a   : > { %v204_v36 = vld [vmem:[%s677_s21 + $0xd8] sm:$0xff]  ;;  %v190_v38 = vld [vmem:[%s677_s21 + $0x68] sm:$0xff]  ;;  %v205_v39 = vld [vmem:[%s677_s21 + $0xe0] sm:$0xff]  ;;  %v214_v41 = vpack.c.bf16 %v188_v34, %v187_v33 }
  0x1b   : > { %v206_v40 = vld [vmem:[%s677_s21 + $0xe8] sm:$0xff]  ;;  %v222_v42 = vpack.c.bf16 %v204_v36, %v203_v35  ;;  %v215_v43 = vpack.c.bf16 %v190_v38, %v189_v37  ;;  %v191_v45 = vld [vmem:[%s677_s21 + $0x70] sm:$0xff]  ;;  %v192_v46 = vld [vmem:[%s677_s21 + $0x78] sm:$0xff] }
  0x1c   : > { %v223_v44 = vpack.c.bf16 %v206_v40, %v205_v39  ;;  %v207_v47 = vld [vmem:[%s677_s21 + $0xf0] sm:$0xff]  ;;  %v208_v48 = vld [vmem:[%s677_s21 + $0xf8] sm:$0xff]  ;;  %v216_v49 = vpack.c.bf16 %v192_v46, %v191_v45 }
  0x1d   : > { %v224_v50 = vpack.c.bf16 %v208_v48, %v207_v47 }
  0x1e   : > { %588 = vmatmul.mubr.msk.bf16.gmra.mrb[4].mxu0 %vm233_vm1, %v212_v29 }
  0x1f   : > { %604 = vmatmul.mubr.msk.bf16.gmra.mrb[4].mxu1 %vm233_vm1, %v220_v30  ;;  %591 = vmatprep.mubr.msk.bf16.mxu0 %vm233_vm1, %v213_v31 }
  0x20   : > { %607 = vmatprep.mubr.msk.bf16.mxu1 %vm233_vm1, %v221_v32 }
  0x26   : > { %592 = vmatmul.mubr.msk.bf16.gmra.mrb[8].mxu0 %vm233_vm1, %v214_v41 }
  0x27   : > { %608 = vmatmul.mubr.msk.bf16.gmra.mrb[8].mxu1 %vm233_vm1, %v222_v42  ;;  %595 = vmatprep.mubr.msk.bf16.mxu0 %vm233_vm1, %v215_v43 }
  0x28   : > { %611 = vmatprep.mubr.msk.bf16.mxu1 %vm233_vm1, %v223_v44 }
  0x2e   : > { %596 = vmatmul.mubr.msk.bf16.gmra.mrb[12].mxu0 %vm233_vm1, %v216_v49 }
  0x2f   : > { %612 = vmatmul.mubr.msk.bf16.gmra.mrb[12].mxu1 %vm233_vm1, %v224_v50 }
  0xe9   : > { %v585_v52 = vpop.f32.mrb[0].mxu0 }
  0xea   : > { %v329_v53 = vadd.f32 %v585_v52, %v727_v51  ;;  %v601_v54 = vpop.f32.mrb[0].mxu1  ;;  %v320_v55 = vpop.f32.mrb[1].mxu0 }
  0xeb   : > { %v393_v56 = vadd.f32 %v601_v54, %v727_v51  ;;  %v321_v57 = vadd.f32 %v727_v51, %v320_v55  ;;  %v384_v58 = vpop.f32.mrb[1].mxu1  ;;  %v586_v59 = vpop.f32.mrb[2].mxu0 }
  0xec   : > { %450 = vst.msk [vmem:[%s734_s24 + $0x10] sm:$0xff] %vm447_vm2, %v329_v53  ;;  %v385_v60 = vadd.f32 %v727_v51, %v384_v58  ;;  %v332_v61 = vadd.f32 %v586_v59, %v727_v51  ;;  %v602_v62 = vpop.f32.mrb[2].mxu1  ;;  %v323_v63 = vpop.f32.mrb[3].mxu0 }
  0xed   : > { %466 = vst.msk [vmem:[%s734_s24 + $0x90] sm:$0xff] %vm447_vm2, %v393_v56  ;;  %448 = vst.msk [vmem:[%s734_s24] sm:$0xff] %vm447_vm2, %v321_v57  ;;  %v396_v0 = vadd.f32 %v602_v62, %v727_v51  ;;  %v324_v1 = vadd.f32 %v727_v51, %v323_v63  ;;  %v387_v2 = vpop.f32.mrb[3].mxu1 }
  0xee   : > { %464 = vst.msk [vmem:[%s734_s24 + $0x80] sm:$0xff] %vm447_vm2, %v385_v60  ;;  %451 = vst.msk [vmem:[%s734_s24 + $0x18] sm:$0xff] %vm447_vm2, %v332_v61  ;;  %v388_v3 = vadd.f32 %v727_v51, %v387_v2 }
  0xef   : > { %467 = vst.msk [vmem:[%s734_s24 + $0x98] sm:$0xff] %vm447_vm2, %v396_v0  ;;  %449 = vst.msk [vmem:[%s734_s24 + $0x8] sm:$0xff] %vm447_vm2, %v324_v1 }
  0xf0   : > { %465 = vst.msk [vmem:[%s734_s24 + $0x88] sm:$0xff] %vm447_vm2, %v388_v3 }
  0xf1   : > { %v589_v4 = vpop.f32.mrb[4].mxu0 }
  0xf2   : > { %v345_v5 = vadd.f32 %v589_v4, %v727_v51  ;;  %v605_v6 = vpop.f32.mrb[4].mxu1  ;;  %v336_v7 = vpop.f32.mrb[5].mxu0 }
  0xf3   : > { %v409_v8 = vadd.f32 %v605_v6, %v727_v51  ;;  %v337_v9 = vadd.f32 %v727_v51, %v336_v7  ;;  %v400_v10 = vpop.f32.mrb[5].mxu1  ;;  %v590_v11 = vpop.f32.mrb[6].mxu0 }
  0xf4   : > { %454 = vst.msk [vmem:[%s734_s24 + $0x30] sm:$0xff] %vm447_vm2, %v345_v5  ;;  %v401_v12 = vadd.f32 %v727_v51, %v400_v10  ;;  %v348_v13 = vadd.f32 %v590_v11, %v727_v51  ;;  %v606_v14 = vpop.f32.mrb[6].mxu1  ;;  %v339_v15 = vpop.f32.mrb[7].mxu0 }
  0xf5   : > { %470 = vst.msk [vmem:[%s734_s24 + $0xb0] sm:$0xff] %vm447_vm2, %v409_v8  ;;  %452 = vst.msk [vmem:[%s734_s24 + $0x20] sm:$0xff] %vm447_vm2, %v337_v9  ;;  %v412_v16 = vadd.f32 %v606_v14, %v727_v51  ;;  %v340_v17 = vadd.f32 %v727_v51, %v339_v15  ;;  %v403_v18 = vpop.f32.mrb[7].mxu1 }
  0xf6   : > { %468 = vst.msk [vmem:[%s734_s24 + $0xa0] sm:$0xff] %vm447_vm2, %v401_v12  ;;  %455 = vst.msk [vmem:[%s734_s24 + $0x38] sm:$0xff] %vm447_vm2, %v348_v13  ;;  %v404_v19 = vadd.f32 %v727_v51, %v403_v18 }
  0xf7   : > { %471 = vst.msk [vmem:[%s734_s24 + $0xb8] sm:$0xff] %vm447_vm2, %v412_v16  ;;  %453 = vst.msk [vmem:[%s734_s24 + $0x28] sm:$0xff] %vm447_vm2, %v340_v17 }
  0xf8   : > { %469 = vst.msk [vmem:[%s734_s24 + $0xa8] sm:$0xff] %vm447_vm2, %v404_v19 }
  0xf9   : > { %v593_v20 = vpop.f32.mrb[8].mxu0 }
  0xfa   : > { %v361_v21 = vadd.f32 %v593_v20, %v727_v51  ;;  %v609_v22 = vpop.f32.mrb[8].mxu1  ;;  %v352_v23 = vpop.f32.mrb[9].mxu0 }
  0xfb   : > { %v425_v24 = vadd.f32 %v609_v22, %v727_v51  ;;  %v353_v25 = vadd.f32 %v727_v51, %v352_v23  ;;  %v416_v26 = vpop.f32.mrb[9].mxu1  ;;  %v594_v27 = vpop.f32.mrb[10].mxu0 }
  0xfc   : > { %458 = vst.msk [vmem:[%s734_s24 + $0x50] sm:$0xff] %vm447_vm2, %v361_v21  ;;  %v417_v28 = vadd.f32 %v727_v51, %v416_v26  ;;  %v364_v29 = vadd.f32 %v594_v27, %v727_v51  ;;  %v610_v30 = vpop.f32.mrb[10].mxu1  ;;  %v355_v31 = vpop.f32.mrb[11].mxu0 }
  0xfd   : > { %474 = vst.msk [vmem:[%s734_s24 + $0xd0] sm:$0xff] %vm447_vm2, %v425_v24  ;;  %456 = vst.msk [vmem:[%s734_s24 + $0x40] sm:$0xff] %vm447_vm2, %v353_v25  ;;  %v428_v32 = vadd.f32 %v610_v30, %v727_v51  ;;  %v356_v33 = vadd.f32 %v727_v51, %v355_v31  ;;  %v419_v34 = vpop.f32.mrb[11].mxu1 }
  0xfe   : > { %472 = vst.msk [vmem:[%s734_s24 + $0xc0] sm:$0xff] %vm447_vm2, %v417_v28  ;;  %459 = vst.msk [vmem:[%s734_s24 + $0x58] sm:$0xff] %vm447_vm2, %v364_v29  ;;  %v420_v35 = vadd.f32 %v727_v51, %v419_v34 }
  0xff   : > { %475 = vst.msk [vmem:[%s734_s24 + $0xd8] sm:$0xff] %vm447_vm2, %v428_v32  ;;  %457 = vst.msk [vmem:[%s734_s24 + $0x48] sm:$0xff] %vm447_vm2, %v356_v33 }
 0x100   : > { %473 = vst.msk [vmem:[%s734_s24 + $0xc8] sm:$0xff] %vm447_vm2, %v420_v35 }
 0x101   : > { %v597_v36 = vpop.f32.mrb[12].mxu0 }
 0x102   : > { %v377_v37 = vadd.f32 %v597_v36, %v727_v51  ;;  %v613_v38 = vpop.f32.mrb[12].mxu1  ;;  %v368_v39 = vpop.f32.mrb[13].mxu0 }
 0x103   : > { %v441_v40 = vadd.f32 %v613_v38, %v727_v51  ;;  %v369_v41 = vadd.f32 %v727_v51, %v368_v39  ;;  %v432_v42 = vpop.f32.mrb[13].mxu1  ;;  %v598_v43 = vpop.f32.mrb[14].mxu0 }
 0x104   : > { %462 = vst.msk [vmem:[%s734_s24 + $0x70] sm:$0xff] %vm447_vm2, %v377_v37  ;;  %v433_v44 = vadd.f32 %v727_v51, %v432_v42  ;;  %v380_v45 = vadd.f32 %v598_v43, %v727_v51  ;;  %v614_v46 = vpop.f32.mrb[14].mxu1  ;;  %v371_v47 = vpop.f32.mrb[15].mxu0 }
 0x105   : > { %478 = vst.msk [vmem:[%s734_s24 + $0xf0] sm:$0xff] %vm447_vm2, %v441_v40  ;;  %460 = vst.msk [vmem:[%s734_s24 + $0x60] sm:$0xff] %vm447_vm2, %v369_v41  ;;  %v444_v48 = vadd.f32 %v614_v46, %v727_v51  ;;  %v372_v49 = vadd.f32 %v727_v51, %v371_v47  ;;  %v435_v50 = vpop.f32.mrb[15].mxu1 }
 0x106   : > { %476 = vst.msk [vmem:[%s734_s24 + $0xe0] sm:$0xff] %vm447_vm2, %v433_v44  ;;  %463 = vst.msk [vmem:[%s734_s24 + $0x78] sm:$0xff] %vm447_vm2, %v380_v45  ;;  %v436_v52 = vadd.f32 %v727_v51, %v435_v50 }
 0x107   : > { %479 = vst.msk [vmem:[%s734_s24 + $0xf8] sm:$0xff] %vm447_vm2, %v444_v48  ;;  %461 = vst.msk [vmem:[%s734_s24 + $0x68] sm:$0xff] %vm447_vm2, %v372_v49 }
 0x108   : > { %477 = vst.msk [vmem:[%s734_s24 + $0xe8] sm:$0xff] %vm447_vm2, %v436_v52 }
 0x109 PF: > { %s15_s14 = sadd.s32 1, %s633_s14  }
 0x10a   : > { %p12_p4 = scmp.ge.s32.totalorder %s15_s14, 4  }
 0x10c   :  { %14 = sbr.rel (!%p12_p4) target bundleno = 3 (0x3), region = 62 }

// kernel: _lambda_.30
= control target key start
LH: loop header
LB: loop body
LE: loop exit
PB: predicated region body
PF: predicated region fallthrough
CT: control target
= control target key end

     0   :  { %s911_s18 = smov 0   ;;  %s1371_s0 = inlined_call_operand.vmem [shape: f32[512,8], index: 0, kind: input, shape index: {}]   ;;  %s1372_s1 = inlined_call_operand.vmem [shape: bf16[8,64], index: 1, kind: input, shape index: {}]   ;;  %s1373_s2 = inlined_call_operand.vmem [shape: f32[1,64], index: 2, kind: input, shape index: {}]   ;;  %s1374_s3 = inlined_call_operand.vmem [shape: f32[512,64], index: 3, kind: output, shape index: {0}]   ;;  %s1375_s4 = inlined_call_operand.vmem [shape: f32[1,64], index: 4, kind: output, shape index: {1}]   ;;  %s1376_s5 = inlined_call_operand.vmem [shape: f32[1,64], index: 5, kind: output, shape index: {2}]  }
   0x1 LB: > { %s779_s19 = sadd.s32 4294967295, %s878_s18   ;;  %p783_p0 = scmp.ge.s32.totalorder %s878_s18, 1  ;;  %s878_s18 = sphi %s911_s18, %s16_s18  }
   0x2   : > { %p183_p1 = scmp.lt.s32.totalorder %s878_s18, 3 }
   0x4   : > { %p184_p2 = pnand %p783_p0, %p183_p1 }
   0x5   : > { %v272_v0 = vld [vmem:[%s1372_s1] sm:$0xf] (!%p184_p2)  ;;  %vm329_vm0 = vcmask (!%p184_p2), 1043456   ;;  %s784_s22 = sshll.u32 (!%p184_p2), %s779_s19, 5  ;;  %vm280_vm1 = vcmask (!%p184_p2), 64512   ;;  %vm494_vm2 = vcmask (!%p184_p2), 523264  }
   0x6   : > { %187 = sbr.rel (%p184_p2) target bundleno = 346 (0x15a), region = 32  ;;  %861 = vmatprep.subr.msk.bf16.mxu0 (!%p184_p2), %vm329_vm0, %v272_v0  ;;  %862 = vmatprep.subr.msk.bf16.mxu1 (!%p184_p2), %vm329_vm0, %v272_v0  ;;  %v331_v1 = vsel (!%p184_p2), %vm329_vm0, %v272_v0, 0  ;;  %p212_p3 = scmp.lt.s32.totalorder (!%p184_p2), %s784_s22, 63  ;;  %v985_v50 = vld [vmem:[%s1373_s2] ss:$0 sm:$0xff] (!%p184_p2) }
   0x7   : > { %826 = vmatpush3.bf16.msra.mxu0 (!%p184_p2), %v331_v1  ;;  %860 = vmatpush3.bf16.msra.mxu1 (!%p184_p2), %v331_v1  ;;  %p805_p4 = scmp.ne.s32.totalorder (!%p184_p2), %s779_s19, 0 }
   0xd   : > { %s1378_s22 = smov (!%p212_p3, %s784_s22), 63  ;;  %vm531_vm3 = vcmask (!%p805_p4), 516096  }
   0xe   : > { %s785_s23 = sshll.u32 %s1378_s22, 3 }
   0xf   : > { %s932_s26 = scalar_lea.vmem %s1371_s0, %s785_s23  ;;  %s992_s6 = scalar_lea.vmem %s1374_s3, %s785_s23 }
  0x10   : > { %v224_v2 = vld [vmem:[%s932_s26] sm:$0xff]  ;;  %v225_v3 = vld [vmem:[%s932_s26 + $0x8] sm:$0xff]  ;;  %v226_v7 = vld [vmem:[%s932_s26 + $0x10] sm:$0xff] }
  0x11   : > { %v240_v4 = vld [vmem:[%s932_s26 + $0x80] sm:$0xff]  ;;  %v256_v5 = vpack.c.bf16 %v225_v3, %v224_v2  ;;  %v241_v6 = vld [vmem:[%s932_s26 + $0x88] sm:$0xff]  ;;  %v227_v8 = vld [vmem:[%s932_s26 + $0x18] sm:$0xff] }
  0x12   : > { %v264_v9 = vpack.c.bf16 %v241_v6, %v240_v4  ;;  %v257_v10 = vpack.c.bf16 %v227_v8, %v226_v7  ;;  %v242_v11 = vld [vmem:[%s932_s26 + $0x90] sm:$0xff]  ;;  %v243_v12 = vld [vmem:[%s932_s26 + $0x98] sm:$0xff]  ;;  %v228_v13 = vld [vmem:[%s932_s26 + $0x20] sm:$0xff] }
  0x13   : > { %827 = vmatprep.mubr.msk.bf16.mxu0 %vm280_vm1, %v256_v5  ;;  %v265_v14 = vpack.c.bf16 %v243_v12, %v242_v11  ;;  %v229_v15 = vld [vmem:[%s932_s26 + $0x28] sm:$0xff]  ;;  %v244_v16 = vld [vmem:[%s932_s26 + $0xa0] sm:$0xff]  ;;  %v230_v20 = vld [vmem:[%s932_s26 + $0x30] sm:$0xff] }
  0x14   : > { %v245_v17 = vld [vmem:[%s932_s26 + $0xa8] sm:$0xff]  ;;  %843 = vmatprep.mubr.msk.bf16.mxu1 %vm280_vm1, %v264_v9  ;;  %828 = vmatmul.mubr.msk.bf16.vlgmr.msra.gmra.mrb[0].mxu0 %vm280_vm1, %v257_v10  ;;  %v258_v18 = vpack.c.bf16 %v229_v15, %v228_v13  ;;  %v231_v21 = vld [vmem:[%s932_s26 + $0x38] sm:$0xff]  ;;  %v246_v22 = vld [vmem:[%s932_s26 + $0xb0] sm:$0xff] }
  0x15   : > { %v266_v19 = vpack.c.bf16 %v245_v17, %v244_v16  ;;  %844 = vmatmul.mubr.msk.bf16.vlgmr.msra.gmra.mrb[0].mxu1 %vm280_vm1, %v265_v14  ;;  %v247_v23 = vld [vmem:[%s932_s26 + $0xb8] sm:$0xff]  ;;  %v232_v24 = vld [vmem:[%s932_s26 + $0x40] sm:$0xff]  ;;  %v233_v25 = vld [vmem:[%s932_s26 + $0x48] sm:$0xff]  ;;  %v259_v28 = vpack.c.bf16 %v231_v21, %v230_v20 }
  0x16   : > { %831 = vmatprep.mubr.msk.bf16.mxu0 %vm280_vm1, %v258_v18  ;;  %v248_v26 = vld [vmem:[%s932_s26 + $0xc0] sm:$0xff]  ;;  %v249_v27 = vld [vmem:[%s932_s26 + $0xc8] sm:$0xff]  ;;  %v267_v29 = vpack.c.bf16 %v247_v23, %v246_v22  ;;  %v260_v30 = vpack.c.bf16 %v233_v25, %v232_v24  ;;  %v234_v32 = vld [vmem:[%s932_s26 + $0x50] sm:$0xff] }
  0x17   : > { %847 = vmatprep.mubr.msk.bf16.mxu1 %vm280_vm1, %v266_v19  ;;  %v268_v31 = vpack.c.bf16 %v249_v27, %v248_v26  ;;  %v235_v33 = vld [vmem:[%s932_s26 + $0x58] sm:$0xff]  ;;  %v250_v34 = vld [vmem:[%s932_s26 + $0xd0] sm:$0xff]  ;;  %v236_v36 = vld [vmem:[%s932_s26 + $0x60] sm:$0xff] }
  0x18   : > { %v251_v35 = vld [vmem:[%s932_s26 + $0xd8] sm:$0xff]  ;;  %v237_v37 = vld [vmem:[%s932_s26 + $0x68] sm:$0xff]  ;;  %v252_v38 = vld [vmem:[%s932_s26 + $0xe0] sm:$0xff]  ;;  %v261_v40 = vpack.c.bf16 %v235_v33, %v234_v32 }
  0x19   : > { %v253_v39 = vld [vmem:[%s932_s26 + $0xe8] sm:$0xff]  ;;  %v269_v41 = vpack.c.bf16 %v251_v35, %v250_v34  ;;  %v262_v42 = vpack.c.bf16 %v237_v37, %v236_v36  ;;  %v238_v44 = vld [vmem:[%s932_s26 + $0x70] sm:$0xff]  ;;  %v239_v45 = vld [vmem:[%s932_s26 + $0x78] sm:$0xff] }
  0x1a   : > { %v270_v43 = vpack.c.bf16 %v253_v39, %v252_v38  ;;  %v254_v46 = vld [vmem:[%s932_s26 + $0xf0] sm:$0xff]  ;;  %v255_v47 = vld [vmem:[%s932_s26 + $0xf8] sm:$0xff]  ;;  %v263_v48 = vpack.c.bf16 %v239_v45, %v238_v44 }
  0x1b   : > { %v271_v49 = vpack.c.bf16 %v255_v47, %v254_v46 }
  0x1c   : > { %832 = vmatmul.mubr.msk.bf16.gmra.mrb[4].mxu0 %vm280_vm1, %v259_v28 }
  0x1d   : > { %848 = vmatmul.mubr.msk.bf16.gmra.mrb[4].mxu1 %vm280_vm1, %v267_v29  ;;  %835 = vmatprep.mubr.msk.bf16.mxu0 %vm280_vm1, %v260_v30 }
  0x1e   : > { %851 = vmatprep.mubr.msk.bf16.mxu1 %vm280_vm1, %v268_v31 }
  0x24   : > { %836 = vmatmul.mubr.msk.bf16.gmra.mrb[8].mxu0 %vm280_vm1, %v261_v40 }
  0x25   : > { %852 = vmatmul.mubr.msk.bf16.gmra.mrb[8].mxu1 %vm280_vm1, %v269_v41  ;;  %839 = vmatprep.mubr.msk.bf16.mxu0 %vm280_vm1, %v262_v42 }
  0x26   : > { %855 = vmatprep.mubr.msk.bf16.mxu1 %vm280_vm1, %v270_v43 }
  0x2c   : > { %840 = vmatmul.mubr.msk.bf16.gmra.mrb[12].mxu0 %vm280_vm1, %v263_v48 }
  0x2d   : > { %856 = vmatmul.mubr.msk.bf16.gmra.mrb[12].mxu1 %vm280_vm1, %v271_v49 }
  0xe7   : > { %v829_v51 = vpop.f32.mrb[0].mxu0 }
  0xe8   : > { %v995_v52 = vadd.f32 %v829_v51, %v985_v50  ;;  %v845_v53 = vpop.f32.mrb[0].mxu1  ;;  %v367_v54 = vpop.f32.mrb[1].mxu0 }
  0xe9   : > { %v998_v55 = vadd.f32 %v845_v53, %v985_v50  ;;  %v1001_v56 = vadd.f32 %v985_v50, %v367_v54  ;;  %v431_v57 = vpop.f32.mrb[1].mxu1  ;;  %v830_v58 = vpop.f32.mrb[2].mxu0  ;;  %v880_v53 = vmov (!%p805_p4), 0.0  }
  0xea   : > { %497 = vst.msk [vmem:[%s992_s6 + $0x10] sm:$0xff] %vm494_vm2, %v995_v52  ;;  %v1007_v59 = vadd.f32 %v985_v50, %v431_v57  ;;  %v1010_v60 = vadd.f32 %v830_v58, %v985_v50  ;;  %v846_v61 = vpop.f32.mrb[2].mxu1  ;;  %v370_v62 = vpop.f32.mrb[3].mxu0 }
  0xeb   : > { %513 = vst.msk [vmem:[%s992_s6 + $0x90] sm:$0xff] %vm494_vm2, %v998_v55  ;;  %495 = vst.msk [vmem:[%s992_s6] sm:$0xff] %vm494_vm2, %v1001_v56  ;;  %v1019_v63 = vadd.f32 %v846_v61, %v985_v50  ;;  %v1022_v0 = vadd.f32 %v985_v50, %v370_v62  ;;  %v434_v1 = vpop.f32.mrb[3].mxu1 }
  0xec   : > { %511 = vst.msk [vmem:[%s992_s6 + $0x80] sm:$0xff] %vm494_vm2, %v1007_v59  ;;  %498 = vst.msk [vmem:[%s992_s6 + $0x18] sm:$0xff] %vm494_vm2, %v1010_v60  ;;  %v1031_v2 = vadd.f32 %v985_v50, %v434_v1 }
  0xed   : > { %514 = vst.msk [vmem:[%s992_s6 + $0x98] sm:$0xff] %vm494_vm2, %v1019_v63  ;;  %496 = vst.msk [vmem:[%s992_s6 + $0x8] sm:$0xff] %vm494_vm2, %v1022_v0 }
  0xee   : > { %512 = vst.msk [vmem:[%s992_s6 + $0x88] sm:$0xff] %vm494_vm2, %v1031_v2 }
  0xef   : > { %v833_v3 = vpop.f32.mrb[4].mxu0  ;;  %532 = vst.msk [vmem:[%s1375_s4] sm:$0x1] (!%p805_p4), %vm531_vm3, %v880_v53  ;;  %533 = vst.msk [vmem:[%s1376_s5] sm:$0x1] (!%p805_p4), %vm531_vm3, %v880_v53 }
  0xf0   : > { %v1043_v4 = vadd.f32 %v833_v3, %v985_v50  ;;  %v849_v5 = vpop.f32.mrb[4].mxu1  ;;  %v383_v6 = vpop.f32.mrb[5].mxu0 }
  0xf1   : > { %v1046_v7 = vadd.f32 %v849_v5, %v985_v50  ;;  %v1049_v8 = vadd.f32 %v985_v50, %v383_v6  ;;  %v447_v9 = vpop.f32.mrb[5].mxu1  ;;  %v834_v10 = vpop.f32.mrb[6].mxu0 }
  0xf2   : > { %501 = vst.msk [vmem:[%s992_s6 + $0x30] sm:$0xff] %vm494_vm2, %v1043_v4  ;;  %v1055_v11 = vadd.f32 %v985_v50, %v447_v9  ;;  %v1058_v12 = vadd.f32 %v834_v10, %v985_v50  ;;  %v850_v13 = vpop.f32.mrb[6].mxu1  ;;  %v386_v14 = vpop.f32.mrb[7].mxu0 }
  0xf3   : > { %517 = vst.msk [vmem:[%s992_s6 + $0xb0] sm:$0xff] %vm494_vm2, %v1046_v7  ;;  %499 = vst.msk [vmem:[%s992_s6 + $0x20] sm:$0xff] %vm494_vm2, %v1049_v8  ;;  %v1067_v15 = vadd.f32 %v850_v13, %v985_v50  ;;  %v1070_v16 = vadd.f32 %v985_v50, %v386_v14  ;;  %v450_v17 = vpop.f32.mrb[7].mxu1 }
  0xf4   : > { %515 = vst.msk [vmem:[%s992_s6 + $0xa0] sm:$0xff] %vm494_vm2, %v1055_v11  ;;  %502 = vst.msk [vmem:[%s992_s6 + $0x38] sm:$0xff] %vm494_vm2, %v1058_v12  ;;  %v1079_v18 = vadd.f32 %v985_v50, %v450_v17 }
  0xf5   : > { %518 = vst.msk [vmem:[%s992_s6 + $0xb8] sm:$0xff] %vm494_vm2, %v1067_v15  ;;  %500 = vst.msk [vmem:[%s992_s6 + $0x28] sm:$0xff] %vm494_vm2, %v1070_v16 }
  0xf6   : > { %516 = vst.msk [vmem:[%s992_s6 + $0xa8] sm:$0xff] %vm494_vm2, %v1079_v18 }
  0xf7   : > { %v837_v19 = vpop.f32.mrb[8].mxu0 }
  0xf8   : > { %v1091_v20 = vadd.f32 %v837_v19, %v985_v50  ;;  %v853_v21 = vpop.f32.mrb[8].mxu1  ;;  %v399_v22 = vpop.f32.mrb[9].mxu0 }
  0xf9   : > { %v1094_v23 = vadd.f32 %v853_v21, %v985_v50  ;;  %v1097_v24 = vadd.f32 %v985_v50, %v399_v22  ;;  %v463_v25 = vpop.f32.mrb[9].mxu1  ;;  %v838_v26 = vpop.f32.mrb[10].mxu0 }
  0xfa   : > { %505 = vst.msk [vmem:[%s992_s6 + $0x50] sm:$0xff] %vm494_vm2, %v1091_v20  ;;  %v1103_v27 = vadd.f32 %v985_v50, %v463_v25  ;;  %v1106_v28 = vadd.f32 %v838_v26, %v985_v50  ;;  %v854_v29 = vpop.f32.mrb[10].mxu1  ;;  %v402_v30 = vpop.f32.mrb[11].mxu0 }
  0xfb   : > { %521 = vst.msk [vmem:[%s992_s6 + $0xd0] sm:$0xff] %vm494_vm2, %v1094_v23  ;;  %503 = vst.msk [vmem:[%s992_s6 + $0x40] sm:$0xff] %vm494_vm2, %v1097_v24  ;;  %v1115_v31 = vadd.f32 %v854_v29, %v985_v50  ;;  %v1118_v32 = vadd.f32 %v985_v50, %v402_v30  ;;  %v466_v33 = vpop.f32.mrb[11].mxu1 }
  0xfc   : > { %519 = vst.msk [vmem:[%s992_s6 + $0xc0] sm:$0xff] %vm494_vm2, %v1103_v27  ;;  %506 = vst.msk [vmem:[%s992_s6 + $0x58] sm:$0xff] %vm494_vm2, %v1106_v28  ;;  %v1127_v34 = vadd.f32 %v985_v50, %v466_v33 }
  0xfd   : > { %522 = vst.msk [vmem:[%s992_s6 + $0xd8] sm:$0xff] %vm494_vm2, %v1115_v31  ;;  %504 = vst.msk [vmem:[%s992_s6 + $0x48] sm:$0xff] %vm494_vm2, %v1118_v32 }
  0xfe   : > { %520 = vst.msk [vmem:[%s992_s6 + $0xc8] sm:$0xff] %vm494_vm2, %v1127_v34 }
  0xff   : > { %v841_v35 = vpop.f32.mrb[12].mxu0 }
 0x100   : > { %v1139_v36 = vadd.f32 %v841_v35, %v985_v50  ;;  %v857_v37 = vpop.f32.mrb[12].mxu1  ;;  %v415_v38 = vpop.f32.mrb[13].mxu0  ;;  %530 = sbr.rel (%p805_p4) target bundleno = 263 (0x107), region = 36 }
 0x101   : > { %v1142_v39 = vadd.f32 %v857_v37, %v985_v50  ;;  %v1145_v40 = vadd.f32 %v985_v50, %v415_v38  ;;  %v479_v41 = vpop.f32.mrb[13].mxu1  ;;  %v842_v42 = vpop.f32.mrb[14].mxu0 }
 0x102   : > { %509 = vst.msk [vmem:[%s992_s6 + $0x70] sm:$0xff] %vm494_vm2, %v1139_v36  ;;  %v1151_v43 = vadd.f32 %v985_v50, %v479_v41  ;;  %v1154_v44 = vadd.f32 %v842_v42, %v985_v50  ;;  %v858_v45 = vpop.f32.mrb[14].mxu1  ;;  %v418_v46 = vpop.f32.mrb[15].mxu0 }
 0x103   : > { %525 = vst.msk [vmem:[%s992_s6 + $0xf0] sm:$0xff] %vm494_vm2, %v1142_v39  ;;  %507 = vst.msk [vmem:[%s992_s6 + $0x60] sm:$0xff] %vm494_vm2, %v1145_v40  ;;  %v1163_v47 = vadd.f32 %v858_v45, %v985_v50  ;;  %v1166_v48 = vadd.f32 %v985_v50, %v418_v46  ;;  %v482_v49 = vpop.f32.mrb[15].mxu1 }
 0x104   : > { %523 = vst.msk [vmem:[%s992_s6 + $0xe0] sm:$0xff] %vm494_vm2, %v1151_v43  ;;  %510 = vst.msk [vmem:[%s992_s6 + $0x78] sm:$0xff] %vm494_vm2, %v1154_v44  ;;  %v1175_v51 = vadd.f32 %v985_v50, %v482_v49 }
 0x105   : > { %526 = vst.msk [vmem:[%s992_s6 + $0xf8] sm:$0xff] %vm494_vm2, %v1163_v47  ;;  %508 = vst.msk [vmem:[%s992_s6 + $0x68] sm:$0xff] %vm494_vm2, %v1166_v48 }
 0x106   : > { %524 = vst.msk [vmem:[%s992_s6 + $0xe8] sm:$0xff] %vm494_vm2, %v1175_v51 }
 0x107 PF: > { %v535_v50 = vsel %vm494_vm2, %v1001_v56, 0.0  ;;  %v536_v54 = vsel %vm494_vm2, %v1022_v0, 0.0  ;;  %v538_v57 = vsel %vm494_vm2, %v995_v52, 0.0  ;;  %v540_v61 = vsel %vm494_vm2, %v1010_v60, 0.0 }
 0x108   : > { %v537_v58 = vadd.f32 %v536_v54, %v535_v50  ;;  %v542_v1 = vsel %vm494_vm2, %v1049_v8, 0.0  ;;  %v544_v5 = vsel %vm494_vm2, %v1070_v16, 0.0  ;;  %v546_v9 = vsel %vm494_vm2, %v1043_v4, 0.0 }
 0x109   : > { %v548_v13 = vsel %vm494_vm2, %v1058_v12, 0.0  ;;  %v550_v17 = vsel %vm494_vm2, %v1097_v24, 0.0  ;;  %v552_v21 = vsel %vm494_vm2, %v1118_v32, 0.0  ;;  %v608_v22 = vmul.f32 %v1001_v56, %v1001_v56 }
 0x10a   : > { %v539_v62 = vadd.f32 %v538_v57, %v537_v58  ;;  %v609_v25 = vmul.f32 %v1022_v0, %v1022_v0  ;;  %v610_v29 = vmul.f32 %v995_v52, %v995_v52  ;;  %v554_v30 = vsel %vm494_vm2, %v1091_v20, 0.0 }
 0x10b   : > { %v611_v33 = vmul.f32 %v1010_v60, %v1010_v60  ;;  %v556_v37 = vsel %vm494_vm2, %v1106_v28, 0.0  ;;  %v612_v56 = vmul.f32 %v1049_v8, %v1049_v8  ;;  %v640_v38 = vsel %vm494_vm2, %v608_v22, 0.0 }
 0x10c   : > { %v541_v3 = vadd.f32 %v540_v61, %v539_v62  ;;  %v641_v0 = vsel %vm494_vm2, %v609_v25, 0.0  ;;  %v643_v52 = vsel %vm494_vm2, %v610_v29, 0.0  ;;  %v558_v45 = vsel %vm494_vm2, %v1145_v40, 0.0 }
 0x10d   : > { %v642_v42 = vadd.f32 %v641_v0, %v640_v38  ;;  %v613_v60 = vmul.f32 %v1070_v16, %v1070_v16  ;;  %v645_v46 = vsel %vm494_vm2, %v611_v33, 0.0  ;;  %v560_v8 = vsel %vm494_vm2, %v1166_v48, 0.0 }
 0x10e   : > { %v543_v6 = vadd.f32 %v542_v1, %v541_v3  ;;  %v614_v50 = vmul.f32 %v1043_v4, %v1043_v4  ;;  %v647_v54 = vsel %vm494_vm2, %v612_v56, 0.0  ;;  %v562_v61 = vsel %vm494_vm2, %v1139_v36, 0.0 }
 0x10f   : > { %v644_v53 = vadd.f32 %v643_v52, %v642_v42  ;;  %v615_v16 = vmul.f32 %v1058_v12, %v1058_v12  ;;  %v649_v62 = vsel %vm494_vm2, %v613_v60, 0.0  ;;  %v616_v4 = vmul.f32 %v1097_v24, %v1097_v24 }
 0x110   : > { %v545_v10 = vadd.f32 %v544_v5, %v543_v6  ;;  %v564_v5 = vsel %vm494_vm2, %v1154_v44, 0.0  ;;  %v651_v6 = vsel %vm494_vm2, %v614_v50, 0.0  ;;  %v617_v12 = vmul.f32 %v1118_v32, %v1118_v32 }
 0x111   : > { %v646_v58 = vadd.f32 %v645_v46, %v644_v53  ;;  %v618_v24 = vmul.f32 %v1091_v20, %v1091_v20  ;;  %v655_v22 = vsel %vm494_vm2, %v616_v4, 0.0  ;;  %v570_v29 = vsel %vm494_vm2, %v998_v55, 0.0 }
 0x112   : > { %v547_v14 = vadd.f32 %v546_v9, %v545_v10  ;;  %v619_v32 = vmul.f32 %v1106_v28, %v1106_v28  ;;  %v620_v20 = vmul.f32 %v1145_v40, %v1145_v40  ;;  %v621_v28 = vmul.f32 %v1166_v48, %v1166_v48 }
 0x113   : > { %v648_v3 = vadd.f32 %v647_v54, %v646_v58  ;;  %v659_v56 = vsel %vm494_vm2, %v618_v24, 0.0  ;;  %v576_v60 = vsel %vm494_vm2, %v1079_v18, 0.0  ;;  %v622_v40 = vmul.f32 %v1139_v36, %v1139_v36 }
 0x114   : > { %v549_v19 = vadd.f32 %v548_v13, %v547_v14  ;;  %v566_v13 = vsel %vm494_vm2, %v1007_v59, 0.0  ;;  %v653_v14 = vsel %vm494_vm2, %v615_v16, 0.0  ;;  %v661_v42 = vsel %vm494_vm2, %v619_v32, 0.0 }
 0x115   : > { %v650_v10 = vadd.f32 %v649_v62, %v648_v3  ;;  %v663_v46 = vsel %vm494_vm2, %v620_v20, 0.0  ;;  %v623_v48 = vmul.f32 %v1154_v44, %v1154_v44  ;;  %v665_v50 = vsel %vm494_vm2, %v621_v28, 0.0 }
 0x116   : > { %v551_v26 = vadd.f32 %v550_v17, %v549_v19  ;;  %v580_v58 = vsel %vm494_vm2, %v1067_v15, 0.0  ;;  %v624_v36 = vmul.f32 %v1007_v59, %v1007_v59  ;;  %v625_v44 = vmul.f32 %v1031_v2, %v1031_v2 }
 0x117   : > { %v652_v19 = vadd.f32 %v651_v6, %v650_v10  ;;  %v669_v3 = vsel %vm494_vm2, %v623_v48, 0.0  ;;  %v584_v6 = vsel %vm494_vm2, %v1127_v34, 0.0  ;;  %v626_v59 = vmul.f32 %v998_v55, %v998_v55 }
 0x118   : > { %v553_v35 = vadd.f32 %v552_v21, %v551_v26  ;;  %v568_v21 = vsel %vm494_vm2, %v1031_v2, 0.0  ;;  %v627_v2 = vmul.f32 %v1019_v63, %v1019_v63  ;;  %v628_v55 = vmul.f32 %v1055_v11, %v1055_v11 }
 0x119   : > { %v654_v26 = vadd.f32 %v653_v14, %v652_v19  ;;  %v673_v14 = vsel %vm494_vm2, %v625_v44, 0.0  ;;  %v675_v24 = vsel %vm494_vm2, %v626_v59, 0.0  ;;  %v596_v28 = vsel %vm494_vm2, %v1163_v47, 0.0 }
 0x11a   : > { %v555_v41 = vadd.f32 %v554_v30, %v553_v35  ;;  %v657_v30 = vsel %vm494_vm2, %v617_v12, 0.0  ;;  %v586_v12 = vsel %vm494_vm2, %v1094_v23, 0.0  ;;  %vm605_vm4 = vcmask 516096  }
 0x11b   : > { %v656_v35 = vadd.f32 %v655_v22, %v654_v26  ;;  %v590_v26 = vsel %vm494_vm2, %v1151_v43, 0.0 }
 0x11c   : > { %v557_v49 = vadd.f32 %v556_v37, %v555_v41  ;;  %v572_v37 = vsel %vm494_vm2, %v1019_v63, 0.0  ;;  %v574_v41 = vsel %vm494_vm2, %v1055_v11, 0.0  ;;  %v629_v63 = vmul.f32 %v1079_v18, %v1079_v18 }
 0x11d   : > { %v658_v0 = vadd.f32 %v657_v30, %v656_v35  ;;  %v630_v11 = vmul.f32 %v1046_v7, %v1046_v7  ;;  %v679_v35 = vsel %vm494_vm2, %v628_v55, 0.0  ;;  %v631_v18 = vmul.f32 %v1067_v15, %v1067_v15  ;;  %v607_v55 = vld [vmem:[%s1376_s5] sm:$0x1] }
 0x11e   : > { %v559_v57 = vadd.f32 %v558_v45, %v557_v49 }
 0x11f   : > { %v660_v45 = vadd.f32 %v659_v56, %v658_v0  ;;  %v594_v56 = vsel %vm494_vm2, %v1142_v39, 0.0 }
 0x120   : > { %v561_v1 = vadd.f32 %v560_v8, %v559_v57  ;;  %v578_v8 = vsel %vm494_vm2, %v1046_v7, 0.0  ;;  %v632_v7 = vmul.f32 %v1103_v27, %v1103_v27 }
 0x121   : > { %v662_v53 = vadd.f32 %v661_v42, %v660_v45  ;;  %v683_v42 = vsel %vm494_vm2, %v630_v11, 0.0 }
 0x122   : > { %v563_v9 = vadd.f32 %v562_v61, %v561_v1  ;;  %v667_v61 = vsel %vm494_vm2, %v622_v40, 0.0  ;;  %v582_v1 = vsel %vm494_vm2, %v1103_v27, 0.0  ;;  %v685_v40 = vsel %vm494_vm2, %v631_v18, 0.0 }
 0x123   : > { %v664_v57 = vadd.f32 %v663_v46, %v662_v53  ;;  %v687_v53 = vsel %vm494_vm2, %v632_v7, 0.0  ;;  %v635_v27 = vmul.f32 %v1115_v31, %v1115_v31 }
 0x124   : > { %v565_v17 = vadd.f32 %v564_v5, %v563_v9  ;;  %v671_v9 = vsel %vm494_vm2, %v624_v36, 0.0 }
 0x125   : > { %v666_v62 = vadd.f32 %v665_v50, %v664_v57 }
 0x126   : > { %v567_v25 = vadd.f32 %v566_v13, %v565_v17 }
 0x127   : > { %v668_v4 = vadd.f32 %v667_v61, %v666_v62 }
 0x128   : > { %v569_v33 = vadd.f32 %v568_v21, %v567_v25  ;;  %v588_v21 = vsel %vm494_vm2, %v1115_v31, 0.0  ;;  %v638_v31 = vmul.f32 %v1142_v39, %v1142_v39 }
 0x129   : > { %v670_v13 = vadd.f32 %v669_v3, %v668_v4  ;;  %v639_v4 = vmul.f32 %v1163_v47, %v1163_v47 }
 0x12a   : > { %v571_v38 = vadd.f32 %v570_v29, %v569_v33  ;;  %v677_v29 = vsel %vm494_vm2, %v627_v2, 0.0  ;;  %v592_v33 = vsel %vm494_vm2, %v1175_v51, 0.0 }
 0x12b   : > { %v672_v19 = vadd.f32 %v671_v9, %v670_v13  ;;  %v699_v9 = vsel %vm494_vm2, %v638_v31, 0.0  ;;  %v701_v13 = vsel %vm494_vm2, %v639_v4, 0.0 }
 0x12c   : > { %v573_v52 = vadd.f32 %v572_v37, %v571_v38  ;;  %v681_v38 = vsel %vm494_vm2, %v629_v63, 0.0 }
 0x12d   : > { %v674_v25 = vadd.f32 %v673_v14, %v672_v19 }
 0x12e   : > { %v575_v49 = vadd.f32 %v574_v41, %v573_v52 }
 0x12f   : > { %v676_v30 = vadd.f32 %v675_v24, %v674_v25 }
 0x130   : > { %v577_v54 = vadd.f32 %v576_v60, %v575_v49  ;;  %v633_v60 = vmul.f32 %v1127_v34, %v1127_v34  ;;  %v634_v49 = vmul.f32 %v1094_v23, %v1094_v23  ;;  %v636_v34 = vmul.f32 %v1151_v43, %v1151_v43  ;;  %v534_v43 = vld [vmem:[%s1375_s4] sm:$0x1] }
 0x131   : > { %v678_v20 = vadd.f32 %v677_v29, %v676_v30  ;;  %v637_v23 = vmul.f32 %v1175_v51, %v1175_v51 }
 0x132   : > { %v579_v16 = vadd.f32 %v578_v8, %v577_v54  ;;  %v689_v50 = vsel %vm494_vm2, %v633_v60, 0.0  ;;  %v695_v44 = vsel %vm494_vm2, %v636_v34, 0.0 }
 0x133   : > { %v680_v41 = vadd.f32 %v679_v35, %v678_v20  ;;  %v697_v51 = vsel %vm494_vm2, %v637_v23, 0.0 }
 0x134   : > { %v581_v5 = vadd.f32 %v580_v58, %v579_v16  ;;  %v691_v58 = vsel %vm494_vm2, %v634_v49, 0.0  ;;  %v693_v16 = vsel %vm494_vm2, %v635_v27, 0.0 }
 0x135   : > { %v682_v45 = vadd.f32 %v681_v38, %v680_v41 }
 0x136   : > { %v583_v10 = vadd.f32 %v582_v1, %v581_v5 }
 0x137   : > { %v684_v46 = vadd.f32 %v683_v42, %v682_v45 }
 0x138   : > { %v585_v17 = vadd.f32 %v584_v6, %v583_v10 }
 0x139   : > { %v686_v48 = vadd.f32 %v685_v40, %v684_v46 }
 0x13a   : > { %v587_v22 = vadd.f32 %v586_v12, %v585_v17 }
 0x13b   : > { %v688_v57 = vadd.f32 %v687_v53, %v686_v48 }
 0x13c   : > { %v589_v32 = vadd.f32 %v588_v21, %v587_v22 }
 0x13d   : > { %v690_v61 = vadd.f32 %v689_v50, %v688_v57 }
 0x13e   : > { %v591_v37 = vadd.f32 %v590_v26, %v589_v32 }
 0x13f   : > { %v692_v1 = vadd.f32 %v691_v58, %v690_v61 }
 0x140   : > { %v593_v0 = vadd.f32 %v592_v33, %v591_v37 }
 0x141   : > { %v694_v5 = vadd.f32 %v693_v16, %v692_v1 }
 0x142   : > { %v595_v52 = vadd.f32 %v594_v56, %v593_v0 }
 0x143   : > { %v696_v59 = vadd.f32 %v695_v44, %v694_v5 }
 0x144   : > { %v597_v15 = vadd.f32 %v596_v28, %v595_v52 }
 0x145   : > { %v698_v39 = vadd.f32 %v697_v51, %v696_v59 }
 0x146   : > { %v598_v8 = vrot.slane %v597_v15, 4 }
 0x147   : > { %v700_v12 = vadd.f32 %v699_v9, %v698_v39 }
 0x148   : > { %v599_v54 = vadd.f32 %v598_v8, %v597_v15 }
 0x149   : > { %v702_v2 = vadd.f32 %v701_v13, %v700_v12 }
 0x14a   : > { %v600_v36 = vrot.slane %v599_v54, 2 }
 0x14b   : > { %v703_v14 = vrot.slane %v702_v2, 4 }
 0x14c   : > { %v601_v62 = vadd.f32 %v600_v36, %v599_v54 }
 0x14d   : > { %v704_v47 = vadd.f32 %v703_v14, %v702_v2 }
 0x14e   : > { %v602_v3 = vrot.slane %v601_v62, 1 }
 0x14f   : > { %v705_v17 = vrot.slane %v704_v47, 2 }
 0x150   : > { %v603_v6 = vadd.f32 %v602_v3, %v601_v62 }
 0x151   : > { %v706_v19 = vadd.f32 %v705_v17, %v704_v47 }
 0x152   : > { %v604_v10 = vadd.f32 %v603_v6, %v534_v43 }
 0x153   : > { %v707_v21 = vrot.slane %v706_v19, 1 }
 0x154   : > { %606 = vst.msk [vmem:[%s1375_s4] sm:$0x1] %vm605_vm4, %v604_v10 }
 0x155   : > { %v708_v24 = vadd.f32 %v707_v21, %v706_v19 }
 0x157   : > { %v709_v22 = vadd.f32 %v708_v24, %v607_v55 }
 0x159   : > { %710 = vst.msk [vmem:[%s1376_s5] sm:$0x1] %vm605_vm4, %v709_v22 }
 0x15a PF: > { %s16_s18 = sadd.s32 1, %s878_s18  }
 0x15b   : > { %p13_p5 = scmp.ge.s32.totalorder %s16_s18, 4  }
 0x15d   :  { %15 = sbr.rel (!%p13_p5) target bundleno = 1 (0x1), region = 82 }

// kernel: _lambda_.31
= control target key start
LH: loop header
LB: loop body
LE: loop exit
PB: predicated region body
PF: predicated region fallthrough
CT: control target
= control target key end

     0   :  { %s454_s12 = smov 0   ;;  %s645_s0 = inlined_call_operand.vmem [shape: f32[512,64], index: 0, kind: input, shape index: {}]   ;;  %s646_s1 = inlined_call_operand.vmem [shape: f32[1,64], index: 1, kind: input, shape index: {}]   ;;  %s647_s2 = inlined_call_operand.vmem [shape: f32[1,64], index: 2, kind: input, shape index: {}]   ;;  %s648_s3 = inlined_call_operand.vmem [shape: f32[512,64], index: 3, kind: output, shape index: {}]  }
   0x1 LB: > { %s405_s13 = sadd.s32 4294967295, %s432_s12   ;;  %p409_p0 = scmp.ge.s32.totalorder %s432_s12, 1  ;;  %s432_s12 = sphi %s454_s12, %s13_s12  }
   0x2   : > { %p138_p1 = scmp.lt.s32.totalorder %s432_s12, 3 }
   0x4   : > { %p139_p2 = pnand %p409_p0, %p138_p1 }
   0x5   : > { %s410_s14 = sshll.u32 (!%p139_p2), %s405_s13, 5  ;;  %v465_v0 = vld [vmem:[%s646_s1] ss:$0 sm:$0xff] (!%p139_p2)  ;;  %vm316_vm0 = vcmask (!%p139_p2), 523264  }
   0x6   : > { %142 = sbr.rel (%p139_p2) target bundleno = 46 (0x2e), region = 32  ;;  %p163_p3 = scmp.lt.s32.totalorder (!%p139_p2), %s410_s14, 63  ;;  %v475_v1 = vld [vmem:[%s647_s2] ss:$0 sm:$0xff] (!%p139_p2) }
   0xd   : > { %s650_s14 = smov (!%p163_p3, %s410_s14), 63 }
   0xe   : > { %s411_s15 = sshll.u32 %s650_s14, 3 }
   0xf   : > { %s470_s20 = scalar_lea.vmem %s645_s0, %s411_s15  ;;  %s498_s25 = scalar_lea.vmem %s648_s3, %s411_s15 }
  0x10   : > { %v174_v2 = vld [vmem:[%s470_s20] sm:$0xff]  ;;  %v175_v3 = vld [vmem:[%s470_s20 + $0x8] sm:$0xff]  ;;  %v176_v4 = vld [vmem:[%s470_s20 + $0x10] sm:$0xff] }
  0x11   : > { %v213_v5 = vmul.f32 %v465_v0, %v174_v2  ;;  %v214_v6 = vmul.f32 %v465_v0, %v175_v3  ;;  %v215_v7 = vmul.f32 %v465_v0, %v176_v4  ;;  %v177_v8 = vld [vmem:[%s470_s20 + $0x18] sm:$0xff]  ;;  %v178_v9 = vld [vmem:[%s470_s20 + $0x20] sm:$0xff]  ;;  %v179_v10 = vld [vmem:[%s470_s20 + $0x28] sm:$0xff] }
  0x12   : > { %v216_v11 = vmul.f32 %v465_v0, %v177_v8  ;;  %v217_v12 = vmul.f32 %v465_v0, %v178_v9  ;;  %v218_v13 = vmul.f32 %v465_v0, %v179_v10  ;;  %v180_v14 = vld [vmem:[%s470_s20 + $0x30] sm:$0xff]  ;;  %v181_v15 = vld [vmem:[%s470_s20 + $0x38] sm:$0xff]  ;;  %v182_v24 = vld [vmem:[%s470_s20 + $0x40] sm:$0xff] }
  0x13   : > { %v252_v16 = vadd.f32 %v475_v1, %v213_v5  ;;  %v253_v17 = vadd.f32 %v475_v1, %v214_v6  ;;  %v254_v18 = vadd.f32 %v475_v1, %v215_v7  ;;  %v219_v19 = vmul.f32 %v465_v0, %v180_v14  ;;  %v183_v25 = vld [vmem:[%s470_s20 + $0x48] sm:$0xff]  ;;  %v184_v26 = vld [vmem:[%s470_s20 + $0x50] sm:$0xff]  ;;  %v185_v31 = vld [vmem:[%s470_s20 + $0x58] sm:$0xff] }
  0x14   : > { %v255_v20 = vadd.f32 %v475_v1, %v216_v11  ;;  %v256_v21 = vadd.f32 %v475_v1, %v217_v12  ;;  %v257_v22 = vadd.f32 %v475_v1, %v218_v13  ;;  %v220_v23 = vmul.f32 %v465_v0, %v181_v15  ;;  %v186_v32 = vld [vmem:[%s470_s20 + $0x60] sm:$0xff]  ;;  %v187_v33 = vld [vmem:[%s470_s20 + $0x68] sm:$0xff]  ;;  %v188_v38 = vld [vmem:[%s470_s20 + $0x70] sm:$0xff] }
  0x15   : > { %v284_v27 = vmax.f32 %v252_v16, 0.0  ;;  %v285_v28 = vmax.f32 %v253_v17, 0.0  ;;  %v286_v29 = vmax.f32 %v254_v18, 0.0  ;;  %v258_v30 = vadd.f32 %v475_v1, %v219_v19  ;;  %v189_v43 = vld [vmem:[%s470_s20 + $0x78] sm:$0xff]  ;;  %v190_v56 = vld [vmem:[%s470_s20 + $0x80] sm:$0xff]  ;;  %v191_v57 = vld [vmem:[%s470_s20 + $0x88] sm:$0xff] }
  0x16   : > { %v287_v34 = vmax.f32 %v255_v20, 0.0  ;;  %v288_v35 = vmax.f32 %v256_v21, 0.0  ;;  %v289_v36 = vmax.f32 %v257_v22, 0.0  ;;  %v259_v37 = vadd.f32 %v475_v1, %v220_v23  ;;  %v192_v58 = vld [vmem:[%s470_s20 + $0x90] sm:$0xff]  ;;  %v193_v63 = vld [vmem:[%s470_s20 + $0x98] sm:$0xff]  ;;  %v194_v2 = vld [vmem:[%s470_s20 + $0xa0] sm:$0xff] }
  0x17   : > { %317 = vst.msk [vmem:[%s498_s25] sm:$0xff] %vm316_vm0, %v284_v27  ;;  %318 = vst.msk [vmem:[%s498_s25 + $0x8] sm:$0xff] %vm316_vm0, %v285_v28  ;;  %v290_v39 = vmax.f32 %v258_v30, 0.0  ;;  %v221_v40 = vmul.f32 %v465_v0, %v182_v24  ;;  %v222_v41 = vmul.f32 %v465_v0, %v183_v25  ;;  %v223_v42 = vmul.f32 %v465_v0, %v184_v26  ;;  %v195_v3 = vld [vmem:[%s470_s20 + $0xa8] sm:$0xff]  ;;  %v196_v8 = vld [vmem:[%s470_s20 + $0xb0] sm:$0xff] }
  0x18   : > { %319 = vst.msk [vmem:[%s498_s25 + $0x10] sm:$0xff] %vm316_vm0, %v286_v29  ;;  %320 = vst.msk [vmem:[%s498_s25 + $0x18] sm:$0xff] %vm316_vm0, %v287_v34  ;;  %v291_v44 = vmax.f32 %v259_v37, 0.0  ;;  %v224_v45 = vmul.f32 %v465_v0, %v185_v31  ;;  %v225_v46 = vmul.f32 %v465_v0, %v186_v32  ;;  %v226_v47 = vmul.f32 %v465_v0, %v187_v33  ;;  %v197_v13 = vld [vmem:[%s470_s20 + $0xb8] sm:$0xff]  ;;  %v198_v26 = vld [vmem:[%s470_s20 + $0xc0] sm:$0xff] }
  0x19   : > { %321 = vst.msk [vmem:[%s498_s25 + $0x20] sm:$0xff] %vm316_vm0, %v288_v35  ;;  %322 = vst.msk [vmem:[%s498_s25 + $0x28] sm:$0xff] %vm316_vm0, %v289_v36  ;;  %v260_v48 = vadd.f32 %v475_v1, %v221_v40  ;;  %v261_v49 = vadd.f32 %v475_v1, %v222_v41  ;;  %v262_v50 = vadd.f32 %v475_v1, %v223_v42  ;;  %v199_v27 = vld [vmem:[%s470_s20 + $0xc8] sm:$0xff]  ;;  %v200_v28 = vld [vmem:[%s470_s20 + $0xd0] sm:$0xff] }
  0x1a   : > { %323 = vst.msk [vmem:[%s498_s25 + $0x30] sm:$0xff] %vm316_vm0, %v290_v39  ;;  %v227_v51 = vmul.f32 %v465_v0, %v188_v38  ;;  %324 = vst.msk [vmem:[%s498_s25 + $0x38] sm:$0xff] %vm316_vm0, %v291_v44  ;;  %v263_v52 = vadd.f32 %v475_v1, %v224_v45  ;;  %v264_v53 = vadd.f32 %v475_v1, %v225_v46  ;;  %v201_v33 = vld [vmem:[%s470_s20 + $0xd8] sm:$0xff]  ;;  %v202_v34 = vld [vmem:[%s470_s20 + $0xe0] sm:$0xff] }
  0x1b   : > { %v265_v54 = vadd.f32 %v475_v1, %v226_v47  ;;  %v228_v55 = vmul.f32 %v465_v0, %v189_v43  ;;  %v292_v59 = vmax.f32 %v260_v48, 0.0  ;;  %v293_v60 = vmax.f32 %v261_v49, 0.0  ;;  %v203_v35 = vld [vmem:[%s470_s20 + $0xe8] sm:$0xff]  ;;  %v204_v40 = vld [vmem:[%s470_s20 + $0xf0] sm:$0xff]  ;;  %v205_v45 = vld [vmem:[%s470_s20 + $0xf8] sm:$0xff] }
  0x1c   : > { %v294_v61 = vmax.f32 %v262_v50, 0.0  ;;  %v266_v62 = vadd.f32 %v475_v1, %v227_v51  ;;  %v295_v4 = vmax.f32 %v263_v52, 0.0  ;;  %v296_v5 = vmax.f32 %v264_v53, 0.0 }
  0x1d   : > { %v297_v6 = vmax.f32 %v265_v54, 0.0  ;;  %v267_v7 = vadd.f32 %v475_v1, %v228_v55  ;;  %325 = vst.msk [vmem:[%s498_s25 + $0x40] sm:$0xff] %vm316_vm0, %v292_v59  ;;  %326 = vst.msk [vmem:[%s498_s25 + $0x48] sm:$0xff] %vm316_vm0, %v293_v60  ;;  %v229_v10 = vmul.f32 %v465_v0, %v190_v56  ;;  %v230_v11 = vmul.f32 %v465_v0, %v191_v57 }
  0x1e   : > { %327 = vst.msk [vmem:[%s498_s25 + $0x50] sm:$0xff] %vm316_vm0, %v294_v61  ;;  %v298_v9 = vmax.f32 %v266_v62, 0.0  ;;  %v231_v12 = vmul.f32 %v465_v0, %v192_v58  ;;  %328 = vst.msk [vmem:[%s498_s25 + $0x58] sm:$0xff] %vm316_vm0, %v295_v4  ;;  %v232_v15 = vmul.f32 %v465_v0, %v193_v63  ;;  %v233_v16 = vmul.f32 %v465_v0, %v194_v2 }
  0x1f   : > { %329 = vst.msk [vmem:[%s498_s25 + $0x60] sm:$0xff] %vm316_vm0, %v296_v5  ;;  %330 = vst.msk [vmem:[%s498_s25 + $0x68] sm:$0xff] %vm316_vm0, %v297_v6  ;;  %v299_v14 = vmax.f32 %v267_v7, 0.0  ;;  %v234_v17 = vmul.f32 %v465_v0, %v195_v3  ;;  %v268_v18 = vadd.f32 %v475_v1, %v229_v10  ;;  %v269_v19 = vadd.f32 %v475_v1, %v230_v11 }
  0x20   : > { %331 = vst.msk [vmem:[%s498_s25 + $0x70] sm:$0xff] %vm316_vm0, %v298_v9  ;;  %v270_v20 = vadd.f32 %v475_v1, %v231_v12  ;;  %v235_v21 = vmul.f32 %v465_v0, %v196_v8  ;;  %v271_v22 = vadd.f32 %v475_v1, %v232_v15  ;;  %v272_v23 = vadd.f32 %v475_v1, %v233_v16 }
  0x21   : > { %332 = vst.msk [vmem:[%s498_s25 + $0x78] sm:$0xff] %vm316_vm0, %v299_v14  ;;  %v273_v24 = vadd.f32 %v475_v1, %v234_v17  ;;  %v236_v25 = vmul.f32 %v465_v0, %v197_v13  ;;  %v300_v29 = vmax.f32 %v268_v18, 0.0  ;;  %v301_v30 = vmax.f32 %v269_v19, 0.0 }
  0x22   : > { %v302_v31 = vmax.f32 %v270_v20, 0.0  ;;  %v274_v32 = vadd.f32 %v475_v1, %v235_v21  ;;  %v303_v36 = vmax.f32 %v271_v22, 0.0  ;;  %v304_v37 = vmax.f32 %v272_v23, 0.0 }
  0x23   : > { %v305_v38 = vmax.f32 %v273_v24, 0.0  ;;  %v275_v39 = vadd.f32 %v475_v1, %v236_v25  ;;  %333 = vst.msk [vmem:[%s498_s25 + $0x80] sm:$0xff] %vm316_vm0, %v300_v29  ;;  %334 = vst.msk [vmem:[%s498_s25 + $0x88] sm:$0xff] %vm316_vm0, %v301_v30  ;;  %v237_v42 = vmul.f32 %v465_v0, %v198_v26  ;;  %v238_v43 = vmul.f32 %v465_v0, %v199_v27 }
  0x24   : > { %335 = vst.msk [vmem:[%s498_s25 + $0x90] sm:$0xff] %vm316_vm0, %v302_v31  ;;  %v306_v41 = vmax.f32 %v274_v32, 0.0  ;;  %v239_v44 = vmul.f32 %v465_v0, %v200_v28  ;;  %336 = vst.msk [vmem:[%s498_s25 + $0x98] sm:$0xff] %vm316_vm0, %v303_v36  ;;  %v240_v47 = vmul.f32 %v465_v0, %v201_v33  ;;  %v241_v48 = vmul.f32 %v465_v0, %v202_v34 }
  0x25   : > { %337 = vst.msk [vmem:[%s498_s25 + $0xa0] sm:$0xff] %vm316_vm0, %v304_v37  ;;  %338 = vst.msk [vmem:[%s498_s25 + $0xa8] sm:$0xff] %vm316_vm0, %v305_v38  ;;  %v307_v46 = vmax.f32 %v275_v39, 0.0  ;;  %v242_v49 = vmul.f32 %v465_v0, %v203_v35  ;;  %v276_v50 = vadd.f32 %v475_v1, %v237_v42  ;;  %v277_v51 = vadd.f32 %v475_v1, %v238_v43 }
  0x26   : > { %339 = vst.msk [vmem:[%s498_s25 + $0xb0] sm:$0xff] %vm316_vm0, %v306_v41  ;;  %v278_v52 = vadd.f32 %v475_v1, %v239_v44  ;;  %v243_v53 = vmul.f32 %v465_v0, %v204_v40  ;;  %v279_v54 = vadd.f32 %v475_v1, %v240_v47  ;;  %v280_v55 = vadd.f32 %v475_v1, %v241_v48 }
  0x27   : > { %340 = vst.msk [vmem:[%s498_s25 + $0xb8] sm:$0xff] %vm316_vm0, %v307_v46  ;;  %v281_v56 = vadd.f32 %v475_v1, %v242_v49  ;;  %v244_v57 = vmul.f32 %v465_v0, %v205_v45  ;;  %v308_v58 = vmax.f32 %v276_v50, 0.0  ;;  %v309_v59 = vmax.f32 %v277_v51, 0.0 }
  0x28   : > { %v310_v60 = vmax.f32 %v278_v52, 0.0  ;;  %v282_v61 = vadd.f32 %v475_v1, %v243_v53  ;;  %v311_v62 = vmax.f32 %v279_v54, 0.0  ;;  %v312_v63 = vmax.f32 %v280_v55, 0.0 }
  0x29   : > { %v313_v2 = vmax.f32 %v281_v56, 0.0  ;;  %v283_v3 = vadd.f32 %v475_v1, %v244_v57  ;;  %341 = vst.msk [vmem:[%s498_s25 + $0xc0] sm:$0xff] %vm316_vm0, %v308_v58  ;;  %342 = vst.msk [vmem:[%s498_s25 + $0xc8] sm:$0xff] %vm316_vm0, %v309_v59 }
  0x2a   : > { %343 = vst.msk [vmem:[%s498_s25 + $0xd0] sm:$0xff] %vm316_vm0, %v310_v60  ;;  %v314_v4 = vmax.f32 %v282_v61, 0.0  ;;  %344 = vst.msk [vmem:[%s498_s25 + $0xd8] sm:$0xff] %vm316_vm0, %v311_v62 }
  0x2b   : > { %345 = vst.msk [vmem:[%s498_s25 + $0xe0] sm:$0xff] %vm316_vm0, %v312_v63  ;;  %346 = vst.msk [vmem:[%s498_s25 + $0xe8] sm:$0xff] %vm316_vm0, %v313_v2  ;;  %v315_v0 = vmax.f32 %v283_v3, 0.0 }
  0x2c   : > { %347 = vst.msk [vmem:[%s498_s25 + $0xf0] sm:$0xff] %vm316_vm0, %v314_v4 }
  0x2d   : > { %348 = vst.msk [vmem:[%s498_s25 + $0xf8] sm:$0xff] %vm316_vm0, %v315_v0 }
  0x2e PF: > { %s13_s12 = sadd.s32 1, %s432_s12  }
  0x2f   : > { %p10_p4 = scmp.ge.s32.totalorder %s13_s12, 4  }
  0x31   :  { %12 = sbr.rel (!%p10_p4) target bundleno = 1 (0x1), region = 62 }

// kernel: _lambda_.32
= control target key start
LH: loop header
LB: loop body
LE: loop exit
PB: predicated region body
PF: predicated region fallthrough
CT: control target
= control target key end

     0   :  { %s5459_s0 = inlined_call_operand.vmem [shape: f32[512,64], index: 0, kind: input, shape index: {}]   ;;  %s5460_s1 = inlined_call_operand.vmem [shape: bf16[64,32], index: 1, kind: input, shape index: {}]   ;;  %s5461_s2 = inlined_call_operand.vmem [shape: f32[1,32], index: 2, kind: input, shape index: {}]   ;;  %s5462_s3 = inlined_call_operand.vmem [shape: bf16[64,32], index: 3, kind: input, shape index: {}]   ;;  %s5463_s4 = inlined_call_operand.vmem [shape: f32[512,32], index: 4, kind: input, shape index: {}]   ;;  %s5464_s5 = inlined_call_operand.vmem [shape: f32[512,8], index: 5, kind: input, shape index: {}]   ;;  %s5465_s6 = inlined_call_operand.hbm [shape: f32[512,32], index: 6, kind: output, shape index: {0}]   ;;  %s5466_s7 = inlined_call_operand.hbm [shape: f32[512,32], index: 7, kind: output, shape index: {1}]   ;;  %s5467_s8 = inlined_call_operand.hbm [shape: f32[512,32], index: 8, kind: output, shape index: {2}]   ;;  %s5468_s9 = inlined_call_operand.hbm [shape: f32[512,32], index: 9, kind: output, shape index: {3}]  }
   0x1   :  { %5488 = sst [smem:[#allocation42_spill]] %s5459_s0 }
   0x2   :  { %5489 = sst [smem:[#allocation43_spill]] %s5460_s1 }
   0x3   :  { %5490 = sst [smem:[#allocation44_spill]] %s5461_s2 }
   0x4   :  { %5491 = sst [smem:[#allocation45_spill]] %s5462_s3 }
   0x5   :  { %5492 = sst [smem:[#allocation46_spill]] %s5463_s4 }
   0x6   :  { %15 = vsyncpa [#allocation3], 0 }
   0x7   :  { %17 = vsyncpa [#allocation3 + $0x1], 0 }
   0x8   :  { %18 = vsyncpa [#allocation5], 0 }
   0x9   :  { %20 = vsyncpa [#allocation5 + $0x1], 0 }
   0xa   :  { %21 = vsyncpa [#allocation8], 0 }
   0xb   :  { %23 = vsyncpa [#allocation8 + $0x1], 0  ;;  %s3234_s30 = smov 0   ;;  %s3236_s10 = smov 0  }
   0xc   :  { %s3238_s11 = smov 0   ;;  %s3240_s12 = smov 0  }
   0xd LB: > { %s3255_s13 = sadd.s32 4294967295, %s3174_s12   ;;  %s5485_s14 = sadd.s32 4294967294, %s3174_s12   ;;  %s3174_s12 = sphi %s3240_s12, %s5614_s12   ;;  %s3170_s11 = sphi %s3238_s11, %s5613_s11   ;;  %s3166_s10 = sphi %s3236_s10, %s5612_s10   ;;  %s3162_s30 = sphi %s3234_s30, %s5611_s30  }
   0xe   : > { %s3259_s15 = sadd.s32 1, %s3174_s12   ;;  %s177_s16 = sadd.s32 1, %s3170_s11 }
   0xf   : > { %s174_s17 = ssub.s32 %s3174_s12, %s3259_s15  ;;  %p187_p0 = scmp.ne.s32.totalorder %s3170_s11, %s3166_s10 }
  0x10   : > { %p175_p1 = scmp.eq.s32.totalorder %s174_s17, 0  ;;  %p188_p2 = scmp.eq.s32.totalorder %s3255_s13, 1 }
  0x11   : > { %p193_p3 = scmp.ne.s32.totalorder %s3166_s10, %s3162_s30  ;;  %p194_p4 = scmp.eq.s32.totalorder %s5485_s14, 1 }
  0x12   : > { %s3272_s18 = scalar_select %p175_p1, %s3170_s11, %s177_s16  }
  0x13   : > { %p3274_p5 = por %p188_p2, %p187_p0  ;;  %p3278_p6 = por %p194_p4, %p193_p3 }
  0x14   : > { %p2507_p7 = scmp.ge.s32.totalorder %s3174_s12, 1  ;;  %p326_p8 = scmp.lt.s32.totalorder %s3174_s12, 3 }
  0x16   : > { %p327_p9 = pnand %p2507_p7, %p326_p8 }
  0x18   : > { %330 = sbr.rel (%p327_p9) target bundleno = 750 (0x2ee), region = 44 }
  0x1f   : > { %s5495_s3 = sld [smem:[#allocation45_spill]]  ;;  %s2512_s23 = sshll.u32 %s3255_s13, 5  ;;  %vm497_vm0 = vcmask 523264   ;;  %vm1509_vm1 = vcmask 64512   ;;  %vm1542_vm2 = vcmask 130048   ;;  %vm1060_vm3 = vcmask 261120  }
  0x20   : > { %p388_p10 = scmp.lt.s32.totalorder %s2512_s23, 63  ;;  %s5496_s1 = sld [smem:[#allocation43_spill]]  ;;  %vm1575_vm4 = vcmask 195584  }
  0x21   : > { %s5497_s0 = sld [smem:[#allocation42_spill]]  ;;  %s5486_s17 = smov 8  }
  0x22   : > { %s5616_s23 = smov (!%p388_p10, %s2512_s23), 63  ;;  %s5526_s2 = sld [smem:[#allocation44_spill]] }
  0x23   : > { %s3297_s16 = sshll.u32 %s5616_s23, 3  ;;  %s3177_s23 = smov 16  }
  0x24   : > { %s3306_s25 = scalar_lea.vmem %s5464_s5, %s3297_s16  ;;  %s5549_s4 = sld [smem:[#allocation46_spill]] }
  0x25   : > { %v2755_v0 = vld [vmem:[%s5495_s3] sm:$0xff]   ;;  %v2756_v1 = vld [vmem:[%s5495_s3 + $0x8] sm:$0xff]   ;;  %v2757_v3 = vld [vmem:[%s5495_s3 + $0x10] sm:$0xff]   ;;  %s2253_s26 = sand.u32 1, %s3255_s13  }
  0x26   : > { %2657 = vmatprep.subr.bf16.mxu1 %v2755_v0  ;;  %v2758_v2 = vld [vmem:[%s5496_s1] sm:$0xff]   ;;  %v2760_v4 = vld [vmem:[%s5496_s1 + $0x8] sm:$0xff]   ;;  %v3315_v5 = vld [vmem:[%s3306_s25 + $0x10] sm:$0xff] }
  0x27   : > { %2658 = vmatpush3.bf16.msra.mxu1 %v2755_v0  ;;  %2617 = vmatprep.subr.bf16.mxu0 %v2758_v2  ;;  %s3312_s27 = scalar_lea.vmem %s5497_s0, %s3297_s16  ;;  %v3318_v6 = vld [vmem:[%s3306_s25] sm:$0xff]  ;;  %v2761_v7 = vld [vmem:[%s5496_s1 + $0x10] sm:$0xff]   ;;  %v3328_v8 = vld [vmem:[%s3306_s25 + $0x18] sm:$0xff] }
  0x28   : > { %2659 = vmatprep.subr.bf16.mxu1 %v2756_v1  ;;  %2618 = vmatpush3.bf16.msra.mxu0 %v2758_v2  ;;  %v2759_v9 = vld [vmem:[%s5495_s3 + $0x18] sm:$0xff]   ;;  %v3334_v10 = vld [vmem:[%s3306_s25 + $0x8] sm:$0xff]  ;;  %v410_v11 = vld [vmem:[%s3312_s27] sm:$0xff] }
  0x29   : > { %2619 = vmatprep.subr.bf16.mxu0 %v2760_v4  ;;  %1225 = vrot.lane.b32.xlu1 %v3315_v5, %s5486_s17  ;;  %v411_v12 = vld [vmem:[%s3312_s27 + $0x8] sm:$0xff]  ;;  %v3342_v15 = vld [vmem:[%s3306_s25 + $0x20] sm:$0xff]  ;;  %v412_v16 = vld [vmem:[%s3312_s27 + $0x10] sm:$0xff] }
  0x2a   : > { %1221 = vrot.lane.b32.xlu0 %v3318_v6, %s5486_s17  ;;  %v442_v13 = vpack.c.bf16 %v411_v12, %v410_v11  ;;  %v3339_v14 = vld [vmem:[%s3306_s25 + $0x28] sm:$0xff]  ;;  %v413_v17 = vld [vmem:[%s3312_s27 + $0x18] sm:$0xff]  ;;  %v414_v18 = vld [vmem:[%s3312_s27 + $0x20] sm:$0xff] }
  0x2b   : > { %2660 = vmatpush3.bf16.msra.mxu1 %v2756_v1  ;;  %v415_v19 = vld [vmem:[%s3312_s27 + $0x28] sm:$0xff]  ;;  %v2762_v20 = vld [vmem:[%s5496_s1 + $0x18] sm:$0xff]   ;;  %v443_v21 = vpack.c.bf16 %v413_v17, %v412_v16  ;;  %v3365_v24 = vld [vmem:[%s3306_s25 + $0x30] sm:$0xff] }
  0x2c   : > { %2661 = vmatprep.subr.bf16.mxu1 %v2757_v3  ;;  %2620 = vmatpush3.bf16.msra.mxu0 %v2760_v4  ;;  %v444_v22 = vpack.c.bf16 %v415_v19, %v414_v18  ;;  %v3362_v23 = vld [vmem:[%s3306_s25 + $0x38] sm:$0xff]  ;;  %v416_v25 = vld [vmem:[%s3312_s27 + $0x30] sm:$0xff]  ;;  %v418_v27 = vld [vmem:[%s3312_s27 + $0x40] sm:$0xff] }
  0x2d   : > { %2621 = vmatprep.subr.bf16.mxu0 %v2761_v7  ;;  %1227 = vrot.lane.b32.xlu1 %v3328_v8, %s5486_s17  ;;  %v417_v26 = vld [vmem:[%s3312_s27 + $0x38] sm:$0xff]  ;;  %v419_v28 = vld [vmem:[%s3312_s27 + $0x48] sm:$0xff]  ;;  %v3381_v30 = vld [vmem:[%s3306_s25 + $0x40] sm:$0xff] }
  0x2e   : > { %1223 = vrot.lane.b32.xlu0 %v3334_v10, %s5486_s17  ;;  %2665 = vmatprep.mubr.msk.bf16.mxu1 %vm497_vm0, %v442_v13  ;;  %v3378_v29 = vld [vmem:[%s3306_s25 + $0x48] sm:$0xff]  ;;  %v445_v31 = vpack.c.bf16 %v417_v26, %v416_v25  ;;  %v446_v32 = vpack.c.bf16 %v419_v28, %v418_v27  ;;  %v3390_v33 = vld [vmem:[%s3306_s25 + $0x58] sm:$0xff]  ;;  %v3393_v34 = vld [vmem:[%s3306_s25 + $0x50] sm:$0xff] }
  0x2f   : > { %2662 = vmatpush3.bf16.msra.mxu1 %v2757_v3  ;;  %2625 = vmatprep.mubr.msk.bf16.mxu0 %vm497_vm0, %v442_v13  ;;  %v420_v35 = vld [vmem:[%s3312_s27 + $0x50] sm:$0xff]  ;;  %v421_v36 = vld [vmem:[%s3312_s27 + $0x58] sm:$0xff]  ;;  %v422_v37 = vld [vmem:[%s3312_s27 + $0x60] sm:$0xff] }
  0x30   : > { %2663 = vmatprep.subr.bf16.mxu1 %v2759_v9  ;;  %2622 = vmatpush3.bf16.msra.mxu0 %v2761_v7  ;;  %v423_v38 = vld [vmem:[%s3312_s27 + $0x68] sm:$0xff]  ;;  %v3409_v40 = vld [vmem:[%s3306_s25 + $0x60] sm:$0xff]  ;;  %v447_v41 = vpack.c.bf16 %v421_v36, %v420_v35  ;;  %v3418_v43 = vld [vmem:[%s3306_s25 + $0x78] sm:$0xff] }
  0x31   : > { %2623 = vmatprep.subr.bf16.mxu0 %v2762_v20  ;;  %1231 = vrot.lane.b32.xlu1 %v3339_v14, %s5486_s17  ;;  %v3406_v39 = vld [vmem:[%s3306_s25 + $0x68] sm:$0xff]  ;;  %v448_v42 = vpack.c.bf16 %v423_v38, %v422_v37  ;;  %v3421_v44 = vld [vmem:[%s3306_s25 + $0x70] sm:$0xff]  ;;  %v425_v46 = vld [vmem:[%s3312_s27 + $0x78] sm:$0xff] }
  0x32   : > { %1229 = vrot.lane.b32.xlu0 %v3342_v15, %s5486_s17  ;;  %v424_v45 = vld [vmem:[%s3312_s27 + $0x70] sm:$0xff]  ;;  %v426_v47 = vld [vmem:[%s3312_s27 + $0x80] sm:$0xff]  ;;  %v427_v48 = vld [vmem:[%s3312_s27 + $0x88] sm:$0xff] }
  0x33   : > { %2664 = vmatpush3.bf16.msra.mxu1 %v2759_v9  ;;  %v3434_v49 = vld [vmem:[%s3306_s25 + $0x88] sm:$0xff]  ;;  %v3437_v50 = vld [vmem:[%s3306_s25 + $0x80] sm:$0xff]  ;;  %v449_v51 = vpack.c.bf16 %v425_v46, %v424_v45  ;;  %v450_v52 = vpack.c.bf16 %v427_v48, %v426_v47  ;;  %v3446_v53 = vld [vmem:[%s3306_s25 + $0x98] sm:$0xff] }
  0x34   : > { %2624 = vmatpush3.bf16.msra.mxu0 %v2762_v20  ;;  %v3449_v54 = vld [vmem:[%s3306_s25 + $0x90] sm:$0xff]  ;;  %v429_v56 = vld [vmem:[%s3312_s27 + $0x98] sm:$0xff]  ;;  %v430_v57 = vld [vmem:[%s3312_s27 + $0xa0] sm:$0xff] }
  0x35   : > { %1235 = vrot.lane.b32.xlu1 %v3362_v23, %s5486_s17  ;;  %v428_v55 = vld [vmem:[%s3312_s27 + $0x90] sm:$0xff]  ;;  %v431_v58 = vld [vmem:[%s3312_s27 + $0xa8] sm:$0xff]  ;;  %v3465_v60 = vld [vmem:[%s3306_s25 + $0xa0] sm:$0xff] }
  0x36   : > { %2666 = vmatmul.mubr.msk.bf16.vlgmr.msra.gmra.mrb[0].mxu1 %vm497_vm0, %v443_v21  ;;  %1233 = vrot.lane.b32.xlu0 %v3365_v24, %s5486_s17  ;;  %v3462_v59 = vld [vmem:[%s3306_s25 + $0xa8] sm:$0xff]  ;;  %v451_v61 = vpack.c.bf16 %v429_v56, %v428_v55  ;;  %v452_v62 = vpack.c.bf16 %v431_v58, %v430_v57  ;;  %v3474_v63 = vld [vmem:[%s3306_s25 + $0xb8] sm:$0xff]  ;;  %v3477_v0 = vld [vmem:[%s3306_s25 + $0xb0] sm:$0xff] }
  0x37   : > { %2669 = vmatprep.mubr.msk.bf16.mxu1 %vm497_vm0, %v444_v22  ;;  %2626 = vmatmul.mubr.msk.bf16.vlgmr.msra.gmra.mrb[0].mxu0 %vm497_vm0, %v443_v21  ;;  %v432_v1 = vld [vmem:[%s3312_s27 + $0xb0] sm:$0xff]  ;;  %v433_v2 = vld [vmem:[%s3312_s27 + $0xb8] sm:$0xff]  ;;  %v434_v3 = vld [vmem:[%s3312_s27 + $0xc0] sm:$0xff] }
  0x38   : > { %2629 = vmatprep.mubr.msk.bf16.mxu0 %vm497_vm0, %v444_v22  ;;  %v435_v4 = vld [vmem:[%s3312_s27 + $0xc8] sm:$0xff]  ;;  %v3493_v9 = vld [vmem:[%s3306_s25 + $0xc0] sm:$0xff]  ;;  %v453_v11 = vpack.c.bf16 %v433_v2, %v432_v1  ;;  %v3502_v13 = vld [vmem:[%s3306_s25 + $0xd8] sm:$0xff] }
  0x39   : > { %1239 = vrot.lane.b32.xlu1 %v3378_v29, %s5486_s17  ;;  %v3490_v7 = vld [vmem:[%s3306_s25 + $0xc8] sm:$0xff]  ;;  %v454_v12 = vpack.c.bf16 %v435_v4, %v434_v3  ;;  %v3505_v16 = vld [vmem:[%s3306_s25 + $0xd0] sm:$0xff]  ;;  %v437_v18 = vld [vmem:[%s3312_s27 + $0xd8] sm:$0xff] }
  0x3a   : > { %1237 = vrot.lane.b32.xlu0 %v3381_v30, %s5486_s17  ;;  %5498 = vst [vmem:[#allocation12_spill] sm:$0xff] %v3505_v16  ;;  %v436_v17 = vld [vmem:[%s3312_s27 + $0xd0] sm:$0xff]  ;;  %v438_v19 = vld [vmem:[%s3312_s27 + $0xe0] sm:$0xff]  ;;  %v439_v20 = vld [vmem:[%s3312_s27 + $0xe8] sm:$0xff] }
  0x3b   : > { %v3518_v21 = vld [vmem:[%s3306_s25 + $0xe8] sm:$0xff]  ;;  %v3521_v22 = vld [vmem:[%s3306_s25 + $0xe0] sm:$0xff]  ;;  %v455_v25 = vpack.c.bf16 %v437_v18, %v436_v17  ;;  %v456_v26 = vpack.c.bf16 %v439_v20, %v438_v19  ;;  %v3530_v27 = vld [vmem:[%s3306_s25 + $0xf8] sm:$0xff] }
  0x3c   : > { %5499 = vst [vmem:[#allocation13_spill] sm:$0xff] %v3518_v21  ;;  %5500 = vst [vmem:[#allocation14_spill] sm:$0xff] %v3521_v22  ;;  %v3533_v28 = vld [vmem:[%s3306_s25 + $0xf0] sm:$0xff]  ;;  %s3178_s25 = smov 24  }
  0x3d   : > { %1243 = vrot.lane.b32.xlu1 %v3390_v33, %s5486_s17  ;;  %5501 = vst [vmem:[#allocation15_spill] sm:$0xff] %v3530_v27  ;;  %5502 = vst [vmem:[#allocation16_spill] sm:$0xff] %v3533_v28 }
  0x3e   : > { %2670 = vmatmul.mubr.msk.bf16.gmra.mrb[4].mxu1 %vm497_vm0, %v445_v31  ;;  %1241 = vrot.lane.b32.xlu0 %v3393_v34, %s5486_s17 }
  0x3f   : > { %2673 = vmatprep.mubr.msk.bf16.mxu1 %vm497_vm0, %v446_v32  ;;  %2630 = vmatmul.mubr.msk.bf16.gmra.mrb[4].mxu0 %vm497_vm0, %v445_v31  ;;  %v440_v31 = vld [vmem:[%s3312_s27 + $0xf0] sm:$0xff] }
  0x40   : > { %2633 = vmatprep.mubr.msk.bf16.mxu0 %vm497_vm0, %v446_v32  ;;  %v441_v32 = vld [vmem:[%s3312_s27 + $0xf8] sm:$0xff]  ;;  %s3783_s27 = sand.u32 1, %s3166_s10  }
  0x41   : > { %1247 = vrot.lane.b32.xlu1 %v3406_v39, %s5486_s17  ;;  %v457_v35 = vpack.c.bf16 %v441_v32, %v440_v31  ;;  %s3827_s28 = sshll.u32 %s3783_s27, 8 }
  0x42   : > { %1245 = vrot.lane.b32.xlu0 %v3409_v40, %s5486_s17  ;;  %s3920_s22 = scalar_lea.vmem [#allocation4], %s3827_s28  ;;  %s3956_s24 = scalar_lea.vmem [#allocation2], %s3827_s28 }
  0x43   : > { %s2293_s14 = sshll.u32 %s3920_s22, 4  ;;  %s5206_s14 = int_to_ptr.vmem [resolvable:$true] %s2293_s14 }
  0x45   : > { %1251 = vrot.lane.b32.xlu1 %v3418_v43, %s5486_s17 }
  0x46   : > { %2674 = vmatmul.mubr.msk.bf16.gmra.mrb[8].mxu1 %vm497_vm0, %v447_v41  ;;  %1249 = vrot.lane.b32.xlu0 %v3421_v44, %s5486_s17 }
  0x47   : > { %2677 = vmatprep.mubr.msk.bf16.mxu1 %vm497_vm0, %v448_v42  ;;  %2634 = vmatmul.mubr.msk.bf16.gmra.mrb[8].mxu0 %vm497_vm0, %v447_v41 }
  0x48   : > { %2637 = vmatprep.mubr.msk.bf16.mxu0 %vm497_vm0, %v448_v42 }
  0x49   : > { %1255 = vrot.lane.b32.xlu1 %v3434_v49, %s5486_s17 }
  0x4a   : > { %1253 = vrot.lane.b32.xlu0 %v3437_v50, %s5486_s17 }
  0x4d   : > { %1259 = vrot.lane.b32.xlu1 %v3446_v53, %s5486_s17 }
  0x4e   : > { %2678 = vmatmul.mubr.msk.bf16.gmra.mrb[12].mxu1 %vm497_vm0, %v449_v51  ;;  %1257 = vrot.lane.b32.xlu0 %v3449_v54, %s5486_s17 }
  0x4f   : > { %2681 = vmatprep.mubr.msk.bf16.mxu1 %vm497_vm0, %v450_v52  ;;  %2638 = vmatmul.mubr.msk.bf16.gmra.mrb[12].mxu0 %vm497_vm0, %v449_v51 }
  0x50   : > { %2641 = vmatprep.mubr.msk.bf16.mxu0 %vm497_vm0, %v450_v52 }
  0x51   : > { %1263 = vrot.lane.b32.xlu1 %v3462_v59, %s5486_s17 }
  0x52   : > { %1261 = vrot.lane.b32.xlu0 %v3465_v60, %s5486_s17 }
  0x55   : > { %1267 = vrot.lane.b32.xlu1 %v3474_v63, %s5486_s17 }
  0x56   : > { %2682 = vmatmul.mubr.msk.bf16.gmra.mrb[16].mxu1 %vm497_vm0, %v451_v61  ;;  %1265 = vrot.lane.b32.xlu0 %v3477_v0, %s5486_s17 }
  0x57   : > { %2685 = vmatprep.mubr.msk.bf16.mxu1 %vm497_vm0, %v452_v62  ;;  %2642 = vmatmul.mubr.msk.bf16.gmra.mrb[16].mxu0 %vm497_vm0, %v451_v61 }
  0x58   : > { %2645 = vmatprep.mubr.msk.bf16.mxu0 %vm497_vm0, %v452_v62 }
  0x59   : > { %1271 = vrot.lane.b32.xlu1 %v3490_v7, %s5486_s17 }
  0x5a   : > { %1269 = vrot.lane.b32.xlu0 %v3493_v9, %s5486_s17 }
  0x5d   : > { %1275 = vrot.lane.b32.xlu1 %v3502_v13, %s5486_s17 }
  0x5e   : > { %2686 = vmatmul.mubr.msk.bf16.gmra.mrb[20].mxu1 %vm497_vm0, %v453_v11  ;;  %1273 = vrot.lane.b32.xlu0 %v3505_v16, %s5486_s17 }
  0x5f   : > { %2689 = vmatprep.mubr.msk.bf16.mxu1 %vm497_vm0, %v454_v12  ;;  %2646 = vmatmul.mubr.msk.bf16.gmra.mrb[20].mxu0 %vm497_vm0, %v453_v11 }
  0x60   : > { %2649 = vmatprep.mubr.msk.bf16.mxu0 %vm497_vm0, %v454_v12 }
  0x61   : > { %1279 = vrot.lane.b32.xlu1 %v3518_v21, %s5486_s17 }
  0x62   : > { %1277 = vrot.lane.b32.xlu0 %v3521_v22, %s5486_s17 }
  0x65   : > { %1283 = vrot.lane.b32.xlu1 %v3530_v27, %s5486_s17 }
  0x66   : > { %2690 = vmatmul.mubr.msk.bf16.gmra.mrb[24].mxu1 %vm497_vm0, %v455_v25  ;;  %1281 = vrot.lane.b32.xlu0 %v3533_v28, %s5486_s17 }
  0x67   : > { %2693 = vmatprep.mubr.msk.bf16.mxu1 %vm497_vm0, %v456_v26  ;;  %2650 = vmatmul.mubr.msk.bf16.gmra.mrb[24].mxu0 %vm497_vm0, %v455_v25 }
  0x68   : > { %2653 = vmatprep.mubr.msk.bf16.mxu0 %vm497_vm0, %v456_v26 }
  0x69   : > { %1319 = vrot.lane.b32.xlu1 %v3334_v10, %s3177_s23 }
  0x6a   : > { %1317 = vrot.lane.b32.xlu0 %v3318_v6, %s3177_s23 }
  0x6d   : > { %1323 = vrot.lane.b32.xlu1 %v3328_v8, %s3177_s23 }
  0x6e   : > { %2694 = vmatmul.mubr.msk.bf16.gmra.mrb[28].mxu1 %vm497_vm0, %v457_v35  ;;  %1321 = vrot.lane.b32.xlu0 %v3315_v5, %s3177_s23 }
  0x6f   : > { %2654 = vmatmul.mubr.msk.bf16.gmra.mrb[28].mxu0 %vm497_vm0, %v457_v35 }
  0x71   : > { %1327 = vrot.lane.b32.xlu1 %v3339_v14, %s3177_s23 }
  0x72   : > { %1325 = vrot.lane.b32.xlu0 %v3342_v15, %s3177_s23 }
  0x75   : > { %1331 = vrot.lane.b32.xlu1 %v3362_v23, %s3177_s23 }
  0x76   : > { %1329 = vrot.lane.b32.xlu0 %v3365_v24, %s3177_s23 }
  0x79   : > { %1335 = vrot.lane.b32.xlu1 %v3378_v29, %s3177_s23 }
  0x7a   : > { %1333 = vrot.lane.b32.xlu0 %v3381_v30, %s3177_s23 }
  0x7d   : > { %1339 = vrot.lane.b32.xlu1 %v3390_v33, %s3177_s23 }
  0x7e   : > { %1337 = vrot.lane.b32.xlu0 %v3393_v34, %s3177_s23 }
  0x81   : > { %1343 = vrot.lane.b32.xlu1 %v3406_v39, %s3177_s23 }
  0x82   : > { %1341 = vrot.lane.b32.xlu0 %v3409_v40, %s3177_s23 }
  0x85   : > { %1347 = vrot.lane.b32.xlu1 %v3418_v43, %s3177_s23 }
  0x86   : > { %1345 = vrot.lane.b32.xlu0 %v3421_v44, %s3177_s23 }
  0x89   : > { %1351 = vrot.lane.b32.xlu1 %v3434_v49, %s3177_s23 }
  0x8a   : > { %1349 = vrot.lane.b32.xlu0 %v3437_v50, %s3177_s23 }
  0x8d   : > { %1355 = vrot.lane.b32.xlu1 %v3446_v53, %s3177_s23 }
  0x8e   : > { %1353 = vrot.lane.b32.xlu0 %v3449_v54, %s3177_s23 }
  0x91   : > { %1359 = vrot.lane.b32.xlu1 %v3462_v59, %s3177_s23 }
  0x92   : > { %1357 = vrot.lane.b32.xlu0 %v3465_v60, %s3177_s23 }
  0x95   : > { %1363 = vrot.lane.b32.xlu1 %v3474_v63, %s3177_s23 }
  0x96   : > { %1361 = vrot.lane.b32.xlu0 %v3477_v0, %s3177_s23 }
  0x99   : > { %1367 = vrot.lane.b32.xlu1 %v3490_v7, %s3177_s23 }
  0x9a   : > { %1365 = vrot.lane.b32.xlu0 %v3493_v9, %s3177_s23 }
  0x9b   : > { %v3599_v36 = vpop.permute.xlu1 %1225 }
  0x9c   : > { %v3601_v37 = vpop.permute.xlu0 %1221 }
  0x9d   : > { %1371 = vrot.lane.b32.xlu1 %v3502_v13, %s3177_s23 }
  0x9e   : > { %1369 = vrot.lane.b32.xlu0 %v3505_v16, %s3177_s23 }
  0x9f   : > { %v3607_v38 = vpop.permute.xlu1 %1227 }
  0xa0   : > { %v3609_v41 = vpop.permute.xlu0 %1223 }
  0xa1   : > { %1375 = vrot.lane.b32.xlu1 %v3518_v21, %s3177_s23 }
  0xa2   : > { %1373 = vrot.lane.b32.xlu0 %v3521_v22, %s3177_s23 }
  0xa3   : > { %v3615_v42 = vpop.permute.xlu1 %1231 }
  0xa4   : > { %v3617_v45 = vpop.permute.xlu0 %1229 }
  0xa5   : > { %1379 = vrot.lane.b32.xlu1 %v3530_v27, %s3177_s23 }
  0xa6   : > { %1377 = vrot.lane.b32.xlu0 %v3533_v28, %s3177_s23  ;;  %s5197_s23 = sshll.u32 %s3255_s13, 12  ;;  %s5214_s13 = scalar_lea.sflag [#allocation5], %s2253_s26 }
  0xa7   : > { %v3623_v46 = vpop.permute.xlu1 %1235  ;;  %s5203_s21 = scalar_lea.hbm %s5466_s7, %s5197_s23  ;;  %s5212_s1 = scalar_lea.hbm %s5467_s8, %s5197_s23 }
  0xa8   : > { %v3625_v47 = vpop.permute.xlu0 %1233 }
  0xa9   : > { %1415 = vrot.lane.b32.xlu1 %v3334_v10, %s3178_s25 }
  0xaa   : > { %1413 = vrot.lane.b32.xlu0 %v3318_v6, %s3178_s25 }
  0xab   : > { %v3631_v48 = vpop.permute.xlu1 %1239 }
  0xac   : > { %v3633_v51 = vpop.permute.xlu0 %1237 }
  0xad   : > { %1419 = vrot.lane.b32.xlu1 %v3328_v8, %s3178_s25 }
  0xae   : > { %1417 = vrot.lane.b32.xlu0 %v3315_v5, %s3178_s25 }
  0xaf   : > { %v3639_v52 = vpop.permute.xlu1 %1243 }
  0xb0   : > { %v3641_v55 = vpop.permute.xlu0 %1241 }
  0xb1   : > { %1423 = vrot.lane.b32.xlu1 %v3339_v14, %s3178_s25 }
  0xb2   : > { %1421 = vrot.lane.b32.xlu0 %v3342_v15, %s3178_s25 }
  0xb3   : > { %v3647_v56 = vpop.permute.xlu1 %1247 }
  0xb4   : > { %v3649_v57 = vpop.permute.xlu0 %1245 }
  0xb5   : > { %1427 = vrot.lane.b32.xlu1 %v3362_v23, %s3178_s25 }
  0xb6   : > { %1425 = vrot.lane.b32.xlu0 %v3365_v24, %s3178_s25 }
  0xb7   : > { %v3655_v58 = vpop.permute.xlu1 %1251 }
  0xb8   : > { %v3657_v61 = vpop.permute.xlu0 %1249 }
  0xb9   : > { %1431 = vrot.lane.b32.xlu1 %v3378_v29, %s3178_s25 }
  0xba   : > { %1429 = vrot.lane.b32.xlu0 %v3381_v30, %s3178_s25 }
  0xbb   : > { %v1256_v62 = vpop.permute.xlu1 %1255 }
  0xbc   : > { %v1254_v1 = vpop.permute.xlu0 %1253 }
  0xbd   : > { %1435 = vrot.lane.b32.xlu1 %v3390_v33, %s3178_s25 }
  0xbe   : > { %1433 = vrot.lane.b32.xlu0 %v3393_v34, %s3178_s25 }
  0xbf   : > { %v1260_v2 = vpop.permute.xlu1 %1259 }
  0xc0   : > { %v3667_v3 = vpop.permute.xlu0 %1257 }
  0xc1   : > { %1439 = vrot.lane.b32.xlu1 %v3406_v39, %s3178_s25 }
  0xc2   : > { %1437 = vrot.lane.b32.xlu0 %v3409_v40, %s3178_s25 }
  0xc3   : > { %v3673_v4 = vpop.permute.xlu1 %1263 }
  0xc4   : > { %v3675_v11 = vpop.permute.xlu0 %1261 }
  0xc5   : > { %1443 = vrot.lane.b32.xlu1 %v3418_v43, %s3178_s25 }
  0xc6   : > { %1441 = vrot.lane.b32.xlu0 %v3421_v44, %s3178_s25 }
  0xc7   : > { %v3681_v12 = vpop.permute.xlu1 %1267 }
  0xc8   : > { %v3683_v17 = vpop.permute.xlu0 %1265 }
  0xc9   : > { %1447 = vrot.lane.b32.xlu1 %v3434_v49, %s3178_s25 }
  0xca   : > { %1445 = vrot.lane.b32.xlu0 %v3437_v50, %s3178_s25 }
  0xcb   : > { %v3689_v18 = vpop.permute.xlu1 %1271 }
  0xcc   : > { %v3691_v19 = vpop.permute.xlu0 %1269 }
  0xcd   : > { %1451 = vrot.lane.b32.xlu1 %v3446_v53, %s3178_s25 }
  0xce   : > { %1449 = vrot.lane.b32.xlu0 %v3449_v54, %s3178_s25 }
  0xcf   : > { %v3697_v20 = vpop.permute.xlu1 %1275 }
  0xd0   : > { %v3699_v25 = vpop.permute.xlu0 %1273 }
  0xd1   : > { %5503 = vst [vmem:[#allocation17_spill] sm:$0xff] %v3699_v25  ;;  %1455 = vrot.lane.b32.xlu1 %v3462_v59, %s3178_s25 }
  0xd2   : > { %1453 = vrot.lane.b32.xlu0 %v3465_v60, %s3178_s25 }
  0xd3   : > { %v3705_v26 = vpop.permute.xlu1 %1279 }
  0xd4   : > { %5504 = vst [vmem:[#allocation18_spill] sm:$0xff] %v3705_v26  ;;  %v3707_v31 = vpop.permute.xlu0 %1277 }
  0xd5   : > { %5505 = vst [vmem:[#allocation19_spill] sm:$0xff] %v3707_v31  ;;  %1459 = vrot.lane.b32.xlu1 %v3474_v63, %s3178_s25 }
  0xd6   : > { %1457 = vrot.lane.b32.xlu0 %v3477_v0, %s3178_s25 }
  0xd7   : > { %v3713_v32 = vpop.permute.xlu1 %1283 }
  0xd8   : > { %5506 = vst [vmem:[#allocation20_spill] sm:$0xff] %v3713_v32  ;;  %v3715_v35 = vpop.permute.xlu0 %1281 }
  0xd9   : > { %5507 = vst [vmem:[#allocation21_spill] sm:$0xff] %v3715_v35  ;;  %1463 = vrot.lane.b32.xlu1 %v3490_v7, %s3178_s25 }
  0xda   : > { %1461 = vrot.lane.b32.xlu0 %v3493_v9, %s3178_s25 }
  0xdb   : > { %v3721_v25 = vpop.permute.xlu1 %1319 }
  0xdc   : > { %5508 = vst [vmem:[#allocation22_spill] sm:$0xff] %v3721_v25  ;;  %v3723_v26 = vpop.permute.xlu0 %1317 }
  0xdd   : > { %5509 = vst [vmem:[#allocation23_spill] sm:$0xff] %v3723_v26  ;;  %1467 = vrot.lane.b32.xlu1 %v3502_v13, %s3178_s25 }
  0xde   : > { %1465 = vrot.lane.b32.xlu0 %v3505_v16, %s3178_s25 }
  0xdf   : > { %v3729_v31 = vpop.permute.xlu1 %1323 }
  0xe0   : > { %5510 = vst [vmem:[#allocation24_spill] sm:$0xff] %v3729_v31  ;;  %v3731_v32 = vpop.permute.xlu0 %1321 }
  0xe1   : > { %5511 = vst [vmem:[#allocation25_spill] sm:$0xff] %v3731_v32  ;;  %1471 = vrot.lane.b32.xlu1 %v3518_v21, %s3178_s25 }
  0xe2   : > { %1469 = vrot.lane.b32.xlu0 %v3521_v22, %s3178_s25 }
  0xe3   : > { %v3737_v35 = vpop.permute.xlu1 %1327 }
  0xe4   : > { %5512 = vst [vmem:[#allocation26_spill] sm:$0xff] %v3737_v35  ;;  %v3739_v25 = vpop.permute.xlu0 %1325 }
  0xe5   : > { %5513 = vst [vmem:[#allocation27_spill] sm:$0xff] %v3739_v25  ;;  %1475 = vrot.lane.b32.xlu1 %v3530_v27, %s3178_s25 }
  0xe6   : > { %1473 = vrot.lane.b32.xlu0 %v3533_v28, %s3178_s25  ;;  %s4020_s25 = scalar_lea.vmem %s5549_s4, %s3297_s16  ;;  %s4135_s16 = scalar_lea.vmem [#allocation6], %s3827_s28 }
  0xe7   : > { %v3745_v26 = vpop.permute.xlu1 %1331 }
  0xe8   : > { %v3747_v31 = vpop.permute.xlu0 %1329 }
  0xe9   : > { %5514 = vst [vmem:[#allocation28_spill] sm:$0xff] %v3747_v31  ;;  %v1527_v31 = vsel %vm1509_vm1, %v3434_v49, %v1256_v62  ;;  %v5533_v62 = vld [vmem:[#allocation19_spill] sm:$0xff] }
  0xeb   : > { %v3749_v32 = vpop.permute.xlu1 %1335 }
  0xec   : > { %5515 = vst [vmem:[#allocation29_spill] sm:$0xff] %v3749_v32  ;;  %v3751_v21 = vpop.permute.xlu0 %1333 }
  0xed   : > { %5516 = vst [vmem:[#allocation30_spill] sm:$0xff] %v3751_v21  ;;  %v1526_v21 = vsel %vm1509_vm1, %v3437_v50, %v1254_v1  ;;  %v3788_v50 = vsel %vm1509_vm1, %v3315_v5, %v3599_v36  ;;  %v3808_v5 = vsel %vm1509_vm1, %v3339_v14, %v3615_v42  ;;  %v5534_v1 = vld [vmem:[#allocation14_spill] sm:$0xff] }
  0xef   : > { %v3753_v16 = vpop.permute.xlu1 %1339 }
  0xf0   : > { %5517 = vst [vmem:[#allocation31_spill] sm:$0xff] %v3753_v16  ;;  %v3755_v22 = vpop.permute.xlu0 %1337 }
  0xf1   : > { %5518 = vst [vmem:[#allocation32_spill] sm:$0xff] %v3755_v22 }
  0xf3   : > { %v3757_v35 = vpop.permute.xlu1 %1343 }
  0xf4   : > { %5519 = vst [vmem:[#allocation33_spill] sm:$0xff] %v3757_v35  ;;  %v3759_v25 = vpop.permute.xlu0 %1341 }
  0xf5   : > { %5520 = vst [vmem:[#allocation34_spill] sm:$0xff] %v3759_v25 }
  0xf7   : > { %v3761_v27 = vpop.permute.xlu1 %1347 }
  0xf8   : > { %5521 = vst [vmem:[#allocation35_spill] sm:$0xff] %v3761_v27  ;;  %v3763_v28 = vpop.permute.xlu0 %1345  ;;  %v1529_v27 = vsel %vm1509_vm1, %v3446_v53, %v1260_v2  ;;  %v3798_v53 = vsel %vm1509_vm1, %v3328_v8, %v3607_v38  ;;  %v3818_v8 = vsel %vm1509_vm1, %v3362_v23, %v3623_v46  ;;  %v3837_v23 = vsel %vm1509_vm1, %v3378_v29, %v3631_v48  ;;  %v5529_v48 = vld [vmem:[#allocation17_spill] sm:$0xff] }
  0xf9   : > { %5522 = vst [vmem:[#allocation36_spill] sm:$0xff] %v3763_v28  ;;  %v3858_v29 = vsel %vm1509_vm1, %v3393_v34, %v3641_v55  ;;  %v3878_v34 = vsel %vm1509_vm1, %v3421_v44, %v3657_v61  ;;  %v1535_v44 = vsel %vm1509_vm1, %v3490_v7, %v3689_v18  ;;  %v5531_v55 = vld [vmem:[#allocation18_spill] sm:$0xff]  ;;  %v3927_v2 = vsel %vm1509_vm1, %v5534_v1, %v5533_v62 }
  0xfa   : > { %v5545_v62 = vld [vmem:[#allocation26_spill] sm:$0xff] }
  0xfb   : > { %v1352_v16 = vpop.permute.xlu1 %1351 }
  0xfc   : > { %v1350_v32 = vpop.permute.xlu0 %1349  ;;  %v3770_v22 = vsel %vm1542_vm2, %v1527_v31, %v1352_v16  ;;  %v3793_v16 = vsel %vm1509_vm1, %v3318_v6, %v3601_v37  ;;  %v3813_v6 = vsel %vm1509_vm1, %v3342_v15, %v3617_v45  ;;  %v3832_v15 = vsel %vm1509_vm1, %v3365_v24, %v3625_v47 }
  0xfd   : > { %v3773_v35 = vsel %vm1542_vm2, %v1526_v21, %v1350_v32  ;;  %v3803_v21 = vsel %vm1509_vm1, %v3334_v10, %v3609_v41  ;;  %v1531_v10 = vsel %vm1509_vm1, %v3462_v59, %v3673_v4  ;;  %v3853_v24 = vsel %vm1509_vm1, %v3390_v33, %v3639_v52  ;;  %v5536_v4 = vld [vmem:[#allocation15_spill] sm:$0xff] }
  0xfe   : > { %v3863_v37 = vsel %vm1509_vm1, %v3406_v39, %v3647_v56  ;;  %v3873_v33 = vsel %vm1509_vm1, %v3418_v43, %v3655_v58  ;;  %v3883_v39 = vsel %vm1509_vm1, %v3449_v54, %v3667_v3  ;;  %v1532_v43 = vsel %vm1509_vm1, %v3477_v0, %v3683_v17  ;;  %v3897_v54 = vld [vmem:[%s5526_s2] ss:$0 sm:$0xff]  ;;  %v5532_v56 = vld [vmem:[#allocation13_spill] sm:$0xff] }
  0xff   : > { %v1356_v28 = vpop.permute.xlu1 %1355  ;;  %v1537_v0 = vsel %vm1509_vm1, %v3502_v13, %v3697_v20  ;;  %v5535_v3 = vld [vmem:[#allocation20_spill] sm:$0xff] }
 0x100   : > { %v3777_v25 = vpop.permute.xlu0 %1353  ;;  %v3780_v49 = vsel %vm1542_vm2, %v1529_v27, %v1356_v28  ;;  %v1530_v27 = vsel %vm1509_vm1, %v3465_v60, %v3675_v11  ;;  %v3848_v60 = vsel %vm1509_vm1, %v3381_v30, %v3633_v51  ;;  %v3868_v30 = vsel %vm1509_vm1, %v3409_v40, %v3649_v57  ;;  %v5530_v51 = vld [vmem:[#allocation12_spill] sm:$0xff] }
 0x101   : > { %5523 = vst [vmem:[#allocation37_spill] sm:$0xff] %v3780_v49  ;;  %v1533_v40 = vsel %vm1509_vm1, %v3474_v63, %v3681_v12  ;;  %v1534_v63 = vsel %vm1509_vm1, %v3493_v9, %v3691_v19  ;;  %v1536_v52 = vsel %vm1509_vm1, %v5530_v51, %v5529_v48  ;;  %v3917_v57 = vsel %vm1509_vm1, %v5532_v56, %v5531_v55  ;;  %v5542_v51 = vld [vmem:[#allocation23_spill] sm:$0xff]  ;;  %v5543_v56 = vld [vmem:[#allocation24_spill] sm:$0xff] }
 0x102   : > { %v3932_v11 = vsel %vm1509_vm1, %v5536_v4, %v5535_v3  ;;  %v3977_v55 = vsel %vm1542_vm2, %v3793_v16, %v5542_v51  ;;  %v3995_v16 = vsel %vm1542_vm2, %v3808_v5, %v5545_v62  ;;  %v5546_v4 = vld [vmem:[#allocation27_spill] sm:$0xff] }
 0x103   : > { %v1360_v14 = vpop.permute.xlu1 %1359 }
 0x104   : > { %v1358_v28 = vpop.permute.xlu0 %1357  ;;  %v3840_v59 = vsel %vm1542_vm2, %v1531_v10, %v1360_v14  ;;  %v5537_v14 = vld [vmem:[#allocation21_spill] sm:$0xff] }
 0x105   : > { %5524 = vst [vmem:[#allocation38_spill] sm:$0xff] %v3840_v59  ;;  %v3843_v36 = vsel %vm1542_vm2, %v1530_v27, %v1358_v28  ;;  %v5538_v28 = vld [vmem:[#allocation16_spill] sm:$0xff] }
 0x106   : > { %5525 = vst [vmem:[#allocation39_spill] sm:$0xff] %v3843_v36 }
 0x107   : > { %v1364_v41 = vpop.permute.xlu1 %1363 }
 0x108   : > { %v1362_v42 = vpop.permute.xlu0 %1361  ;;  %v3906_v46 = vsel %vm1542_vm2, %v1533_v40, %v1364_v41 }
 0x109   : > { %v2667_v38 = vpop.f32.mrb[0].mxu1  ;;  %5527 = vst [vmem:[#allocation40_spill] sm:$0xff] %v3906_v46  ;;  %v3909_v7 = vsel %vm1542_vm2, %v1532_v43, %v1362_v42 }
 0x10a   : > { %v782_v45 = vadd.f32 0.1, %v2667_v38  ;;  %5528 = vst [vmem:[#allocation41_spill] sm:$0xff] %v3909_v7  ;;  %v773_v47 = vpop.f32.mrb[1].mxu1  ;;  %v2627_v61 = vpop.f32.mrb[0].mxu0  ;;  %v3945_v38 = vsel %vm1509_vm1, %v5538_v28, %v5537_v14 }
 0x10b   : > { %v774_v13 = vadd.f32 0.1, %v773_v47  ;;  %v2668_v58 = vpop.f32.mrb[2].mxu1  ;;  %v3935_v18 = vadd.f32 %v2627_v61, %v3897_v54  ;;  %v580_v19 = vpop.f32.mrb[1].mxu0 }
 0x10c   : > { %v904_v9 = vmul.f32 1.442695, %v782_v45  ;;  %1095 = vst.msk [vmem:[%s3920_s22 + $0x10] sm:$0xff] %vm1060_vm3, %v782_v45  ;;  %v785_v12 = vadd.f32 0.1, %v2668_v58  ;;  %v1368_v32 = vpop.permute.xlu1 %1367  ;;  %v1366_v10 = vpop.permute.xlu0 %1365  ;;  %v3940_v27 = vadd.f32 %v3897_v54, %v580_v19  ;;  %v5541_v45 = vld [vmem:[#allocation22_spill] sm:$0xff] }
 0x10d   : > { %v776_v17 = vpop.f32.mrb[3].mxu1  ;;  %v900_v20 = vmul.f32 1.442695, %v774_v13  ;;  %1093 = vst.msk [vmem:[%s3920_s22] sm:$0xff] %vm1060_vm3, %v774_v13  ;;  %v3950_v43 = vsel %vm1542_vm2, %v1535_v44, %v1368_v32  ;;  %v3953_v41 = vsel %vm1542_vm2, %v1534_v63, %v1366_v10  ;;  %1063 = vst.msk [vmem:[%s3956_s24 + $0x10] sm:$0xff] %vm1060_vm3, %v3935_v18  ;;  %v2628_v42 = vpop.f32.mrb[2].mxu0  ;;  %v3964_v47 = vsel %vm1542_vm2, %v3803_v21, %v5541_v45 }
 0x10e   : > { %2763 = vpow2.f32 %v904_v9  ;;  %v777_v31 = vadd.f32 0.1, %v776_v17  ;;  %v906_v40 = vmul.f32 1.442695, %v785_v12  ;;  %1096 = vst.msk [vmem:[%s3920_s22 + $0x18] sm:$0xff] %vm1060_vm3, %v785_v12  ;;  %5539 = vst [vmem:[#allocation17_spill] sm:$0xff] %v3950_v43  ;;  %v3972_v44 = vadd.f32 %v2628_v42, %v3897_v54 }
 0x10f   : > { %5540 = vst [vmem:[#allocation12_spill] sm:$0xff] %v3953_v41  ;;  %2765 = vpow2.f32 %v900_v20  ;;  %1061 = vst.msk [vmem:[%s3956_s24] sm:$0xff] %vm1060_vm3, %v3940_v27  ;;  %v583_v63 = vpop.f32.mrb[3].mxu0  ;;  %v3982_v21 = vsel %vm1542_vm2, %v3798_v53, %v5543_v56  ;;  %v5544_v58 = vld [vmem:[#allocation25_spill] sm:$0xff]  ;;  %v4003_v12 = vsel %vm1542_vm2, %v3813_v6, %v5546_v4  ;;  %v5550_v6 = vld [vmem:[#allocation28_spill] sm:$0xff] }
 0x110   : > { %v902_v48 = vmul.f32 1.442695, %v777_v31  ;;  %1094 = vst.msk [vmem:[%s3920_s22 + $0x8] sm:$0xff] %vm1060_vm3, %v777_v31  ;;  %2767 = vpow2.f32 %v906_v40  ;;  %v3985_v13 = vadd.f32 %v3897_v54, %v583_v63  ;;  %v3990_v61 = vsel %vm1542_vm2, %v3788_v50, %v5544_v58  ;;  %v1372_v53 = vpop.permute.xlu1 %1371  ;;  %v1370_v1 = vpop.permute.xlu0 %1369  ;;  %1064 = vst.msk [vmem:[%s3956_s24 + $0x18] sm:$0xff] %vm1060_vm3, %v3972_v44  ;;  %v5552_v10 = vld [vmem:[#allocation30_spill] sm:$0xff] }
 0x111   : > { %v2671_v9 = vpop.f32.mrb[4].mxu1  ;;  %v4008_v50 = vsel %vm1542_vm2, %v3818_v8, %v3745_v26  ;;  %v4011_v5 = vsel %vm1542_vm2, %v1537_v0, %v1372_v53  ;;  %v4014_v17 = vsel %vm1542_vm2, %v1536_v52, %v1370_v1  ;;  %v4028_v26 = vsel %vm1542_vm2, %v3832_v15, %v5550_v6  ;;  %v5551_v8 = vld [vmem:[#allocation29_spill] sm:$0xff]  ;;  %v5553_v15 = vld [vmem:[#allocation31_spill] sm:$0xff] }
 0x112   : > { %2769 = vpow2.f32 %v902_v48  ;;  %v798_v3 = vadd.f32 0.1, %v2671_v9  ;;  %5547 = vst [vmem:[#allocation18_spill] sm:$0xff] %v4011_v5  ;;  %5548 = vst [vmem:[#allocation13_spill] sm:$0xff] %v4014_v17  ;;  %v789_v19 = vpop.f32.mrb[5].mxu1  ;;  %v4033_v0 = vsel %vm1542_vm2, %v3837_v23, %v5551_v8  ;;  %v2631_v32 = vpop.f32.mrb[4].mxu0  ;;  %v4040_v14 = vsel %vm1542_vm2, %v3848_v60, %v5552_v10 }
 0x113   : > { %1062 = vst.msk [vmem:[%s3956_s24 + $0x8] sm:$0xff] %vm1060_vm3, %v3985_v13  ;;  %v790_v20 = vadd.f32 0.1, %v789_v19  ;;  %v2672_v31 = vpop.f32.mrb[6].mxu1  ;;  %v4045_v28 = vsel %vm1542_vm2, %v3853_v24, %v5553_v15  ;;  %v4048_v42 = vadd.f32 %v2631_v32, %v3897_v54  ;;  %v596_v45 = vpop.f32.mrb[5].mxu0  ;;  %v966_v24 = vld [vmem:[%s4020_s25 + $0x10] sm:$0xff] }
 0x114   : > { %v912_v52 = vmul.f32 1.442695, %v798_v3  ;;  %1099 = vst.msk [vmem:[%s3920_s22 + $0x30] sm:$0xff] %vm1060_vm3, %v798_v3  ;;  %v801_v23 = vadd.f32 0.1, %v2672_v31  ;;  %v1376_v63 = vpop.permute.xlu1 %1375  ;;  %v1374_v51 = vpop.permute.xlu0 %1373  ;;  %v4054_v56 = vadd.f32 %v3897_v54, %v596_v45  ;;  %v5554_v9 = vld [vmem:[#allocation32_spill] sm:$0xff] }
 0x115   : > { %v792_v40 = vpop.f32.mrb[7].mxu1  ;;  %v908_v48 = vmul.f32 1.442695, %v790_v20  ;;  %1097 = vst.msk [vmem:[%s3920_s22 + $0x20] sm:$0xff] %vm1060_vm3, %v790_v20  ;;  %v4059_v58 = vsel %vm1542_vm2, %v3858_v29, %v5554_v9  ;;  %v4065_v53 = vsel %vm1542_vm2, %v3917_v57, %v1376_v63  ;;  %v4069_v1 = vsel %vm1542_vm2, %v3927_v2, %v1374_v51  ;;  %1067 = vst.msk [vmem:[%s3956_s24 + $0x30] sm:$0xff] %vm1060_vm3, %v4048_v42  ;;  %v2632_v3 = vpop.f32.mrb[6].mxu0 }
 0x116   : > { %2771 = vpow2.f32 %v912_v52  ;;  %v793_v60 = vadd.f32 0.1, %v792_v40  ;;  %v914_v62 = vmul.f32 1.442695, %v801_v23  ;;  %1100 = vst.msk [vmem:[%s3920_s22 + $0x38] sm:$0xff] %vm1060_vm3, %v801_v23  ;;  %5555 = vst [vmem:[#allocation19_spill] sm:$0xff] %v4065_v53  ;;  %v4086_v2 = vadd.f32 %v2632_v3, %v3897_v54 }
 0x117   : > { %5556 = vst [vmem:[#allocation14_spill] sm:$0xff] %v4069_v1  ;;  %v5557_v19 = vld [vmem:[#allocation33_spill] sm:$0xff]  ;;  %2773 = vpow2.f32 %v908_v48  ;;  %v964_v57 = vld [vmem:[%s4020_s25] sm:$0xff]  ;;  %1065 = vst.msk [vmem:[%s3956_s24 + $0x20] sm:$0xff] %vm1060_vm3, %v4054_v56  ;;  %v599_v8 = vpop.f32.mrb[7].mxu0 }
 0x118   : > { %v2764_v4 = vpop.eup %2763  ;;  %v4077_v29 = vsel %vm1542_vm2, %v3863_v37, %v5557_v19  ;;  %v910_v6 = vmul.f32 1.442695, %v793_v60  ;;  %1098 = vst.msk [vmem:[%s3920_s22 + $0x28] sm:$0xff] %vm1060_vm3, %v793_v60  ;;  %v5558_v52 = vld [vmem:[#allocation34_spill] sm:$0xff]  ;;  %2775 = vpow2.f32 %v914_v62  ;;  %v967_v31 = vld [vmem:[%s4020_s25 + $0x18] sm:$0xff]  ;;  %v4095_v10 = vadd.f32 %v3897_v54, %v599_v8  ;;  %v5560_v45 = vld [vmem:[#allocation36_spill] sm:$0xff]  ;;  %v1380_v60 = vpop.permute.xlu1 %1379 }
 0x119   : > { %v4091_v20 = vsel %vm1542_vm2, %v3868_v30, %v5558_v52  ;;  %v998_v37 = vmul.f32 %v2764_v4, %v966_v24  ;;  %v2675_v32 = vpop.f32.mrb[8].mxu1  ;;  %v2766_v15 = vpop.eup %2765  ;;  %v5559_v23 = vld [vmem:[#allocation35_spill] sm:$0xff]  ;;  %v4105_v48 = vsel %vm1542_vm2, %v3878_v34, %v5560_v45  ;;  %v965_v30 = vld [vmem:[%s4020_s25 + $0x8] sm:$0xff]  ;;  %1068 = vst.msk [vmem:[%s3956_s24 + $0x38] sm:$0xff] %vm1060_vm3, %v4086_v2  ;;  %v4116_v62 = vsel %vm1542_vm2, %v3932_v11, %v1380_v60 }
 0x11a   : > { %v4100_v40 = vsel %vm1542_vm2, %v3873_v33, %v5559_v23  ;;  %2777 = vpow2.f32 %v910_v6  ;;  %v1378_v63 = vpop.permute.xlu0 %1377  ;;  %v814_v51 = vadd.f32 0.1, %v2675_v32  ;;  %v2768_v24 = vpop.eup %2767  ;;  %v996_v33 = vmul.f32 %v2766_v15, %v964_v57  ;;  %5561 = vst [vmem:[#allocation20_spill] sm:$0xff] %v4116_v62  ;;  %1066 = vst.msk [vmem:[%s3956_s24 + $0x28] sm:$0xff] %vm1060_vm3, %v4095_v10 }
 0x11b   : > { %v4112_v9 = vadd.f32 %v998_v37, %v3935_v18  ;;  %v4120_v34 = vsel %vm1542_vm2, %v3945_v38, %v1378_v63  ;;  %v805_v3 = vpop.f32.mrb[9].mxu1  ;;  %v4128_v19 = vsel %vm1542_vm2, %v3883_v39, %v3777_v25  ;;  %v999_v6 = vmul.f32 %v2768_v24, %v967_v31  ;;  %v4132_v52 = vpop.f32.mrb[8].mxu0 }
 0x11c   : > { %5562 = vst [vmem:[#allocation15_spill] sm:$0xff] %v4120_v34  ;;  %v2770_v4 = vpop.eup %2769  ;;  %5563 = vst [vmem:[#allocation21_spill] sm:$0xff] %v4128_v19  ;;  %v920_v57 = vmul.f32 1.442695, %v814_v51  ;;  %v806_v11 = vadd.f32 0.1, %v805_v3  ;;  %v4142_v25 = vadd.f32 %v996_v33, %v3940_v27  ;;  %v1416_v60 = vpop.permute.xlu1 %1415  ;;  %v4263_v59 = vadd.f32 %v4132_v52, %v3897_v54 }
 0x11d   : > { %1103 = vst.msk [vmem:[%s3920_s22 + $0x50] sm:$0xff] %vm1060_vm3, %v814_v51  ;;  %v2676_v8 = vpop.f32.mrb[10].mxu1  ;;  %1127 = vst.msk [vmem:[%s4135_s16 + $0x10] sm:$0xff] %vm1060_vm3, %v4112_v9  ;;  %v1708_v38 = vmul.f32 1.442695, %v4112_v9  ;;  %v997_v39 = vmul.f32 %v2770_v4, %v965_v30  ;;  %v4144_v32 = vpop.f32.mrb[9].mxu0  ;;  %v4147_v15 = vadd.f32 %v999_v6, %v3972_v44 }
 0x11e   : > { %v817_v37 = vadd.f32 0.1, %v2676_v8  ;;  %v808_v31 = vpop.f32.mrb[11].mxu1  ;;  %2779 = vpow2.f32 %v920_v57  ;;  %v916_v23 = vmul.f32 1.442695, %v806_v11  ;;  %v1414_v63 = vpop.permute.xlu0 %1413  ;;  %1125 = vst.msk [vmem:[%s4135_s16] sm:$0xff] %vm1060_vm3, %v4142_v25  ;;  %v4281_v52 = vadd.f32 %v3897_v54, %v4144_v32 }
 0x11f   : > { %1101 = vst.msk [vmem:[%s3920_s22 + $0x40] sm:$0xff] %vm1060_vm3, %v806_v11  ;;  %v809_v45 = vadd.f32 0.1, %v808_v31  ;;  %2781 = vpow2.f32 %v1708_v38  ;;  %v1704_v30 = vmul.f32 1.442695, %v4142_v25  ;;  %v4156_v51 = vadd.f32 %v997_v39, %v3985_v13  ;;  %v970_v33 = vld [vmem:[%s4020_s25 + $0x30] sm:$0xff] }
 0x120   : > { %v922_v24 = vmul.f32 1.442695, %v817_v37  ;;  %1104 = vst.msk [vmem:[%s3920_s22 + $0x58] sm:$0xff] %vm1060_vm3, %v817_v37  ;;  %v4161_v3 = vpop.f32.mrb[10].mxu0  ;;  %v2772_v4 = vpop.eup %2771  ;;  %1128 = vst.msk [vmem:[%s4135_s16 + $0x18] sm:$0xff] %vm1060_vm3, %v4147_v15  ;;  %2783 = vpow2.f32 %v916_v23  ;;  %v1577_v11 = vsel %vm1575_vm4, %v3964_v47, %v1416_v60  ;;  %v1576_v37 = vsel %vm1575_vm4, %v3977_v55, %v1414_v63 }
 0x121   : > { %v1710_v6 = vmul.f32 1.442695, %v4147_v15  ;;  %v918_v57 = vmul.f32 1.442695, %v809_v45  ;;  %1102 = vst.msk [vmem:[%s3920_s22 + $0x48] sm:$0xff] %vm1060_vm3, %v809_v45  ;;  %v4171_v8 = vpop.f32.mrb[11].mxu0  ;;  %2785 = vpow2.f32 %v1704_v30  ;;  %v1609_v39 = vsub.f32 %v1577_v11, %v3985_v13  ;;  %v2774_v23 = vpop.eup %2773 }
 0x122   : > { %1126 = vst.msk [vmem:[%s4135_s16 + $0x8] sm:$0xff] %vm1060_vm3, %v4156_v51  ;;  %v1706_v38 = vmul.f32 1.442695, %v4156_v51  ;;  %v2679_v31 = vpop.f32.mrb[12].mxu1  ;;  %v1608_v45 = vsub.f32 %v1576_v37, %v3940_v27  ;;  %v1002_v34 = vmul.f32 %v2772_v4, %v970_v33  ;;  %v1420_v47 = vpop.permute.xlu1 %1419  ;;  %v968_v30 = vld [vmem:[%s4020_s25 + $0x20] sm:$0xff]  ;;  %v971_v11 = vld [vmem:[%s4020_s25 + $0x38] sm:$0xff] }
 0x123   : > { %2787 = vpow2.f32 %v1710_v6  ;;  %v1418_v60 = vpop.permute.xlu0 %1417  ;;  %v830_v62 = vadd.f32 0.1, %v2679_v31  ;;  %v2776_v1 = vpop.eup %2775  ;;  %v1641_v53 = vmul.f32 %v1609_v39, %v1609_v39  ;;  %v1579_v13 = vsel %vm1575_vm4, %v3982_v21, %v1420_v47  ;;  %1071 = vst.msk [vmem:[%s3956_s24 + $0x50] sm:$0xff] %vm1060_vm3, %v4263_v59  ;;  %1069 = vst.msk [vmem:[%s3956_s24 + $0x40] sm:$0xff] %vm1060_vm3, %v4281_v52 }
 0x124   : > { %2789 = vpow2.f32 %v1706_v38  ;;  %v1578_v55 = vsel %vm1575_vm4, %v3990_v61, %v1418_v60  ;;  %v821_v63 = vpop.f32.mrb[13].mxu1  ;;  %v2778_v6 = vpop.eup %2777  ;;  %v1640_v27 = vmul.f32 %v1608_v45, %v1608_v45  ;;  %v4187_v33 = vadd.f32 %v1002_v34, %v4048_v42 }
 0x125   : > { %2791 = vpow2.f32 %v922_v24  ;;  %v1611_v4 = vsub.f32 %v1579_v13, %v3972_v44  ;;  %1107 = vst.msk [vmem:[%s3920_s22 + $0x70] sm:$0xff] %vm1060_vm3, %v830_v62  ;;  %v2680_v38 = vpop.f32.mrb[14].mxu1  ;;  %v4193_v39 = vpop.f32.mrb[12].mxu0  ;;  %v4195_v21 = vmul.f32 -0.5, %v1641_v53  ;;  %v1610_v61 = vsub.f32 %v1578_v55, %v3935_v18  ;;  %v969_v24 = vld [vmem:[%s4020_s25 + $0x28] sm:$0xff] }
 0x126   : > { %2793 = vpow2.f32 %v918_v57  ;;  %v1000_v37 = vmul.f32 %v2774_v23, %v968_v30  ;;  %v824_v31 = vpop.f32.mrb[15].mxu1  ;;  %v4199_v45 = vpop.f32.mrb[13].mxu0  ;;  %v1672_v34 = vmul.f32 -0.5, %v1640_v27  ;;  %1131 = vst.msk [vmem:[%s4135_s16 + $0x30] sm:$0xff] %vm1060_vm3, %v4187_v33  ;;  %v1716_v44 = vmul.f32 1.442695, %v4187_v33 }
 0x127   : > { %v1643_v47 = vmul.f32 %v1611_v4, %v1611_v4  ;;  %v928_v60 = vmul.f32 1.442695, %v830_v62  ;;  %v1424_v13 = vpop.permute.xlu1 %1423  ;;  %v1422_v57 = vpop.permute.xlu0 %1421  ;;  %v1642_v53 = vmul.f32 %v1610_v61, %v1610_v61  ;;  %v1003_v18 = vmul.f32 %v2776_v1, %v971_v11 }
 0x128   : > { %v4206_v17 = vadd.f32 %v1000_v37, %v4054_v56  ;;  %v822_v23 = vadd.f32 0.1, %v821_v63  ;;  %v4208_v30 = vpop.f32.mrb[14].mxu0  ;;  %v2780_v55 = vpop.eup %2779  ;;  %2795 = vpow2.f32 %v1716_v44  ;;  %v1001_v5 = vmul.f32 %v2778_v6, %v969_v24 }
 0x129   : > { %v1675_v27 = vmul.f32 -0.5, %v1643_v47  ;;  %v833_v41 = vadd.f32 0.1, %v2680_v38  ;;  %v4210_v4 = vpop.f32.mrb[15].mxu0  ;;  %v4212_v62 = vpop.eup %2781  ;;  %v4214_v43 = vmul.f32 -0.5, %v1642_v53  ;;  %2797 = vpow2.f32 %v928_v60 }
 0x12a   : > { %1129 = vst.msk [vmem:[%s4135_s16 + $0x20] sm:$0xff] %vm1060_vm3, %v4206_v17  ;;  %v1712_v1 = vmul.f32 1.442695, %v4206_v17  ;;  %v4221_v63 = vadd.f32 %v1003_v18, %v4086_v2  ;;  %1105 = vst.msk [vmem:[%s3920_s22 + $0x60] sm:$0xff] %vm1060_vm3, %v822_v23  ;;  %v2683_v6 = vpop.f32.mrb[16].mxu1  ;;  %v2784_v11 = vpop.eup %2783  ;;  %v4226_v61 = vadd.f32 %v1001_v5, %v4095_v10  ;;  %v1581_v53 = vsel %vm1575_vm4, %v3995_v16, %v1424_v13  ;;  %v974_v18 = vld [vmem:[%s4020_s25 + $0x50] sm:$0xff] }
 0x12b   : > { %v924_v38 = vmul.f32 1.442695, %v822_v23  ;;  %v930_v37 = vmul.f32 1.442695, %v833_v41  ;;  %1108 = vst.msk [vmem:[%s3920_s22 + $0x78] sm:$0xff] %vm1060_vm3, %v833_v41  ;;  %v1428_v44 = vpop.permute.xlu1 %1427  ;;  %v2786_v47 = vpop.eup %2785  ;;  %v1580_v5 = vsel %vm1575_vm4, %v4003_v12, %v1422_v57 }
 0x12c   : > { %5564 = vst [vmem:[#allocation16_spill] sm:$0xff] %v4221_v63  ;;  %5565 = vst [vmem:[#allocation22_spill] sm:$0xff] %v4226_v61  ;;  %v825_v24 = vadd.f32 0.1, %v824_v31  ;;  %2799 = vpow2.f32 %v1712_v1  ;;  %v1718_v60 = vmul.f32 1.442695, %v4221_v63  ;;  %v1426_v23 = vpop.permute.xlu0 %1425  ;;  %v4239_v31 = vmul.f32 %v2786_v47, %v1672_v34 }
 0x12d   : > { %1132 = vst.msk [vmem:[%s4135_s16 + $0x38] sm:$0xff] %vm1060_vm3, %v4221_v63  ;;  %v837_v7 = vpop.f32.mrb[17].mxu1  ;;  %v2788_v41 = vpop.eup %2787  ;;  %2801 = vpow2.f32 %v924_v38  ;;  %1130 = vst.msk [vmem:[%s4135_s16 + $0x28] sm:$0xff] %vm1060_vm3, %v4226_v61  ;;  %v1714_v1 = vmul.f32 1.442695, %v4226_v61  ;;  %v1613_v34 = vsub.f32 %v1581_v53, %v4095_v10  ;;  %v1612_v57 = vsub.f32 %v1580_v5, %v4054_v56  ;;  %v972_v5 = vld [vmem:[%s4020_s25 + $0x40] sm:$0xff] }
 0x12e   : > { %v926_v46 = vmul.f32 1.442695, %v825_v24  ;;  %1106 = vst.msk [vmem:[%s3920_s22 + $0x68] sm:$0xff] %vm1060_vm3, %v825_v24  ;;  %v4247_v36 = vpop.f32.mrb[18].mxu1  ;;  %v4249_v16 = vpop.f32.mrb[16].mxu0  ;;  %v4253_v13 = vmul.f32 %v2788_v41, %v1675_v27  ;;  %2803 = vpow2.f32 %v1718_v60  ;;  %v1006_v27 = vmul.f32 %v2780_v55, %v974_v18 }
 0x12f   : > { %v4251_v12 = vpop.eup %2789  ;;  %v4257_v38 = vpop.f32.mrb[19].mxu1  ;;  %2805 = vpow2.f32 %v1714_v1  ;;  %v1583_v60 = vsel %vm1575_vm4, %v4008_v50, %v1428_v44  ;;  %v1645_v10 = vmul.f32 %v1613_v34, %v1613_v34  ;;  %v1644_v56 = vmul.f32 %v1612_v57, %v1612_v57 }
 0x130   : > { %v4259_v47 = vpop.f32.mrb[17].mxu0  ;;  %v2792_v24 = vpop.eup %2791  ;;  %2807 = vpow2.f32 %v930_v37  ;;  %v1615_v53 = vsub.f32 %v1583_v60, %v4086_v2  ;;  %v4272_v1 = vadd.f32 %v1006_v27, %v4263_v59  ;;  %v1582_v50 = vsel %vm1575_vm4, %v4028_v26, %v1426_v23  ;;  %v975_v2 = vld [vmem:[%s4020_s25 + $0x58] sm:$0xff] }
 0x131   : > { %v2794_v41 = vpop.eup %2793  ;;  %v4269_v61 = vpop.f32.mrb[18].mxu0  ;;  %2809 = vpow2.f32 %v926_v46  ;;  %v1677_v37 = vmul.f32 -0.5, %v1645_v10  ;;  %v1676_v46 = vmul.f32 -0.5, %v1644_v56  ;;  %v1614_v18 = vsub.f32 %v1582_v50, %v4048_v42  ;;  %v973_v42 = vld [vmem:[%s4020_s25 + $0x48] sm:$0xff] }
 0x132   : > { %5566 = vst [vmem:[#allocation23_spill] sm:$0xff] %v4272_v1  ;;  %v4284_v55 = vpop.f32.mrb[19].mxu0  ;;  %v1647_v44 = vmul.f32 %v1615_v53, %v1615_v53  ;;  %v4287_v34 = vpop.f32.mrb[20].mxu1  ;;  %1135 = vst.msk [vmem:[%s4135_s16 + $0x50] sm:$0xff] %vm1060_vm3, %v4272_v1  ;;  %v1724_v26 = vmul.f32 1.442695, %v4272_v1  ;;  %v1004_v23 = vmul.f32 %v2784_v11, %v972_v5  ;;  %v4298_v27 = vadd.f32 %v4161_v3, %v3897_v54 }
 0x133   : > { %v2796_v57 = vpop.eup %2795  ;;  %v846_v32 = vadd.f32 0.1, %v2683_v6  ;;  %v1432_v60 = vpop.permute.xlu1 %1431  ;;  %v1646_v53 = vmul.f32 %v1614_v18, %v1614_v18  ;;  %v1007_v50 = vmul.f32 %v2792_v24, %v975_v2  ;;  %v838_v1 = vadd.f32 0.1, %v837_v7 }
 0x134   : > { %v4301_v10 = vpop.eup %2797  ;;  %v1679_v56 = vmul.f32 -0.5, %v1647_v44  ;;  %v1430_v11 = vpop.permute.xlu0 %1429  ;;  %2811 = vpow2.f32 %v1724_v26  ;;  %v4306_v19 = vadd.f32 %v1004_v23, %v4281_v52  ;;  %1072 = vst.msk [vmem:[%s3956_s24 + $0x58] sm:$0xff] %vm1060_vm3, %v4298_v27  ;;  %v616_v3 = vadd.f32 %v3897_v54, %v4171_v8 }
 0x135   : > { %v4303_v5 = vpop.f32.mrb[21].mxu1  ;;  %v936_v6 = vmul.f32 1.442695, %v846_v32  ;;  %1111 = vst.msk [vmem:[%s3920_s22 + $0x90] sm:$0xff] %vm1060_vm3, %v846_v32  ;;  %v4317_v7 = vpop.f32.mrb[20].mxu0  ;;  %v1678_v44 = vmul.f32 -0.5, %v1646_v53  ;;  %v4320_v18 = vadd.f32 %v1007_v50, %v4298_v27  ;;  %v1005_v23 = vmul.f32 %v2794_v41, %v973_v42 }
 0x136   : > { %5567 = vst [vmem:[#allocation24_spill] sm:$0xff] %v4306_v19  ;;  %v4315_v24 = vpop.f32.mrb[22].mxu1  ;;  %5568 = vst [vmem:[#allocation25_spill] sm:$0xff] %v4317_v7  ;;  %v2800_v2 = vpop.eup %2799  ;;  %v932_v26 = vmul.f32 1.442695, %v838_v1 }
 0x137   : > { %5569 = vst [vmem:[#allocation26_spill] sm:$0xff] %v4320_v18  ;;  %1109 = vst.msk [vmem:[%s3920_s22 + $0x80] sm:$0xff] %vm1060_vm3, %v838_v1  ;;  %v4324_v32 = vpop.f32.mrb[23].mxu1  ;;  %v4326_v49 = vpop.f32.mrb[21].mxu0  ;;  %v4330_v63 = vmul.f32 %v2800_v2, %v1676_v46  ;;  %v1720_v53 = vmul.f32 1.442695, %v4306_v19  ;;  %2813 = vpow2.f32 %v936_v6  ;;  %v4339_v42 = vmul.f32 %v2796_v57, %v1678_v44 }
 0x138   : > { %5570 = vst [vmem:[#allocation27_spill] sm:$0xff] %v4326_v49  ;;  %v4328_v8 = vpop.eup %2801  ;;  %1133 = vst.msk [vmem:[%s4135_s16 + $0x40] sm:$0xff] %vm1060_vm3, %v4306_v19  ;;  %v849_v41 = vadd.f32 0.1, %v4247_v36  ;;  %v1726_v46 = vmul.f32 1.442695, %v4320_v18  ;;  %2815 = vpow2.f32 %v932_v26  ;;  %v4345_v50 = vadd.f32 %v1005_v23, %v616_v3  ;;  %v1436_v44 = vpop.permute.xlu1 %1435 }
 0x139   : > { %1070 = vst.msk [vmem:[%s3956_s24 + $0x48] sm:$0xff] %vm1060_vm3, %v616_v3  ;;  %v2804_v1 = vpop.eup %2803  ;;  %1136 = vst.msk [vmem:[%s4135_s16 + $0x58] sm:$0xff] %vm1060_vm3, %v4320_v18  ;;  %v4347_v2 = vpop.f32.mrb[22].mxu0  ;;  %2817 = vpow2.f32 %v1720_v53  ;;  %v841_v36 = vadd.f32 0.1, %v4257_v38  ;;  %v978_v57 = vld [vmem:[%s4020_s25 + $0x70] sm:$0xff]  ;;  %v1585_v23 = vsel %vm1575_vm4, %v4033_v0, %v1432_v60  ;;  %v4376_v0 = vadd.f32 %v4193_v39, %v3897_v54 }
 0x13a   : > { %5571 = vst [vmem:[#allocation28_spill] sm:$0xff] %v4345_v50  ;;  %v2806_v6 = vpop.eup %2805  ;;  %v4349_v19 = vmul.f32 %v2804_v1, %v1679_v56  ;;  %v938_v49 = vmul.f32 1.442695, %v849_v41  ;;  %1112 = vst.msk [vmem:[%s3920_s22 + $0x98] sm:$0xff] %vm1060_vm3, %v849_v41  ;;  %v4355_v7 = vpop.f32.mrb[23].mxu0  ;;  %2819 = vpow2.f32 %v1726_v46  ;;  %v1584_v46 = vsel %vm1575_vm4, %v4040_v14, %v1430_v11 }
 0x13b   : > { %v2808_v18 = vpop.eup %2807  ;;  %v4357_v26 = vmul.f32 %v2806_v6, %v1677_v37  ;;  %1134 = vst.msk [vmem:[%s4135_s16 + $0x48] sm:$0xff] %vm1060_vm3, %v4345_v50  ;;  %v1722_v56 = vmul.f32 1.442695, %v4345_v50  ;;  %v1434_v53 = vpop.permute.xlu0 %1433  ;;  %v934_v1 = vmul.f32 1.442695, %v841_v36  ;;  %1110 = vst.msk [vmem:[%s3920_s22 + $0x88] sm:$0xff] %vm1060_vm3, %v841_v36  ;;  %v1617_v37 = vsub.f32 %v1585_v23, %v616_v3 }
 0x13c   : > { %v4365_v41 = vpop.f32.mrb[24].mxu1  ;;  %v4367_v38 = vpop.eup %2809  ;;  %2821 = vpow2.f32 %v938_v49  ;;  %v1616_v6 = vsub.f32 %v1584_v46, %v4281_v52  ;;  %v1010_v60 = vmul.f32 %v4301_v10, %v978_v57  ;;  %v1587_v3 = vsel %vm1575_vm4, %v4045_v28, %v1436_v44  ;;  %1075 = vst.msk [vmem:[%s3956_s24 + $0x70] sm:$0xff] %vm1060_vm3, %v4376_v0  ;;  %v976_v57 = vld [vmem:[%s4020_s25 + $0x60] sm:$0xff] }
 0x13d   : > { %2823 = vpow2.f32 %v1722_v56  ;;  %v4379_v50 = vpop.f32.mrb[25].mxu1  ;;  %v1649_v49 = vmul.f32 %v1617_v37, %v1617_v37  ;;  %v1586_v14 = vsel %vm1575_vm4, %v4059_v58, %v1434_v53  ;;  %v4387_v52 = vpop.f32.mrb[24].mxu0  ;;  %v1619_v10 = vsub.f32 %v1587_v3, %v4298_v27  ;;  %v979_v27 = vld [vmem:[%s4020_s25 + $0x78] sm:$0xff] }
 0x13e   : > { %2825 = vpow2.f32 %v934_v1  ;;  %v4385_v11 = vpop.f32.mrb[26].mxu1  ;;  %v1648_v39 = vmul.f32 %v1616_v6, %v1616_v6  ;;  %v4390_v36 = vadd.f32 %v1010_v60, %v4376_v0  ;;  %v1618_v28 = vsub.f32 %v1586_v14, %v4263_v59  ;;  %v4400_v58 = vpop.f32.mrb[25].mxu0 }
 0x13f   : > { %v4398_v44 = vpop.f32.mrb[27].mxu1  ;;  %v2812_v56 = vpop.eup %2811  ;;  %v1681_v23 = vmul.f32 -0.5, %v1649_v49  ;;  %v862_v53 = vadd.f32 0.1, %v4287_v34  ;;  %v1770_v1 = vmul.f32 %v4212_v62, %v4214_v43  ;;  %v4407_v37 = vadd.f32 %v3897_v54, %v4199_v45 }
 0x140   : > { %v1680_v59 = vmul.f32 -0.5, %v1648_v39  ;;  %1139 = vst.msk [vmem:[%s4135_s16 + $0x70] sm:$0xff] %vm1060_vm3, %v4390_v36  ;;  %v1732_v46 = vmul.f32 1.442695, %v4390_v36  ;;  %v1651_v6 = vmul.f32 %v1619_v10, %v1619_v10  ;;  %v1650_v60 = vmul.f32 %v1618_v28, %v1618_v28  ;;  %v4414_v49 = vpop.f32.mrb[26].mxu0 }
 0x141   : > { %5572 = vst [vmem:[#allocation29_spill] sm:$0xff] %v4414_v49  ;;  %v4416_v3 = vpop.eup %2813  ;;  %v944_v34 = vmul.f32 1.442695, %v862_v53  ;;  %1115 = vst.msk [vmem:[%s3920_s22 + $0xb0] sm:$0xff] %vm1060_vm3, %v862_v53  ;;  %v1802_v43 = vsub.f32 %v1770_v1, %v4112_v9  ;;  %v1008_v45 = vmul.f32 %v4328_v8, %v976_v57  ;;  %v4427_v62 = vadd.f32 %v4208_v30, %v3897_v54  ;;  %v4429_v14 = vpop.f32.mrb[27].mxu0  ;;  %v977_v1 = vld [vmem:[%s4020_s25 + $0x68] sm:$0xff] }
 0x142   : > { %1073 = vst.msk [vmem:[%s3956_s24 + $0x60] sm:$0xff] %vm1060_vm3, %v4407_v37  ;;  %5573 = vst [vmem:[#allocation30_spill] sm:$0xff] %v4429_v14  ;;  %v4431_v39 = vpop.eup %2815  ;;  %2827 = vpow2.f32 %v1732_v46  ;;  %v1683_v10 = vmul.f32 -0.5, %v1651_v6  ;;  %v1682_v28 = vmul.f32 -0.5, %v1650_v60  ;;  %v1011_v53 = vmul.f32 %v2808_v18, %v979_v27  ;;  %v4433_v49 = vpop.f32.mrb[28].mxu1 }
 0x143   : > { %v2818_v9 = vpop.eup %2817  ;;  %2829 = vpow2.f32 %v944_v34  ;;  %v4435_v8 = vadd.f32 1.1447299, %v1802_v43  ;;  %v4438_v57 = vadd.f32 %v1008_v45, %v4407_v37  ;;  %1076 = vst.msk [vmem:[%s3956_s24 + $0x78] sm:$0xff] %vm1060_vm3, %v4427_v62  ;;  %v854_v30 = vadd.f32 0.1, %v4303_v5  ;;  %v1440_v46 = vpop.permute.xlu1 %1439 }
 0x144   : > { %v2820_v6 = vpop.eup %2819  ;;  %v4445_v18 = vmul.f32 %v2818_v9, %v1680_v59  ;;  %v4447_v27 = vmul.f32 %v2812_v56, %v1682_v28  ;;  %v4450_v60 = vadd.f32 %v1011_v53, %v4427_v62  ;;  %v632_v34 = vadd.f32 %v3897_v54, %v4210_v4  ;;  %v1438_v43 = vpop.permute.xlu0 %1437 }
 0x145   : > { %5574 = vst [vmem:[#allocation31_spill] sm:$0xff] %v4435_v8  ;;  %5575 = vst [vmem:[#allocation32_spill] sm:$0xff] %v4438_v57  ;;  %v4454_v45 = vpop.f32.mrb[29].mxu1  ;;  %v4458_v14 = vmul.f32 %v2820_v6, %v1683_v10  ;;  %v1870_v59 = vsel %vm1060_vm3, %v4435_v8, -inf  ;;  %v1728_v56 = vmul.f32 1.442695, %v4438_v57  ;;  %v1009_v9 = vmul.f32 %v4367_v38, %v977_v1 }
 0x146   : > { %5576 = vst [vmem:[#allocation33_spill] sm:$0xff] %v4450_v60  ;;  %v4456_v5 = vpop.eup %2821  ;;  %1137 = vst.msk [vmem:[%s4135_s16 + $0x60] sm:$0xff] %vm1060_vm3, %v4438_v57  ;;  %v940_v28 = vmul.f32 1.442695, %v854_v30  ;;  %v4468_v4 = vpop.f32.mrb[30].mxu1  ;;  %1871 = vmax.xlane.f32.xlu0 %v1870_v59  ;;  %v1769_v59 = vmul.f32 %v4251_v12, %v4195_v21 }
 0x147   : > { %1113 = vst.msk [vmem:[%s3920_s22 + $0xa0] sm:$0xff] %vm1060_vm3, %v854_v30  ;;  %v2824_v53 = vpop.eup %2823  ;;  %1140 = vst.msk [vmem:[%s4135_s16 + $0x78] sm:$0xff] %vm1060_vm3, %v4450_v60  ;;  %v1734_v10 = vmul.f32 1.442695, %v4450_v60  ;;  %v865_v6 = vadd.f32 0.1, %v4315_v24  ;;  %2831 = vpow2.f32 %v1728_v56  ;;  %v1589_v60 = vsel %vm1575_vm4, %v4077_v29, %v1440_v46  ;;  %v1444_v56 = vpop.permute.xlu1 %1443 }
 0x148   : > { %1074 = vst.msk [vmem:[%s3956_s24 + $0x68] sm:$0xff] %vm1060_vm3, %v632_v34  ;;  %v857_v8 = vadd.f32 0.1, %v4324_v32  ;;  %v4479_v30 = vpop.eup %2825  ;;  %v4481_v57 = vmul.f32 %v2824_v53, %v1681_v23  ;;  %v4487_v38 = vpop.f32.mrb[31].mxu1  ;;  %v4489_v1 = vadd.f32 %v1009_v9, %v632_v34  ;;  %v1801_v21 = vsub.f32 %v1769_v59, %v4156_v51  ;;  %v982_v46 = vld [vmem:[%s4020_s25 + $0x90] sm:$0xff] }
 0x149   : > { %2833 = vpow2.f32 %v1734_v10  ;;  %v946_v24 = vmul.f32 1.442695, %v865_v6  ;;  %1116 = vst.msk [vmem:[%s3920_s22 + $0xb8] sm:$0xff] %vm1060_vm3, %v865_v6  ;;  %v4495_v23 = vpop.f32.mrb[28].mxu0  ;;  %v1621_v12 = vsub.f32 %v1589_v60, %v632_v34  ;;  %v1588_v29 = vsel %vm1575_vm4, %v4091_v20, %v1438_v43  ;;  %v1442_v60 = vpop.permute.xlu0 %1441 }
 0x14a   : > { %v942_v32 = vmul.f32 1.442695, %v857_v8  ;;  %1114 = vst.msk [vmem:[%s3920_s22 + $0xa8] sm:$0xff] %vm1060_vm3, %v857_v8  ;;  %2835 = vpow2.f32 %v940_v28  ;;  %v4501_v53 = vpop.f32.mrb[29].mxu0  ;;  %1138 = vst.msk [vmem:[%s4135_s16 + $0x68] sm:$0xff] %vm1060_vm3, %v4489_v1  ;;  %v1620_v8 = vsub.f32 %v1588_v29, %v4407_v37  ;;  %v1800_v51 = vsub.f32 %v4239_v31, %v4142_v25  ;;  %v980_v31 = vld [vmem:[%s4020_s25 + $0x80] sm:$0xff] }
 0x14b   : > { %v1730_v10 = vmul.f32 1.442695, %v4489_v1  ;;  %2837 = vpow2.f32 %v946_v24  ;;  %v4510_v34 = vpop.f32.mrb[30].mxu0  ;;  %v4512_v20 = vadd.f32 1.1447299, %v1801_v21  ;;  %v1653_v43 = vmul.f32 %v1621_v12, %v1621_v12 }
 0x14c   : > { %2839 = vpow2.f32 %v942_v32  ;;  %v4516_v28 = vadd.f32 %v4249_v16, %v3897_v54  ;;  %v4518_v9 = vpop.f32.mrb[31].mxu0  ;;  %v2828_v6 = vpop.eup %2827  ;;  %v1652_v37 = vmul.f32 %v1620_v8, %v1620_v8  ;;  %v4520_v59 = vadd.f32 1.1447299, %v1800_v51 }
 0x14d   : > { %2841 = vpow2.f32 %v1730_v10  ;;  %v1014_v25 = vmul.f32 %v4416_v3, %v982_v46  ;;  %v4524_v24 = vpop.eup %2829  ;;  %v1867_v32 = vsel %vm1060_vm3, %v4512_v20, -inf  ;;  %v1685_v21 = vmul.f32 -0.5, %v1653_v43 }
 0x14e   : > { %1079 = vst.msk [vmem:[%s3956_s24 + $0x90] sm:$0xff] %vm1060_vm3, %v4516_v28  ;;  %v1591_v16 = vsel %vm1575_vm4, %v4100_v40, %v1444_v56  ;;  %v1590_v12 = vsel %vm1575_vm4, %v4105_v48, %v1442_v60  ;;  %1868 = vmax.xlane.f32.xlu1 %v1867_v32  ;;  %v1684_v29 = vmul.f32 -0.5, %v1652_v37  ;;  %v1864_v3 = vsel %vm1060_vm3, %v4520_v59, -inf }
 0x14f   : > { %v4538_v46 = vadd.f32 %v1014_v25, %v4516_v28  ;;  %v1623_v10 = vsub.f32 %v1591_v16, %v4427_v62  ;;  %1865 = vmax.xlane.f32.xlu0 %v1864_v3  ;;  %v1622_v8 = vsub.f32 %v1590_v12, %v4376_v0  ;;  %v4544_v40 = vadd.f32 %v3897_v54, %v4259_v47 }
 0x150   : > { %v1012_v48 = vmul.f32 %v4431_v39, %v980_v31  ;;  %v878_v56 = vadd.f32 0.1, %v4365_v41  ;;  %v1806_v62 = vsub.f32 %v4339_v42, %v4187_v33  ;;  %v1803_v0 = vsub.f32 %v4253_v13, %v4147_v15  ;;  %v983_v42 = vld [vmem:[%s4020_s25 + $0x98] sm:$0xff] }
 0x151   : > { %1143 = vst.msk [vmem:[%s4135_s16 + $0x90] sm:$0xff] %vm1060_vm3, %v4538_v46  ;;  %v1740_v51 = vmul.f32 1.442695, %v4538_v46  ;;  %v1655_v60 = vmul.f32 %v1623_v10, %v1623_v10  ;;  %v2832_v43 = vpop.eup %2831  ;;  %v1654_v47 = vmul.f32 %v1622_v8, %v1622_v8  ;;  %1077 = vst.msk [vmem:[%s3956_s24 + $0x80] sm:$0xff] %vm1060_vm3, %v4544_v40  ;;  %v4566_v33 = vadd.f32 %v4269_v61, %v3897_v54  ;;  %v981_v54 = vld [vmem:[%s4020_s25 + $0x88] sm:$0xff]  ;;  %v1448_v61 = vpop.permute.xlu1 %1447 }
 0x152   : > { %v4557_v37 = vadd.f32 %v1012_v48, %v4544_v40  ;;  %v952_v41 = vmul.f32 1.442695, %v878_v56  ;;  %1119 = vst.msk [vmem:[%s3920_s22 + $0xd0] sm:$0xff] %vm1060_vm3, %v878_v56  ;;  %v4569_v13 = vmul.f32 %v2832_v43, %v1684_v29  ;;  %v4571_v25 = vadd.f32 1.1447299, %v1806_v62  ;;  %v1446_v56 = vpop.permute.xlu0 %1445 }
 0x153   : > { %v2834_v15 = vpop.eup %2833  ;;  %2843 = vpow2.f32 %v1740_v51  ;;  %v1687_v39 = vmul.f32 -0.5, %v1655_v60  ;;  %v1686_v32 = vmul.f32 -0.5, %v1654_v47  ;;  %v4579_v12 = vadd.f32 1.1447299, %v1803_v0  ;;  %1080 = vst.msk [vmem:[%s3956_s24 + $0x98] sm:$0xff] %vm1060_vm3, %v4566_v33 }
 0x154   : > { %v4573_v31 = vpop.eup %2835  ;;  %1141 = vst.msk [vmem:[%s4135_s16 + $0x80] sm:$0xff] %vm1060_vm3, %v4557_v37  ;;  %v1736_v16 = vmul.f32 1.442695, %v4557_v37  ;;  %2845 = vpow2.f32 %v952_v41  ;;  %v1882_v10 = vsel %vm1060_vm3, %v4571_v25, -inf  ;;  %v1015_v8 = vmul.f32 %v4456_v5, %v983_v42  ;;  %v4602_v0 = vld [vmem:[%s5526_s2] ss:$0 sm:$0xff] }
 0x155   : > { %v4585_v29 = vpop.eup %2837  ;;  %v4587_v3 = vmul.f32 %v2834_v15, %v1687_v39  ;;  %v870_v48 = vadd.f32 0.1, %v4379_v50  ;;  %v4595_v60 = vmul.f32 %v2828_v6, %v1686_v32  ;;  %1883 = vmax.xlane.f32.xlu1 %v1882_v10  ;;  %v1873_v62 = vsel %vm1060_vm3, %v4579_v12, -inf  ;;  %v5577_v10 = vld [vmem:[#allocation16_spill] sm:$0xff]  ;;  %s3020_s2 = scalar_lea.vmem %s5206_s14, 4096 }
 0x156   : > { %v4593_v51 = vpop.eup %2839  ;;  %2847 = vpow2.f32 %v1736_v16  ;;  %v648_v50 = vadd.f32 %v4602_v0, %v4284_v55  ;;  %1874 = vmax.xlane.f32.xlu0 %v1873_v62  ;;  %v4607_v6 = vadd.f32 %v1015_v8, %v4566_v33  ;;  %v1013_v47 = vmul.f32 %v4479_v30, %v981_v54  ;;  %v986_v16 = vld [vmem:[%s4020_s25 + $0xb0] sm:$0xff]  ;;  %v1452_v54 = vpop.permute.xlu1 %1451  ;;  %p3021_p11 = scmp.ne.s32.totalorder %s5206_s14, %s3020_s2 }
 0x157   : > { %v2842_v5 = vpop.eup %2841  ;;  %v948_v43 = vmul.f32 1.442695, %v870_v48  ;;  %1117 = vst.msk [vmem:[%s3920_s22 + $0xc0] sm:$0xff] %vm1060_vm3, %v870_v48  ;;  %v881_v41 = vadd.f32 0.1, %v4385_v11  ;;  %v1593_v15 = vsel %vm1575_vm4, %v3770_v22, %v1448_v61  ;;  %v1592_v39 = vsel %vm1575_vm4, %v3773_v35, %v1446_v56  ;;  %v5578_v48 = vld [vmem:[#allocation25_spill] sm:$0xff]  ;;  %v1450_v62 = vpop.permute.xlu0 %1449 }
 0x158   : > { %v4613_v42 = vmul.f32 %v2842_v5, %v1685_v21  ;;  %1078 = vst.msk [vmem:[%s3956_s24 + $0x88] sm:$0xff] %vm1060_vm3, %v648_v50  ;;  %v873_v55 = vadd.f32 0.1, %v4398_v44  ;;  %1144 = vst.msk [vmem:[%s4135_s16 + $0x98] sm:$0xff] %vm1060_vm3, %v4607_v6  ;;  %v1742_v30 = vmul.f32 1.442695, %v4607_v6  ;;  %v4626_v11 = vadd.f32 %v1013_v47, %v648_v50  ;;  %p3022_p12 = pnand %p3021_p11, %p3274_p5 }
 0x159   : > { %2849 = vpow2.f32 %v948_v43  ;;  %v954_v21 = vmul.f32 1.442695, %v881_v41  ;;  %1120 = vst.msk [vmem:[%s3920_s22 + $0xd8] sm:$0xff] %vm1060_vm3, %v881_v41  ;;  %v1625_v44 = vsub.f32 %v1593_v15, %v648_v50  ;;  %v1624_v22 = vsub.f32 %v1592_v39, %v4544_v40  ;;  %v984_v41 = vld [vmem:[%s4020_s25 + $0xa0] sm:$0xff] }
 0x15a   : > { %v950_v32 = vmul.f32 1.442695, %v873_v55  ;;  %1118 = vst.msk [vmem:[%s3920_s22 + $0xc8] sm:$0xff] %vm1060_vm3, %v873_v55  ;;  %v1804_v35 = vsub.f32 %v4330_v63, %v4206_v17  ;;  %2851 = vpow2.f32 %v1742_v30  ;;  %1142 = vst.msk [vmem:[%s4135_s16 + $0x88] sm:$0xff] %vm1060_vm3, %v4626_v11  ;;  %v1738_v61 = vmul.f32 1.442695, %v4626_v11  ;;  %p3023_p13 = pneg %p3022_p12 }
 0x15b   : > { %v1807_v8 = vsub.f32 %v4349_v19, %v5577_v10  ;;  %v4644_v56 = vadd.f32 %v4602_v0, %v5578_v48  ;;  %2853 = vpow2.f32 %v954_v21  ;;  %v1657_v40 = vmul.f32 %v1625_v44, %v1625_v44  ;;  %v5579_v19 = vld [vmem:[#allocation37_spill] sm:$0xff] }
 0x15c   : > { %v1656_v17 = vmul.f32 %v1624_v22, %v1624_v22  ;;  %v4646_v63 = vadd.f32 1.1447299, %v1804_v35  ;;  %2855 = vpow2.f32 %v1738_v61  ;;  %v1018_v43 = vmul.f32 %v4524_v24, %v986_v16  ;;  %v5580_v22 = vld [vmem:[#allocation21_spill] sm:$0xff] }
 0x15d   : > { %v2844_v50 = vpop.eup %2843  ;;  %v4648_v5 = vadd.f32 1.1447299, %v1807_v8  ;;  %1083 = vst.msk [vmem:[%s3956_s24 + $0xb0] sm:$0xff] %vm1060_vm3, %v4644_v56  ;;  %v1595_v47 = vsel %vm1575_vm4, %v5579_v19, %v1452_v54  ;;  %2857 = vpow2.f32 %v950_v32  ;;  %v1689_v15 = vmul.f32 -0.5, %v1657_v40  ;;  %v5581_v54 = vld [vmem:[#allocation27_spill] sm:$0xff] }
 0x15e   : > { %v4657_v55 = vpop.eup %2845  ;;  %v1688_v39 = vmul.f32 -0.5, %v1656_v17  ;;  %v1876_v30 = vsel %vm1060_vm3, %v4646_v63, -inf  ;;  %v4664_v21 = vadd.f32 %v1018_v43, %v4644_v56  ;;  %v1627_v44 = vsub.f32 %v1595_v47, %v4566_v33  ;;  %v5582_v17 = vld [vmem:[#allocation23_spill] sm:$0xff] }
 0x15f   : > { %1877 = vmax.xlane.f32.xlu1 %v1876_v30  ;;  %v1885_v24 = vsel %vm1060_vm3, %v4648_v5, -inf  ;;  %v1594_v35 = vsel %vm1575_vm4, %v5580_v22, %v1450_v62  ;;  %v661_v61 = vadd.f32 %v4602_v0, %v5581_v54  ;;  %v1016_v10 = vmul.f32 %v4573_v31, %v984_v41  ;;  %v987_v47 = vld [vmem:[%s4020_s25 + $0xb8] sm:$0xff]  ;;  %v985_v22 = vld [vmem:[%s4020_s25 + $0xa8] sm:$0xff] }
 0x160   : > { %v2848_v32 = vpop.eup %2847  ;;  %1886 = vmax.xlane.f32.xlu0 %v1885_v24  ;;  %v1626_v16 = vsub.f32 %v1594_v35, %v4516_v28  ;;  %v894_v8 = vadd.f32 0.1, %v4433_v49  ;;  %1147 = vst.msk [vmem:[%s4135_s16 + $0xb0] sm:$0xff] %vm1060_vm3, %v4664_v21  ;;  %v1748_v33 = vmul.f32 1.442695, %v4664_v21  ;;  %v1659_v40 = vmul.f32 %v1627_v44, %v1627_v44  ;;  %v5583_v49 = vld [vmem:[#allocation22_spill] sm:$0xff]  ;;  %v1456_v35 = vpop.permute.xlu1 %1455 }
 0x161   : > { %v4674_v48 = vmul.f32 %v2848_v32, %v1688_v39  ;;  %v1810_v62 = vsub.f32 %v4447_v27, %v5582_v17  ;;  %v4682_v43 = vadd.f32 %v1016_v10, %v661_v61  ;;  %1081 = vst.msk [vmem:[%s3956_s24 + $0xa0] sm:$0xff] %vm1060_vm3, %v661_v61  ;;  %v1805_v19 = vsub.f32 %v4357_v26, %v5583_v49 }
 0x162   : > { %v1658_v28 = vmul.f32 %v1626_v16, %v1626_v16  ;;  %v960_v31 = vmul.f32 1.442695, %v894_v8  ;;  %1123 = vst.msk [vmem:[%s3920_s22 + $0xf0] sm:$0xff] %vm1060_vm3, %v894_v8  ;;  %2859 = vpow2.f32 %v1748_v33  ;;  %v1691_v39 = vmul.f32 -0.5, %v1659_v40  ;;  %v1454_v8 = vpop.permute.xlu0 %1453 }
 0x163   : > { %v4691_v41 = vpop.eup %2849  ;;  %v4693_v30 = vadd.f32 1.1447299, %v1810_v62  ;;  %v4697_v27 = vadd.f32 %v4602_v0, %v4347_v2  ;;  %1145 = vst.msk [vmem:[%s4135_s16 + $0xa0] sm:$0xff] %vm1060_vm3, %v4682_v43  ;;  %v1744_v44 = vmul.f32 1.442695, %v4682_v43  ;;  %v1019_v54 = vmul.f32 %v4585_v29, %v987_v47  ;;  %v5584_v47 = vld [vmem:[#allocation38_spill] sm:$0xff] }
 0x164   : > { %v1690_v24 = vmul.f32 -0.5, %v1658_v28  ;;  %2861 = vpow2.f32 %v960_v31  ;;  %v4703_v26 = vadd.f32 1.1447299, %v1805_v19  ;;  %v2852_v32 = vpop.eup %2851  ;;  %v886_v2 = vadd.f32 0.1, %v4454_v45 }
 0x165   : > { %v1894_v16 = vsel %vm1060_vm3, %v4693_v30, -inf  ;;  %1084 = vst.msk [vmem:[%s3956_s24 + $0xb8] sm:$0xff] %vm1060_vm3, %v4697_v27  ;;  %v664_v10 = vadd.f32 %v4602_v0, %v4355_v7  ;;  %v4715_v33 = vpop.eup %2853  ;;  %v4717_v40 = vmul.f32 %v2852_v32, %v1691_v39  ;;  %2863 = vpow2.f32 %v1744_v44  ;;  %v5586_v32 = vld [vmem:[#allocation24_spill] sm:$0xff] }
 0x166   : > { %v4719_v17 = vmul.f32 %v2844_v50, %v1690_v24  ;;  %1895 = vmax.xlane.f32.xlu1 %v1894_v16  ;;  %v1879_v29 = vsel %vm1060_vm3, %v4703_v26, -inf  ;;  %v2856_v62 = vpop.eup %2855  ;;  %v4724_v45 = vadd.f32 %v1019_v54, %v4697_v27  ;;  %v956_v7 = vmul.f32 1.442695, %v886_v2  ;;  %1121 = vst.msk [vmem:[%s3920_s22 + $0xe0] sm:$0xff] %vm1060_vm3, %v886_v2  ;;  %v5585_v24 = vld [vmem:[#allocation39_spill] sm:$0xff]  ;;  %v990_v54 = vld [vmem:[%s4020_s25 + $0xd0] sm:$0xff]  ;;  %v1460_v2 = vpop.permute.xlu1 %1459 }
 0x167   : > { %1880 = vmax.xlane.f32.xlu0 %v1879_v29  ;;  %v1017_v28 = vmul.f32 %v4593_v51, %v985_v22  ;;  %1082 = vst.msk [vmem:[%s3956_s24 + $0xa8] sm:$0xff] %vm1060_vm3, %v664_v10  ;;  %v897_v50 = vadd.f32 0.1, %v4468_v4  ;;  %v4732_v31 = vpop.eup %2857  ;;  %v4734_v49 = vmul.f32 %v2856_v62, %v1689_v15  ;;  %v889_v19 = vadd.f32 0.1, %v4487_v38  ;;  %v5587_v29 = vld [vmem:[#allocation26_spill] sm:$0xff] }
 0x168   : > { %v1597_v39 = vsel %vm1575_vm4, %v5584_v47, %v1456_v35  ;;  %v1596_v44 = vsel %vm1575_vm4, %v5585_v24, %v1454_v8  ;;  %1148 = vst.msk [vmem:[%s4135_s16 + $0xb8] sm:$0xff] %vm1060_vm3, %v4724_v45  ;;  %v1750_v51 = vmul.f32 1.442695, %v4724_v45  ;;  %2865 = vpow2.f32 %v956_v7 }
 0x169   : > { %v4745_v4 = vadd.f32 %v1017_v28, %v664_v10  ;;  %v962_v22 = vmul.f32 1.442695, %v897_v50  ;;  %1124 = vst.msk [vmem:[%s3920_s22 + $0xf8] sm:$0xff] %vm1060_vm3, %v897_v50  ;;  %v958_v15 = vmul.f32 1.442695, %v889_v19  ;;  %1122 = vst.msk [vmem:[%s3920_s22 + $0xe8] sm:$0xff] %vm1060_vm3, %v889_v19  ;;  %v1629_v38 = vsub.f32 %v1597_v39, %v664_v10  ;;  %v1458_v28 = vpop.permute.xlu0 %1457 }
 0x16a   : > { %v1628_v35 = vsub.f32 %v1596_v44, %v661_v61  ;;  %v1808_v16 = vsub.f32 %v4445_v18, %v5586_v32  ;;  %2867 = vpow2.f32 %v1750_v51  ;;  %v1811_v62 = vsub.f32 %v4458_v14, %v5587_v29  ;;  %v5588_v14 = vld [vmem:[#allocation40_spill] sm:$0xff]  ;;  %v5589_v32 = vld [vmem:[#allocation41_spill] sm:$0xff] }
 0x16b   : > { %1146 = vst.msk [vmem:[%s4135_s16 + $0xa8] sm:$0xff] %vm1060_vm3, %v4745_v4  ;;  %v1746_v8 = vmul.f32 1.442695, %v4745_v4  ;;  %v4762_v10 = vadd.f32 %v4602_v0, %v4387_v52  ;;  %2869 = vpow2.f32 %v962_v22  ;;  %v1661_v61 = vmul.f32 %v1629_v38, %v1629_v38  ;;  %v988_v52 = vld [vmem:[%s4020_s25 + $0xc0] sm:$0xff] }
 0x16c   : > { %v1660_v18 = vmul.f32 %v1628_v35, %v1628_v35  ;;  %v4764_v7 = vadd.f32 1.1447299, %v1808_v16  ;;  %v2860_v50 = vpop.eup %2859  ;;  %v4766_v19 = vadd.f32 1.1447299, %v1811_v62  ;;  %v1022_v47 = vmul.f32 %v4657_v55, %v990_v54  ;;  %v991_v62 = vld [vmem:[%s4020_s25 + $0xd8] sm:$0xff] }
 0x16d   : > { %2871 = vpow2.f32 %v1746_v8  ;;  %1087 = vst.msk [vmem:[%s3956_s24 + $0xd0] sm:$0xff] %vm1060_vm3, %v4762_v10  ;;  %v1599_v39 = vsel %vm1575_vm4, %v5588_v14, %v1460_v2  ;;  %v1693_v44 = vmul.f32 -0.5, %v1661_v61  ;;  %v1598_v16 = vsel %vm1575_vm4, %v5589_v32, %v1458_v28  ;;  %v1464_v61 = vpop.permute.xlu1 %1463  ;;  %v5590_v28 = vld [vmem:[#allocation28_spill] sm:$0xff] }
 0x16e   : > { %v4775_v24 = vpop.eup %2861  ;;  %2873 = vpow2.f32 %v958_v15  ;;  %v1692_v51 = vmul.f32 -0.5, %v1660_v18  ;;  %v1888_v22 = vsel %vm1060_vm3, %v4764_v7, -inf  ;;  %v1897_v55 = vsel %vm1060_vm3, %v4766_v19, -inf }
 0x16f   : > { %1889 = vmax.xlane.f32.xlu1 %v1888_v22  ;;  %v4782_v38 = vadd.f32 %v1022_v47, %v4762_v10  ;;  %v1631_v35 = vsub.f32 %v1599_v39, %v4697_v27  ;;  %v2864_v15 = vpop.eup %2863  ;;  %1898 = vmax.xlane.f32.xlu0 %v1897_v55  ;;  %v1630_v54 = vsub.f32 %v1598_v16, %v4644_v56  ;;  %v989_v39 = vld [vmem:[%s4020_s25 + $0xc8] sm:$0xff] }
 0x170   : > { %v677_v2 = vadd.f32 %v4602_v0, %v4400_v58  ;;  %v1020_v8 = vmul.f32 %v4691_v41, %v988_v52  ;;  %v1814_v29 = vsub.f32 %v4595_v60, %v4390_v36  ;;  %v4794_v27 = vmul.f32 %v2864_v15, %v1692_v51  ;;  %v5592_v60 = vld [vmem:[#allocation29_spill] sm:$0xff]  ;;  %v1462_v52 = vpop.permute.xlu0 %1461  ;;  %v5594_v15 = vld [vmem:[#allocation30_spill] sm:$0xff] }
 0x171   : > { %1151 = vst.msk [vmem:[%s4135_s16 + $0xd0] sm:$0xff] %vm1060_vm3, %v4782_v38  ;;  %v1756_v18 = vmul.f32 1.442695, %v4782_v38  ;;  %v1663_v56 = vmul.f32 %v1631_v35, %v1631_v35  ;;  %v1809_v47 = vsub.f32 %v4481_v57, %v5590_v28  ;;  %v1662_v58 = vmul.f32 %v1630_v54, %v1630_v54 }
 0x172   : > { %v4802_v41 = vadd.f32 %v1020_v8, %v677_v2  ;;  %1085 = vst.msk [vmem:[%s3956_s24 + $0xc0] sm:$0xff] %vm1060_vm3, %v677_v2  ;;  %v4806_v36 = vadd.f32 1.1447299, %v1814_v29  ;;  %v688_v14 = vadd.f32 %v4602_v0, %v5592_v60  ;;  %v4811_v51 = vpop.eup %2865  ;;  %v1023_v57 = vmul.f32 %v4715_v33, %v991_v62 }
 0x173   : > { %2875 = vpow2.f32 %v1756_v18  ;;  %v1695_v22 = vmul.f32 -0.5, %v1663_v56  ;;  %v4813_v55 = vadd.f32 1.1447299, %v1809_v47  ;;  %v1694_v35 = vmul.f32 -0.5, %v1662_v58  ;;  %v5595_v18 = vld [vmem:[#allocation17_spill] sm:$0xff] }
 0x174   : > { %5591 = vst [vmem:[#allocation34_spill] sm:$0xff] %v4806_v36  ;;  %1149 = vst.msk [vmem:[%s4135_s16 + $0xc0] sm:$0xff] %vm1060_vm3, %v4802_v41  ;;  %v1752_v32 = vmul.f32 1.442695, %v4802_v41  ;;  %v1906_v16 = vsel %vm1060_vm3, %v4806_v36, -inf  ;;  %v680_v54 = vadd.f32 %v4602_v0, %v5594_v15  ;;  %v2868_v8 = vpop.eup %2867  ;;  %v4828_v29 = vadd.f32 %v1023_v57, %v688_v14  ;;  %v1466_v36 = vpop.permute.xlu0 %1465 }
 0x175   : > { %5593 = vst [vmem:[#allocation35_spill] sm:$0xff] %v4813_v55  ;;  %1088 = vst.msk [vmem:[%s3956_s24 + $0xd8] sm:$0xff] %vm1060_vm3, %v688_v14  ;;  %1907 = vmax.xlane.f32.xlu1 %v1906_v16  ;;  %v1891_v33 = vsel %vm1060_vm3, %v4813_v55, -inf  ;;  %v1021_v62 = vmul.f32 %v4732_v31, %v989_v39  ;;  %v1601_v56 = vsel %vm1575_vm4, %v5595_v18, %v1464_v61  ;;  %v2870_v28 = vpop.eup %2869  ;;  %v1468_v16 = vpop.permute.xlu1 %1467  ;;  %v5596_v61 = vld [vmem:[#allocation12_spill] sm:$0xff] }
 0x176   : > { %v4833_v47 = vmul.f32 %v2868_v8, %v1695_v22  ;;  %v4835_v58 = vmul.f32 %v2860_v50, %v1694_v35  ;;  %2877 = vpow2.f32 %v1752_v32  ;;  %1892 = vmax.xlane.f32.xlu0 %v1891_v33  ;;  %1086 = vst.msk [vmem:[%s3956_s24 + $0xc8] sm:$0xff] %vm1060_vm3, %v680_v54  ;;  %v1633_v60 = vsub.f32 %v1601_v56, %v680_v54  ;;  %v5597_v50 = vld [vmem:[#allocation32_spill] sm:$0xff]  ;;  %v994_v32 = vld [vmem:[%s4020_s25 + $0xf0] sm:$0xff]  ;;  %v5598_v56 = vld [vmem:[#allocation33_spill] sm:$0xff] }
 0x177   : > { %v2872_v57 = vpop.eup %2871  ;;  %1152 = vst.msk [vmem:[%s4135_s16 + $0xd8] sm:$0xff] %vm1060_vm3, %v4828_v29  ;;  %v1758_v31 = vmul.f32 1.442695, %v4828_v29  ;;  %v4843_v39 = vadd.f32 %v1021_v62, %v680_v54  ;;  %v1600_v22 = vsel %vm1575_vm4, %v5596_v61, %v1462_v52  ;;  %v1812_v35 = vsub.f32 %v4569_v13, %v5597_v50  ;;  %v5600_v61 = vld [vmem:[#allocation13_spill] sm:$0xff] }
 0x178   : > { %v2874_v15 = vpop.eup %2873  ;;  %v4850_v8 = vmul.f32 %v2872_v57, %v1693_v44  ;;  %v1665_v33 = vmul.f32 %v1633_v60, %v1633_v60  ;;  %v1632_v18 = vsub.f32 %v1600_v22, %v677_v2  ;;  %v1815_v55 = vsub.f32 %v4587_v3, %v5598_v56  ;;  %v992_v60 = vld [vmem:[%s4020_s25 + $0xe0] sm:$0xff] }
 0x179   : > { %2879 = vpow2.f32 %v1758_v31  ;;  %1150 = vst.msk [vmem:[%s4135_s16 + $0xc8] sm:$0xff] %vm1060_vm3, %v4843_v39  ;;  %v1754_v52 = vmul.f32 1.442695, %v4843_v39  ;;  %v4858_v54 = vadd.f32 1.1447299, %v1812_v35  ;;  %v4862_v13 = vadd.f32 %v4602_v0, %v4495_v23  ;;  %v5599_v31 = vld [vmem:[#allocation18_spill] sm:$0xff] }
 0x17a   : > { %v4864_v44 = vmul.f32 -0.5, %v1665_v33  ;;  %v1664_v2 = vmul.f32 %v1632_v18, %v1632_v18  ;;  %v4866_v62 = vadd.f32 1.1447299, %v1815_v55  ;;  %v1026_v3 = vmul.f32 %v4775_v24, %v994_v32  ;;  %v995_v32 = vld [vmem:[%s4020_s25 + $0xf8] sm:$0xff]  ;;  %v1472_v33 = vpop.permute.xlu1 %1471 }
 0x17b   : > { %2881 = vpow2.f32 %v1754_v52  ;;  %v1900_v57 = vsel %vm1060_vm3, %v4858_v54, -inf  ;;  %1091 = vst.msk [vmem:[%s3956_s24 + $0xf0] sm:$0xff] %vm1060_vm3, %v4862_v13  ;;  %v1603_v23 = vsel %vm1575_vm4, %v5599_v31, %v1468_v16  ;;  %v1602_v22 = vsel %vm1575_vm4, %v5600_v61, %v1466_v36 }
 0x17c   : > { %v1696_v50 = vmul.f32 -0.5, %v1664_v2  ;;  %1901 = vmax.xlane.f32.xlu1 %v1900_v57  ;;  %v1909_v24 = vsel %vm1060_vm3, %v4866_v62, -inf  ;;  %v4882_v55 = vadd.f32 %v1026_v3, %v4862_v13  ;;  %v1635_v35 = vsub.f32 %v1603_v23, %v688_v14 }
 0x17d   : > { %v2876_v18 = vpop.eup %2875  ;;  %1910 = vmax.xlane.f32.xlu0 %v1909_v24  ;;  %v1634_v16 = vsub.f32 %v1602_v22, %v4762_v10  ;;  %v693_v36 = vadd.f32 %v4602_v0, %v4501_v53  ;;  %v1024_v56 = vmul.f32 %v4811_v51, %v992_v60  ;;  %v1818_v52 = vsub.f32 %v4719_v17, %v4538_v46  ;;  %v993_v51 = vld [vmem:[%s4020_s25 + $0xe8] sm:$0xff]  ;;  %v1470_v60 = vpop.permute.xlu0 %1469  ;;  %s3179_s25 = smov [#allocation4]  }
 0x17e   : > { %1155 = vst.msk [vmem:[%s4135_s16 + $0xf0] sm:$0xff] %vm1060_vm3, %v4882_v55  ;;  %v1764_v14 = vmul.f32 1.442695, %v4882_v55  ;;  %v1667_v2 = vmul.f32 %v1635_v35, %v1635_v35  ;;  %v1813_v3 = vsub.f32 %v4613_v42, %v4489_v1  ;;  %v704_v10 = vadd.f32 %v4602_v0, %v4510_v34  ;;  %s3024_s29 = sshll.u32 %s3179_s25, 4  ;;  %s3025_s29 = int_to_ptr.vmem [resolvable:$false] %s3024_s29 }
 0x17f   : > { %v1666_v53 = vmul.f32 %v1634_v16, %v1634_v16  ;;  %v4899_v57 = vadd.f32 %v1024_v56, %v693_v36  ;;  %1089 = vst.msk [vmem:[%s3956_s24 + $0xe0] sm:$0xff] %vm1060_vm3, %v693_v36  ;;  %v4903_v46 = vadd.f32 1.1447299, %v1818_v52  ;;  %v1027_v17 = vmul.f32 %v2870_v28, %v995_v32  ;;  %s3026_s22 = scalar_lea.vmem %s3025_s29, 8192  ;;  %p3027_p0 = scmp.lt.s32.totalorder %s5206_s14, %s3025_s29 }
 0x180   : > { %v2878_v31 = vpop.eup %2877  ;;  %2883 = vpow2.f32 %v1764_v14  ;;  %v1699_v23 = vmul.f32 -0.5, %v1667_v2  ;;  %v4906_v61 = vadd.f32 1.1447299, %v1813_v3  ;;  %1092 = vst.msk [vmem:[%s3956_s24 + $0xf8] sm:$0xff] %vm1060_vm3, %v704_v10  ;;  %v696_v1 = vadd.f32 %v4602_v0, %v4518_v9  ;;  %v5601_v9 = vld [vmem:[#allocation19_spill] sm:$0xff]  ;;  %v5602_v14 = vld [vmem:[#allocation14_spill] sm:$0xff]  ;;  %p3028_p1 = scmp.lt.s32.totalorder %s3026_s22, %s3020_s2 }
 0x181   : > { %v4912_v34 = vmul.f32 %v2878_v31, %v1696_v50  ;;  %v1698_v42 = vmul.f32 -0.5, %v1666_v53  ;;  %1153 = vst.msk [vmem:[%s4135_s16 + $0xe0] sm:$0xff] %vm1060_vm3, %v4899_v57  ;;  %v1760_v28 = vmul.f32 1.442695, %v4899_v57  ;;  %v1918_v22 = vsel %vm1060_vm3, %v4903_v46, -inf  ;;  %v1476_v50 = vpop.permute.xlu1 %1475  ;;  %v5603_v31 = vld [vmem:[#allocation20_spill] sm:$0xff] }
 0x182   : > { %1919 = vmax.xlane.f32.xlu1 %v1918_v22  ;;  %v1903_v24 = vsel %vm1060_vm3, %v4906_v61, -inf  ;;  %v4922_v35 = vadd.f32 %v1027_v17, %v704_v10  ;;  %v1025_v32 = vmul.f32 %v2874_v15, %v993_v51  ;;  %1090 = vst.msk [vmem:[%s3956_s24 + $0xe8] sm:$0xff] %vm1060_vm3, %v696_v1  ;;  %v1605_v0 = vsel %vm1575_vm4, %v5601_v9, %v1472_v33  ;;  %p3029_p2 = por %p3028_p1, %p3027_p0 }
 0x183   : > { %v2880_v16 = vpop.eup %2879  ;;  %v1794_v56 = vmul.f32 %v2876_v18, %v1698_v42  ;;  %2885 = vpow2.f32 %v1760_v28  ;;  %1904 = vmax.xlane.f32.xlu0 %v1903_v24  ;;  %v1637_v52 = vsub.f32 %v1605_v0, %v696_v1  ;;  %v1604_v2 = vsel %vm1575_vm4, %v5602_v14, %v1470_v60 }
 0x184   : > { %v4930_v3 = vmul.f32 %v2880_v16, %v1699_v23  ;;  %1156 = vst.msk [vmem:[%s4135_s16 + $0xf8] sm:$0xff] %vm1060_vm3, %v4922_v35  ;;  %v1766_v15 = vmul.f32 1.442695, %v4922_v35  ;;  %v4936_v53 = vadd.f32 %v1025_v32, %v696_v1  ;;  %v1636_v33 = vsub.f32 %v1604_v2, %v693_v36  ;;  %v1474_v23 = vpop.permute.xlu0 %1473  ;;  %p3030_p3 = pnand %p3029_p2, %p3023_p13 }
 0x185   : > { %v2882_v17 = vpop.eup %2881  ;;  %v1816_v18 = vsub.f32 %v4674_v48, %v4557_v37  ;;  %v1819_v51 = vsub.f32 %v4717_v40, %v4607_v6  ;;  %v1607_v60 = vsel %vm1575_vm4, %v5603_v31, %v1476_v50  ;;  %v5604_v48 = vld [vmem:[#allocation15_spill] sm:$0xff]  ;;  %v1817_v0 = vsub.f32 %v4734_v49, %v4626_v11 }
 0x186   : > { %v4945_v42 = vmul.f32 %v2882_v17, %v4864_v44  ;;  %2887 = vpow2.f32 %v1766_v15  ;;  %1154 = vst.msk [vmem:[%s4135_s16 + $0xe8] sm:$0xff] %vm1060_vm3, %v4936_v53  ;;  %v1762_v36 = vmul.f32 1.442695, %v4936_v53  ;;  %v1639_v37 = vsub.f32 %v1607_v60, %v704_v10 }
 0x187   : > { %v4951_v1 = vadd.f32 1.1447299, %v1816_v18  ;;  %v4953_v28 = vadd.f32 1.1447299, %v1819_v51  ;;  %v1668_v6 = vmul.f32 %v1636_v33, %v1636_v33  ;;  %v1606_v40 = vsel %vm1575_vm4, %v5604_v48, %v1474_v23 }
 0x188   : > { %2889 = vpow2.f32 %v1762_v36  ;;  %v1822_v44 = vsub.f32 %v4835_v58, %v4664_v21  ;;  %v1638_v32 = vsub.f32 %v1606_v40, %v4862_v13  ;;  %v1820_v50 = vsub.f32 %v4794_v27, %v4682_v43 }
 0x189   : > { %v1912_v22 = vsel %vm1060_vm3, %v4951_v1, -inf  ;;  %v1921_v24 = vsel %vm1060_vm3, %v4953_v28, -inf  ;;  %v1823_v21 = vsub.f32 %v4833_v47, %v4724_v45  ;;  %v1671_v58 = vmul.f32 %v1639_v37, %v1639_v37 }
 0x18a   : > { %v2884_v9 = vpop.eup %2883  ;;  %1913 = vmax.xlane.f32.xlu1 %v1912_v22  ;;  %1922 = vmax.xlane.f32.xlu0 %v1921_v24  ;;  %v4964_v10 = vadd.f32 1.1447299, %v1822_v44  ;;  %v1670_v16 = vmul.f32 %v1638_v32, %v1638_v32  ;;  %v1826_v14 = vsub.f32 %v1794_v56, %v4782_v38  ;;  %v1821_v13 = vsub.f32 %v4850_v8, %v4745_v4 }
 0x18b   : > { %v1700_v2 = vmul.f32 -0.5, %v1668_v6  ;;  %v4977_v33 = vadd.f32 1.1447299, %v1817_v0  ;;  %v1824_v11 = vsub.f32 %v4912_v34, %v4802_v41  ;;  %v1669_v49 = vmul.f32 %v1637_v52, %v1637_v52 }
 0x18c   : > { %v1930_v15 = vsel %vm1060_vm3, %v4964_v10, -inf  ;;  %v1702_v27 = vmul.f32 -0.5, %v1670_v16  ;;  %v4981_v45 = vadd.f32 1.1447299, %v1820_v50  ;;  %v1827_v38 = vsub.f32 %v4930_v3, %v4828_v29 }
 0x18d   : > { %v2886_v43 = vpop.eup %2885  ;;  %v1915_v4 = vsel %vm1060_vm3, %v4977_v33, -inf  ;;  %v4987_v8 = vadd.f32 1.1447299, %v1823_v21  ;;  %v1703_v56 = vmul.f32 -0.5, %v1671_v58  ;;  %v4989_v18 = vadd.f32 1.1447299, %v1826_v14 }
 0x18e   : > { %v1796_v47 = vmul.f32 %v2886_v43, %v1700_v2  ;;  %1931 = vmax.xlane.f32.xlu1 %v1930_v15  ;;  %v1798_v17 = vmul.f32 %v2884_v9, %v1702_v27  ;;  %1916 = vmax.xlane.f32.xlu0 %v1915_v4  ;;  %v1825_v34 = vsub.f32 %v4945_v42, %v4843_v39  ;;  %v1701_v51 = vmul.f32 -0.5, %v1669_v49  ;;  %v5605_v14 = vld [vmem:[#allocation31_spill] sm:$0xff] }
 0x18f   : > { %v1924_v3 = vsel %vm1060_vm3, %v4981_v45, -inf  ;;  %v1933_v23 = vsel %vm1060_vm3, %v4987_v8, -inf  ;;  %v4999_v36 = vadd.f32 1.1447299, %v1821_v13  ;;  %v1942_v39 = vsel %vm1060_vm3, %v4989_v18, -inf }
 0x190   : > { %v2888_v41 = vpop.eup %2887  ;;  %v1828_v52 = vsub.f32 %v1796_v47, %v4899_v57  ;;  %v1830_v31 = vsub.f32 %v1798_v17, %v4882_v55  ;;  %v5004_v42 = vadd.f32 1.1447299, %v1824_v11  ;;  %v5009_v48 = vadd.f32 1.1447299, %v1827_v38 }
 0x191   : > { %v1799_v29 = vmul.f32 %v2888_v41, %v1703_v56  ;;  %v1927_v55 = vsel %vm1060_vm3, %v4999_v36, -inf  ;;  %v5017_v22 = vadd.f32 1.1447299, %v1825_v34 }
 0x192   : > { %v2890_v60 = vpop.eup %2889  ;;  %1925 = vmax.xlane.f32.xlu1 %v1924_v3  ;;  %1934 = vmax.xlane.f32.xlu0 %v1933_v23  ;;  %v5011_v40 = vadd.f32 1.1447299, %v1828_v52  ;;  %v1936_v44 = vsel %vm1060_vm3, %v5004_v42, -inf  ;;  %v5023_v32 = vadd.f32 1.1447299, %v1830_v31 }
 0x193   : > { %v1797_v37 = vmul.f32 %v2890_v60, %v1701_v51  ;;  %v1831_v57 = vsub.f32 %v1799_v29, %v4922_v35  ;;  %v1945_v35 = vsel %vm1060_vm3, %v5009_v48, -inf  ;;  %v1939_v9 = vsel %vm1060_vm3, %v5017_v22, -inf }
 0x194   : > { %v1954_v50 = vsel %vm1060_vm3, %v5023_v32, -inf }
 0x195   : > { %v1829_v6 = vsub.f32 %v1797_v37, %v4936_v53  ;;  %v1948_v53 = vsel %vm1060_vm3, %v5011_v40, -inf  ;;  %v5031_v21 = vadd.f32 1.1447299, %v1831_v57 }
 0x196   : > { %1943 = vmax.xlane.f32.xlu1 %v1942_v39  ;;  %1928 = vmax.xlane.f32.xlu0 %v1927_v55 }
 0x197   : > { %v5021_v24 = vadd.f32 1.1447299, %v1829_v6  ;;  %v1957_v58 = vsel %vm1060_vm3, %v5031_v21, -inf }
 0x199   : > { %v1951_v0 = vsel %vm1060_vm3, %v5021_v24, -inf }
 0x19a   : > { %1937 = vmax.xlane.f32.xlu1 %v1936_v44  ;;  %1946 = vmax.xlane.f32.xlu0 %v1945_v35 }
 0x19e   : > { %1949 = vmax.xlane.f32.xlu1 %v1948_v53  ;;  %1940 = vmax.xlane.f32.xlu0 %v1939_v9 }
 0x1a2   : > { %1955 = vmax.xlane.f32.xlu1 %v1954_v50  ;;  %1952 = vmax.xlane.f32.xlu0 %v1951_v0 }
 0x1a6   : > { %1958 = vmax.xlane.f32.xlu0 %v1957_v58 }
 0x1d3   : > { %v1872_v16 = vpop.xlane.xlu0 %1871 }
 0x1d4   : > { %v1962_v13 = vsub.f32 %v5605_v14, %v1872_v16 }
 0x1d6   : > { %v1996_v2 = vmul.f32 1.442695, %v1962_v13 }
 0x1d8   : > { %2891 = vpow2.f32 %v1996_v2 }
 0x1db   : > { %v1869_v15 = vpop.xlane.xlu1 %1868 }
 0x1dc   : > { %v1866_v11 = vpop.xlane.xlu0 %1865  ;;  %v1961_v38 = vsub.f32 %v4512_v20, %v1869_v15 }
 0x1dd   : > { %v1960_v43 = vsub.f32 %v4520_v59, %v1866_v11 }
 0x1de   : > { %v1994_v52 = vmul.f32 1.442695, %v1961_v38  ;;  %v5606_v38 = vld [vmem:[#allocation34_spill] sm:$0xff] }
 0x1df   : > { %v1992_v49 = vmul.f32 1.442695, %v1960_v43 }
 0x1e1   : > { %2893 = vpow2.f32 %v1992_v49 }
 0x1e2   : > { %v5037_v27 = vpop.eup %2891  ;;  %v1884_v47 = vpop.xlane.xlu1 %1883 }
 0x1e3   : > { %v1966_v4 = vsub.f32 %v4571_v25, %v1884_v47  ;;  %v1875_v56 = vpop.xlane.xlu0 %1874  ;;  %v2062_v17 = vsel %vm1060_vm3, %v5037_v27, 0.0 }
 0x1e4   : > { %v1963_v41 = vsub.f32 %v4579_v12, %v1875_v56  ;;  %2063 = vadd.xlane.f32.xlu1 %v2062_v17  ;;  %v5607_v56 = vld [vmem:[#allocation35_spill] sm:$0xff] }
 0x1e5   : > { %v2004_v34 = vmul.f32 1.442695, %v1966_v4 }
 0x1e6   : > { %v1998_v51 = vmul.f32 1.442695, %v1963_v41 }
 0x1e7   : > { %2895 = vpow2.f32 %v2004_v34 }
 0x1e8   : > { %2897 = vpow2.f32 %v1998_v51 }
 0x1e9   : > { %2899 = vpow2.f32 %v1994_v52 }
 0x1eb   : > { %v5044_v59 = vpop.eup %2893 }
 0x1ec   : > { %v1878_v29 = vpop.xlane.xlu1 %1877  ;;  %v2056_v25 = vsel %vm1060_vm3, %v5044_v59, 0.0 }
 0x1ed   : > { %v1964_v20 = vsub.f32 %v4646_v63, %v1878_v29  ;;  %v1887_v3 = vpop.xlane.xlu0 %1886  ;;  %2057 = vadd.xlane.f32.xlu1 %v2056_v25 }
 0x1ee   : > { %v1967_v31 = vsub.f32 %v4648_v5, %v1887_v3 }
 0x1ef   : > { %v2000_v12 = vmul.f32 1.442695, %v1964_v20 }
 0x1f0   : > { %v2006_v60 = vmul.f32 1.442695, %v1967_v31 }
 0x1f1   : > { %2901 = vpow2.f32 %v2000_v12  ;;  %v5050_v23 = vpop.eup %2895 }
 0x1f2   : > { %2903 = vpow2.f32 %v2006_v60  ;;  %v5052_v37 = vpop.eup %2897  ;;  %v2074_v57 = vsel %vm1060_vm3, %v5050_v23, 0.0 }
 0x1f3   : > { %v1896_v39 = vpop.xlane.xlu1 %1895  ;;  %2075 = vadd.xlane.f32.xlu1 %v2074_v57  ;;  %v2065_v5 = vsel %vm1060_vm3, %v5052_v37, 0.0  ;;  %v5059_v55 = vpop.eup %2899 }
 0x1f4   : > { %v1970_v63 = vsub.f32 %v4693_v30, %v1896_v39  ;;  %v1881_v6 = vpop.xlane.xlu0 %1880  ;;  %2066 = vadd.xlane.f32.xlu0 %v2065_v5  ;;  %v2059_v9 = vsel %vm1060_vm3, %v5059_v55, 0.0 }
 0x1f5   : > { %v1965_v44 = vsub.f32 %v4703_v26, %v1881_v6 }
 0x1f6   : > { %v2012_v35 = vmul.f32 1.442695, %v1970_v63 }
 0x1f7   : > { %v2002_v53 = vmul.f32 1.442695, %v1965_v44 }
 0x1f8   : > { %2905 = vpow2.f32 %v2012_v35  ;;  %2060 = vadd.xlane.f32.xlu0 %v2059_v9 }
 0x1f9   : > { %2907 = vpow2.f32 %v2002_v53 }
 0x1fb   : > { %v5064_v0 = vpop.eup %2901 }
 0x1fc   : > { %v5066_v30 = vpop.eup %2903  ;;  %v1890_v50 = vpop.xlane.xlu1 %1889  ;;  %v2068_v58 = vsel %vm1060_vm3, %v5064_v0, 0.0 }
 0x1fd   : > { %v1968_v16 = vsub.f32 %v4764_v7, %v1890_v50  ;;  %v1899_v26 = vpop.xlane.xlu0 %1898  ;;  %2069 = vadd.xlane.f32.xlu1 %v2068_v58  ;;  %v2077_v14 = vsel %vm1060_vm3, %v5066_v30, 0.0 }
 0x1fe   : > { %v1971_v13 = vsub.f32 %v4766_v19, %v1899_v26  ;;  %2078 = vadd.xlane.f32.xlu0 %v2077_v14 }
 0x1ff   : > { %v2008_v2 = vmul.f32 1.442695, %v1968_v16 }
 0x200   : > { %v2014_v15 = vmul.f32 1.442695, %v1971_v13 }
 0x201   : > { %2909 = vpow2.f32 %v2008_v2 }
 0x202   : > { %v5074_v11 = vpop.eup %2905  ;;  %2911 = vpow2.f32 %v2014_v15  ;;  %v1908_v43 = vpop.xlane.xlu1 %1907 }
 0x203   : > { %v5076_v49 = vpop.eup %2907  ;;  %v1974_v47 = vsub.f32 %v5606_v38, %v1908_v43  ;;  %v1893_v7 = vpop.xlane.xlu0 %1892  ;;  %v2086_v4 = vsel %vm1060_vm3, %v5074_v11, 0.0 }
 0x204   : > { %v1969_v17 = vsub.f32 %v5607_v56, %v1893_v7  ;;  %2087 = vadd.xlane.f32.xlu1 %v2086_v4  ;;  %v2071_v19 = vsel %vm1060_vm3, %v5076_v49, 0.0 }
 0x205   : > { %v2020_v41 = vmul.f32 1.442695, %v1974_v47  ;;  %2072 = vadd.xlane.f32.xlu0 %v2071_v19 }
 0x206   : > { %v2010_v34 = vmul.f32 1.442695, %v1969_v17 }
 0x207   : > { %2913 = vpow2.f32 %v2020_v41 }
 0x208   : > { %2915 = vpow2.f32 %v2010_v34 }
 0x209   : > { %v1902_v52 = vpop.xlane.xlu1 %1901 }
 0x20a   : > { %v1972_v51 = vsub.f32 %v4858_v54, %v1902_v52  ;;  %v1911_v29 = vpop.xlane.xlu0 %1910 }
 0x20b   : > { %v5085_v20 = vpop.eup %2909  ;;  %v1975_v3 = vsub.f32 %v4866_v62, %v1911_v29 }
 0x20c   : > { %v5088_v25 = vpop.eup %2911  ;;  %v2016_v31 = vmul.f32 1.442695, %v1972_v51  ;;  %v2080_v12 = vsel %vm1060_vm3, %v5085_v20, 0.0 }
 0x20d   : > { %v2022_v60 = vmul.f32 1.442695, %v1975_v3  ;;  %2081 = vadd.xlane.f32.xlu1 %v2080_v12  ;;  %v2089_v39 = vsel %vm1060_vm3, %v5088_v25, 0.0 }
 0x20e   : > { %2917 = vpow2.f32 %v2016_v31  ;;  %2090 = vadd.xlane.f32.xlu0 %v2089_v39 }
 0x20f   : > { %2919 = vpow2.f32 %v2022_v60  ;;  %v1920_v54 = vpop.xlane.xlu1 %1919 }
 0x210   : > { %v1978_v57 = vsub.f32 %v4903_v46, %v1920_v54  ;;  %v1905_v63 = vpop.xlane.xlu0 %1904 }
 0x211   : > { %v5095_v6 = vpop.eup %2913  ;;  %v1973_v62 = vsub.f32 %v4906_v61, %v1905_v63 }
 0x212   : > { %v5098_v5 = vpop.eup %2915  ;;  %v2028_v44 = vmul.f32 1.442695, %v1978_v57  ;;  %v2098_v35 = vsel %vm1060_vm3, %v5095_v6, 0.0 }
 0x213   : > { %v2018_v53 = vmul.f32 1.442695, %v1973_v62  ;;  %2099 = vadd.xlane.f32.xlu1 %v2098_v35  ;;  %v2083_v9 = vsel %vm1060_vm3, %v5098_v5, 0.0 }
 0x214   : > { %2921 = vpow2.f32 %v2028_v44  ;;  %2084 = vadd.xlane.f32.xlu0 %v2083_v9 }
 0x215   : > { %2923 = vpow2.f32 %v2018_v53 }
 0x217   : > { %v1914_v46 = vpop.xlane.xlu1 %1913  ;;  %v1923_v50 = vpop.xlane.xlu0 %1922 }
 0x218   : > { %v5104_v58 = vpop.eup %2917  ;;  %v1976_v61 = vsub.f32 %v4951_v1, %v1914_v46  ;;  %v1979_v16 = vsub.f32 %v4953_v28, %v1923_v50 }
 0x219   : > { %v5108_v26 = vpop.eup %2919  ;;  %v2092_v14 = vsel %vm1060_vm3, %v5104_v58, 0.0 }
 0x21a   : > { %v2024_v13 = vmul.f32 1.442695, %v1976_v61  ;;  %v2030_v2 = vmul.f32 1.442695, %v1979_v16  ;;  %2093 = vadd.xlane.f32.xlu1 %v2092_v14  ;;  %v2101_v15 = vsel %vm1060_vm3, %v5108_v26, 0.0 }
 0x21b   : > { %v1932_v43 = vpop.xlane.xlu1 %1931  ;;  %2102 = vadd.xlane.f32.xlu0 %v2101_v15  ;;  %v1917_v47 = vpop.xlane.xlu0 %1916 }
 0x21c   : > { %2925 = vpow2.f32 %v2024_v13  ;;  %v1982_v38 = vsub.f32 %v4964_v10, %v1932_v43  ;;  %v1977_v1 = vsub.f32 %v4977_v33, %v1917_v47 }
 0x21d   : > { %2927 = vpow2.f32 %v2030_v2 }
 0x21e   : > { %v5116_v28 = vpop.eup %2921  ;;  %v2036_v7 = vmul.f32 1.442695, %v1982_v38  ;;  %v2026_v56 = vmul.f32 1.442695, %v1977_v1 }
 0x21f   : > { %v5118_v4 = vpop.eup %2923  ;;  %v1926_v17 = vpop.xlane.xlu1 %1925  ;;  %v2110_v19 = vsel %vm1060_vm3, %v5116_v28, 0.0 }
 0x220   : > { %2929 = vpow2.f32 %v2036_v7  ;;  %v1980_v41 = vsub.f32 %v4981_v45, %v1926_v17  ;;  %v1935_v34 = vpop.xlane.xlu0 %1934  ;;  %2111 = vadd.xlane.f32.xlu1 %v2110_v19  ;;  %v2095_v10 = vsel %vm1060_vm3, %v5118_v4, 0.0 }
 0x221   : > { %2931 = vpow2.f32 %v2026_v56  ;;  %v1983_v33 = vsub.f32 %v4987_v8, %v1935_v34  ;;  %2096 = vadd.xlane.f32.xlu0 %v2095_v10 }
 0x222   : > { %v2032_v52 = vmul.f32 1.442695, %v1980_v41 }
 0x223   : > { %v2038_v51 = vmul.f32 1.442695, %v1983_v33  ;;  %v1944_v29 = vpop.xlane.xlu1 %1943 }
 0x224   : > { %2933 = vpow2.f32 %v2032_v52  ;;  %v1986_v3 = vsub.f32 %v4989_v18, %v1944_v29  ;;  %v1929_v31 = vpop.xlane.xlu0 %1928 }
 0x225   : > { %2935 = vpow2.f32 %v2038_v51  ;;  %v1981_v12 = vsub.f32 %v4999_v36, %v1929_v31 }
 0x226   : > { %v5128_v45 = vpop.eup %2925  ;;  %v2044_v60 = vmul.f32 1.442695, %v1986_v3 }
 0x227   : > { %v5130_v39 = vpop.eup %2927  ;;  %v2034_v54 = vmul.f32 1.442695, %v1981_v12  ;;  %v1938_v57 = vpop.xlane.xlu1 %1937  ;;  %v2104_v8 = vsel %vm1060_vm3, %v5128_v45, 0.0 }
 0x228   : > { %2937 = vpow2.f32 %v2044_v60  ;;  %v1984_v63 = vsub.f32 %v5004_v42, %v1938_v57  ;;  %v1947_v62 = vpop.xlane.xlu0 %1946  ;;  %2105 = vadd.xlane.f32.xlu1 %v2104_v8  ;;  %v2113_v18 = vsel %vm1060_vm3, %v5130_v39, 0.0 }
 0x229   : > { %2939 = vpow2.f32 %v2034_v54  ;;  %v1987_v36 = vsub.f32 %v5009_v48, %v1947_v62  ;;  %2114 = vadd.xlane.f32.xlu0 %v2113_v18 }
 0x22a   : > { %v5138_v44 = vpop.eup %2929  ;;  %v2040_v35 = vmul.f32 1.442695, %v1984_v63 }
 0x22b   : > { %v5140_v53 = vpop.eup %2931  ;;  %v2046_v9 = vmul.f32 1.442695, %v1987_v36  ;;  %v1950_v46 = vpop.xlane.xlu1 %1949  ;;  %v2122_v50 = vsel %vm1060_vm3, %v5138_v44, 0.0 }
 0x22c   : > { %2941 = vpow2.f32 %v2040_v35  ;;  %v1941_v42 = vpop.xlane.xlu0 %1940  ;;  %v1988_v61 = vsub.f32 %v5011_v40, %v1950_v46  ;;  %2123 = vadd.xlane.f32.xlu1 %v2122_v50  ;;  %v2107_v16 = vsel %vm1060_vm3, %v5140_v53, 0.0 }
 0x22d   : > { %2943 = vpow2.f32 %v2046_v9  ;;  %v1985_v48 = vsub.f32 %v5017_v22, %v1941_v42  ;;  %2108 = vadd.xlane.f32.xlu0 %v2107_v16 }
 0x22e   : > { %v5148_v14 = vpop.eup %2933  ;;  %v2048_v13 = vmul.f32 1.442695, %v1988_v61 }
 0x22f   : > { %v5150_v2 = vpop.eup %2935  ;;  %v2042_v15 = vmul.f32 1.442695, %v1985_v48  ;;  %v1956_v43 = vpop.xlane.xlu1 %1955  ;;  %v2116_v38 = vsel %vm1060_vm3, %v5148_v14, 0.0 }
 0x230   : > { %2945 = vpow2.f32 %v2048_v13  ;;  %v1953_v40 = vpop.xlane.xlu0 %1952  ;;  %v1990_v47 = vsub.f32 %v5023_v32, %v1956_v43  ;;  %2117 = vadd.xlane.f32.xlu1 %v2116_v38  ;;  %v2125_v1 = vsel %vm1060_vm3, %v5150_v2, 0.0 }
 0x231   : > { %2947 = vpow2.f32 %v2042_v15  ;;  %v1989_v22 = vsub.f32 %v5021_v24, %v1953_v40  ;;  %2126 = vadd.xlane.f32.xlu0 %v2125_v1 }
 0x232   : > { %v5158_v7 = vpop.eup %2937  ;;  %v2052_v56 = vmul.f32 1.442695, %v1990_v47 }
 0x233   : > { %v5160_v17 = vpop.eup %2939  ;;  %v2050_v19 = vmul.f32 1.442695, %v1989_v22  ;;  %v2134_v41 = vsel %vm1060_vm3, %v5158_v7, 0.0 }
 0x234   : > { %2949 = vpow2.f32 %v2052_v56  ;;  %v1959_v34 = vpop.xlane.xlu0 %1958  ;;  %2135 = vadd.xlane.f32.xlu1 %v2134_v41  ;;  %v2119_v32 = vsel %vm1060_vm3, %v5160_v17, 0.0 }
 0x235   : > { %2951 = vpow2.f32 %v2050_v19  ;;  %v1991_v10 = vsub.f32 %v5031_v21, %v1959_v34  ;;  %2120 = vadd.xlane.f32.xlu0 %v2119_v32 }
 0x236   : > { %v5167_v24 = vpop.eup %2941 }
 0x237   : > { %v5169_v33 = vpop.eup %2943  ;;  %v2054_v52 = vmul.f32 1.442695, %v1991_v10  ;;  %v2128_v51 = vsel %vm1060_vm3, %v5167_v24, 0.0 }
 0x238   : > { %2129 = vadd.xlane.f32.xlu1 %v2128_v51  ;;  %v2137_v29 = vsel %vm1060_vm3, %v5169_v33, 0.0 }
 0x239   : > { %2953 = vpow2.f32 %v2054_v52  ;;  %2138 = vadd.xlane.f32.xlu0 %v2137_v29 }
 0x23a   : > { %v5175_v3 = vpop.eup %2945 }
 0x23b   : > { %v5177_v21 = vpop.eup %2947  ;;  %v2140_v31 = vsel %vm1060_vm3, %v5175_v3, 0.0 }
 0x23c   : > { %2141 = vadd.xlane.f32.xlu1 %v2140_v31  ;;  %v2131_v12 = vsel %vm1060_vm3, %v5177_v21, 0.0 }
 0x23d   : > { %2132 = vadd.xlane.f32.xlu0 %v2131_v12 }
 0x23e   : > { %v5183_v60 = vpop.eup %2949 }
 0x23f   : > { %v5185_v54 = vpop.eup %2951  ;;  %v2146_v57 = vsel %vm1060_vm3, %v5183_v60, 0.0 }
 0x240   : > { %2147 = vadd.xlane.f32.xlu1 %v2146_v57  ;;  %v2143_v8 = vsel %vm1060_vm3, %v5185_v54, 0.0 }
 0x241   : > { %2144 = vadd.xlane.f32.xlu0 %v2143_v8 }
 0x243   : > { %v5191_v63 = vpop.eup %2953 }
 0x244   : > { %v2149_v62 = vsel %vm1060_vm3, %v5191_v63, 0.0 }
 0x245   : > { %2150 = vadd.xlane.f32.xlu0 %v2149_v62 }
 0x246   : > { %3033 = shalt.err (!%p3030_p3)
}
 0x247   : > { %s3034_s0 = scalar_lea.hbm %s5203_s21, 4096  ;;  %s3038_s25 = scalar_lea.hbm %s5466_s7, 8192 }
 0x248   : > { %p3035_p4 = scmp.ne.s32.totalorder %s5203_s21, %s3034_s0  ;;  %p3039_p9 = scmp.lt.u32.totalorder %s5203_s21, %s5466_s7 }
 0x249   : > { %p3040_p10 = scmp.lt.u32.totalorder %s3038_s25, %s3034_s0  ;;  %p3042_p12 = scmp.lt.u32.totalorder %s3034_s0, %s5203_s21 }
 0x24a   : > { %p3036_p7 = pnand %p3035_p4, %p3274_p5 }
 0x24b   : > { %p3041_p11 = por %p3040_p10, %p3039_p9 }
 0x24c   : > { %p3037_p8 = pneg %p3036_p7 }
 0x24d   : > { %p3043_p13 = por %p3042_p12, %p3041_p11 }
 0x24f   : > { %p3044_p0 = pnand %p3043_p13, %p3037_p8 }
 0x251   : > { %3047 = shalt.err (!%p3044_p0)
}
 0x252   : > { %s3180_s2 = smov 128   ;;  %s5608_s22 = smov 8  }
 0x253   : > { %2698 = dma.vmem_to_hbm [thread:$0]  (%p3274_p5), %s5206_s14, 4096, %s5203_s21, %s5214_s13, %s3180_s2, %s3180_s2, %s5608_s22  }
 0x254   : > { %s5245_s17 = scalar_lea.hbm %s5465_s6, %s5197_s23  ;;  %s2277_s26 = sshll.u32 %s3956_s24, 4  ;;  %s5249_s26 = int_to_ptr.vmem [resolvable:$true] %s2277_s26 }
 0x255   : > { %s2309_s25 = sshll.u32 %s4135_s16, 4  ;;  %s3048_s4 = scalar_lea.vmem %s5249_s26, 4096  ;;  %s5251_s25 = int_to_ptr.vmem [resolvable:$true] %s2309_s25 }
 0x256   : > { %p3049_p1 = scmp.ne.s32.totalorder %s5249_s26, %s3048_s4  ;;  %s3181_s14 = smov [#allocation2]  }
 0x257   : > { %s3052_s21 = sshll.u32 %s3181_s14, 4  ;;  %s3053_s21 = int_to_ptr.vmem [resolvable:$false] %s3052_s21 }
 0x258   : > { %p3050_p2 = pnand %p3049_p1, %p3274_p5  ;;  %s3054_s3 = scalar_lea.vmem %s3053_s21, 8192 }
 0x259   : > { %p3055_p4 = scmp.lt.s32.totalorder %s5249_s26, %s3053_s21  ;;  %p3056_p7 = scmp.lt.s32.totalorder %s3054_s3, %s3048_s4 }
 0x25a   : > { %p3051_p3 = pneg %p3050_p2 }
 0x25b   : > { %p3057_p8 = por %p3056_p7, %p3055_p4 }
 0x25d   : > { %p3058_p9 = pnand %p3057_p8, %p3051_p3 }
 0x25f   : > { %3061 = shalt.err (!%p3058_p9)
}
 0x260   : > { %s3062_s24 = scalar_lea.hbm %s5245_s17, 4096  ;;  %s3066_s14 = scalar_lea.hbm %s5465_s6, 8192 }
 0x261   : > { %p3063_p10 = scmp.ne.s32.totalorder %s5245_s17, %s3062_s24  ;;  %p3067_p13 = scmp.lt.u32.totalorder %s5245_s17, %s5465_s6 }
 0x262   : > { %p3068_p0 = scmp.lt.u32.totalorder %s3066_s14, %s3062_s24  ;;  %p3070_p2 = scmp.lt.u32.totalorder %s3062_s24, %s5245_s17 }
 0x263   : > { %p3064_p11 = pnand %p3063_p10, %p3274_p5 }
 0x264   : > { %p3069_p1 = por %p3068_p0, %p3067_p13 }
 0x265   : > { %p3065_p12 = pneg %p3064_p11 }
 0x266   : > { %p3071_p3 = por %p3070_p2, %p3069_p1 }
 0x268   : > { %p3072_p4 = pnand %p3071_p3, %p3065_p12 }
 0x26a   : > { %3075 = shalt.err (!%p3072_p4)
}
 0x26b   : > { %s5609_s4 = scalar_lea.sflag [#allocation3], %s3783_s27  ;;  %s3076_s29 = scalar_lea.vmem %s5251_s25, 4096 }
 0x26c   : > { %2697 = dma.vmem_to_hbm [thread:$0]  (%p3274_p5), %s5249_s26, 4096, %s5245_s17, %s5609_s4, %s3180_s2, %s3180_s2, %s5608_s22  }
 0x26d   : > { %p3077_p7 = scmp.ne.s32.totalorder %s5251_s25, %s3076_s29  ;;  %s3182_s3 = smov [#allocation6]  }
 0x26e   : > { %s3080_s24 = sshll.u32 %s3182_s3, 4  ;;  %s3081_s24 = int_to_ptr.vmem [resolvable:$false] %s3080_s24 }
 0x26f   : > { %p3078_p8 = pnand %p3077_p7, %p3274_p5  ;;  %s3082_s16 = scalar_lea.vmem %s3081_s24, 8192 }
 0x270   : > { %p3083_p10 = scmp.lt.s32.totalorder %s5251_s25, %s3081_s24  ;;  %p3084_p11 = scmp.lt.s32.totalorder %s3082_s16, %s3076_s29 }
 0x271   : > { %p3079_p9 = pneg %p3078_p8 }
 0x272   : > { %p3085_p12 = por %p3084_p11, %p3083_p10 }
 0x274   : > { %p3086_p13 = pnand %p3085_p12, %p3079_p9 }
 0x276   : > { %3089 = shalt.err (!%p3086_p13)
}
 0x277   : > { %s3090_s17 = scalar_lea.hbm %s5212_s1, 4096  ;;  %s3094_s14 = scalar_lea.hbm %s5467_s8, 8192 }
 0x278   : > { %p3091_p0 = scmp.ne.s32.totalorder %s5212_s1, %s3090_s17  ;;  %p3095_p3 = scmp.lt.u32.totalorder %s5212_s1, %s5467_s8 }
 0x279   : > { %p3096_p4 = scmp.lt.u32.totalorder %s3094_s14, %s3090_s17  ;;  %p3098_p8 = scmp.lt.u32.totalorder %s3090_s17, %s5212_s1 }
 0x27a   : > { %p3092_p1 = pnand %p3091_p0, %p3274_p5 }
 0x27b   : > { %p3097_p7 = por %p3096_p4, %p3095_p3 }
 0x27c   : > { %p3093_p2 = pneg %p3092_p1 }
 0x27d   : > { %p3099_p9 = por %p3098_p8, %p3097_p7 }
 0x27f   : > { %p3100_p10 = pnand %p3099_p9, %p3093_p2 }
 0x281   : > { %3103 = shalt.err (!%p3100_p10)
}
 0x282   : > { %2699 = dma.vmem_to_hbm [thread:$0]  (%p3274_p5), %s5251_s25, 4096, %s5212_s1, %s5214_s13, %s3180_s2, %s3180_s2, %s5608_s22   ;;  %v2064_v18 = vpop.xlane.xlu1 %2063  ;;  %v2067_v50 = vpop.xlane.xlu0 %2066 }
 0x283   : > { %2955 = vrcp.f32 %v2064_v18  ;;  %s5307_s29 = scalar_lea.vmem [#allocation7], %s3827_s28  ;;  %s5407_s25 = scalar_lea.hbm %s5468_s9, %s5197_s23 }
 0x284   : > { %s2325_s1 = sshll.u32 %s5307_s29, 4  ;;  %s2264_s3 = scalar_lea.sflag [#allocation8], %s3783_s27  ;;  %s5409_s1 = int_to_ptr.vmem [resolvable:$true] %s2325_s1 }
 0x285   : > { %s3104_s24 = scalar_lea.vmem %s5409_s1, 4096  ;;  %s3183_s16 = smov [#allocation7]  }
 0x286   : > { %v2058_v36 = vpop.xlane.xlu1 %2057  ;;  %v2061_v61 = vpop.xlane.xlu0 %2060  ;;  %p3105_p11 = scmp.ne.s32.totalorder %s5409_s1, %s3104_s24  ;;  %s3108_s17 = sshll.u32 %s3183_s16, 4  ;;  %s3109_s17 = int_to_ptr.vmem [resolvable:$false] %s3108_s17 }
 0x287   : > { %2957 = vrcp.f32 %v2058_v36  ;;  %s3110_s26 = scalar_lea.vmem %s3109_s17, 8192  ;;  %p3111_p0 = scmp.lt.s32.totalorder %s5409_s1, %s3109_s17 }
 0x288   : > { %p3106_p12 = pnand %p3105_p11, %p3274_p5  ;;  %p3112_p1 = scmp.lt.s32.totalorder %s3110_s26, %s3104_s24 }
 0x28a   : > { %v2076_v46 = vpop.xlane.xlu1 %2075  ;;  %p3107_p13 = pneg %p3106_p12  ;;  %p3113_p2 = por %p3112_p1, %p3111_p0 }
 0x28b   : > { %2959 = vrcp.f32 %v2076_v46  ;;  %v2079_v48 = vpop.xlane.xlu0 %2078 }
 0x28c   : > { %2961 = vrcp.f32 %v2067_v50  ;;  %p3114_p3 = pnand %p3113_p2, %p3107_p13 }
 0x28d   : > { %v2956_v35 = vpop.eup %2955  ;;  %2963 = vrcp.f32 %v2061_v61 }
 0x28e   : > { %v2157_v9 = vmul.f32 %v2956_v35, %v5037_v27  ;;  %v2070_v27 = vpop.xlane.xlu1 %2069 }
 0x28f   : > { %2965 = vrcp.f32 %v2070_v27 }
 0x290   : > { %2218 = vst.msk [vmem:[%s5307_s29 + $0x10] sm:$0xff] %vm1060_vm3, %v2157_v9  ;;  %2967 = vrcp.f32 %v2079_v48 }
 0x291   : > { %v2958_v42 = vpop.eup %2957 }
 0x292   : > { %v2153_v16 = vmul.f32 %v2958_v42, %v5044_v59  ;;  %v2088_v40 = vpop.xlane.xlu1 %2087  ;;  %v2073_v1 = vpop.xlane.xlu0 %2072 }
 0x293   : > { %2969 = vrcp.f32 %v2088_v40 }
 0x294   : > { %2216 = vst.msk [vmem:[%s5307_s29] sm:$0xff] %vm1060_vm3, %v2153_v16  ;;  %2971 = vrcp.f32 %v2073_v1 }
 0x295   : > { %v2960_v13 = vpop.eup %2959 }
 0x296   : > { %v2962_v15 = vpop.eup %2961  ;;  %v2165_v43 = vmul.f32 %v2960_v13, %v5050_v23 }
 0x297   : > { %v2159_v38 = vmul.f32 %v2962_v15, %v5052_v37  ;;  %v2964_v59 = vpop.eup %2963 }
 0x298   : > { %2222 = vst.msk [vmem:[%s5307_s29 + $0x30] sm:$0xff] %vm1060_vm3, %v2165_v43  ;;  %v2155_v47 = vmul.f32 %v2964_v59, %v5059_v55 }
 0x299   : > { %2219 = vst.msk [vmem:[%s5307_s29 + $0x18] sm:$0xff] %vm1060_vm3, %v2159_v38  ;;  %v2966_v22 = vpop.eup %2965 }
 0x29a   : > { %2217 = vst.msk [vmem:[%s5307_s29 + $0x8] sm:$0xff] %vm1060_vm3, %v2155_v47  ;;  %v2968_v23 = vpop.eup %2967  ;;  %v2161_v56 = vmul.f32 %v2966_v22, %v5064_v0  ;;  %v2082_v19 = vpop.xlane.xlu1 %2081 }
 0x29b   : > { %v2167_v37 = vmul.f32 %v2968_v23, %v5066_v30  ;;  %2973 = vrcp.f32 %v2082_v19  ;;  %v2091_v55 = vpop.xlane.xlu0 %2090 }
 0x29c   : > { %2220 = vst.msk [vmem:[%s5307_s29 + $0x20] sm:$0xff] %vm1060_vm3, %v2161_v56  ;;  %2975 = vrcp.f32 %v2091_v55 }
 0x29d   : > { %2223 = vst.msk [vmem:[%s5307_s29 + $0x38] sm:$0xff] %vm1060_vm3, %v2167_v37  ;;  %v2970_v41 = vpop.eup %2969 }
 0x29e   : > { %v2972_v34 = vpop.eup %2971  ;;  %v2173_v32 = vmul.f32 %v2970_v41, %v5074_v11 }
 0x29f   : > { %v2163_v10 = vmul.f32 %v2972_v34, %v5076_v49 }
 0x2a0   : > { %2226 = vst.msk [vmem:[%s5307_s29 + $0x50] sm:$0xff] %vm1060_vm3, %v2173_v32  ;;  %v2100_v0 = vpop.xlane.xlu1 %2099 }
 0x2a1   : > { %2221 = vst.msk [vmem:[%s5307_s29 + $0x28] sm:$0xff] %vm1060_vm3, %v2163_v10  ;;  %2977 = vrcp.f32 %v2100_v0  ;;  %v2085_v30 = vpop.xlane.xlu0 %2084 }
 0x2a2   : > { %2979 = vrcp.f32 %v2085_v30 }
 0x2a5   : > { %v2974_v52 = vpop.eup %2973 }
 0x2a6   : > { %v2976_v51 = vpop.eup %2975  ;;  %v2169_v29 = vmul.f32 %v2974_v52, %v5085_v20 }
 0x2a7   : > { %v2175_v31 = vmul.f32 %v2976_v51, %v5088_v25  ;;  %v2094_v11 = vpop.xlane.xlu1 %2093 }
 0x2a8   : > { %2224 = vst.msk [vmem:[%s5307_s29 + $0x40] sm:$0xff] %vm1060_vm3, %v2169_v29  ;;  %2981 = vrcp.f32 %v2094_v11  ;;  %v2103_v49 = vpop.xlane.xlu0 %2102 }
 0x2a9   : > { %2227 = vst.msk [vmem:[%s5307_s29 + $0x58] sm:$0xff] %vm1060_vm3, %v2175_v31  ;;  %2983 = vrcp.f32 %v2103_v49 }
 0x2ab   : > { %v2978_v12 = vpop.eup %2977 }
 0x2ac   : > { %v2980_v57 = vpop.eup %2979  ;;  %v2181_v8 = vmul.f32 %v2978_v12, %v5095_v6 }
 0x2ad   : > { %v2171_v62 = vmul.f32 %v2980_v57, %v5098_v5  ;;  %v2112_v20 = vpop.xlane.xlu1 %2111 }
 0x2ae   : > { %2230 = vst.msk [vmem:[%s5307_s29 + $0x70] sm:$0xff] %vm1060_vm3, %v2181_v8  ;;  %2985 = vrcp.f32 %v2112_v20  ;;  %v2097_v25 = vpop.xlane.xlu0 %2096 }
 0x2af   : > { %2225 = vst.msk [vmem:[%s5307_s29 + $0x48] sm:$0xff] %vm1060_vm3, %v2171_v62  ;;  %2987 = vrcp.f32 %v2097_v25 }
 0x2b2   : > { %v2982_v18 = vpop.eup %2981 }
 0x2b3   : > { %v2984_v36 = vpop.eup %2983  ;;  %v2177_v35 = vmul.f32 %v2982_v18, %v5104_v58 }
 0x2b4   : > { %v2183_v9 = vmul.f32 %v2984_v36, %v5108_v26 }
 0x2b5   : > { %2228 = vst.msk [vmem:[%s5307_s29 + $0x60] sm:$0xff] %vm1060_vm3, %v2177_v35  ;;  %v2106_v6 = vpop.xlane.xlu1 %2105 }
 0x2b6   : > { %2231 = vst.msk [vmem:[%s5307_s29 + $0x78] sm:$0xff] %vm1060_vm3, %v2183_v9  ;;  %2989 = vrcp.f32 %v2106_v6  ;;  %v2115_v5 = vpop.xlane.xlu0 %2114 }
 0x2b7   : > { %2991 = vrcp.f32 %v2115_v5 }
 0x2b8   : > { %v2986_v46 = vpop.eup %2985 }
 0x2b9   : > { %v2988_v50 = vpop.eup %2987  ;;  %v2189_v42 = vmul.f32 %v2986_v46, %v5116_v28  ;;  %v2124_v61 = vpop.xlane.xlu1 %2123 }
 0x2ba   : > { %v2179_v16 = vmul.f32 %v2988_v50, %v5118_v4  ;;  %2993 = vrcp.f32 %v2124_v61  ;;  %v2109_v58 = vpop.xlane.xlu0 %2108 }
 0x2bb   : > { %2234 = vst.msk [vmem:[%s5307_s29 + $0x90] sm:$0xff] %vm1060_vm3, %v2189_v42  ;;  %2995 = vrcp.f32 %v2109_v58 }
 0x2bc   : > { %2229 = vst.msk [vmem:[%s5307_s29 + $0x68] sm:$0xff] %vm1060_vm3, %v2179_v16 }
 0x2bd   : > { %v2118_v26 = vpop.xlane.xlu1 %2117 }
 0x2be   : > { %2997 = vrcp.f32 %v2118_v26  ;;  %v2127_v27 = vpop.xlane.xlu0 %2126 }
 0x2bf   : > { %2999 = vrcp.f32 %v2127_v27 }
 0x2c0   : > { %v2990_v48 = vpop.eup %2989 }
 0x2c1   : > { %v2992_v13 = vpop.eup %2991  ;;  %v2185_v28 = vmul.f32 %v2990_v48, %v5128_v45  ;;  %v2136_v15 = vpop.xlane.xlu1 %2135 }
 0x2c2   : > { %v2191_v4 = vmul.f32 %v2992_v13, %v5130_v39  ;;  %3001 = vrcp.f32 %v2136_v15  ;;  %v2121_v43 = vpop.xlane.xlu0 %2120 }
 0x2c3   : > { %2232 = vst.msk [vmem:[%s5307_s29 + $0x80] sm:$0xff] %vm1060_vm3, %v2185_v28  ;;  %3003 = vrcp.f32 %v2121_v43 }
 0x2c4   : > { %v2994_v38 = vpop.eup %2993  ;;  %2235 = vst.msk [vmem:[%s5307_s29 + $0x98] sm:$0xff] %vm1060_vm3, %v2191_v4 }
 0x2c5   : > { %v2996_v59 = vpop.eup %2995  ;;  %v2197_v40 = vmul.f32 %v2994_v38, %v5138_v44  ;;  %v2130_v47 = vpop.xlane.xlu1 %2129 }
 0x2c6   : > { %v2187_v1 = vmul.f32 %v2996_v59, %v5140_v53  ;;  %3005 = vrcp.f32 %v2130_v47  ;;  %v2139_v45 = vpop.xlane.xlu0 %2138 }
 0x2c7   : > { %2238 = vst.msk [vmem:[%s5307_s29 + $0xb0] sm:$0xff] %vm1060_vm3, %v2197_v40  ;;  %3007 = vrcp.f32 %v2139_v45 }
 0x2c8   : > { %v2998_v39 = vpop.eup %2997  ;;  %2233 = vst.msk [vmem:[%s5307_s29 + $0x88] sm:$0xff] %vm1060_vm3, %v2187_v1 }
 0x2c9   : > { %v3000_v22 = vpop.eup %2999  ;;  %v2193_v23 = vmul.f32 %v2998_v39, %v5148_v14  ;;  %v2142_v56 = vpop.xlane.xlu1 %2141 }
 0x2ca   : > { %v2199_v37 = vmul.f32 %v3000_v22, %v5150_v2  ;;  %3009 = vrcp.f32 %v2142_v56  ;;  %v2133_v44 = vpop.xlane.xlu0 %2132 }
 0x2cb   : > { %2236 = vst.msk [vmem:[%s5307_s29 + $0xa0] sm:$0xff] %vm1060_vm3, %v2193_v23  ;;  %3011 = vrcp.f32 %v2133_v44 }
 0x2cc   : > { %v3002_v53 = vpop.eup %3001  ;;  %2239 = vst.msk [vmem:[%s5307_s29 + $0xb8] sm:$0xff] %vm1060_vm3, %v2199_v37 }
 0x2cd   : > { %v3004_v19 = vpop.eup %3003  ;;  %v2205_v55 = vmul.f32 %v3002_v53, %v5158_v7  ;;  %v2148_v41 = vpop.xlane.xlu1 %2147 }
 0x2ce   : > { %v2195_v14 = vmul.f32 %v3004_v19, %v5160_v17  ;;  %3013 = vrcp.f32 %v2148_v41  ;;  %v2145_v34 = vpop.xlane.xlu0 %2144 }
 0x2cf   : > { %2242 = vst.msk [vmem:[%s5307_s29 + $0xd0] sm:$0xff] %vm1060_vm3, %v2205_v55  ;;  %3015 = vrcp.f32 %v2145_v34 }
 0x2d0   : > { %v3006_v2 = vpop.eup %3005  ;;  %2237 = vst.msk [vmem:[%s5307_s29 + $0xa8] sm:$0xff] %vm1060_vm3, %v2195_v14 }
 0x2d1   : > { %v3008_v32 = vpop.eup %3007  ;;  %v2201_v10 = vmul.f32 %v3006_v2, %v5167_v24 }
 0x2d2   : > { %v2207_v7 = vmul.f32 %v3008_v32, %v5169_v33  ;;  %v2151_v0 = vpop.xlane.xlu0 %2150 }
 0x2d3   : > { %2240 = vst.msk [vmem:[%s5307_s29 + $0xc0] sm:$0xff] %vm1060_vm3, %v2201_v10  ;;  %3017 = vrcp.f32 %v2151_v0 }
 0x2d4   : > { %v3010_v17 = vpop.eup %3009  ;;  %2243 = vst.msk [vmem:[%s5307_s29 + $0xd8] sm:$0xff] %vm1060_vm3, %v2207_v7 }
 0x2d5   : > { %v3012_v30 = vpop.eup %3011  ;;  %v2209_v52 = vmul.f32 %v3010_v17, %v5175_v3 }
 0x2d6   : > { %v2203_v24 = vmul.f32 %v3012_v30, %v5177_v21 }
 0x2d7   : > { %2244 = vst.msk [vmem:[%s5307_s29 + $0xe0] sm:$0xff] %vm1060_vm3, %v2209_v52 }
 0x2d8   : > { %v3014_v33 = vpop.eup %3013  ;;  %2241 = vst.msk [vmem:[%s5307_s29 + $0xc8] sm:$0xff] %vm1060_vm3, %v2203_v24 }
 0x2d9   : > { %v3016_v51 = vpop.eup %3015  ;;  %v2213_v29 = vmul.f32 %v3014_v33, %v5183_v60 }
 0x2da   : > { %v2211_v31 = vmul.f32 %v3016_v51, %v5185_v54 }
 0x2db   : > { %2246 = vst.msk [vmem:[%s5307_s29 + $0xf0] sm:$0xff] %vm1060_vm3, %v2213_v29 }
 0x2dc   : > { %2245 = vst.msk [vmem:[%s5307_s29 + $0xe8] sm:$0xff] %vm1060_vm3, %v2211_v31 }
 0x2dd   : > { %v3018_v3 = vpop.eup %3017 }
 0x2de   : > { %v2215_v11 = vmul.f32 %v3018_v3, %v5191_v63 }
 0x2e0   : > { %2247 = vst.msk [vmem:[%s5307_s29 + $0xf8] sm:$0xff] %vm1060_vm3, %v2215_v11 }
 0x2e1   : > { %3117 = shalt.err (!%p3114_p3)
}
 0x2e2   : > { %s3118_s23 = scalar_lea.hbm %s5407_s25, 4096  ;;  %s3122_s21 = scalar_lea.hbm %s5468_s9, 8192 }
 0x2e3   : > { %p3119_p4 = scmp.ne.s32.totalorder %s5407_s25, %s3118_s23  ;;  %p3123_p9 = scmp.lt.u32.totalorder %s5407_s25, %s5468_s9 }
 0x2e4   : > { %p3124_p10 = scmp.lt.u32.totalorder %s3122_s21, %s3118_s23  ;;  %p3126_p12 = scmp.lt.u32.totalorder %s3118_s23, %s5407_s25 }
 0x2e5   : > { %p3120_p7 = pnand %p3119_p4, %p3274_p5 }
 0x2e6   : > { %p3125_p11 = por %p3124_p10, %p3123_p9 }
 0x2e7   : > { %p3121_p8 = pneg %p3120_p7 }
 0x2e8   : > { %p3127_p13 = por %p3126_p12, %p3125_p11 }
 0x2ea   : > { %p3128_p0 = pnand %p3127_p13, %p3121_p8 }
 0x2ec   : > { %3131 = shalt.err (!%p3128_p0)
}
 0x2ed   : > { %2700 = dma.vmem_to_hbm [thread:$0]  (%p3274_p5), %s5409_s1, 4096, %s5407_s25, %s2264_s3, %s3180_s2, %s3180_s2, %s5608_s22  }
 0x2ee PF: > { %p2718_p1 = scmp.ge.s32.totalorder %s3174_s12, 2  ;;  %s2340_s28 = sand.u32 1, %s3162_s30  }
 0x2ef   : > { %s2341_s13 = scalar_lea.sflag [#allocation3], %s2340_s28 }
 0x2f0   : > { %p2706_p2 = pnand %p2718_p1, %p3278_p6 }
 0x2f2   : > { %3149 = dma.done.wait (!%p2706_p2), %s2341_s13, 4096  }
 0x2f3   : > { %3151 = vsyncadd (!%p2706_p2), %s2341_s13, 4294963200  ;;  %s5610_s19 = sadd.s32 4294967294, %s3174_s12  }
 0x2f4   : > { %s2349_s24 = sand.u32 1, %s5610_s19  }
 0x2f5   : > { %s2350_s16 = scalar_lea.sflag [#allocation5], %s2349_s24 }
 0x2f6   : > { %3153 = dma.done.wait (!%p2706_p2), %s2350_s16, 8192  }
 0x2f7   : > { %3155 = vsyncadd (!%p2706_p2), %s2350_s16, 4294959104  ;;  %s2368_s27 = scalar_lea.sflag [#allocation8], %s2340_s28 }
 0x2f8   : > { %3157 = dma.done.wait (!%p2706_p2), %s2368_s27, 4096  }
 0x2f9   : > { %3159 = vsyncadd (!%p2706_p2), %s2368_s27, 4294963200  ;;  %p26_p5 = scmp.ge.s32.totalorder %s3259_s15, 4   ;;  %s5611_s30 = smov %s3166_s10 }
 0x2fa   : > { %s5612_s10 = smov %s3170_s11  ;;  %s5613_s11 = smov %s3272_s18 }
 0x2fb   : > { %s5614_s12 = smov %s3259_s15  ;;  %28 = sbr.rel (!%p26_p5) target bundleno = 13 (0xd), region = 134 }
 0x302   :  { %2373 = vsyncpa [#allocation3], 1 }
 0x303   :  { %2375 = vsyncpa [#allocation3 + $0x1], 1 }
 0x304   :  { %2376 = vsyncpa [#allocation5], 1 }
 0x305   :  { %2378 = vsyncpa [#allocation5 + $0x1], 1 }
 0x306   :  { %2379 = vsyncpa [#allocation8], 1 }
 0x307   :  { %2381 = vsyncpa [#allocation8 + $0x1], 1 }

</bundles_post_ra>
